<compile_context>
chip_gen: v5e
topology: v5e:2x2
jax: 0.10.0
libtpu: 0.0.40
codegen_flags: <defaults>
</compile_context>

<pallas_src>
import jax
import jax.numpy as jnp
from jax.experimental import pallas as pl
from jax.experimental.pallas import tpu as pltpu

NUM_FEATURES = 3        # PROTEINS node features
NUM_FEATURES_PAD = 8    # zero-padded feature dim (padding does not change the math)
EMBED = 64              # embedding_size
NUM_CLASSES = 2         # PROTEINS classes
OUT_PAD = 128           # lane-dense padded logits width (sliced back to NUM_CLASSES outside)

B_BATCHES = 2           # independent graph-batches -> grid axis ("parallel")
N_NODES = 256           # nodes per batch
N_GRAPHS = 8            # graphs per batch (block-sorted batch_index, 32 nodes each)


def _gcn_net_kernel(a_ref, x_ref, w0_ref, wmid_ref, b_ref, pool_ref,
                    wout_ref, bout_ref, out_ref, hidden_ref):
    f32, bf16 = jnp.float32, jnp.bfloat16
    a = a_ref[0]                       # (N, N) bf16 normalized adjacency
    biases = b_ref[...]                # (3, E) f32

    def gcn_layer(h_lo, w_lo, bias_row):
        # GCNConv: A_hat @ (h @ W) + b ; bf16 MXU operands, f32 accumulation.
        xw = jnp.dot(h_lo, w_lo, preferred_element_type=f32)            # (N, E)
        agg = jnp.dot(a, xw.astype(bf16), preferred_element_type=f32)   # (N, E)
        return jnp.tanh(agg + bias_row)                                  # f32, in [-1, 1]

    h = gcn_layer(x_ref[0], w0_ref[...], biases[0:1])           # initial_conv + tanh
    h = gcn_layer(h.astype(bf16), wmid_ref[0], biases[1:2])     # conv1 + tanh
    h = gcn_layer(h.astype(bf16), wmid_ref[1], biases[2:3])     # conv2 + tanh
    h_lo = h.astype(bf16)

    onehot = pool_ref[0]                                         # (G, N) f32 0/1 membership
    counts = jnp.maximum(jnp.sum(onehot, axis=1, keepdims=True), 1.0)        # (G, 1)
    sums = jnp.dot(onehot.astype(bf16), h_lo, preferred_element_type=f32)    # (G, E)
    meanp = sums / counts                                        # global_mean_pool

    # global_max_pool, vectorized; sentinel -2 < min(tanh) keeps empty graphs finite.
    m = onehot[:, :, None]                                       # (G, N, 1)
    masked = h[None, :, :] * m - 2.0 * (1.0 - m)                 # (G, N, E)
    maxp = jnp.max(masked, axis=1)                               # (G, E)

    # hidden = cat([max_pool, mean_pool], dim=1) written directly, no in-kernel concat.
    hidden_ref[0, :, :EMBED] = maxp
    hidden_ref[0, :, EMBED:] = meanp

    # out = hidden @ Wout + bout, with Wout split so no concat is needed; (G, 128) lane-dense.
    out_ref[0] = (jnp.dot(maxp.astype(bf16), wout_ref[0], preferred_element_type=f32)
                  + jnp.dot(meanp.astype(bf16), wout_ref[1], preferred_element_type=f32)
                  + bout_ref[...])


def gcn_net_forward(x_pad, a_norm, batch_index, params, num_graphs):
    """Full Net.forward for B independent graph-batches in one pallas_call.

    x_pad:       (B, N, NUM_FEATURES_PAD) f32
    a_norm:      (B, N, N) f32 dense D^-1/2 (A+I) D^-1/2
    batch_index: (B, N) int32 node -> graph id in [0, num_graphs)
    Returns (out, hidden) of shapes (B, G, NUM_CLASSES) and (B, G, 2*EMBED).
    """
    w0, b0, w1, b1, w2, b2, wout, bout = params
    bsz, n, f_pad = x_pad.shape
    g, e = num_graphs, EMBED
    f32, bf16 = jnp.float32, jnp.bfloat16

    # Pack / cast operands: fewer, larger DMAs; bf16 halves bytes of the big operands.
    a_lo = a_norm.astype(bf16)                                    # (B, N, N)
    x_lo = x_pad.astype(bf16)                                     # (B, N, F)
    w0_lo = w0.astype(bf16)                                       # (F, E)
    wmid = jnp.stack([w1, w2]).astype(bf16)                       # (2, E, E)
    bpack = jnp.concatenate([b0, b1, b2], axis=0).astype(f32)     # (3, E)
    nc = wout.shape[1]
    wout_pad = jnp.pad(wout, ((0, 0), (0, OUT_PAD - nc)))         # (2E, 128)
    wout_split = jnp.stack([wout_pad[:e], wout_pad[e:]]).astype(bf16)   # (2, E, 128)
    bout_pad = jnp.pad(bout, ((0, 0), (0, OUT_PAD - nc))).astype(f32)   # (1, 128)

    # node -> graph one-hot membership (serves both mean and max pooling).
    onehot = (batch_index[:, None, :] ==
              jnp.arange(g, dtype=batch_index.dtype)[None, :, None]).astype(f32)  # (B, G, N)

    in_specs = [
        pl.BlockSpec((1, n, n), lambda b: (b, 0, 0)),             # a_lo
        pl.BlockSpec((1, n, f_pad), lambda b: (b, 0, 0)),         # x_lo
        pl.BlockSpec((f_pad, e), lambda b: (0, 0)),               # w0
        pl.BlockSpec((2, e, e), lambda b: (0, 0, 0)),             # w1, w2 packed
        pl.BlockSpec((3, e), lambda b: (0, 0)),                   # biases packed
        pl.BlockSpec((1, g, n), lambda b: (b, 0, 0)),             # pooling one-hot
        pl.BlockSpec((2, e, OUT_PAD), lambda b: (0, 0, 0)),       # wout split + padded
        pl.BlockSpec((1, OUT_PAD), lambda b: (0, 0)),             # bout padded
    ]
    out_specs = [
        pl.BlockSpec((1, g, OUT_PAD), lambda b: (b, 0, 0)),       # padded logits (lane-dense)
        pl.BlockSpec((1, g, 2 * e), lambda b: (b, 0, 0)),         # hidden
    ]
    out_shape = (
        jax.ShapeDtypeStruct((bsz, g, OUT_PAD), f32),
        jax.ShapeDtypeStruct((bsz, g, 2 * e), f32),
    )

    flops_per_b = (2 * n * (f_pad * e + n * e)          # initial_conv
                   + 2 * 2 * n * (e * e + n * e)        # conv1, conv2
                   + 2 * g * n * e                      # mean-pool matmul
                   + 2 * 2 * g * e * OUT_PAD)           # split output Linear
    cost = pl.CostEstimate(
        flops=int(bsz * flops_per_b),
        transcendentals=int(bsz * 3 * n * e),
        bytes_accessed=int(sum(int(t.nbytes) for t in
                               (a_lo, x_lo, w0_lo, wmid, bpack, onehot,
                                wout_split, bout_pad))
                           + bsz * g * (OUT_PAD + 2 * e) * 4),
    )

    fn = pl.pallas_call(
        _gcn_net_kernel,
        out_shape=out_shape,
        grid_spec=pltpu.PrefetchScalarGridSpec(
            num_scalar_prefetch=0, grid=(bsz,),
            in_specs=in_specs, out_specs=out_specs),
        compiler_params=pltpu.CompilerParams(
            dimension_semantics=("parallel",)),
        cost_estimate=cost,
    )
    out_padded, hidden = fn(a_lo, x_lo, w0_lo, wmid, bpack, onehot,
                            wout_split, bout_pad)
    return out_padded[:, :, :nc], hidden


def build_norm_adj(edge_index, num_nodes):
    """Dense GCN normalization: A_hat = D^-1/2 (A + I) D^-1/2 (plain JAX glue)."""
    src, dst = edge_index
    a = jnp.zeros((num_nodes, num_nodes), jnp.float32)
    a = a.at[dst, src].add(1.0)                      # messages flow src -> dst
    a = jnp.minimum(a, 1.0)                          # dedupe duplicate edges
    a = a + jnp.eye(num_nodes, dtype=jnp.float32)    # self loops
    deg = a.sum(axis=1)
    dinv = jax.lax.rsqrt(deg)
    return a * dinv[:, None] * dinv[None, :]


def init_params(key):
    def glorot(k, shape):
        fan_in, fan_out = shape
        lim = (6.0 / (fan_in + fan_out)) ** 0.5
        return jax.random.uniform(k, shape, jnp.float32, -lim, lim)

    ks = jax.random.split(key, 8)
    w0 = glorot(ks[0], (NUM_FEATURES, EMBED))        # true fan_in = 3 (matches PyG stats)
    w0 = jnp.pad(w0, ((0, NUM_FEATURES_PAD - NUM_FEATURES), (0, 0)))  # padded rows hit zero features
    b0 = 0.01 * jax.random.normal(ks[1], (1, EMBED), jnp.float32)
    w1 = glorot(ks[2], (EMBED, EMBED))
    b1 = 0.01 * jax.random.normal(ks[3], (1, EMBED), jnp.float32)
    w2 = glorot(ks[4], (EMBED, EMBED))
    b2 = 0.01 * jax.random.normal(ks[5], (1, EMBED), jnp.float32)
    wout = glorot(ks[6], (2 * EMBED, NUM_CLASSES))
    bout = 0.01 * jax.random.normal(ks[7], (1, NUM_CLASSES), jnp.float32)
    return (w0, b0, w1, b1, w2, b2, wout, bout)


def reference_forward(x_pad, a_norm, batch_index, params, num_graphs):
    """Pure-JAX reference mirroring the module semantics with identical bf16 MXU casts."""
    w0, b0, w1, b1, w2, b2, wout, bout = params
    f32, bf16 = jnp.float32, jnp.bfloat16
    e = EMBED
    outs, hids = [], []
    for bi in range(x_pad.shape[0]):
        a = a_norm[bi].astype(bf16)

        def gcn(h, w, bias):
            xw = jnp.dot(h.astype(bf16), w.astype(bf16), preferred_element_type=f32)
            agg = jnp.dot(a, xw.astype(bf16), preferred_element_type=f32)
            return jnp.tanh(agg + bias)

        h = gcn(x_pad[bi], w0, b0)
        h = gcn(h, w1, b1)
        h = gcn(h, w2, b2)

        onehot = (batch_index[bi][None, :] ==
                  jnp.arange(num_graphs)[:, None]).astype(f32)
        counts = jnp.maximum(onehot.sum(axis=1, keepdims=True), 1.0)
        sums = jnp.dot(onehot.astype(bf16), h.astype(bf16), preferred_element_type=f32)
        meanp = sums / counts
        m = onehot[:, :, None]
        maxp = jnp.max(h[None, :, :] * m - 2.0 * (1.0 - m), axis=1)
        hidden = jnp.concatenate([maxp, meanp], axis=1)
        out = (jnp.dot(maxp.astype(bf16), wout[:e].astype(bf16), preferred_element_type=f32)
               + jnp.dot(meanp.astype(bf16), wout[e:].astype(bf16), preferred_element_type=f32)
               + bout)
        outs.append(out)
        hids.append(hidden)
    return jnp.stack(outs), jnp.stack(hids)


if __name__ == "__main__":
    key = jax.random.PRNGKey(0)
    k_data, k_params = jax.random.split(key)
    params = init_params(k_params)

    # Synthetic batched-PROTEINS-style data: B batches x (8 graphs x 32 nodes),
    # random undirected edges within graphs.
    per_graph = N_NODES // N_GRAPHS
    bidx = jnp.repeat(jnp.arange(N_GRAPHS, dtype=jnp.int32), per_graph)
    a_list, x_list, bidx_list = [], [], []
    for _ in range(B_BATCHES):
        k_adj, k_x, k_data = jax.random.split(k_data, 3)
        rand_adj = jax.random.bernoulli(k_adj, 0.2, (N_NODES, N_NODES))
        same_graph = bidx[:, None] == bidx[None, :]
        adj = jnp.logical_and(rand_adj, same_graph)
        adj = jnp.logical_or(adj, adj.T)
        adj = jnp.logical_and(adj, ~jnp.eye(N_NODES, dtype=bool))
        src, dst = jnp.nonzero(adj)
        edge_index = jnp.stack([src.astype(jnp.int32), dst.astype(jnp.int32)])
        a_list.append(build_norm_adj(edge_index, N_NODES))
        x = jax.random.normal(k_x, (N_NODES, NUM_FEATURES), jnp.float32)
        x_list.append(jnp.pad(x, ((0, 0), (0, NUM_FEATURES_PAD - NUM_FEATURES))))
        bidx_list.append(bidx)

    a_norm = jnp.stack(a_list)            # (B, N, N)
    x_pad = jnp.stack(x_list)             # (B, N, F_pad)
    batch_index = jnp.stack(bidx_list)    # (B, N)

    out, hidden = gcn_net_forward(x_pad, a_norm, batch_index, params, N_GRAPHS)
    out = jax.block_until_ready(out)
    hidden = jax.block_until_ready(hidden)

    out_ref, hidden_ref = reference_forward(x_pad, a_norm, batch_index, params, N_GRAPHS)
    assert out.shape == (B_BATCHES, N_GRAPHS, NUM_CLASSES)
    assert hidden.shape == (B_BATCHES, N_GRAPHS, 2 * EMBED)
    # bf16 MXU operands + f32 accumulation in both kernel and reference -> tight match;
    # tolerance leaves headroom for tanh/accumulation-order implementation differences.
    assert jnp.allclose(out, out_ref, atol=5e-3, rtol=5e-3), \
        float(jnp.max(jnp.abs(out - out_ref)))
    assert jnp.allclose(hidden, hidden_ref, atol=5e-3, rtol=5e-3), \
        float(jnp.max(jnp.abs(hidden - hidden_ref)))

    print("KERNEL_OK")
</pallas_src>

<mosaic_0001>
module attributes {stable_mosaic.version = 11 : i64} {
  func.func @_gcn_net_kernel(%arg0: i32, %arg1: memref<1x256x256xbf16, #tpu.memory_space<vmem>>, %arg2: memref<1x256x8xbf16, #tpu.memory_space<vmem>>, %arg3: memref<8x64xbf16, #tpu.memory_space<vmem>>, %arg4: memref<2x64x64xbf16, #tpu.memory_space<vmem>>, %arg5: memref<3x64xf32, #tpu.memory_space<vmem>>, %arg6: memref<1x8x256xf32, #tpu.memory_space<vmem>>, %arg7: memref<2x64x128xbf16, #tpu.memory_space<vmem>>, %arg8: memref<1x128xf32, #tpu.memory_space<vmem>>, %arg9: memref<1x8x128xf32, #tpu.memory_space<vmem>>, %arg10: memref<1x8x128xf32, #tpu.memory_space<vmem>>) attributes {dimension_semantics = [#tpu.dimension_semantics<parallel>], iteration_bounds = array<i64: 2>, scalar_prefetch = 0 : i64, scratch_operands = 0 : i64, tpu.core_type = #tpu.core_type<tc>, window_params = [{transform_indices = @transform_0, window_bounds = array<i64: 1, 256, 256>}, {transform_indices = @transform_1, window_bounds = array<i64: 1, 256, 8>}, {pipeline_mode = #tpu.pipeline_mode<synchronous>, transform_indices = @transform_2, window_bounds = array<i64: 8, 64>}, {pipeline_mode = #tpu.pipeline_mode<synchronous>, transform_indices = @transform_3, window_bounds = array<i64: 2, 64, 64>}, {pipeline_mode = #tpu.pipeline_mode<synchronous>, transform_indices = @transform_4, window_bounds = array<i64: 3, 64>}, {transform_indices = @transform_5, window_bounds = array<i64: 1, 8, 256>}, {pipeline_mode = #tpu.pipeline_mode<synchronous>, transform_indices = @transform_6, window_bounds = array<i64: 2, 64, 128>}, {pipeline_mode = #tpu.pipeline_mode<synchronous>, transform_indices = @transform_7, window_bounds = array<i64: 1, 128>}, {transform_indices = @transform_8, window_bounds = array<i64: 1, 8, 128>}, {transform_indices = @transform_9, window_bounds = array<i64: 1, 8, 128>}]} {
    %c0 = arith.constant 0 : index
    %c0_0 = arith.constant 0 : index
    %c0_1 = arith.constant 0 : index
    %0 = vector.load %arg1[%c0, %c0_0, %c0_1] : memref<1x256x256xbf16, #tpu.memory_space<vmem>>, vector<1x256x256xbf16>
    %1 = vector.shape_cast %0 : vector<1x256x256xbf16> to vector<256x256xbf16>
    %c0_2 = arith.constant 0 : index
    %c0_3 = arith.constant 0 : index
    %2 = vector.load %arg5[%c0_2, %c0_3] : memref<3x64xf32, #tpu.memory_space<vmem>>, vector<3x64xf32>
    %c0_4 = arith.constant 0 : index
    %c0_5 = arith.constant 0 : index
    %c0_6 = arith.constant 0 : index
    %3 = vector.load %arg2[%c0_4, %c0_5, %c0_6] : memref<1x256x8xbf16, #tpu.memory_space<vmem>>, vector<1x256x8xbf16>
    %4 = vector.shape_cast %3 : vector<1x256x8xbf16> to vector<256x8xbf16>
    %c0_7 = arith.constant 0 : index
    %c0_8 = arith.constant 0 : index
    %5 = vector.load %arg3[%c0_7, %c0_8] : memref<8x64xbf16, #tpu.memory_space<vmem>>, vector<8x64xbf16>
    %6 = vector.extract_strided_slice %2 {offsets = [0, 0], sizes = [1, 64], strides = [1, 1]} : vector<3x64xf32> to vector<1x64xf32>
    %cst = arith.constant dense<0.000000e+00> : vector<256x64xf32>
    %7 = tpu.matmul %4, %5, %cst {dimension_numbers = #tpu.dot_dimension_numbers<[1], [0], [0], [1], [0, 0, 1, 1], [], []>} : vector<256x8xbf16>, vector<8x64xbf16>, vector<256x64xf32> -> vector<256x64xf32>
    %8 = arith.truncf %7 : vector<256x64xf32> to vector<256x64xbf16>
    %cst_9 = arith.constant dense<0.000000e+00> : vector<256x64xf32>
    %9 = tpu.matmul %1, %8, %cst_9 {dimension_numbers = #tpu.dot_dimension_numbers<[1], [0], [0], [1], [0, 0, 1, 1], [], []>} : vector<256x256xbf16>, vector<256x64xbf16>, vector<256x64xf32> -> vector<256x64xf32>
    %10 = vector.broadcast %6 : vector<1x64xf32> to vector<256x64xf32>
    %11 = arith.addf %9, %10 : vector<256x64xf32>
    %12 = math.tanh %11 : vector<256x64xf32>
    %13 = arith.truncf %12 : vector<256x64xf32> to vector<256x64xbf16>
    %c0_10 = arith.constant 0 : index
    %c0_11 = arith.constant 0 : index
    %c0_12 = arith.constant 0 : index
    %14 = vector.load %arg4[%c0_10, %c0_11, %c0_12] : memref<2x64x64xbf16, #tpu.memory_space<vmem>>, vector<1x64x64xbf16>
    %15 = vector.shape_cast %14 : vector<1x64x64xbf16> to vector<64x64xbf16>
    %16 = vector.extract_strided_slice %2 {offsets = [1, 0], sizes = [1, 64], strides = [1, 1]} : vector<3x64xf32> to vector<1x64xf32>
    %cst_13 = arith.constant dense<0.000000e+00> : vector<256x64xf32>
    %17 = tpu.matmul %13, %15, %cst_13 {dimension_numbers = #tpu.dot_dimension_numbers<[1], [0], [0], [1], [0, 0, 1, 1], [], []>} : vector<256x64xbf16>, vector<64x64xbf16>, vector<256x64xf32> -> vector<256x64xf32>
    %18 = arith.truncf %17 : vector<256x64xf32> to vector<256x64xbf16>
    %cst_14 = arith.constant dense<0.000000e+00> : vector<256x64xf32>
    %19 = tpu.matmul %1, %18, %cst_14 {dimension_numbers = #tpu.dot_dimension_numbers<[1], [0], [0], [1], [0, 0, 1, 1], [], []>} : vector<256x256xbf16>, vector<256x64xbf16>, vector<256x64xf32> -> vector<256x64xf32>
    %20 = vector.broadcast %16 : vector<1x64xf32> to vector<256x64xf32>
    %21 = arith.addf %19, %20 : vector<256x64xf32>
    %22 = math.tanh %21 : vector<256x64xf32>
    %23 = arith.truncf %22 : vector<256x64xf32> to vector<256x64xbf16>
    %c1 = arith.constant 1 : index
    %c0_15 = arith.constant 0 : index
    %c0_16 = arith.constant 0 : index
    %24 = vector.load %arg4[%c1, %c0_15, %c0_16] : memref<2x64x64xbf16, #tpu.memory_space<vmem>>, vector<1x64x64xbf16>
    %25 = vector.shape_cast %24 : vector<1x64x64xbf16> to vector<64x64xbf16>
    %26 = vector.extract_strided_slice %2 {offsets = [2, 0], sizes = [1, 64], strides = [1, 1]} : vector<3x64xf32> to vector<1x64xf32>
    %cst_17 = arith.constant dense<0.000000e+00> : vector<256x64xf32>
    %27 = tpu.matmul %23, %25, %cst_17 {dimension_numbers = #tpu.dot_dimension_numbers<[1], [0], [0], [1], [0, 0, 1, 1], [], []>} : vector<256x64xbf16>, vector<64x64xbf16>, vector<256x64xf32> -> vector<256x64xf32>
    %28 = arith.truncf %27 : vector<256x64xf32> to vector<256x64xbf16>
    %cst_18 = arith.constant dense<0.000000e+00> : vector<256x64xf32>
    %29 = tpu.matmul %1, %28, %cst_18 {dimension_numbers = #tpu.dot_dimension_numbers<[1], [0], [0], [1], [0, 0, 1, 1], [], []>} : vector<256x256xbf16>, vector<256x64xbf16>, vector<256x64xf32> -> vector<256x64xf32>
    %30 = vector.broadcast %26 : vector<1x64xf32> to vector<256x64xf32>
    %31 = arith.addf %29, %30 : vector<256x64xf32>
    %32 = math.tanh %31 : vector<256x64xf32>
    %33 = arith.truncf %32 : vector<256x64xf32> to vector<256x64xbf16>
    %c0_19 = arith.constant 0 : index
    %c0_20 = arith.constant 0 : index
    %c0_21 = arith.constant 0 : index
    %34 = vector.load %arg6[%c0_19, %c0_20, %c0_21] : memref<1x8x256xf32, #tpu.memory_space<vmem>>, vector<1x8x256xf32>
    %35 = vector.shape_cast %34 : vector<1x8x256xf32> to vector<8x256xf32>
    %cst_22 = arith.constant dense<0.000000e+00> : vector<8xf32>
    %36 = vector.multi_reduction <add>, %35, %cst_22 [1] : vector<8x256xf32> to vector<8xf32>
    %37 = vector.shape_cast %36 : vector<8xf32> to vector<8x1xf32>
    %cst_23 = arith.constant 1.000000e+00 : f32
    %38 = vector.broadcast %cst_23 : f32 to vector<8x1xf32>
    %39 = arith.maximumf %37, %38 : vector<8x1xf32>
    %40 = arith.truncf %35 : vector<8x256xf32> to vector<8x256xbf16>
    %cst_24 = arith.constant dense<0.000000e+00> : vector<8x64xf32>
    %41 = tpu.matmul %40, %33, %cst_24 {dimension_numbers = #tpu.dot_dimension_numbers<[1], [0], [0], [1], [0, 0, 1, 1], [], []>} : vector<8x256xbf16>, vector<256x64xbf16>, vector<8x64xf32> -> vector<8x64xf32>
    %42 = vector.broadcast %39 : vector<8x1xf32> to vector<8x64xf32>
    %43 = arith.divf %41, %42 : vector<8x64xf32>
    %44 = vector.shape_cast %35 : vector<8x256xf32> to vector<8x256x1xf32>
    %45 = vector.shape_cast %32 : vector<256x64xf32> to vector<1x256x64xf32>
    %46 = vector.broadcast %45 : vector<1x256x64xf32> to vector<8x256x64xf32>
    %47 = vector.broadcast %44 : vector<8x256x1xf32> to vector<8x256x64xf32>
    %48 = arith.mulf %46, %47 : vector<8x256x64xf32>
    %cst_25 = arith.constant 1.000000e+00 : f32
    %49 = vector.broadcast %cst_25 : f32 to vector<8x256x1xf32>
    %50 = arith.subf %49, %44 : vector<8x256x1xf32>
    %cst_26 = arith.constant 2.000000e+00 : f32
    %51 = vector.broadcast %cst_26 : f32 to vector<8x256x1xf32>
    %52 = arith.mulf %51, %50 : vector<8x256x1xf32>
    %53 = vector.broadcast %52 : vector<8x256x1xf32> to vector<8x256x64xf32>
    %54 = arith.subf %48, %53 : vector<8x256x64xf32>
    %cst_27 = arith.constant dense<0xFF800000> : vector<8x64xf32>
    %55 = vector.multi_reduction <maximumf>, %54, %cst_27 [1] : vector<8x256x64xf32> to vector<8x64xf32>
    %c0_28 = arith.constant 0 : index
    %c0_29 = arith.constant 0 : index
    %c0_30 = arith.constant 0 : index
    %56 = vector.load %arg10[%c0_28, %c0_29, %c0_30] : memref<1x8x128xf32, #tpu.memory_space<vmem>>, vector<1x8x64xf32>
    %57 = vector.shape_cast %56 : vector<1x8x64xf32> to vector<8x64xf32>
    %58 = vector.shape_cast %55 : vector<8x64xf32> to vector<1x8x64xf32>
    tpu.vector_store %arg10[%c0_28, %c0_29, %c0_30], %58 {strides = array<i32>} : memref<1x8x128xf32, #tpu.memory_space<vmem>>, vector<1x8x64xf32>,
    %c0_31 = arith.constant 0 : index
    %c0_32 = arith.constant 0 : index
    %c64 = arith.constant 64 : index
    %59 = vector.load %arg10[%c0_31, %c0_32, %c64] : memref<1x8x128xf32, #tpu.memory_space<vmem>>, vector<1x8x64xf32>
    %60 = vector.shape_cast %59 : vector<1x8x64xf32> to vector<8x64xf32>
    %61 = vector.shape_cast %43 : vector<8x64xf32> to vector<1x8x64xf32>
    tpu.vector_store %arg10[%c0_31, %c0_32, %c64], %61 {strides = array<i32>} : memref<1x8x128xf32, #tpu.memory_space<vmem>>, vector<1x8x64xf32>,
    %62 = arith.truncf %55 : vector<8x64xf32> to vector<8x64xbf16>
    %c0_33 = arith.constant 0 : index
    %c0_34 = arith.constant 0 : index
    %c0_35 = arith.constant 0 : index
    %63 = vector.load %arg7[%c0_33, %c0_34, %c0_35] : memref<2x64x128xbf16, #tpu.memory_space<vmem>>, vector<1x64x128xbf16>
    %64 = vector.shape_cast %63 : vector<1x64x128xbf16> to vector<64x128xbf16>
    %cst_36 = arith.constant dense<0.000000e+00> : vector<8x128xf32>
    %65 = tpu.matmul %62, %64, %cst_36 {dimension_numbers = #tpu.dot_dimension_numbers<[1], [0], [0], [1], [0, 0, 1, 1], [], []>} : vector<8x64xbf16>, vector<64x128xbf16>, vector<8x128xf32> -> vector<8x128xf32>
    %66 = arith.truncf %43 : vector<8x64xf32> to vector<8x64xbf16>
    %c1_37 = arith.constant 1 : index
    %c0_38 = arith.constant 0 : index
    %c0_39 = arith.constant 0 : index
    %67 = vector.load %arg7[%c1_37, %c0_38, %c0_39] : memref<2x64x128xbf16, #tpu.memory_space<vmem>>, vector<1x64x128xbf16>
    %68 = vector.shape_cast %67 : vector<1x64x128xbf16> to vector<64x128xbf16>
    %cst_40 = arith.constant dense<0.000000e+00> : vector<8x128xf32>
    %69 = tpu.matmul %66, %68, %cst_40 {dimension_numbers = #tpu.dot_dimension_numbers<[1], [0], [0], [1], [0, 0, 1, 1], [], []>} : vector<8x64xbf16>, vector<64x128xbf16>, vector<8x128xf32> -> vector<8x128xf32>
    %70 = arith.addf %65, %69 : vector<8x128xf32>
    %c0_41 = arith.constant 0 : index
    %c0_42 = arith.constant 0 : index
    %71 = vector.load %arg8[%c0_41, %c0_42] : memref<1x128xf32, #tpu.memory_space<vmem>>, vector<1x128xf32>
    %72 = vector.broadcast %71 : vector<1x128xf32> to vector<8x128xf32>
    %73 = arith.addf %70, %72 : vector<8x128xf32>
    %c0_43 = arith.constant 0 : index
    %c0_44 = arith.constant 0 : index
    %c0_45 = arith.constant 0 : index
    %74 = vector.load %arg9[%c0_43, %c0_44, %c0_45] : memref<1x8x128xf32, #tpu.memory_space<vmem>>, vector<1x8x128xf32>
    %75 = vector.shape_cast %74 : vector<1x8x128xf32> to vector<8x128xf32>
    %76 = vector.shape_cast %73 : vector<8x128xf32> to vector<1x8x128xf32>
    tpu.vector_store %arg9[%c0_43, %c0_44, %c0_45], %76 {strides = array<i32>} : memref<1x8x128xf32, #tpu.memory_space<vmem>>, vector<1x8x128xf32>,
    return
  }
  func.func @transform_0(%arg0: i32) -> (i32, i32, i32) {
    %c0_i32 = arith.constant 0 : i32
    %c0_i32_0 = arith.constant 0 : i32
    %c0_i32_1 = arith.constant 0 : i32
    return %arg0, %c0_i32, %c0_i32_0 : i32, i32, i32
  }
  func.func @transform_1(%arg0: i32) -> (i32, i32, i32) {
    %c0_i32 = arith.constant 0 : i32
    %c0_i32_0 = arith.constant 0 : i32
    %c0_i32_1 = arith.constant 0 : i32
    return %arg0, %c0_i32, %c0_i32_0 : i32, i32, i32
  }
  func.func @transform_2(%arg0: i32) -> (i32, i32) {
    %c0_i32 = arith.constant 0 : i32
    %c0_i32_0 = arith.constant 0 : i32
    %c0_i32_1 = arith.constant 0 : i32
    return %c0_i32, %c0_i32_0 : i32, i32
  }
  func.func @transform_3(%arg0: i32) -> (i32, i32, i32) {
    %c0_i32 = arith.constant 0 : i32
    %c0_i32_0 = arith.constant 0 : i32
    %c0_i32_1 = arith.constant 0 : i32
    %c0_i32_2 = arith.constant 0 : i32
    return %c0_i32, %c0_i32_0, %c0_i32_1 : i32, i32, i32
  }
  func.func @transform_4(%arg0: i32) -> (i32, i32) {
    %c0_i32 = arith.constant 0 : i32
    %c0_i32_0 = arith.constant 0 : i32
    %c0_i32_1 = arith.constant 0 : i32
    return %c0_i32, %c0_i32_0 : i32, i32
  }
  func.func @transform_5(%arg0: i32) -> (i32, i32, i32) {
    %c0_i32 = arith.constant 0 : i32
    %c0_i32_0 = arith.constant 0 : i32
    %c0_i32_1 = arith.constant 0 : i32
    return %arg0, %c0_i32, %c0_i32_0 : i32, i32, i32
  }
  func.func @transform_6(%arg0: i32) -> (i32, i32, i32) {
    %c0_i32 = arith.constant 0 : i32
    %c0_i32_0 = arith.constant 0 : i32
    %c0_i32_1 = arith.constant 0 : i32
    %c0_i32_2 = arith.constant 0 : i32
    return %c0_i32, %c0_i32_0, %c0_i32_1 : i32, i32, i32
  }
  func.func @transform_7(%arg0: i32) -> (i32, i32) {
    %c0_i32 = arith.constant 0 : i32
    %c0_i32_0 = arith.constant 0 : i32
    %c0_i32_1 = arith.constant 0 : i32
    return %c0_i32, %c0_i32_0 : i32, i32
  }
  func.func @transform_8(%arg0: i32) -> (i32, i32, i32) {
    %c0_i32 = arith.constant 0 : i32
    %c0_i32_0 = arith.constant 0 : i32
    %c0_i32_1 = arith.constant 0 : i32
    return %arg0, %c0_i32, %c0_i32_0 : i32, i32, i32
  }
  func.func @transform_9(%arg0: i32) -> (i32, i32, i32) {
    %c0_i32 = arith.constant 0 : i32
    %c0_i32_0 = arith.constant 0 : i32
    %c0_i32_1 = arith.constant 0 : i32
    return %arg0, %c0_i32, %c0_i32_0 : i32, i32, i32
  }
}

</mosaic_0001>

<bundles_post_ra>
// kernel: tpu_custom_call.1
= control target key start
LH: loop header
LB: loop body
LE: loop exit
PB: predicated region body
PF: predicated region fallthrough
CT: control target
= control target key end

     0   :  { %s10620_s0 = inlined_call_operand.hbm [shape: bf16[2,256,256], index: 0, kind: input, shape index: {}]   ;;  %s10621_s1 = inlined_call_operand.vmem [shape: bf16[2,256,8], index: 1, kind: input, shape index: {}]   ;;  %s10622_s2 = inlined_call_operand.vmem [shape: bf16[8,64], index: 2, kind: input, shape index: {}]   ;;  %s10623_s3 = inlined_call_operand.vmem [shape: bf16[2,64,64], index: 3, kind: input, shape index: {}]   ;;  %s10624_s4 = inlined_call_operand.vmem [shape: f32[3,64], index: 4, kind: input, shape index: {}]   ;;  %s10625_s5 = inlined_call_operand.vmem [shape: f32[2,8,256], index: 5, kind: input, shape index: {}]   ;;  %s10626_s6 = inlined_call_operand.vmem [shape: bf16[2,64,128], index: 6, kind: input, shape index: {}]   ;;  %s10627_s7 = inlined_call_operand.vmem [shape: f32[1,128], index: 7, kind: input, shape index: {}]   ;;  %s10628_s8 = inlined_call_operand.hbm [shape: f32[2,8,128], index: 8, kind: output, shape index: {0}]   ;;  %s10629_s9 = inlined_call_operand.hbm [shape: f32[2,8,128], index: 9, kind: output, shape index: {1}]  }
   0x1   :  { %10985 = sst [smem:[#allocation369_spill]] %s10620_s0 }
   0x2   :  { %10986 = sst [smem:[#allocation370_spill]] %s10621_s1 }
   0x3   :  { %15 = vsyncpa [#allocation3], 0 }
   0x4   :  { %17 = vsyncpa [#allocation3 + $0x1], 0 }
   0x5   :  { %18 = vsyncpa [#allocation4], 0 }
   0x6   :  { %20 = vsyncpa [#allocation4 + $0x1], 0 }
   0x7   :  { %21 = vsyncpa [#allocation7], 0 }
   0x8   :  { %23 = vsyncpa [#allocation7 + $0x1], 0  ;;  %s6505_s30 = smov 0   ;;  %s6507_s10 = smov 0  }
   0x9   :  { %s6509_s11 = smov 0   ;;  %s6511_s12 = smov 0  }
   0xa LB: > { %10987 = sst [smem:[#allocation11_spill]] %s6446_s11  ;;  %s6526_s13 = sadd.s32 4294967295, %s6450_s12   ;;  %s6450_s12 = sphi %s6511_s12, %s12151_s12   ;;  %s6446_s11 = sphi %s6509_s11, %s12153_s11   ;;  %s6442_s10 = sphi %s6507_s10, %s12155_s10   ;;  %s6438_s30 = sphi %s6505_s30, %s12154_s30  }
   0xb   : > { %s5427_s14 = sadd.s32 4294967294, %s6450_s12   ;;  %s6530_s15 = sadd.s32 1, %s6450_s12  }
   0xc   : > { %10988 = sst [smem:[#allocation12_spill]] %s6530_s15  ;;  %s36_s16 = sadd.s32 1, %s6446_s11 }
   0xd   : > { %s33_s17 = ssub.s32 %s6450_s12, %s6530_s15  ;;  %p43_p0 = scmp.ne.s32.totalorder %s6446_s11, %s6442_s10 }
   0xe   : > { %p34_p1 = scmp.eq.s32.totalorder %s33_s17, 0  ;;  %p44_p2 = scmp.eq.s32.totalorder %s6450_s12, 0 }
   0xf   : > { %p49_p3 = scmp.ne.s32.totalorder %s6442_s10, %s6438_s30  ;;  %p50_p4 = scmp.eq.s32.totalorder %s6526_s13, 0 }
  0x10   : > { %s6542_s18 = scalar_select %p34_p1, %s6446_s11, %s36_s16  }
  0x11   : > { %p6544_p5 = por %p44_p2, %p43_p0  ;;  %p6548_p6 = por %p50_p4, %p49_p3 }
  0x12   : > { %10989 = sst [smem:[#allocation13_spill]] %s6542_s18  ;;  %p230_p7 = scmp.eq.s32.totalorder %s6526_s13, 1 }
  0x13   : > { %p236_p8 = scmp.eq.s32.totalorder %s5427_s14, 1  ;;  %p5856_p10 = scmp.lt.s32.totalorder %s6450_s12, 2 }
  0x14   : > { %p6555_p11 = por %p230_p7, %p43_p0  ;;  %s297_s23 = sand.u32 1, %s6446_s11  }
  0x15   : > { %p6559_p12 = por %p236_p8, %p49_p3  ;;  %s5769_s24 = sshll.u32 %s6450_s12, 8 }
  0x16   : > { %s5430_s25 = sshll.u32 %s297_s23, 8  ;;  %s10994_s0 = sld [smem:[#allocation369_spill]] }
  0x17   : > { %s301_s14 = scalar_lea.vmem [#allocation2], %s5430_s25  ;;  %p6570_p13 = pnand %p5856_p10, %p6544_p5 }
  0x18   : > { %s309_s16 = sshll.u32 %s301_s14, 4  ;;  %p5433_p0 = scmp.ge.s32.totalorder %s6450_s12, 1  ;;  %s310_s16 = int_to_ptr.vmem [resolvable:$true] %s309_s16 }
  0x19   : > { %p333_p1 = scmp.lt.s32.totalorder %s6450_s12, 3  ;;  %s298_s18 = scalar_lea.sflag [#allocation3], %s297_s23 }
  0x1a   : > { %p6326_p3 = pneg %p6570_p13 }
  0x1c   : > { %s306_s28 = scalar_lea.hbm %s10994_s0, %s5769_s24  ;;  %s6329_s19 = scalar_lea.hbm %s10994_s0, 512 }
  0x1d   : > { %s307_s29 = sshll.u32 %s306_s28, 4  ;;  %s308_s29 = int_to_ptr.hbm [resolvable:$true] %s307_s29 }
  0x1e   : > { %s6322_s11 = sshra.s32 %s308_s29, 4  ;;  %s6323_s11 = int_to_ptr.hbm [resolvable:$true] %s6322_s11 }
  0x1f   : > { %s6324_s15 = scalar_lea.hbm %s6323_s11, 256  ;;  %p6330_p5 = scmp.lt.s32.totalorder %s6323_s11, %s10994_s0 }
  0x20   : > { %p6325_p2 = scmp.ne.s32.totalorder %s6323_s11, %s6324_s15  ;;  %p6331_p8 = scmp.lt.s32.totalorder %s6329_s19, %s6324_s15 }
  0x22   : > { %p6327_p4 = pnand %p6326_p3, %p6325_p2  ;;  %p6332_p10 = por %p6331_p8, %p6330_p5 }
  0x24   : > { %p6328_p7 = pneg %p6327_p4 }
  0x26   : > { %p6333_p9 = pnand %p6332_p10, %p6328_p7 }
  0x28   : > { %6336 = shalt.err (!%p6333_p9)
}
  0x29   : > { %s6452_s23 = smov 128   ;;  %s6453_s28 = smov 8  }
  0x2a   : > { %5848 = dma.hbm_to_vmem [thread:$0]  (!%p6570_p13), %s308_s29, 4096, %s310_s16, %s298_s18, %s6452_s23, %s6452_s23, %s6453_s28  }
  0x2b   : > { %p334_p2 = pnand %p5433_p0, %p333_p1 }
  0x2d   : > { %337 = sbr.rel (%p334_p2) target bundleno = 2217 (0x8a9), region = 52 }
  0x32   : > { %s6591_s14 = sand.u32 1, %s6442_s10  }
  0x33   : > { %s5434_s11 = sshll.u32 %s6591_s14, 8  ;;  %s340_s15 = scalar_lea.sflag [#allocation3], %s6591_s14 }
  0x34   : > { %s6595_s24 = scalar_lea.vmem [#allocation2], %s5434_s11 }
  0x35   : > { %6425 = dma.done.wait (%p6548_p6), %s340_s15, 4096  }
  0x36   : > { %6427 = vsyncadd (%p6548_p6), %s340_s15, 4294963200  ;;  %v1972_v0 = vlaneseq  ;;  %p394_p9 = scmp.lt.s32.totalorder %s6526_s13, 1  ;;  %vm600_vm0 = vcmask 1043456   ;;  %s10997_s1 = sld [smem:[#allocation370_spill]]  ;;  %v470_v5 = vld [vmem:[%s10622_s2] sm:$0xf] }
  0x37   : > { %v602_v6 = vsel %vm600_vm0, %v470_v5, 0  ;;  %vm551_vm1 = vcmask 64512   ;;  %vm1128_vm2 = vcmask 523264   ;;  %vm5107_vm3 = vcmask 1041409   ;;  %s6454_s23 = smov 64   ;;  %s5435_s28 = sshll.u32 %s6591_s14, 3 }
  0x38   : > { %v6602_v1 = vshrl.u32 %v1972_v0, 7  ;;  %s395_s18 = scalar_select %p394_p9, %s6526_s13, 1  ;;  %611 = vmatpush.bf16.msra.mxu0 %v602_v6  ;;  %5836 = vmatpush.bf16.msra.mxu1 %v602_v6  ;;  %vm5109_vm4 = vcmask 1042434   ;;  %vm5111_vm5 = vcmask 1043459   ;;  %vm5113_vm6 = vcmask 1044484  }
  0x39   : > { %5837 = vmatpush.bf16.msra.mxu2 %v602_v6  ;;  %5838 = vmatpush.bf16.msra.mxu3 %v602_v6  ;;  %vm5115_vm7 = vcmask 1045509   ;;  %vm5117_vm8 = vcmask 1046534   ;;  %vm5119_vm9 = vcmask 1047559   ;;  %vm5127_vm14 = vcmask 1048064   ;;  %s5271_s25 = scalar_lea.sflag [#allocation7], %s6591_s14 }
  0x3a   : > { %10996 = vst [vmem:[#allocation14_spill] sm:$0xff] %v6602_v1  ;;  %v6606_v2 = vadd.s32 24, %v6602_v1  ;;  %v6609_v3 = vadd.s32 8, %v6602_v1  ;;  %s5770_s29 = sshll.u32 %s395_s18, 7  ;;  %s5771_s16 = sshll.u32 %s395_s18, 4  ;;  %v6622_v4 = vadd.s32 40, %v6602_v1 }
  0x3b   : > { %s6619_s27 = scalar_lea.vmem %s10625_s5, %s5771_s16  ;;  %v6647_v13 = vadd.s32 32, %v6602_v1  ;;  %v6650_v14 = vadd.s32 16, %v6602_v1  ;;  %v6665_v19 = vadd.s32 48, %v6602_v1  ;;  %v6680_v24 = vadd.s32 64, %v6602_v1 }
  0x3c   : > { %s6614_s20 = scalar_lea.vmem %s10997_s1, %s5770_s29  ;;  %10998 = vst [vmem:[#allocation15_spill] sm:$0xff] %v6622_v4  ;;  %5895 = vset.pattern.permute.xlu2 %v6606_v2  ;;  %5893 = vset.pattern.permute.xlu1 %v6609_v3  ;;  %v6633_v9 = vld [vmem:[%s6619_s27] sm:$0xff]  ;;  %v6683_v25 = vadd.s32 56, %v6602_v1  ;;  %v6696_v29 = vadd.s32 80, %v6602_v1  ;;  %v6699_v30 = vadd.s32 72, %v6602_v1  ;;  %v6708_v32 = vadd.s32 96, %v6602_v1 }
  0x3d   : > { %5937 = vset.pattern.permute.xlu0 %v6622_v4  ;;  %v5804_v7 = vld [vmem:[%s6614_s20] sm:$0xff]  ;;  %v5809_v8 = vld [vmem:[%s6614_s20 + $0x28] sm:$0xff]  ;;  %v6638_v12 = vperm.slane %v6633_v9, 0  ;;  %v5810_v16 = vld [vmem:[%s6614_s20 + $0x30] sm:$0xff]  ;;  %11000 = vst [vmem:[#allocation17_spill] sm:$0xff] %v6665_v19  ;;  %v6711_v33 = vadd.s32 88, %v6602_v1 }
  0x3e   : > { %v5813_v10 = vld [vmem:[%s6614_s20 + $0x48] sm:$0xff]  ;;  %5505 = vmatmul.msk.bf16.vlgmr.msra.gmra.mxu0 %vm551_vm1, %v5804_v7  ;;  %5510 = vmatmul.msk.bf16.vlgmr.msra.gmra.mxu1 %vm551_vm1, %v5809_v8  ;;  %v5814_v17 = vld [vmem:[%s6614_s20 + $0x50] sm:$0xff]  ;;  %v5811_v21 = vld [vmem:[%s6614_s20 + $0x38] sm:$0xff]  ;;  %11001 = vst [vmem:[#allocation18_spill] sm:$0xff] %v6680_v24  ;;  %v6718_v34 = vadd.s32 120, %v6602_v1  ;;  %v6721_v35 = vadd.s32 112, %v6602_v1 }
  0x3f   : > { %v5817_v11 = vld [vmem:[%s6614_s20 + $0x68] sm:$0xff]  ;;  %10999 = vst [vmem:[#allocation16_spill] sm:$0xff] %v6638_v12  ;;  %5514 = vmatmul.msk.bf16.vlgmr.msra.gmra.mxu2 %vm551_vm1, %v5813_v10  ;;  %v5818_v18 = vld [vmem:[%s6614_s20 + $0x70] sm:$0xff]  ;;  %v5815_v22 = vld [vmem:[%s6614_s20 + $0x58] sm:$0xff]  ;;  %s393_s29 = scalar_lea.vmem [#allocation6], %s5435_s28 }
  0x40   : > { %5518 = vmatmul.msk.bf16.vlgmr.msra.gmra.mxu3 %vm551_vm1, %v5817_v11  ;;  %v5805_v15 = vld [vmem:[%s6614_s20 + $0x8] sm:$0xff]  ;;  %v5806_v20 = vld [vmem:[%s6614_s20 + $0x10] sm:$0xff]  ;;  %v5819_v23 = vld [vmem:[%s6614_s20 + $0x78] sm:$0xff]  ;;  %11002 = vst [vmem:[#allocation19_spill] sm:$0xff] %v6683_v25  ;;  %s5297_s16 = sshll.u32 %s393_s29, 4  ;;  %s5298_s16 = int_to_ptr.vmem [resolvable:$true] %s5297_s16 }
  0x41   : > { %v5807_v26 = vld [vmem:[%s6614_s20 + $0x18] sm:$0xff]  ;;  %v5812_v27 = vld [vmem:[%s6614_s20 + $0x40] sm:$0xff]  ;;  %11003 = vst [vmem:[#allocation20_spill] sm:$0xff] %v6696_v29  ;;  %v6730_v36 = vld [vmem:[%s6619_s27 + $0x8] sm:$0xff] }
  0x42   : > { %v5816_v28 = vld [vmem:[%s6614_s20 + $0x60] sm:$0xff]  ;;  %11004 = vst [vmem:[#allocation21_spill] sm:$0xff] %v6699_v30  ;;  %v6733_v37 = vperm.slane %v6730_v36, 0 }
  0x43   : > { %v5808_v31 = vld [vmem:[%s6614_s20 + $0x20] sm:$0xff]  ;;  %11005 = vst [vmem:[#allocation22_spill] sm:$0xff] %v6708_v32 }
  0x44   : > { %1994 = vperm.xlu2 %5895, %v6638_v12   ;;  %1982 = vperm.xlu1 %5893, %v6638_v12   ;;  %11006 = vst [vmem:[#allocation23_spill] sm:$0xff] %v6711_v33 }
  0x45   : > { %11007 = vst [vmem:[#allocation24_spill] sm:$0xff] %v6718_v34 }
  0x46   : > { %11008 = vst [vmem:[#allocation25_spill] sm:$0xff] %v6733_v37 }
  0x4c   : > { %5896 = vset.pattern.permute.xlu2 %v6647_v13  ;;  %5894 = vset.pattern.permute.xlu1 %v6650_v14 }
  0x4e   : > { %5506 = vmatmul.msk.bf16.gmra.mxu0 %vm551_vm1, %v5805_v15  ;;  %5511 = vmatmul.msk.bf16.gmra.mxu1 %vm551_vm1, %v5810_v16  ;;  %v6766_v15 = vadd.s32 104, %v6602_v1 }
  0x4f   : > { %5515 = vmatmul.msk.bf16.gmra.mxu2 %vm551_vm1, %v5814_v17 }
  0x50   : > { %5519 = vmatmul.msk.bf16.gmra.mxu3 %vm551_vm1, %v5818_v18  ;;  %11009 = vst [vmem:[#allocation26_spill] sm:$0xff] %v6766_v15 }
  0x54   : > { %2000 = vperm.xlu2 %5896, %v6638_v12   ;;  %1988 = vperm.xlu1 %5894, %v6638_v12  }
  0x5c   : > { %5898 = vset.pattern.permute.xlu2 %v6665_v19  ;;  %5897 = vset.pattern.permute.xlu1 %v6622_v4 }
  0x5e   : > { %5507 = vmatmul.msk.bf16.gmra.mxu0 %vm551_vm1, %v5806_v20  ;;  %5512 = vmatmul.msk.bf16.gmra.mxu1 %vm551_vm1, %v5811_v21 }
  0x5f   : > { %5516 = vmatmul.msk.bf16.gmra.mxu2 %vm551_vm1, %v5815_v22 }
  0x60   : > { %5520 = vmatmul.msk.bf16.gmra.mxu3 %vm551_vm1, %v5819_v23 }
  0x64   : > { %2012 = vperm.xlu2 %5898, %v6638_v12   ;;  %2006 = vperm.xlu1 %5897, %v6638_v12  }
  0x6c   : > { %5900 = vset.pattern.permute.xlu2 %v6680_v24  ;;  %5899 = vset.pattern.permute.xlu1 %v6683_v25 }
  0x6e   : > { %5508 = vmatmul.msk.bf16.gmra.mxu0 %vm551_vm1, %v5807_v26  ;;  %5513 = vmatmul.msk.bf16.gmra.mxu1 %vm551_vm1, %v5812_v27 }
  0x6f   : > { %5517 = vmatmul.msk.bf16.gmra.mxu2 %vm551_vm1, %v5816_v28 }
  0x74   : > { %2024 = vperm.xlu2 %5900, %v6638_v12   ;;  %2018 = vperm.xlu1 %5899, %v6638_v12  }
  0x7c   : > { %5902 = vset.pattern.permute.xlu2 %v6696_v29  ;;  %5901 = vset.pattern.permute.xlu1 %v6699_v30 }
  0x7e   : > { %5509 = vmatmul.msk.bf16.gmra.mxu0 %vm551_vm1, %v5808_v31 }
  0x84   : > { %2036 = vperm.xlu2 %5902, %v6638_v12   ;;  %2030 = vperm.xlu1 %5901, %v6638_v12  }
  0x8c   : > { %5904 = vset.pattern.permute.xlu2 %v6708_v32  ;;  %5903 = vset.pattern.permute.xlu1 %v6711_v33 }
  0x94   : > { %2048 = vperm.xlu2 %5904, %v6638_v12   ;;  %2042 = vperm.xlu1 %5903, %v6638_v12  }
  0x9c   : > { %5906 = vset.pattern.permute.xlu2 %v6718_v34  ;;  %5905 = vset.pattern.permute.xlu1 %v6721_v35 }
  0xa4   : > { %2066 = vperm.xlu2 %5906, %v6638_v12   ;;  %2060 = vperm.xlu1 %5905, %v6638_v12  }
  0xac   : > { %5908 = vset.pattern.permute.xlu2 %v6609_v3  ;;  %5907 = vset.pattern.permute.xlu1 %v6602_v1 }
  0xb4   : > { %2079 = vperm.xlu2 %5908, %v6733_v37   ;;  %2073 = vperm.xlu1 %5907, %v6733_v37  }
  0xbb   : > { %v6739_v38 = vpop.f32.mrf.mxu0  ;;  %v638_v39 = vpop.f32.mrf.mxu1 }
  0xbc   : > { %5910 = vset.pattern.permute.xlu2 %v6647_v13  ;;  %5909 = vset.pattern.permute.xlu1 %v6606_v2 }
  0xc2   : > { %v6743_v40 = vpop.f32.mrf.mxu2 }
  0xc3   : > { %v678_v41 = vpop.f32.mrf.mxu3  ;;  %v6745_v42 = vpop.f32.mrf.mxu0 }
  0xc4   : > { %2097 = vperm.xlu2 %5910, %v6733_v37   ;;  %2091 = vperm.xlu1 %5909, %v6733_v37   ;;  %v640_v43 = vpop.f32.mrf.mxu1 }
  0xc5   : > { %v698_v6 = vpack.c.bf16 %v640_v43, %v638_v39  ;;  %v5772_v39 = vld [vmem:[%s6595_s24 + $0x4] sm:$0xf] }
  0xca   : > { %v6749_v44 = vpop.f32.mrf.mxu2 }
  0xcb   : > { %v680_v45 = vpop.f32.mrf.mxu3  ;;  %v6751_v46 = vpop.f32.mrf.mxu0  ;;  %v702_v27 = vpack.c.bf16 %v6749_v44, %v6743_v40  ;;  %v5523_v44 = vld [vmem:[%s6595_s24] sm:$0xf] }
  0xcc   : > { %5912 = vset.pattern.permute.xlu2 %v6665_v19  ;;  %5911 = vset.pattern.permute.xlu1 %v6622_v4  ;;  %v643_v47 = vpop.f32.mrf.mxu1  ;;  %v706_v11 = vpack.c.bf16 %v680_v45, %v678_v41  ;;  %v5525_v41 = vld [vmem:[%s6595_s24 + $0x8] sm:$0xf0] }
  0xd2   : > { %v663_v48 = vpop.f32.mrf.mxu2 }
  0xd3   : > { %v683_v49 = vpop.f32.mrf.mxu3  ;;  %v6755_v50 = vpop.f32.mrf.mxu0 }
  0xd4   : > { %2109 = vperm.xlu2 %5912, %v6733_v37   ;;  %2103 = vperm.xlu1 %5911, %v6733_v37   ;;  %v645_v51 = vpop.f32.mrf.mxu1  ;;  %v694_v40 = vpack.c.bf16 %v6755_v50, %v6751_v46  ;;  %v5774_v46 = vld [vmem:[%s6595_s24 + $0x14] sm:$0xf]  ;;  %v5533_v50 = vld [vmem:[%s6595_s24 + $0x18] sm:$0xf0] }
  0xd5   : > { %v699_v61 = vpack.c.bf16 %v645_v51, %v643_v47  ;;  %v6778_v47 = vor.u32 %v5772_v39, %v5525_v41  ;;  %v693_v51 = vpack.c.bf16 %v6745_v42, %v6739_v38  ;;  %v5531_v38 = vld [vmem:[%s6595_s24 + $0x10] sm:$0xf]  ;;  %v5775_v42 = vld [vmem:[%s6595_s24 + $0x14] sm:$0xf0]  ;;  %v5571_v39 = vld [vmem:[%s6595_s24 + $0x60] sm:$0xf] }
  0xd6   : > { %v5785_v41 = vld [vmem:[%s6595_s24 + $0x64] sm:$0xf0] }
  0xda   : > { %v665_v52 = vpop.f32.mrf.mxu2 }
  0xdb   : > { %v685_v53 = vpop.f32.mrf.mxu3  ;;  %v623_v54 = vpop.f32.mrf.mxu0  ;;  %v703_v23 = vpack.c.bf16 %v665_v52, %v663_v48  ;;  %v6781_v48 = vperm.slane %v6633_v9, 1 }
  0xdc   : > { %5914 = vset.pattern.permute.xlu2 %v6699_v30  ;;  %5913 = vset.pattern.permute.xlu1 %v6680_v24  ;;  %v648_v55 = vpop.f32.mrf.mxu1  ;;  %v707_v7 = vpack.c.bf16 %v685_v53, %v683_v49  ;;  %v5773_v49 = vld [vmem:[%s6595_s24 + $0x4] sm:$0xf0]  ;;  %v6799_v53 = vor.u32 %v5774_v46, %v5533_v50  ;;  %v5822_v46 = vld [vmem:[%s10623_s3 + $0x10] sm:$0xff] }
  0xdd   : > { %11010 = vst [vmem:[#allocation27_spill] sm:$0xff] %v6781_v48  ;;  %v6792_v52 = vor.u32 %v5773_v49, %v5523_v44  ;;  %v5823_v44 = vld [vmem:[%s10623_s3 + $0x18] sm:$0xff]  ;;  %v5579_v50 = vld [vmem:[%s6595_s24 + $0x70] sm:$0xf] }
  0xde   : > { %1181 = vmatpush.bf16.msrb.mxu3 %v5823_v44  ;;  %v5791_v44 = vld [vmem:[%s6595_s24 + $0x94] sm:$0xf0] }
  0xe2   : > { %v668_v56 = vpop.f32.mrf.mxu2  ;;  %1182 = vmatpush.bf16.msrb.mxu3 %v5822_v46 }
  0xe3   : > { %v688_v57 = vpop.f32.mrf.mxu3  ;;  %v625_v58 = vpop.f32.mrf.mxu0 }
  0xe4   : > { %2127 = vperm.xlu2 %5914, %v6733_v37   ;;  %2121 = vperm.xlu1 %5913, %v6733_v37   ;;  %v650_v59 = vpop.f32.mrf.mxu1  ;;  %v695_v45 = vpack.c.bf16 %v625_v58, %v623_v54  ;;  %v6806_v54 = vor.u32 %v5775_v42, %v5531_v38  ;;  %v5539_v58 = vld [vmem:[%s6595_s24 + $0x20] sm:$0xf]  ;;  %v5787_v38 = vld [vmem:[%s6595_s24 + $0x74] sm:$0xf0]  ;;  %v5821_v42 = vld [vmem:[%s10623_s3 + $0x8] sm:$0xff] }
  0xe5   : > { %v700_v60 = vpack.c.bf16 %v650_v59, %v648_v55  ;;  %v5776_v55 = vld [vmem:[%s6595_s24 + $0x24] sm:$0xf]  ;;  %v5777_v59 = vld [vmem:[%s6595_s24 + $0x24] sm:$0xf0] }
  0xe6   : > { %1183 = vmatpush.bf16.msrb.mxu3 %v5821_v42 }
  0xe7   : > { %870 = vmatpush.bf16.msrb.mxu1 %v700_v60  ;;  %v6820_v60 = vor.u32 %v5777_v59, %v5539_v58  ;;  %v5788_v58 = vld [vmem:[%s6595_s24 + $0x84] sm:$0xf]  ;;  %v5589_v59 = vld [vmem:[%s6595_s24 + $0x88] sm:$0xf0] }
  0xea   : > { %v670_v62 = vpop.f32.mrf.mxu2 }
  0xeb   : > { %v690_v63 = vpop.f32.mrf.mxu3  ;;  %871 = vmatpush.bf16.msrb.mxu1 %v699_v61  ;;  %v628_v0 = vpop.f32.mrf.mxu0  ;;  %v704_v21 = vpack.c.bf16 %v670_v62, %v668_v56  ;;  %v5541_v56 = vld [vmem:[%s6595_s24 + $0x28] sm:$0xf0]  ;;  %v5778_v61 = vld [vmem:[%s6595_s24 + $0x34] sm:$0xf]  ;;  %v5549_v62 = vld [vmem:[%s6595_s24 + $0x38] sm:$0xf0] }
  0xec   : > { %5916 = vset.pattern.permute.xlu2 %v6711_v33  ;;  %5915 = vset.pattern.permute.xlu1 %v6696_v29  ;;  %v708_v5 = vpack.c.bf16 %v690_v63, %v688_v57  ;;  %v653_v20 = vpop.f32.mrf.mxu1  ;;  %v6813_v57 = vor.u32 %v5776_v55, %v5541_v56  ;;  %v6827_v63 = vor.u32 %v5778_v61, %v5549_v62  ;;  %v5820_v56 = vld [vmem:[%s10623_s3] sm:$0xff] }
  0xed   : > { %v6902_v55 = vor.u32 %v5787_v38, %v5579_v50  ;;  %1184 = vmatpush.bf16.msrb.mxu3 %v5820_v56  ;;  %v6912_v61 = vor.u32 %v5788_v58, %v5589_v59  ;;  %v5587_v62 = vld [vmem:[%s6595_s24 + $0x80] sm:$0xf]  ;;  %v5792_v58 = vld [vmem:[%s6595_s24 + $0xa4] sm:$0xf]  ;;  %v5605_v59 = vld [vmem:[%s6595_s24 + $0xa8] sm:$0xf0] }
  0xee   : > { %959 = vmatpush.bf16.msrb.mxu2 %v708_v5  ;;  %11011 = vst [vmem:[#allocation28_spill] sm:$0xff] %v6813_v57  ;;  %v5779_v5 = vld [vmem:[%s6595_s24 + $0x34] sm:$0xf0] }
  0xef   : > { %872 = vmatpush.bf16.msrb.mxu1 %v698_v6  ;;  %11012 = vst [vmem:[#allocation29_spill] sm:$0xff] %v6827_v63 }
  0xf0   : > { %11018 = vst [vmem:[#allocation35_spill] sm:$0xff] %v6912_v61 }
  0xf2   : > { %960 = vmatpush.bf16.msrb.mxu2 %v707_v7  ;;  %v673_v8 = vpop.f32.mrf.mxu2  ;;  %v5780_v7 = vld [vmem:[%s6595_s24 + $0x44] sm:$0xf] }
  0xf3   : > { %v630_v10 = vpop.f32.mrf.mxu0 }
  0xf4   : > { %2139 = vperm.xlu2 %5916, %v6733_v37   ;;  %2133 = vperm.xlu1 %5915, %v6733_v37   ;;  %v655_v28 = vpop.f32.mrf.mxu1  ;;  %v696_v31 = vpack.c.bf16 %v630_v10, %v628_v0  ;;  %v5547_v0 = vld [vmem:[%s6595_s24 + $0x30] sm:$0xf] }
  0xf5   : > { %v701_v43 = vpack.c.bf16 %v655_v28, %v653_v20  ;;  %v6834_v6 = vor.u32 %v5779_v5, %v5547_v0  ;;  %v5565_v20 = vld [vmem:[%s6595_s24 + $0x58] sm:$0xf0]  ;;  %v5573_v28 = vld [vmem:[%s6595_s24 + $0x68] sm:$0xf0]  ;;  %v5789_v0 = vld [vmem:[%s6595_s24 + $0x84] sm:$0xf0] }
  0xf6   : > { %961 = vmatpush.bf16.msrb.mxu2 %v706_v11  ;;  %v5555_v11 = vld [vmem:[%s6595_s24 + $0x40] sm:$0xf] }
  0xfa   : > { %v675_v16 = vpop.f32.mrf.mxu2 }
  0xfb   : > { %v633_v17 = vpop.f32.mrf.mxu0  ;;  %v705_v18 = vpack.c.bf16 %v675_v16, %v673_v8  ;;  %v5557_v8 = vld [vmem:[%s6595_s24 + $0x48] sm:$0xf0]  ;;  %v5781_v16 = vld [vmem:[%s6595_s24 + $0x44] sm:$0xf0] }
  0xfc   : > { %5918 = vset.pattern.permute.xlu2 %v6721_v35  ;;  %5917 = vset.pattern.permute.xlu1 %v6766_v15  ;;  %v6841_v10 = vor.u32 %v5780_v7, %v5557_v8  ;;  %v437_v7 = vld [vmem:[%s10624_s4] sm:$0x7]  ;;  %v6922_v8 = vor.u32 %v5789_v0, %v5587_v62 }
  0xfd   : > { %962 = vmatpush.bf16.msrb.mxu2 %v705_v18  ;;  %v5782_v18 = vld [vmem:[%s6595_s24 + $0x54] sm:$0xf] }
  0xfe   : > { %11013 = vst [vmem:[#allocation30_spill] sm:$0xff] %v6841_v10 }
 0x101   : > { %963 = vmatpush.bf16.msrb.mxu2 %v704_v21  ;;  %v6855_v21 = vor.u32 %v5782_v18, %v5565_v20  ;;  %v5790_v18 = vld [vmem:[%s6595_s24 + $0x94] sm:$0xf]  ;;  %v5597_v20 = vld [vmem:[%s6595_s24 + $0x98] sm:$0xf0] }
 0x103   : > { %v635_v22 = vpop.f32.mrf.mxu0  ;;  %11014 = vst [vmem:[#allocation31_spill] sm:$0xff] %v6855_v21 }
 0x104   : > { %2157 = vperm.xlu2 %5918, %v6733_v37   ;;  %2151 = vperm.xlu1 %5917, %v6733_v37   ;;  %v697_v26 = vpack.c.bf16 %v635_v22, %v633_v17  ;;  %v6848_v17 = vor.u32 %v5781_v16, %v5555_v11  ;;  %v5563_v22 = vld [vmem:[%s6595_s24 + $0x50] sm:$0xf]  ;;  %v6924_v11 = vperm.slane %v437_v7, 0  ;;  %v6949_v7 = vor.u32 %v5792_v58, %v5605_v59 }
 0x105   : > { %964 = vmatpush.bf16.msrb.mxu2 %v703_v23  ;;  %v5783_v23 = vld [vmem:[%s6595_s24 + $0x54] sm:$0xf0] }
 0x106   : > { %873 = vmatpush.bf16.msrb.mxu1 %v697_v26  ;;  %v6862_v26 = vor.u32 %v5783_v23, %v5563_v22  ;;  %11020 = vst [vmem:[#allocation37_spill] sm:$0xff] %v6949_v7 }
 0x109   : > { %965 = vmatpush.bf16.msrb.mxu2 %v702_v27  ;;  %v5784_v27 = vld [vmem:[%s6595_s24 + $0x64] sm:$0xf] }
 0x10a   : > { %874 = vmatpush.bf16.msrb.mxu1 %v696_v31  ;;  %v6869_v31 = vor.u32 %v5784_v27, %v5573_v28  ;;  %v6932_v27 = vor.u32 %v5790_v18, %v5597_v20 }
 0x10c   : > { %5920 = vset.pattern.permute.xlu2 %v6602_v1  ;;  %5919 = vset.pattern.permute.xlu1 %v6718_v34  ;;  %11015 = vst [vmem:[#allocation32_spill] sm:$0xff] %v6869_v31 }
 0x10d   : > { %966 = vmatpush.bf16.msrb.mxu2 %v701_v43  ;;  %v6876_v43 = vor.u32 %v5785_v41, %v5571_v39  ;;  %11019 = vst [vmem:[#allocation36_spill] sm:$0xff] %v6932_v27 }
 0x10e   : > { %875 = vmatpush.bf16.msrb.mxu1 %v695_v45  ;;  %v5786_v45 = vld [vmem:[%s6595_s24 + $0x74] sm:$0xf] }
 0x110   : > { %967 = vmatmul.bf16.vlgmr.msrb.gmra.mxu2 %v6778_v47 }
 0x112   : > { %876 = vmatpush.bf16.msrb.mxu1 %v694_v40  ;;  %v5581_v40 = vld [vmem:[%s6595_s24 + $0x78] sm:$0xf0] }
 0x113   : > { %v6886_v49 = vor.u32 %v5786_v45, %v5581_v40  ;;  %v5595_v40 = vld [vmem:[%s6595_s24 + $0x90] sm:$0xf] }
 0x114   : > { %2170 = vperm.xlu2 %5920, %v6781_v48   ;;  %2163 = vperm.xlu1 %5919, %v6733_v37   ;;  %v6940_v50 = vor.u32 %v5791_v44, %v5595_v40 }
 0x115   : > { %11016 = vst [vmem:[#allocation33_spill] sm:$0xff] %v6886_v49 }
 0x116   : > { %877 = vmatpush.bf16.msrb.mxu1 %v693_v51  ;;  %v6889_v51 = vperm.slane %v6730_v36, 1 }
 0x118   : > { %11017 = vst [vmem:[#allocation34_spill] sm:$0xff] %v6889_v51 }
 0x119   : > { %878 = vmatmul.bf16.vlgmr.msrb.gmra.mxu1 %v6792_v52 }
 0x11c   : > { %5922 = vset.pattern.permute.xlu2 %v6606_v2  ;;  %5921 = vset.pattern.permute.xlu1 %v6650_v14 }
 0x120   : > { %972 = vmatmul.bf16.gmra.mxu2 %v6799_v53 }
 0x124   : > { %2188 = vperm.xlu2 %5922, %v6781_v48   ;;  %2182 = vperm.xlu1 %5921, %v6781_v48  }
 0x129   : > { %883 = vmatmul.bf16.gmra.mxu1 %v6806_v54 }
 0x12c   : > { %5924 = vset.pattern.permute.xlu2 %v6622_v4  ;;  %5923 = vset.pattern.permute.xlu1 %v6647_v13 }
 0x130   : > { %977 = vmatmul.bf16.gmra.mxu2 %v6813_v57 }
 0x134   : > { %2200 = vperm.xlu2 %5924, %v6781_v48   ;;  %2194 = vperm.xlu1 %5923, %v6781_v48  }
 0x139   : > { %888 = vmatmul.bf16.gmra.mxu1 %v6820_v60 }
 0x13c   : > { %5926 = vset.pattern.permute.xlu2 %v6680_v24  ;;  %5925 = vset.pattern.permute.xlu1 %v6683_v25 }
 0x140   : > { %982 = vmatmul.bf16.gmra.mxu2 %v6827_v63 }
 0x144   : > { %2218 = vperm.xlu2 %5926, %v6781_v48   ;;  %2212 = vperm.xlu1 %5925, %v6781_v48  }
 0x149   : > { %893 = vmatmul.bf16.gmra.mxu1 %v6834_v6 }
 0x14c   : > { %5928 = vset.pattern.permute.xlu2 %v6696_v29  ;;  %5927 = vset.pattern.permute.xlu1 %v6699_v30 }
 0x150   : > { %987 = vmatmul.bf16.gmra.mxu2 %v6841_v10 }
 0x154   : > { %2230 = vperm.xlu2 %5928, %v6781_v48   ;;  %2224 = vperm.xlu1 %5927, %v6781_v48  }
 0x159   : > { %898 = vmatmul.bf16.gmra.mxu1 %v6848_v17 }
 0x15c   : > { %5930 = vset.pattern.permute.xlu2 %v6766_v15  ;;  %5929 = vset.pattern.permute.xlu1 %v6708_v32 }
 0x160   : > { %992 = vmatmul.bf16.gmra.mxu2 %v6855_v21 }
 0x164   : > { %2248 = vperm.xlu2 %5930, %v6781_v48   ;;  %2242 = vperm.xlu1 %5929, %v6781_v48  }
 0x169   : > { %903 = vmatmul.bf16.gmra.mxu1 %v6862_v26 }
 0x16c   : > { %5932 = vset.pattern.permute.xlu2 %v6718_v34  ;;  %5931 = vset.pattern.permute.xlu1 %v6721_v35 }
 0x170   : > { %997 = vmatmul.bf16.gmra.mxu2 %v6869_v31 }
 0x174   : > { %2260 = vperm.xlu2 %5932, %v6781_v48   ;;  %2254 = vperm.xlu1 %5931, %v6781_v48  }
 0x179   : > { %908 = vmatmul.bf16.gmra.mxu1 %v6876_v43 }
 0x17c   : > { %5934 = vset.pattern.permute.xlu2 %v6650_v14  ;;  %5933 = vset.pattern.permute.xlu1 %v6609_v3 }
 0x180   : > { %1002 = vmatmul.bf16.gmra.mxu2 %v6886_v49 }
 0x184   : > { %2279 = vperm.xlu2 %5934, %v6889_v51   ;;  %2273 = vperm.xlu1 %5933, %v6889_v51  }
 0x189   : > { %913 = vmatmul.bf16.gmra.mxu1 %v6902_v55 }
 0x18c   : > { %5936 = vset.pattern.permute.xlu2 %v6647_v13  ;;  %5935 = vset.pattern.permute.xlu1 %v6606_v2 }
 0x190   : > { %1007 = vmatmul.bf16.gmra.mxu2 %v6912_v61 }
 0x193   : > { %v968_v5 = vpop.f32.mrf.mxu2 }
 0x194   : > { %2291 = vperm.xlu2 %5936, %v6889_v51   ;;  %2285 = vperm.xlu1 %5935, %v6889_v51  }
 0x196   : > { %v879_v16 = vpop.f32.mrf.mxu1 }
 0x197   : > { %v880_v22 = vadd.f32 %v879_v16, %v6924_v11 }
 0x199   : > { %918 = vmatmul.bf16.gmra.mxu1 %v6922_v8  ;;  %v969_v28 = vadd.f32 %v968_v5, %v880_v22 }
 0x19b   : > { %v970_v23 = vpop.f32.mrf.mxu2  ;;  %6120 = vtanh.f32 %v969_v28  ;;  %v5793_v28 = vld [vmem:[%s6595_s24 + $0xa4] sm:$0xf0] }
 0x19c   : > { %5939 = vset.pattern.permute.xlu2 %v6683_v25  ;;  %5938 = vset.pattern.permute.xlu1 %v6665_v19 }
 0x19e   : > { %v881_v39 = vpop.f32.mrf.mxu1 }
 0x19f   : > { %v882_v41 = vadd.f32 %v881_v39, %v6924_v11 }
 0x1a0   : > { %1012 = vmatmul.bf16.gmra.mxu2 %v6932_v27 }
 0x1a1   : > { %v971_v45 = vadd.f32 %v970_v23, %v882_v41  ;;  %v6121_v42 = vpop.eup %6120  ;;  %v5603_v23 = vld [vmem:[%s6595_s24 + $0xa0] sm:$0xf] }
 0x1a2   : > { %v6957_v41 = vor.u32 %v5793_v28, %v5603_v23 }
 0x1a3   : > { %6122 = vtanh.f32 %v971_v45  ;;  %v973_v46 = vpop.f32.mrf.mxu2 }
 0x1a4   : > { %2309 = vperm.xlu2 %5939, %v6889_v51   ;;  %2303 = vperm.xlu1 %5938, %v6889_v51   ;;  %11021 = vst [vmem:[#allocation38_spill] sm:$0xff] %v6957_v41 }
 0x1a6   : > { %v884_v38 = vpop.f32.mrf.mxu1 }
 0x1a7   : > { %v885_v62 = vadd.f32 %v884_v38, %v6924_v11  ;;  %v5613_v38 = vld [vmem:[%s6595_s24 + $0xb8] sm:$0xf0] }
 0x1a9   : > { %v6123_v56 = vpop.eup %6122  ;;  %923 = vmatmul.bf16.gmra.mxu1 %v6940_v50  ;;  %v974_v16 = vadd.f32 %v973_v46, %v885_v62  ;;  %v5794_v46 = vld [vmem:[%s6595_s24 + $0xb4] sm:$0xf] }
 0x1aa   : > { %v1080_v0 = vpack.c.bf16 %v6123_v56, %v6121_v42  ;;  %v6966_v59 = vor.u32 %v5794_v46, %v5613_v38 }
 0x1ab   : > { %v975_v5 = vpop.f32.mrf.mxu2  ;;  %6124 = vtanh.f32 %v974_v16 }
 0x1ac   : > { %5941 = vset.pattern.permute.xlu2 %v6699_v30  ;;  %5940 = vset.pattern.permute.xlu1 %v6680_v24  ;;  %11022 = vst [vmem:[#allocation39_spill] sm:$0xff] %v6966_v59 }
 0x1ad   : > { %5665 = vmatmul.msk.bf16.vlgmr.msrb.gmra.mxu3 %vm1128_vm2, %v1080_v0 }
 0x1ae   : > { %v886_v18 = vpop.f32.mrf.mxu1 }
 0x1af   : > { %v887_v20 = vadd.f32 %v886_v18, %v6924_v11  ;;  %v5611_v18 = vld [vmem:[%s6595_s24 + $0xb0] sm:$0xf] }
 0x1b0   : > { %1017 = vmatmul.bf16.gmra.mxu2 %v6949_v7 }
 0x1b1   : > { %v976_v22 = vadd.f32 %v975_v5, %v887_v20  ;;  %v6125_v40 = vpop.eup %6124  ;;  %v5795_v20 = vld [vmem:[%s6595_s24 + $0xb4] sm:$0xf0] }
 0x1b2   : > { %v6974_v23 = vor.u32 %v5795_v20, %v5611_v18  ;;  %v5797_v18 = vld [vmem:[%s6595_s24 + $0xc4] sm:$0xf0] }
 0x1b3   : > { %6126 = vtanh.f32 %v976_v22  ;;  %v978_v39 = vpop.f32.mrf.mxu2 }
 0x1b4   : > { %2321 = vperm.xlu2 %5941, %v6889_v51   ;;  %2315 = vperm.xlu1 %5940, %v6889_v51   ;;  %11023 = vst [vmem:[#allocation40_spill] sm:$0xff] %v6974_v23 }
 0x1b6   : > { %v889_v45 = vpop.f32.mrf.mxu1 }
 0x1b7   : > { %v890_v42 = vadd.f32 %v889_v45, %v6924_v11 }
 0x1b9   : > { %v6127_v44 = vpop.eup %6126  ;;  %928 = vmatmul.bf16.gmra.mxu1 %v6957_v41  ;;  %v979_v62 = vadd.f32 %v978_v39, %v890_v42 }
 0x1ba   : > { %v1081_v56 = vpack.c.bf16 %v6127_v44, %v6125_v40  ;;  %v5796_v40 = vld [vmem:[%s6595_s24 + $0xc4] sm:$0xf]  ;;  %v5621_v44 = vld [vmem:[%s6595_s24 + $0xc8] sm:$0xf0] }
 0x1bb   : > { %v980_v58 = vpop.f32.mrf.mxu2  ;;  %6128 = vtanh.f32 %v979_v62 }
 0x1bc   : > { %5943 = vset.pattern.permute.xlu2 %v6708_v32  ;;  %5942 = vset.pattern.permute.xlu1 %v6711_v33 }
 0x1bd   : > { %5666 = vmatmul.msk.bf16.gmra.mxu3 %vm1128_vm2, %v1081_v56  ;;  %v6983_v56 = vor.u32 %v5796_v40, %v5621_v44  ;;  %v5798_v40 = vld [vmem:[%s6595_s24 + $0xd4] sm:$0xf]  ;;  %v5629_v44 = vld [vmem:[%s6595_s24 + $0xd8] sm:$0xf0] }
 0x1be   : > { %v891_v0 = vpop.f32.mrf.mxu1 }
 0x1bf   : > { %v892_v5 = vadd.f32 %v891_v0, %v6924_v11  ;;  %11024 = vst [vmem:[#allocation41_spill] sm:$0xff] %v6983_v56 }
 0x1c0   : > { %1022 = vmatmul.bf16.gmra.mxu2 %v6966_v59 }
 0x1c1   : > { %v981_v16 = vadd.f32 %v980_v58, %v892_v5  ;;  %v6129_v39 = vpop.eup %6128 }
 0x1c3   : > { %6130 = vtanh.f32 %v981_v16  ;;  %v983_v22 = vpop.f32.mrf.mxu2  ;;  %v5619_v16 = vld [vmem:[%s6595_s24 + $0xc0] sm:$0xf] }
 0x1c4   : > { %2339 = vperm.xlu2 %5943, %v6889_v51   ;;  %2333 = vperm.xlu1 %5942, %v6889_v51  }
 0x1c6   : > { %v894_v28 = vpop.f32.mrf.mxu1 }
 0x1c7   : > { %v895_v46 = vadd.f32 %v894_v28, %v6924_v11  ;;  %v6991_v28 = vor.u32 %v5797_v18, %v5619_v16 }
 0x1c9   : > { %v6131_v45 = vpop.eup %6130  ;;  %933 = vmatmul.bf16.gmra.mxu1 %v6974_v23  ;;  %v984_v58 = vadd.f32 %v983_v22, %v895_v46  ;;  %11025 = vst [vmem:[#allocation42_spill] sm:$0xff] %v6991_v28 }
 0x1ca   : > { %v1082_v38 = vpack.c.bf16 %v6131_v45, %v6129_v39 }
 0x1cb   : > { %v985_v42 = vpop.f32.mrf.mxu2  ;;  %6132 = vtanh.f32 %v984_v58  ;;  %v7000_v58 = vor.u32 %v5798_v40, %v5629_v44 }
 0x1cc   : > { %5945 = vset.pattern.permute.xlu2 %v6721_v35  ;;  %5944 = vset.pattern.permute.xlu1 %v6766_v15 }
 0x1cd   : > { %5667 = vmatmul.msk.bf16.gmra.mxu3 %vm1128_vm2, %v1082_v38  ;;  %11026 = vst [vmem:[#allocation43_spill] sm:$0xff] %v7000_v58 }
 0x1ce   : > { %v896_v62 = vpop.f32.mrf.mxu1 }
 0x1cf   : > { %v897_v0 = vadd.f32 %v896_v62, %v6924_v11  ;;  %v7003_v62 = vperm.slane %v6633_v9, 2 }
 0x1d0   : > { %1027 = vmatmul.bf16.gmra.mxu2 %v6983_v56 }
 0x1d1   : > { %v986_v5 = vadd.f32 %v985_v42, %v897_v0  ;;  %v6133_v39 = vpop.eup %6132  ;;  %11027 = vst [vmem:[#allocation44_spill] sm:$0xff] %v7003_v62 }
 0x1d3   : > { %6134 = vtanh.f32 %v986_v5  ;;  %v988_v20 = vpop.f32.mrf.mxu2 }
 0x1d4   : > { %2351 = vperm.xlu2 %5945, %v6889_v51   ;;  %2345 = vperm.xlu1 %5944, %v6889_v51  }
 0x1d6   : > { %v899_v22 = vpop.f32.mrf.mxu1 }
 0x1d7   : > { %v900_v46 = vadd.f32 %v899_v22, %v6924_v11  ;;  %v5627_v22 = vld [vmem:[%s6595_s24 + $0xd0] sm:$0xf] }
 0x1d9   : > { %v6135_v45 = vpop.eup %6134  ;;  %938 = vmatmul.bf16.gmra.mxu1 %v6991_v28  ;;  %v989_v0 = vadd.f32 %v988_v20, %v900_v46  ;;  %v5800_v46 = vld [vmem:[%s6595_s24 + $0xe4] sm:$0xf] }
 0x1da   : > { %v1083_v38 = vpack.c.bf16 %v6135_v45, %v6133_v39  ;;  %v5799_v39 = vld [vmem:[%s6595_s24 + $0xd4] sm:$0xf0] }
 0x1db   : > { %v990_v42 = vpop.f32.mrf.mxu2  ;;  %6136 = vtanh.f32 %v989_v0  ;;  %v7011_v9 = vor.u32 %v5799_v39, %v5627_v22 }
 0x1dc   : > { %5947 = vset.pattern.permute.xlu2 %v6609_v3  ;;  %5946 = vset.pattern.permute.xlu1 %v6602_v1 }
 0x1dd   : > { %5668 = vmatmul.msk.bf16.gmra.mxu3 %vm1128_vm2, %v1083_v38  ;;  %11028 = vst [vmem:[#allocation45_spill] sm:$0xff] %v7011_v9  ;;  %v5637_v38 = vld [vmem:[%s6595_s24 + $0xe8] sm:$0xf0] }
 0x1de   : > { %v901_v5 = vpop.f32.mrf.mxu1 }
 0x1df   : > { %v902_v16 = vadd.f32 %v901_v5, %v6924_v11 }
 0x1e0   : > { %1032 = vmatmul.bf16.gmra.mxu2 %v7000_v58 }
 0x1e1   : > { %v991_v18 = vadd.f32 %v990_v42, %v902_v16  ;;  %v6137_v40 = vpop.eup %6136  ;;  %v7020_v16 = vor.u32 %v5800_v46, %v5637_v38 }
 0x1e3   : > { %6138 = vtanh.f32 %v991_v18  ;;  %v993_v45 = vpop.f32.mrf.mxu2  ;;  %11029 = vst [vmem:[#allocation46_spill] sm:$0xff] %v7020_v16 }
 0x1e4   : > { %2370 = vperm.xlu2 %5947, %v7003_v62   ;;  %2364 = vperm.xlu1 %5946, %v7003_v62  }
 0x1e6   : > { %v904_v20 = vpop.f32.mrf.mxu1 }
 0x1e7   : > { %v905_v42 = vadd.f32 %v904_v20, %v6924_v11  ;;  %v5635_v20 = vld [vmem:[%s6595_s24 + $0xe0] sm:$0xf] }
 0x1e9   : > { %v6139_v44 = vpop.eup %6138  ;;  %943 = vmatmul.bf16.gmra.mxu1 %v7011_v9  ;;  %v994_v18 = vadd.f32 %v993_v45, %v905_v42 }
 0x1ea   : > { %v1084_v0 = vpack.c.bf16 %v6139_v44, %v6137_v40  ;;  %v5801_v40 = vld [vmem:[%s6595_s24 + $0xe4] sm:$0xf0] }
 0x1eb   : > { %v995_v5 = vpop.f32.mrf.mxu2  ;;  %6140 = vtanh.f32 %v994_v18  ;;  %v7028_v46 = vor.u32 %v5801_v40, %v5635_v20 }
 0x1ec   : > { %5949 = vset.pattern.permute.xlu2 %v6606_v2  ;;  %5948 = vset.pattern.permute.xlu1 %v6650_v14 }
 0x1ed   : > { %5669 = vmatmul.msk.bf16.gmra.mxu3 %vm1128_vm2, %v1084_v0  ;;  %11030 = vst [vmem:[#allocation47_spill] sm:$0xff] %v7028_v46  ;;  %v5802_v0 = vld [vmem:[%s6595_s24 + $0xf4] sm:$0xf] }
 0x1ee   : > { %v906_v22 = vpop.f32.mrf.mxu1 }
 0x1ef   : > { %v907_v39 = vadd.f32 %v906_v22, %v6924_v11 }
 0x1f0   : > { %1037 = vmatmul.bf16.gmra.mxu2 %v7020_v16  ;;  %v5643_v16 = vld [vmem:[%s6595_s24 + $0xf0] sm:$0xf] }
 0x1f1   : > { %v996_v12 = vadd.f32 %v995_v5, %v907_v39  ;;  %v6141_v38 = vpop.eup %6140  ;;  %v5645_v5 = vld [vmem:[%s6595_s24 + $0xf8] sm:$0xf0] }
 0x1f2   : > { %v7037_v39 = vor.u32 %v5802_v0, %v5645_v5 }
 0x1f3   : > { %6142 = vtanh.f32 %v996_v12  ;;  %v998_v44 = vpop.f32.mrf.mxu2 }
 0x1f4   : > { %2382 = vperm.xlu2 %5949, %v7003_v62   ;;  %2376 = vperm.xlu1 %5948, %v7003_v62   ;;  %11031 = vst [vmem:[#allocation48_spill] sm:$0xff] %v7037_v39 }
 0x1f6   : > { %v909_v45 = vpop.f32.mrf.mxu1 }
 0x1f7   : > { %v910_v18 = vadd.f32 %v909_v45, %v6924_v11  ;;  %v5803_v45 = vld [vmem:[%s6595_s24 + $0xf4] sm:$0xf0]  ;;  %s6372_s24 = scalar_lea.hbm %s10629_s9, 16 }
 0x1f9   : > { %v6143_v42 = vpop.eup %6142  ;;  %948 = vmatmul.bf16.gmra.mxu1 %v7028_v46  ;;  %v999_v20 = vadd.f32 %v998_v44, %v910_v18 }
 0x1fa   : > { %v1085_v22 = vpack.c.bf16 %v6143_v42, %v6141_v38  ;;  %v7045_v42 = vor.u32 %v5803_v45, %v5643_v16 }
 0x1fb   : > { %v1000_v12 = vpop.f32.mrf.mxu2  ;;  %6144 = vtanh.f32 %v999_v20 }
 0x1fc   : > { %5951 = vset.pattern.permute.xlu2 %v6665_v19  ;;  %5950 = vset.pattern.permute.xlu1 %v6622_v4  ;;  %11032 = vst [vmem:[#allocation49_spill] sm:$0xff] %v7045_v42 }
 0x1fd   : > { %5670 = vmatmul.msk.bf16.gmra.mxu3 %vm1128_vm2, %v1085_v22 }
 0x1fe   : > { %v911_v40 = vpop.f32.mrf.mxu1 }
 0x1ff   : > { %v912_v48 = vadd.f32 %v911_v40, %v6924_v11 }
 0x200   : > { %1042 = vmatmul.bf16.gmra.mxu2 %v7037_v39 }
 0x201   : > { %v1001_v37 = vadd.f32 %v1000_v12, %v912_v48  ;;  %v6145_v5 = vpop.eup %6144 }
 0x203   : > { %6146 = vtanh.f32 %v1001_v37  ;;  %v1003_v38 = vpop.f32.mrf.mxu2 }
 0x204   : > { %2400 = vperm.xlu2 %5951, %v7003_v62   ;;  %2394 = vperm.xlu1 %5950, %v7003_v62  }
 0x206   : > { %v914_v0 = vpop.f32.mrf.mxu1 }
 0x207   : > { %v915_v48 = vadd.f32 %v914_v0, %v6924_v11 }
 0x209   : > { %v6147_v44 = vpop.eup %6146  ;;  %953 = vmatmul.bf16.gmra.mxu1 %v7045_v42  ;;  %v1004_v12 = vadd.f32 %v1003_v38, %v915_v48 }
 0x20a   : > { %v1086_v18 = vpack.c.bf16 %v6147_v44, %v6145_v5 }
 0x20b   : > { %v1005_v22 = vpop.f32.mrf.mxu2  ;;  %6148 = vtanh.f32 %v1004_v12 }
 0x20c   : > { %5953 = vset.pattern.permute.xlu2 %v6680_v24  ;;  %5952 = vset.pattern.permute.xlu1 %v6683_v25 }
 0x20d   : > { %5671 = vmatmul.msk.bf16.gmra.mxu3 %vm1128_vm2, %v1086_v18 }
 0x20e   : > { %v916_v37 = vpop.f32.mrf.mxu1 }
 0x20f   : > { %v917_v16 = vadd.f32 %v916_v37, %v6924_v11 }
 0x211   : > { %v1006_v20 = vadd.f32 %v1005_v22, %v917_v16  ;;  %v6149_v39 = vpop.eup %6148 }
 0x213   : > { %6150 = vtanh.f32 %v1006_v20  ;;  %v1008_v40 = vpop.f32.mrf.mxu2 }
 0x214   : > { %2412 = vperm.xlu2 %5953, %v7003_v62   ;;  %2406 = vperm.xlu1 %5952, %v7003_v62  }
 0x216   : > { %v919_v45 = vpop.f32.mrf.mxu1 }
 0x217   : > { %v920_v38 = vadd.f32 %v919_v45, %v6924_v11 }
 0x219   : > { %v6151_v0 = vpop.eup %6150  ;;  %v1009_v48 = vadd.f32 %v1008_v40, %v920_v38 }
 0x21a   : > { %v1087_v5 = vpack.c.bf16 %v6151_v0, %v6149_v39 }
 0x21b   : > { %v1010_v44 = vpop.f32.mrf.mxu2  ;;  %6152 = vtanh.f32 %v1009_v48 }
 0x21c   : > { %5955 = vset.pattern.permute.xlu2 %v6711_v33  ;;  %5954 = vset.pattern.permute.xlu1 %v6696_v29 }
 0x21d   : > { %5672 = vmatmul.msk.bf16.gmra.mxu3 %vm1128_vm2, %v1087_v5 }
 0x21e   : > { %v921_v18 = vpop.f32.mrf.mxu1 }
 0x21f   : > { %v922_v22 = vadd.f32 %v921_v18, %v6924_v11 }
 0x221   : > { %v1011_v12 = vadd.f32 %v1010_v44, %v922_v22  ;;  %v6153_v20 = vpop.eup %6152 }
 0x223   : > { %6154 = vtanh.f32 %v1011_v12  ;;  %v1013_v37 = vpop.f32.mrf.mxu2 }
 0x224   : > { %2430 = vperm.xlu2 %5955, %v7003_v62   ;;  %2424 = vperm.xlu1 %5954, %v7003_v62  }
 0x226   : > { %v924_v16 = vpop.f32.mrf.mxu1 }
 0x227   : > { %v925_v40 = vadd.f32 %v924_v16, %v6924_v11 }
 0x229   : > { %v6155_v39 = vpop.eup %6154  ;;  %v1014_v38 = vadd.f32 %v1013_v37, %v925_v40 }
 0x22a   : > { %v1088_v45 = vpack.c.bf16 %v6155_v39, %v6153_v20 }
 0x22b   : > { %v1015_v0 = vpop.f32.mrf.mxu2  ;;  %6156 = vtanh.f32 %v1014_v38  ;;  %v7080_v38 = vperm.slane %v6730_v36, 2 }
 0x22c   : > { %5957 = vset.pattern.permute.xlu2 %v6766_v15  ;;  %5956 = vset.pattern.permute.xlu1 %v6708_v32 }
 0x22d   : > { %5673 = vmatmul.msk.bf16.gmra.mxu3 %vm1128_vm2, %v1088_v45 }
 0x22e   : > { %v926_v5 = vpop.f32.mrf.mxu1 }
 0x22f   : > { %v927_v44 = vadd.f32 %v926_v5, %v6924_v11 }
 0x230   : > { %v7067_v48 = vpop.f32.mrf.mxu3 }
 0x231   : > { %v1016_v18 = vadd.f32 %v1015_v0, %v927_v44  ;;  %v6157_v20 = vpop.eup %6156 }
 0x233   : > { %6158 = vtanh.f32 %v1016_v18  ;;  %v1018_v22 = vpop.f32.mrf.mxu2 }
 0x234   : > { %2442 = vperm.xlu2 %5957, %v7003_v62   ;;  %2436 = vperm.xlu1 %5956, %v7003_v62  }
 0x236   : > { %v929_v12 = vpop.f32.mrf.mxu1 }
 0x237   : > { %v930_v40 = vadd.f32 %v929_v12, %v6924_v11 }
 0x238   : > { %v7071_v16 = vpop.f32.mrf.mxu3 }
 0x239   : > { %v6159_v39 = vpop.eup %6158  ;;  %v1019_v5 = vadd.f32 %v1018_v22, %v930_v40 }
 0x23a   : > { %v1089_v45 = vpack.c.bf16 %v6159_v39, %v6157_v20 }
 0x23b   : > { %v1020_v0 = vpop.f32.mrf.mxu2  ;;  %6160 = vtanh.f32 %v1019_v5 }
 0x23c   : > { %5959 = vset.pattern.permute.xlu2 %v6602_v1  ;;  %5958 = vset.pattern.permute.xlu1 %v6718_v34 }
 0x23d   : > { %5674 = vmatmul.msk.bf16.gmra.mxu3 %vm1128_vm2, %v1089_v45 }
 0x23e   : > { %v931_v44 = vpop.f32.mrf.mxu1 }
 0x23f   : > { %v932_v18 = vadd.f32 %v931_v44, %v6924_v11 }
 0x240   : > { %v7083_v58 = vpop.f32.mrf.mxu3 }
 0x241   : > { %v1021_v37 = vadd.f32 %v1020_v0, %v932_v18  ;;  %v6161_v45 = vpop.eup %6160 }
 0x243   : > { %6162 = vtanh.f32 %v1021_v37  ;;  %v1023_v12 = vpop.f32.mrf.mxu2 }
 0x244   : > { %2461 = vperm.xlu2 %5959, %v7080_v38   ;;  %2454 = vperm.xlu1 %5958, %v7003_v62  }
 0x246   : > { %v934_v20 = vpop.f32.mrf.mxu1 }
 0x247   : > { %v935_v40 = vadd.f32 %v934_v20, %v6924_v11 }
 0x248   : > { %v7087_v39 = vpop.f32.mrf.mxu3 }
 0x249   : > { %v6163_v22 = vpop.eup %6162  ;;  %v1024_v37 = vadd.f32 %v1023_v12, %v935_v40 }
 0x24a   : > { %v1090_v0 = vpack.c.bf16 %v6163_v22, %v6161_v45 }
 0x24b   : > { %v1025_v44 = vpop.f32.mrf.mxu2  ;;  %6164 = vtanh.f32 %v1024_v37 }
 0x24c   : > { %5961 = vset.pattern.permute.xlu2 %v6650_v14  ;;  %5960 = vset.pattern.permute.xlu1 %v6609_v3 }
 0x24d   : > { %5675 = vmatmul.msk.bf16.gmra.mxu3 %vm1128_vm2, %v1090_v0 }
 0x24e   : > { %v936_v5 = vpop.f32.mrf.mxu1 }
 0x24f   : > { %v937_v18 = vadd.f32 %v936_v5, %v6924_v11 }
 0x250   : > { %v7096_v56 = vpop.f32.mrf.mxu3 }
 0x251   : > { %v1026_v62 = vadd.f32 %v1025_v44, %v937_v18  ;;  %v6165_v45 = vpop.eup %6164 }
 0x253   : > { %6166 = vtanh.f32 %v1026_v62  ;;  %v1028_v36 = vpop.f32.mrf.mxu2 }
 0x254   : > { %2473 = vperm.xlu2 %5961, %v7080_v38   ;;  %2467 = vperm.xlu1 %5960, %v7080_v38  }
 0x256   : > { %v939_v59 = vpop.f32.mrf.mxu1 }
 0x257   : > { %v940_v40 = vadd.f32 %v939_v59, %v6924_v11 }
 0x258   : > { %v7100_v20 = vpop.f32.mrf.mxu3 }
 0x259   : > { %v6167_v22 = vpop.eup %6166  ;;  %v1029_v62 = vadd.f32 %v1028_v36, %v940_v40 }
 0x25a   : > { %v1091_v0 = vpack.c.bf16 %v6167_v22, %v6165_v45 }
 0x25b   : > { %v1030_v44 = vpop.f32.mrf.mxu2  ;;  %6168 = vtanh.f32 %v1029_v62 }
 0x25c   : > { %5963 = vset.pattern.permute.xlu2 %v6622_v4  ;;  %5962 = vset.pattern.permute.xlu1 %v6647_v13 }
 0x25d   : > { %5676 = vmatmul.msk.bf16.gmra.mxu3 %vm1128_vm2, %v1091_v0 }
 0x25e   : > { %v941_v37 = vpop.f32.mrf.mxu1 }
 0x25f   : > { %v942_v5 = vadd.f32 %v941_v37, %v6924_v11 }
 0x260   : > { %v7109_v18 = vpop.f32.mrf.mxu3 }
 0x261   : > { %v1031_v7 = vadd.f32 %v1030_v44, %v942_v5  ;;  %v6169_v45 = vpop.eup %6168 }
 0x263   : > { %6170 = vtanh.f32 %v1031_v7  ;;  %v1033_v12 = vpop.f32.mrf.mxu2 }
 0x264   : > { %2491 = vperm.xlu2 %5963, %v7080_v38   ;;  %2485 = vperm.xlu1 %5962, %v7080_v38  }
 0x266   : > { %v944_v42 = vpop.f32.mrf.mxu1 }
 0x267   : > { %v945_v40 = vadd.f32 %v944_v42, %v6924_v11 }
 0x268   : > { %v7113_v59 = vpop.f32.mrf.mxu3 }
 0x269   : > { %v6171_v22 = vpop.eup %6170  ;;  %v1034_v7 = vadd.f32 %v1033_v12, %v945_v40 }
 0x26a   : > { %v1092_v0 = vpack.c.bf16 %v6171_v22, %v6169_v45 }
 0x26b   : > { %v1035_v44 = vpop.f32.mrf.mxu2  ;;  %6172 = vtanh.f32 %v1034_v7 }
 0x26c   : > { %5965 = vset.pattern.permute.xlu2 %v6683_v25  ;;  %5964 = vset.pattern.permute.xlu1 %v6665_v19 }
 0x26d   : > { %5677 = vmatmul.msk.bf16.gmra.mxu3 %vm1128_vm2, %v1092_v0 }
 0x26e   : > { %v946_v62 = vpop.f32.mrf.mxu1 }
 0x26f   : > { %v947_v37 = vadd.f32 %v946_v62, %v6924_v11 }
 0x270   : > { %v7122_v5 = vpop.f32.mrf.mxu3 }
 0x271   : > { %v1036_v27 = vadd.f32 %v1035_v44, %v947_v37  ;;  %v6173_v45 = vpop.eup %6172 }
 0x273   : > { %6174 = vtanh.f32 %v1036_v27  ;;  %v1038_v36 = vpop.f32.mrf.mxu2 }
 0x274   : > { %2503 = vperm.xlu2 %5965, %v7080_v38   ;;  %2497 = vperm.xlu1 %5964, %v7080_v38  }
 0x276   : > { %v949_v46 = vpop.f32.mrf.mxu1 }
 0x277   : > { %v950_v22 = vadd.f32 %v949_v46, %v6924_v11 }
 0x278   : > { %v7126_v42 = vpop.f32.mrf.mxu3 }
 0x279   : > { %v6175_v12 = vpop.eup %6174  ;;  %v1039_v44 = vadd.f32 %v1038_v36, %v950_v22 }
 0x27a   : > { %v1093_v40 = vpack.c.bf16 %v6175_v12, %v6173_v45 }
 0x27b   : > { %v1040_v0 = vpop.f32.mrf.mxu2  ;;  %6176 = vtanh.f32 %v1039_v44 }
 0x27c   : > { %5967 = vset.pattern.permute.xlu2 %v6696_v29  ;;  %5966 = vset.pattern.permute.xlu1 %v6699_v30 }
 0x27d   : > { %5678 = vmatmul.msk.bf16.gmra.mxu3 %vm1128_vm2, %v1093_v40 }
 0x27e   : > { %v951_v62 = vpop.f32.mrf.mxu1 }
 0x27f   : > { %v952_v27 = vadd.f32 %v951_v62, %v6924_v11 }
 0x280   : > { %v1211_v7 = vpop.f32.mrf.mxu3 }
 0x281   : > { %v1041_v37 = vadd.f32 %v1040_v0, %v952_v27  ;;  %v6177_v46 = vpop.eup %6176 }
 0x283   : > { %6178 = vtanh.f32 %v1041_v37  ;;  %v1043_v61 = vpop.f32.mrf.mxu2 }
 0x284   : > { %2521 = vperm.xlu2 %5967, %v7080_v38   ;;  %2515 = vperm.xlu1 %5966, %v7080_v38  }
 0x286   : > { %v954_v9 = vpop.f32.mrf.mxu1 }
 0x287   : > { %v955_v36 = vadd.f32 %v954_v9, %v6924_v11 }
 0x288   : > { %v1213_v49 = vpop.f32.mrf.mxu3 }
 0x289   : > { %v6179_v45 = vpop.eup %6178  ;;  %v1044_v22 = vadd.f32 %v1043_v61, %v955_v36 }
 0x28a   : > { %v1094_v12 = vpack.c.bf16 %v6179_v45, %v6177_v46 }
 0x28b   : > { %v1045_v62 = vpop.f32.mrf.mxu2  ;;  %6180 = vtanh.f32 %v1044_v22 }
 0x28c   : > { %5969 = vset.pattern.permute.xlu2 %v6708_v32  ;;  %5968 = vset.pattern.permute.xlu1 %v6711_v33 }
 0x28d   : > { %5679 = vmatmul.msk.bf16.gmra.mxu3 %vm1128_vm2, %v1094_v12  ;;  %v7150_v12 = vld [vmem:[%s6619_s27] sm:$0xff] }
 0x28e   : > { %v956_v40 = vpop.f32.mrf.mxu1  ;;  %v7153_v22 = vperm.slane %v7150_v12, 3 }
 0x28f   : > { %v957_v0 = vadd.f32 %v956_v40, %v6924_v11  ;;  %v1271_v40 = vpack.c.bf16 %v1213_v49, %v1211_v7  ;;  %v11034_v49 = vpack.c.bf16 %v7100_v20, %v7096_v56 }
 0x290   : > { %v1216_v44 = vpop.f32.mrf.mxu3 }
 0x291   : > { %v1046_v27 = vadd.f32 %v1045_v62, %v957_v0  ;;  %v6181_v51 = vpop.eup %6180  ;;  %v1270_v0 = vpack.c.bf16 %v7126_v42, %v7122_v5  ;;  %v11035_v5 = vpack.c.bf16 %v7087_v39, %v7083_v58  ;;  %v11036_v42 = vpack.c.bf16 %v7071_v16, %v7067_v48 }
 0x293   : > { %6182 = vtanh.f32 %v1046_v27 }
 0x294   : > { %2533 = vperm.xlu2 %5969, %v7080_v38   ;;  %2527 = vperm.xlu1 %5968, %v7080_v38  }
 0x298   : > { %v1218_v37 = vpop.f32.mrf.mxu3 }
 0x299   : > { %v6183_v9 = vpop.eup %6182  ;;  %v1272_v36 = vpack.c.bf16 %v1218_v37, %v1216_v44  ;;  %v11033_v44 = vpack.c.bf16 %v7113_v59, %v7109_v18  ;;  %v7207_v37 = vld [vmem:[%s6619_s27 + $0x8] sm:$0xff] }
 0x29a   : > { %v1095_v61 = vpack.c.bf16 %v6183_v9, %v6181_v51  ;;  %v7210_v9 = vperm.slane %v7207_v37, 3 }
 0x29c   : > { %5971 = vset.pattern.permute.xlu2 %v6718_v34  ;;  %5970 = vset.pattern.permute.xlu1 %v6721_v35  ;;  %11037 = vst [vmem:[#allocation50_spill] sm:$0xff] %v7210_v9 }
 0x29d   : > { %5680 = vmatmul.msk.bf16.gmra.mxu3 %vm1128_vm2, %v1095_v61 }
 0x2a0   : > { %v1221_v11 = vpop.f32.mrf.mxu3 }
 0x2a4   : > { %2551 = vperm.xlu2 %5971, %v7080_v38   ;;  %2545 = vperm.xlu1 %5970, %v7080_v38  }
 0x2a8   : > { %v1223_v46 = vpop.f32.mrf.mxu3 }
 0x2a9   : > { %v1273_v45 = vpack.c.bf16 %v1223_v46, %v1221_v11 }
 0x2ab   : > { %1283 = vmatpush.bf16.msrb.mxu0 %v1273_v45 }
 0x2ac   : > { %5973 = vset.pattern.permute.xlu2 %v6609_v3  ;;  %5972 = vset.pattern.permute.xlu1 %v6602_v1 }
 0x2af   : > { %1284 = vmatpush.bf16.msrb.mxu0 %v1272_v36 }
 0x2b0   : > { %v7155_v51 = vpop.f32.mrf.mxu3 }
 0x2b3   : > { %1285 = vmatpush.bf16.msrb.mxu0 %v1271_v40 }
 0x2b4   : > { %2564 = vperm.xlu2 %5973, %v7153_v22   ;;  %2558 = vperm.xlu1 %5972, %v7153_v22  }
 0x2b7   : > { %1286 = vmatpush.bf16.msrb.mxu0 %v1270_v0 }
 0x2b8   : > { %v7161_v62 = vpop.f32.mrf.mxu3 }
 0x2bb   : > { %1287 = vmatpush.bf16.msrb.mxu0 %v11033_v44 }
 0x2bc   : > { %5975 = vset.pattern.permute.xlu2 %v6647_v13  ;;  %5974 = vset.pattern.permute.xlu1 %v6606_v2 }
 0x2bf   : > { %1288 = vmatpush.bf16.msrb.mxu0 %v11034_v49 }
 0x2c0   : > { %v7171_v7 = vpop.f32.mrf.mxu3 }
 0x2c3   : > { %1289 = vmatpush.bf16.msrb.mxu0 %v11035_v5  ;;  %v7225_v5 = vpop.permute.xlu2 %1994 }
 0x2c4   : > { %2582 = vperm.xlu2 %5975, %v7153_v22   ;;  %2576 = vperm.xlu1 %5974, %v7153_v22   ;;  %11038 = vst [vmem:[#allocation51_spill] sm:$0xff] %v7225_v5 }
 0x2c7   : > { %1290 = vmatpush.bf16.msrb.mxu0 %v11036_v42 }
 0x2c8   : > { %v7181_v18 = vpop.f32.mrf.mxu3 }
 0x2ca   : > { %1291 = vmatmul.bf16.vlgmr.msrb.gmra.mxu0 %v6792_v52 }
 0x2cc   : > { %5977 = vset.pattern.permute.xlu2 %v6665_v19  ;;  %5976 = vset.pattern.permute.xlu1 %v6622_v4 }
 0x2d0   : > { %v1236_v56 = vpop.f32.mrf.mxu3 }
 0x2d4   : > { %2594 = vperm.xlu2 %5977, %v7153_v22   ;;  %2588 = vperm.xlu1 %5976, %v7153_v22  }
 0x2d8   : > { %v1238_v20 = vpop.f32.mrf.mxu3 }
 0x2d9   : > { %v1276_v42 = vpack.c.bf16 %v1238_v20, %v1236_v56 }
 0x2da   : > { %1296 = vmatmul.bf16.gmra.mxu0 %v6806_v54 }
 0x2dc   : > { %5979 = vset.pattern.permute.xlu2 %v6699_v30  ;;  %5978 = vset.pattern.permute.xlu1 %v6680_v24 }
 0x2e0   : > { %v1241_v58 = vpop.f32.mrf.mxu3 }
 0x2e4   : > { %2612 = vperm.xlu2 %5979, %v7153_v22   ;;  %2606 = vperm.xlu1 %5978, %v7153_v22  }
 0x2e8   : > { %v1243_v48 = vpop.f32.mrf.mxu3 }
 0x2e9   : > { %v1277_v49 = vpack.c.bf16 %v1243_v48, %v1241_v58  ;;  %v1274_v58 = vpack.c.bf16 %v7161_v62, %v7155_v51  ;;  %v7237_v48 = vpop.permute.xlu1 %1982 }
 0x2ea   : > { %1301 = vmatmul.bf16.gmra.mxu0 %v6820_v60  ;;  %11040 = vst [vmem:[#allocation53_spill] sm:$0xff] %v7237_v48 }
 0x2ec   : > { %5981 = vset.pattern.permute.xlu2 %v6711_v33  ;;  %5980 = vset.pattern.permute.xlu1 %v6696_v29 }
 0x2f0   : > { %v1246_v16 = vpop.f32.mrf.mxu3 }
 0x2f4   : > { %2624 = vperm.xlu2 %5981, %v7153_v22   ;;  %2618 = vperm.xlu1 %5980, %v7153_v22  }
 0x2f8   : > { %v1248_v39 = vpop.f32.mrf.mxu3 }
 0x2f9   : > { %v1278_v44 = vpack.c.bf16 %v1248_v39, %v1246_v16 }
 0x2fa   : > { %1306 = vmatmul.bf16.gmra.mxu0 %v6834_v6 }
 0x2fc   : > { %5983 = vset.pattern.permute.xlu2 %v6721_v35  ;;  %5982 = vset.pattern.permute.xlu1 %v6766_v15 }
 0x300   : > { %v1251_v59 = vpop.f32.mrf.mxu3 }
 0x304   : > { %2642 = vperm.xlu2 %5983, %v7153_v22   ;;  %2636 = vperm.xlu1 %5982, %v7153_v22  }
 0x308   : > { %v1253_v27 = vpop.f32.mrf.mxu3 }
 0x309   : > { %v1279_v0 = vpack.c.bf16 %v1253_v27, %v1251_v59  ;;  %v1275_v59 = vpack.c.bf16 %v7181_v18, %v7171_v7  ;;  %v7232_v27 = vpop.permute.xlu2 %2000  ;;  %v7245_v7 = vpop.permute.xlu1 %1988 }
 0x30a   : > { %1311 = vmatmul.bf16.gmra.mxu0 %v6848_v17  ;;  %11039 = vst [vmem:[#allocation52_spill] sm:$0xff] %v7232_v27 }
 0x30b   : > { %11042 = vst [vmem:[#allocation55_spill] sm:$0xff] %v7245_v7 }
 0x30c   : > { %5985 = vset.pattern.permute.xlu2 %v6602_v1  ;;  %5984 = vset.pattern.permute.xlu1 %v6718_v34 }
 0x310   : > { %v1256_v61 = vpop.f32.mrf.mxu3 }
 0x311   : > { %v7240_v56 = vpop.permute.xlu2 %2012  ;;  %v7251_v51 = vpop.permute.xlu1 %2006 }
 0x312   : > { %11041 = vst [vmem:[#allocation54_spill] sm:$0xff] %v7240_v56 }
 0x313   : > { %11044 = vst [vmem:[#allocation57_spill] sm:$0xff] %v7251_v51 }
 0x314   : > { %2655 = vperm.xlu2 %5985, %v7210_v9   ;;  %2648 = vperm.xlu1 %5984, %v7153_v22  }
 0x318   : > { %v1258_v11 = vpop.f32.mrf.mxu3 }
 0x319   : > { %v1280_v40 = vpack.c.bf16 %v1258_v11, %v1256_v61  ;;  %v7248_v18 = vpop.permute.xlu2 %2024  ;;  %v7259_v20 = vpop.permute.xlu1 %2018 }
 0x31a   : > { %1316 = vmatmul.bf16.gmra.mxu0 %v6862_v26  ;;  %11043 = vst [vmem:[#allocation56_spill] sm:$0xff] %v7248_v18 }
 0x31b   : > { %11046 = vst [vmem:[#allocation59_spill] sm:$0xff] %v7259_v20 }
 0x31c   : > { %5987 = vset.pattern.permute.xlu2 %v6606_v2  ;;  %5986 = vset.pattern.permute.xlu1 %v6650_v14 }
 0x320   : > { %v1261_v46 = vpop.f32.mrf.mxu3 }
 0x321   : > { %v7254_v62 = vpop.permute.xlu2 %2036  ;;  %v7265_v39 = vpop.permute.xlu1 %2030 }
 0x322   : > { %11045 = vst [vmem:[#allocation58_spill] sm:$0xff] %v7254_v62 }
 0x323   : > { %11048 = vst [vmem:[#allocation61_spill] sm:$0xff] %v7265_v39 }
 0x324   : > { %2673 = vperm.xlu2 %5987, %v7210_v9   ;;  %2667 = vperm.xlu1 %5986, %v7210_v9  }
 0x328   : > { %v1263_v45 = vpop.f32.mrf.mxu3 }
 0x329   : > { %v1281_v36 = vpack.c.bf16 %v1263_v45, %v1261_v46  ;;  %v7262_v16 = vpop.permute.xlu2 %2048  ;;  %v7273_v11 = vpop.permute.xlu1 %2042 }
 0x32a   : > { %1321 = vmatmul.bf16.gmra.mxu0 %v6876_v43  ;;  %11047 = vst [vmem:[#allocation60_spill] sm:$0xff] %v7262_v16 }
 0x32b   : > { %1372 = vmatpush.bf16.msra.mxu3 %v1281_v36  ;;  %11050 = vst [vmem:[#allocation63_spill] sm:$0xff] %v7273_v11 }
 0x32c   : > { %5989 = vset.pattern.permute.xlu2 %v6622_v4  ;;  %5988 = vset.pattern.permute.xlu1 %v6647_v13 }
 0x32f   : > { %1373 = vmatpush.bf16.msra.mxu3 %v1280_v40  ;;  %v7288_v40 = vperm.slane %v7150_v12, 4 }
 0x331   : > { %v7268_v61 = vpop.permute.xlu2 %2066  ;;  %v7279_v45 = vpop.permute.xlu1 %2060 }
 0x332   : > { %11049 = vst [vmem:[#allocation62_spill] sm:$0xff] %v7268_v61 }
 0x333   : > { %1374 = vmatpush.bf16.msra.mxu3 %v1279_v0  ;;  %11052 = vst [vmem:[#allocation65_spill] sm:$0xff] %v7279_v45  ;;  %v11078_v45 = vld [vmem:[#allocation47_spill] sm:$0xff] }
 0x334   : > { %2685 = vperm.xlu2 %5989, %v7210_v9   ;;  %2679 = vperm.xlu1 %5988, %v7210_v9  }
 0x337   : > { %1375 = vmatpush.bf16.msra.mxu3 %v1278_v44 }
 0x339   : > { %v7276_v46 = vpop.permute.xlu2 %2079  ;;  %v7290_v0 = vpop.permute.xlu1 %2073 }
 0x33a   : > { %1326 = vmatmul.bf16.gmra.mxu0 %v6902_v55  ;;  %11051 = vst [vmem:[#allocation64_spill] sm:$0xff] %v7276_v46 }
 0x33b   : > { %1376 = vmatpush.bf16.msra.mxu3 %v1277_v49  ;;  %11054 = vst [vmem:[#allocation67_spill] sm:$0xff] %v7290_v0  ;;  %v11072_v0 = vld [vmem:[#allocation45_spill] sm:$0xff] }
 0x33c   : > { %5991 = vset.pattern.permute.xlu2 %v6680_v24  ;;  %5990 = vset.pattern.permute.xlu1 %v6683_v25 }
 0x33f   : > { %1377 = vmatpush.bf16.msra.mxu3 %v1276_v42 }
 0x341   : > { %v7282_v36 = vpop.permute.xlu2 %2097  ;;  %v7296_v49 = vpop.permute.xlu1 %2091 }
 0x342   : > { %11053 = vst [vmem:[#allocation66_spill] sm:$0xff] %v7282_v36 }
 0x343   : > { %1378 = vmatpush.bf16.msra.mxu3 %v1275_v59  ;;  %11056 = vst [vmem:[#allocation69_spill] sm:$0xff] %v7296_v49 }
 0x344   : > { %2703 = vperm.xlu2 %5991, %v7210_v9   ;;  %2697 = vperm.xlu1 %5990, %v7210_v9  }
 0x347   : > { %1379 = vmatpush.bf16.msra.mxu3 %v1274_v58 }
 0x349   : > { %v7293_v44 = vpop.permute.xlu2 %2109  ;;  %v7303_v59 = vpop.permute.xlu1 %2103 }
 0x34a   : > { %1380 = vmatmul.bf16.vlgmr.msra.gmra.mxu3 %v6778_v47  ;;  %1331 = vmatmul.bf16.gmra.mxu0 %v6922_v8  ;;  %11055 = vst [vmem:[#allocation68_spill] sm:$0xff] %v7293_v44 }
 0x34b   : > { %11058 = vst [vmem:[#allocation71_spill] sm:$0xff] %v7303_v59 }
 0x34c   : > { %5993 = vset.pattern.permute.xlu2 %v6696_v29  ;;  %5992 = vset.pattern.permute.xlu1 %v6699_v30 }
 0x351   : > { %v7299_v42 = vpop.permute.xlu2 %2127  ;;  %v7309_v44 = vpop.permute.xlu1 %2121 }
 0x352   : > { %11057 = vst [vmem:[#allocation70_spill] sm:$0xff] %v7299_v42 }
 0x353   : > { %11060 = vst [vmem:[#allocation73_spill] sm:$0xff] %v7309_v44  ;;  %v1292_v44 = vpop.f32.mrf.mxu0 }
 0x354   : > { %2715 = vperm.xlu2 %5993, %v7210_v9   ;;  %2709 = vperm.xlu1 %5992, %v7210_v9  }
 0x359   : > { %v7306_v58 = vpop.permute.xlu2 %2139  ;;  %v7316_v42 = vpop.permute.xlu1 %2133 }
 0x35a   : > { %1385 = vmatmul.bf16.gmra.mxu3 %v6799_v53  ;;  %1336 = vmatmul.bf16.gmra.mxu0 %v6940_v50  ;;  %11059 = vst [vmem:[#allocation72_spill] sm:$0xff] %v7306_v58  ;;  %v5827_v58 = vld [vmem:[%s10623_s3 + $0x38] sm:$0xff] }
 0x35b   : > { %11062 = vst [vmem:[#allocation75_spill] sm:$0xff] %v7316_v42  ;;  %1594 = vmatpush.bf16.msra.mxu1 %v5827_v58  ;;  %v5826_v58 = vld [vmem:[%s10623_s3 + $0x30] sm:$0xff] }
 0x35c   : > { %5995 = vset.pattern.permute.xlu2 %v6766_v15  ;;  %5994 = vset.pattern.permute.xlu1 %v6708_v32 }
 0x35f   : > { %1595 = vmatpush.bf16.msra.mxu1 %v5826_v58  ;;  %v5824_v58 = vld [vmem:[%s10623_s3 + $0x20] sm:$0xff] }
 0x361   : > { %v7312_v36 = vpop.permute.xlu2 %2157  ;;  %v7327_v49 = vpop.permute.xlu1 %2151 }
 0x362   : > { %11061 = vst [vmem:[#allocation74_spill] sm:$0xff] %v7312_v36  ;;  %v1924_v36 = vadd.f32 %v7207_v37, %v7150_v12 }
 0x363   : > { %11064 = vst [vmem:[#allocation77_spill] sm:$0xff] %v7327_v49 }
 0x364   : > { %2733 = vperm.xlu2 %5995, %v7210_v9   ;;  %2727 = vperm.xlu1 %5994, %v7210_v9  }
 0x365   : > { %1925 = vadd.xlane.f32.xlu0 %v1924_v36 }
 0x369   : > { %v7319_v59 = vpop.permute.xlu2 %2170  ;;  %v7335_v42 = vpop.permute.xlu1 %2163 }
 0x36a   : > { %1390 = vmatmul.bf16.gmra.mxu3 %v6813_v57  ;;  %1341 = vmatmul.bf16.gmra.mxu0 %v6957_v41  ;;  %11063 = vst [vmem:[#allocation76_spill] sm:$0xff] %v7319_v59  ;;  %v1294_v59 = vpop.f32.mrf.mxu0 }
 0x36b   : > { %11066 = vst [vmem:[#allocation79_spill] sm:$0xff] %v7335_v42 }
 0x36c   : > { %5997 = vset.pattern.permute.xlu2 %v6718_v34  ;;  %5996 = vset.pattern.permute.xlu1 %v6721_v35 }
 0x372   : > { %v1297_v36 = vpop.f32.mrf.mxu0 }
 0x374   : > { %2745 = vperm.xlu2 %5997, %v7210_v9   ;;  %2739 = vperm.xlu1 %5996, %v7210_v9  }
 0x37a   : > { %1395 = vmatmul.bf16.gmra.mxu3 %v6827_v63  ;;  %1346 = vmatmul.bf16.gmra.mxu0 %v6974_v23  ;;  %v1299_v49 = vpop.f32.mrf.mxu0 }
 0x37c   : > { %5999 = vset.pattern.permute.xlu2 %v6650_v14  ;;  %5998 = vset.pattern.permute.xlu1 %v6609_v3 }
 0x384   : > { %2764 = vperm.xlu2 %5999, %v7288_v40   ;;  %2758 = vperm.xlu1 %5998, %v7288_v40  }
 0x38a   : > { %1400 = vmatmul.bf16.gmra.mxu3 %v6841_v10  ;;  %1351 = vmatmul.bf16.gmra.mxu0 %v6991_v28  ;;  %v5825_v28 = vld [vmem:[%s10623_s3 + $0x28] sm:$0xff] }
 0x38b   : > { %1596 = vmatpush.bf16.msra.mxu1 %v5825_v28 }
 0x38c   : > { %6001 = vset.pattern.permute.xlu2 %v6647_v13  ;;  %6000 = vset.pattern.permute.xlu1 %v6606_v2 }
 0x38f   : > { %1597 = vmatpush.bf16.msra.mxu1 %v5824_v58  ;;  %v11077_v58 = vld [vmem:[#allocation35_spill] sm:$0xff] }
 0x394   : > { %2776 = vperm.xlu2 %6001, %v7288_v40   ;;  %2770 = vperm.xlu1 %6000, %v7288_v40  }
 0x39a   : > { %1405 = vmatmul.bf16.gmra.mxu3 %v6855_v21  ;;  %v7330_v21 = vpop.permute.xlu2 %2188  ;;  %1356 = vmatmul.bf16.gmra.mxu0 %v11072_v0 }
 0x39b   : > { %11065 = vst [vmem:[#allocation78_spill] sm:$0xff] %v7330_v21  ;;  %v11068_v21 = vld [vmem:[#allocation34_spill] sm:$0xff] }
 0x39c   : > { %6004 = vset.pattern.permute.xlu2 %v6683_v25  ;;  %6003 = vset.pattern.permute.xlu1 %v6665_v19 }
 0x39d   : > { %2297 = vperm.xlu0 %5937, %v11068_v21  }
 0x3a2   : > { %v7338_v46 = vpop.permute.xlu2 %2200 }
 0x3a3   : > { %11067 = vst [vmem:[#allocation80_spill] sm:$0xff] %v7338_v46  ;;  %v11071_v46 = vld [vmem:[#allocation33_spill] sm:$0xff] }
 0x3a4   : > { %2794 = vperm.xlu2 %6004, %v7288_v40   ;;  %2788 = vperm.xlu1 %6003, %v7288_v40  }
 0x3a5   : > { %2782 = vperm.xlu0 %5937, %v7288_v40  }
 0x3aa   : > { %1410 = vmatmul.bf16.gmra.mxu3 %v6869_v31  ;;  %v7345_v31 = vpop.permute.xlu1 %2182  ;;  %v7351_v42 = vpop.permute.xlu2 %2218 }
 0x3ab   : > { %11069 = vst [vmem:[#allocation34_spill] sm:$0xff] %v7345_v31 }
 0x3ac   : > { %6006 = vset.pattern.permute.xlu2 %v6699_v30  ;;  %6005 = vset.pattern.permute.xlu1 %v6680_v24  ;;  %11070 = vst [vmem:[#allocation81_spill] sm:$0xff] %v7351_v42 }
 0x3ad   : > { %6002 = vset.pattern.permute.xlu0 %v6696_v29 }
 0x3b2   : > { %v7360_v31 = vpop.permute.xlu1 %2194  ;;  %v7363_v42 = vpop.permute.xlu2 %2230 }
 0x3b3   : > { %11073 = vst [vmem:[#allocation82_spill] sm:$0xff] %v7360_v31  ;;  %v6316_v31 = vld [vmem:[%s10624_s4] sm:$0x7] }
 0x3b4   : > { %2806 = vperm.xlu2 %6006, %v7288_v40   ;;  %2800 = vperm.xlu1 %6005, %v7288_v40   ;;  %11074 = vst [vmem:[#allocation83_spill] sm:$0xff] %v7363_v42  ;;  %v7377_v42 = vperm.slane %v6316_v31, 1 }
 0x3b5   : > { %2327 = vperm.xlu0 %6002, %v11068_v21  }
 0x3b6   : > { %v1295_v31 = vadd.f32 %v1294_v59, %v7377_v42  ;;  %v11084_v59 = vld [vmem:[#allocation49_spill] sm:$0xff]  ;;  %v1300_v18 = vadd.f32 %v1299_v49, %v7377_v42 }
 0x3ba   : > { %1415 = vmatmul.bf16.gmra.mxu3 %v11071_v46  ;;  %v1302_v46 = vpop.f32.mrf.mxu0  ;;  %v7367_v28 = vpop.permute.xlu1 %2212 }
 0x3bb   : > { %11075 = vst [vmem:[#allocation84_spill] sm:$0xff] %v7367_v28  ;;  %v7370_v0 = vpop.permute.xlu2 %2248  ;;  %v1293_v28 = vadd.f32 %v1292_v44, %v7377_v42 }
 0x3bc   : > { %6009 = vset.pattern.permute.xlu2 %v6708_v32  ;;  %6008 = vset.pattern.permute.xlu1 %v6711_v33  ;;  %11076 = vst [vmem:[#allocation85_spill] sm:$0xff] %v7370_v0 }
 0x3bd   : > { %2812 = vperm.xlu0 %6002, %v7288_v40  }
 0x3c2   : > { %v1304_v61 = vpop.f32.mrf.mxu0  ;;  %1361 = vmatmul.bf16.gmra.mxu0 %v11078_v45  ;;  %v7382_v11 = vpop.permute.xlu1 %2224 }
 0x3c3   : > { %11079 = vst [vmem:[#allocation86_spill] sm:$0xff] %v7382_v11  ;;  %v7385_v0 = vpop.permute.xlu2 %2260 }
 0x3c4   : > { %2824 = vperm.xlu2 %6009, %v7288_v40   ;;  %2818 = vperm.xlu1 %6008, %v7288_v40   ;;  %11080 = vst [vmem:[#allocation87_spill] sm:$0xff] %v7385_v0  ;;  %v11083_v0 = vld [vmem:[#allocation36_spill] sm:$0xff] }
 0x3c5   : > { %6007 = vset.pattern.permute.xlu0 %v6718_v34 }
 0x3ca   : > { %1420 = vmatmul.bf16.gmra.mxu3 %v11077_v58  ;;  %v7389_v62 = vpop.f32.mrf.mxu0  ;;  %v7392_v44 = vpop.permute.xlu1 %2242 }
 0x3cb   : > { %11081 = vst [vmem:[#allocation88_spill] sm:$0xff] %v7392_v44  ;;  %v7395_v11 = vpop.permute.xlu2 %2279 }
 0x3cc   : > { %6011 = vset.pattern.permute.xlu2 %v6721_v35  ;;  %6010 = vset.pattern.permute.xlu1 %v6766_v15  ;;  %11082 = vst [vmem:[#allocation89_spill] sm:$0xff] %v7395_v11 }
 0x3cd   : > { %v1381_v16 = vpop.f32.mrf.mxu3  ;;  %2357 = vperm.xlu0 %6007, %v11068_v21  }
 0x3ce   : > { %v1382_v58 = vadd.f32 %v1381_v16, %v1293_v28 }
 0x3d0   : > { %6184 = vtanh.f32 %v1382_v58 }
 0x3d2   : > { %v7399_v16 = vpop.f32.mrf.mxu0  ;;  %1366 = vmatmul.bf16.gmra.mxu0 %v11084_v59  ;;  %v7407_v11 = vpop.permute.xlu1 %2254 }
 0x3d3   : > { %11085 = vst [vmem:[#allocation90_spill] sm:$0xff] %v7407_v11 }
 0x3d4   : > { %2836 = vperm.xlu2 %6011, %v7288_v40   ;;  %2830 = vperm.xlu1 %6010, %v7288_v40  }
 0x3d5   : > { %v1383_v39 = vpop.f32.mrf.mxu3  ;;  %2842 = vperm.xlu0 %6007, %v7288_v40  }
 0x3d6   : > { %v1384_v45 = vadd.f32 %v1383_v39, %v1295_v31  ;;  %v6185_v28 = vpop.eup %6184  ;;  %v1298_v31 = vadd.f32 %v1297_v36, %v7377_v42 }
 0x3d8   : > { %6186 = vtanh.f32 %v1384_v45  ;;  %v7403_v45 = vperm.slane %v7207_v37, 4 }
 0x3da   : > { %1425 = vmatmul.bf16.gmra.mxu3 %v11083_v0  ;;  %v7411_v0 = vpop.permute.xlu2 %2291  ;;  %v7415_v10 = vpop.f32.mrf.mxu0 }
 0x3db   : > { %11086 = vst [vmem:[#allocation91_spill] sm:$0xff] %v7411_v0 }
 0x3dc   : > { %6014 = vset.pattern.permute.xlu2 %v6609_v3  ;;  %6013 = vset.pattern.permute.xlu1 %v6602_v1 }
 0x3dd   : > { %v1386_v39 = vpop.f32.mrf.mxu3  ;;  %6012 = vset.pattern.permute.xlu0 %v6647_v13 }
 0x3de   : > { %v6187_v58 = vpop.eup %6186  ;;  %v1387_v59 = vadd.f32 %v1386_v39, %v1298_v31 }
 0x3df   : > { %v1493_v44 = vpack.c.bf16 %v6187_v58, %v6185_v28  ;;  %v7418_v28 = vpop.permute.xlu1 %2273  ;;  %v11089_v58 = vld [vmem:[#allocation37_spill] sm:$0xff] }
 0x3e0   : > { %6188 = vtanh.f32 %v1387_v59  ;;  %11087 = vst [vmem:[#allocation92_spill] sm:$0xff] %v7418_v28 }
 0x3e1   : > { %5705 = vmatmul.msk.bf16.vlgmr.msra.gmra.mxu1 %vm1128_vm2, %v1493_v44 }
 0x3e2   : > { %v7421_v44 = vpop.permute.xlu2 %2309  ;;  %v7425_v39 = vpop.f32.mrf.mxu0 }
 0x3e3   : > { %11088 = vst [vmem:[#allocation93_spill] sm:$0xff] %v7421_v44  ;;  %v1305_v44 = vadd.f32 %v1304_v61, %v7377_v42 }
 0x3e4   : > { %2855 = vperm.xlu2 %6014, %v7403_v45   ;;  %2849 = vperm.xlu1 %6013, %v7403_v45  }
 0x3e5   : > { %v1388_v20 = vpop.f32.mrf.mxu3 }
 0x3e6   : > { %v1389_v36 = vadd.f32 %v1388_v20, %v1300_v18  ;;  %v6189_v49 = vpop.eup %6188  ;;  %v1303_v18 = vadd.f32 %v1302_v46, %v7377_v42 }
 0x3e7   : > { %v7429_v59 = vpop.permute.xlu1 %2285 }
 0x3e8   : > { %6190 = vtanh.f32 %v1389_v36  ;;  %11090 = vst [vmem:[#allocation94_spill] sm:$0xff] %v7429_v59 }
 0x3ea   : > { %1430 = vmatmul.bf16.gmra.mxu3 %v11089_v58  ;;  %v7433_v36 = vpop.permute.xlu2 %2321  ;;  %v7437_v28 = vpop.f32.mrf.mxu0 }
 0x3eb   : > { %11091 = vst [vmem:[#allocation95_spill] sm:$0xff] %v7433_v36 }
 0x3ec   : > { %6016 = vset.pattern.permute.xlu2 %v6606_v2  ;;  %6015 = vset.pattern.permute.xlu1 %v6650_v14 }
 0x3ed   : > { %v1391_v31 = vpop.f32.mrf.mxu3 }
 0x3ee   : > { %v6191_v0 = vpop.eup %6190  ;;  %v1392_v58 = vadd.f32 %v1391_v31, %v1303_v18 }
 0x3ef   : > { %v1494_v20 = vpack.c.bf16 %v6191_v0, %v6189_v49  ;;  %v7440_v0 = vpop.permute.xlu1 %2303 }
 0x3f0   : > { %6192 = vtanh.f32 %v1392_v58  ;;  %11092 = vst [vmem:[#allocation96_spill] sm:$0xff] %v7440_v0  ;;  %v11095_v58 = vld [vmem:[#allocation44_spill] sm:$0xff]  ;;  %v1310_v0 = vadd.f32 %v7399_v16, %v7377_v42 }
 0x3f1   : > { %5706 = vmatmul.msk.bf16.gmra.mxu1 %vm1128_vm2, %v1494_v20  ;;  %v11094_v20 = vld [vmem:[#allocation39_spill] sm:$0xff]  ;;  %2388 = vperm.xlu0 %6012, %v11095_v58  }
 0x3f2   : > { %v7443_v49 = vpop.permute.xlu2 %2339  ;;  %v7447_v31 = vpop.f32.mrf.mxu0 }
 0x3f3   : > { %11093 = vst [vmem:[#allocation97_spill] sm:$0xff] %v7443_v49 }
 0x3f4   : > { %2867 = vperm.xlu2 %6016, %v7403_v45   ;;  %2861 = vperm.xlu1 %6015, %v7403_v45  }
 0x3f5   : > { %v1393_v11 = vpop.f32.mrf.mxu3 }
 0x3f6   : > { %v1394_v46 = vadd.f32 %v1393_v11, %v1305_v44  ;;  %v6193_v61 = vpop.eup %6192  ;;  %v1308_v11 = vadd.f32 %v7389_v62, %v7377_v42 }
 0x3f8   : > { %6194 = vtanh.f32 %v1394_v46  ;;  %v7452_v46 = vpop.permute.xlu1 %2315 }
 0x3f9   : > { %11096 = vst [vmem:[#allocation44_spill] sm:$0xff] %v7452_v46  ;;  %2873 = vperm.xlu0 %6012, %v7403_v45  }
 0x3fa   : > { %1435 = vmatmul.bf16.gmra.mxu3 %v11094_v20  ;;  %v7456_v49 = vpop.permute.xlu2 %2351  ;;  %v7461_v59 = vpop.f32.mrf.mxu0 }
 0x3fb   : > { %11097 = vst [vmem:[#allocation98_spill] sm:$0xff] %v7456_v49 }
 0x3fc   : > { %6019 = vset.pattern.permute.xlu2 %v6665_v19  ;;  %6018 = vset.pattern.permute.xlu1 %v6622_v4 }
 0x3fd   : > { %v1396_v18 = vpop.f32.mrf.mxu3 }
 0x3fe   : > { %v6195_v36 = vpop.eup %6194  ;;  %v1397_v20 = vadd.f32 %v1396_v18, %v1308_v11  ;;  %v11100_v18 = vld [vmem:[#allocation41_spill] sm:$0xff] }
 0x3ff   : > { %v1495_v44 = vpack.c.bf16 %v6195_v36, %v6193_v61 }
 0x400   : > { %6196 = vtanh.f32 %v1397_v20  ;;  %v7464_v61 = vpop.permute.xlu1 %2333 }
 0x401   : > { %5707 = vmatmul.msk.bf16.gmra.mxu1 %vm1128_vm2, %v1495_v44  ;;  %11098 = vst [vmem:[#allocation99_spill] sm:$0xff] %v7464_v61  ;;  %6017 = vset.pattern.permute.xlu0 %v6699_v30 }
 0x402   : > { %v7467_v44 = vpop.permute.xlu2 %2370  ;;  %v1324_v49 = vpop.f32.mrf.mxu0 }
 0x403   : > { %11099 = vst [vmem:[#allocation100_spill] sm:$0xff] %v7467_v44  ;;  %v1315_v44 = vadd.f32 %v7425_v39, %v7377_v42 }
 0x404   : > { %2885 = vperm.xlu2 %6019, %v7403_v45   ;;  %2879 = vperm.xlu1 %6018, %v7403_v45  }
 0x405   : > { %v1398_v62 = vpop.f32.mrf.mxu3 }
 0x406   : > { %v1399_v36 = vadd.f32 %v1398_v62, %v1310_v0  ;;  %v6197_v11 = vpop.eup %6196  ;;  %v1313_v0 = vadd.f32 %v7415_v10, %v7377_v42 }
 0x408   : > { %6198 = vtanh.f32 %v1399_v36  ;;  %v7474_v62 = vpop.permute.xlu1 %2345 }
 0x409   : > { %11101 = vst [vmem:[#allocation101_spill] sm:$0xff] %v7474_v62  ;;  %2418 = vperm.xlu0 %6017, %v11095_v58  }
 0x40a   : > { %1440 = vmatmul.bf16.gmra.mxu3 %v11100_v18  ;;  %v7478_v36 = vpop.permute.xlu2 %2382  ;;  %v1327_v10 = vpop.f32.mrf.mxu0 }
 0x40b   : > { %11102 = vst [vmem:[#allocation102_spill] sm:$0xff] %v7478_v36  ;;  %v1320_v36 = vadd.f32 %v7447_v31, %v7377_v42 }
 0x40c   : > { %6021 = vset.pattern.permute.xlu2 %v6680_v24  ;;  %6020 = vset.pattern.permute.xlu1 %v6683_v25 }
 0x40d   : > { %v1401_v16 = vpop.f32.mrf.mxu3 }
 0x40e   : > { %v6199_v46 = vpop.eup %6198  ;;  %v1402_v18 = vadd.f32 %v1401_v16, %v1313_v0 }
 0x40f   : > { %v1496_v20 = vpack.c.bf16 %v6199_v46, %v6197_v11 }
 0x410   : > { %6200 = vtanh.f32 %v1402_v18  ;;  %v7484_v46 = vpop.permute.xlu1 %2364 }
 0x411   : > { %5708 = vmatmul.msk.bf16.gmra.mxu1 %vm1128_vm2, %v1496_v20  ;;  %11103 = vst [vmem:[#allocation103_spill] sm:$0xff] %v7484_v46  ;;  %v11105_v20 = vld [vmem:[#allocation43_spill] sm:$0xff]  ;;  %2903 = vperm.xlu0 %6017, %v7403_v45  }
 0x412   : > { %v7487_v11 = vpop.permute.xlu2 %2400  ;;  %v1329_v18 = vpop.f32.mrf.mxu0 }
 0x413   : > { %11104 = vst [vmem:[#allocation104_spill] sm:$0xff] %v7487_v11 }
 0x414   : > { %2897 = vperm.xlu2 %6021, %v7403_v45   ;;  %2891 = vperm.xlu1 %6020, %v7403_v45  }
 0x415   : > { %v1403_v61 = vpop.f32.mrf.mxu3 }
 0x416   : > { %v1404_v56 = vadd.f32 %v1403_v61, %v1315_v44  ;;  %v6201_v16 = vpop.eup %6200  ;;  %v1318_v61 = vadd.f32 %v7437_v28, %v7377_v42 }
 0x418   : > { %6202 = vtanh.f32 %v1404_v56  ;;  %v7494_v56 = vpop.permute.xlu1 %2376 }
 0x419   : > { %11106 = vst [vmem:[#allocation105_spill] sm:$0xff] %v7494_v56  ;;  %6022 = vset.pattern.permute.xlu0 %v6721_v35 }
 0x41a   : > { %1445 = vmatmul.bf16.gmra.mxu3 %v11105_v20  ;;  %v7498_v11 = vpop.permute.xlu2 %2412 }
 0x41b   : > { %11107 = vst [vmem:[#allocation106_spill] sm:$0xff] %v7498_v11 }
 0x41c   : > { %6024 = vset.pattern.permute.xlu2 %v6711_v33  ;;  %6023 = vset.pattern.permute.xlu1 %v6696_v29 }
 0x41d   : > { %v1406_v0 = vpop.f32.mrf.mxu3 }
 0x41e   : > { %v6203_v39 = vpop.eup %6202  ;;  %v1407_v20 = vadd.f32 %v1406_v0, %v1318_v61  ;;  %v1332_v0 = vpop.f32.mrf.mxu0 }
 0x41f   : > { %v1497_v44 = vpack.c.bf16 %v6203_v39, %v6201_v16 }
 0x420   : > { %6204 = vtanh.f32 %v1407_v20  ;;  %v7504_v16 = vpop.permute.xlu1 %2394 }
 0x421   : > { %5709 = vmatmul.msk.bf16.gmra.mxu1 %vm1128_vm2, %v1497_v44  ;;  %11108 = vst [vmem:[#allocation107_spill] sm:$0xff] %v7504_v16  ;;  %v11110_v44 = vld [vmem:[#allocation46_spill] sm:$0xff]  ;;  %2448 = vperm.xlu0 %6022, %v11095_v58  }
 0x422   : > { %v7507_v39 = vpop.permute.xlu2 %2430 }
 0x423   : > { %11109 = vst [vmem:[#allocation108_spill] sm:$0xff] %v7507_v39  ;;  %v1325_v39 = vadd.f32 %v1324_v49, %v7377_v42  ;;  %v7531_v49 = vperm.slane %v7150_v12, 5  ;;  %v1330_v12 = vadd.f32 %v1329_v18, %v7377_v42  ;;  %v1333_v18 = vadd.f32 %v1332_v0, %v7377_v42 }
 0x424   : > { %2915 = vperm.xlu2 %6024, %v7403_v45   ;;  %2909 = vperm.xlu1 %6023, %v7403_v45  }
 0x425   : > { %v1408_v46 = vpop.f32.mrf.mxu3 }
 0x426   : > { %v1409_v28 = vadd.f32 %v1408_v46, %v1320_v36  ;;  %v6205_v61 = vpop.eup %6204  ;;  %v1323_v36 = vadd.f32 %v7461_v59, %v7377_v42  ;;  %v1334_v56 = vpop.f32.mrf.mxu0 }
 0x428   : > { %6206 = vtanh.f32 %v1409_v28  ;;  %v7514_v20 = vpop.permute.xlu1 %2406 }
 0x429   : > { %11111 = vst [vmem:[#allocation109_spill] sm:$0xff] %v7514_v20  ;;  %2933 = vperm.xlu0 %6022, %v7403_v45  }
 0x42a   : > { %1450 = vmatmul.bf16.gmra.mxu3 %v11110_v44  ;;  %v7518_v28 = vpop.permute.xlu2 %2442 }
 0x42b   : > { %11112 = vst [vmem:[#allocation110_spill] sm:$0xff] %v7518_v28 }
 0x42c   : > { %6026 = vset.pattern.permute.xlu2 %v6766_v15  ;;  %6025 = vset.pattern.permute.xlu1 %v6708_v32 }
 0x42d   : > { %v1411_v11 = vpop.f32.mrf.mxu3 }
 0x42e   : > { %v6207_v31 = vpop.eup %6206  ;;  %v1412_v44 = vadd.f32 %v1411_v11, %v1323_v36 }
 0x42f   : > { %v1498_v46 = vpack.c.bf16 %v6207_v31, %v6205_v61  ;;  %v11115_v61 = vld [vmem:[#allocation48_spill] sm:$0xff] }
 0x430   : > { %6208 = vtanh.f32 %v1412_v44  ;;  %v7523_v59 = vpop.permute.xlu1 %2424  ;;  %v1337_v44 = vpop.f32.mrf.mxu0 }
 0x431   : > { %5710 = vmatmul.msk.bf16.gmra.mxu1 %vm1128_vm2, %v1498_v46  ;;  %11113 = vst [vmem:[#allocation111_spill] sm:$0xff] %v7523_v59  ;;  %6027 = vset.pattern.permute.xlu0 %v6683_v25 }
 0x432   : > { %v7526_v58 = vpop.permute.xlu2 %2461 }
 0x433   : > { %11114 = vst [vmem:[#allocation112_spill] sm:$0xff] %v7526_v58 }
 0x434   : > { %2927 = vperm.xlu2 %6026, %v7403_v45   ;;  %2921 = vperm.xlu1 %6025, %v7403_v45  }
 0x435   : > { %v1413_v16 = vpop.f32.mrf.mxu3 }
 0x436   : > { %v1414_v62 = vadd.f32 %v1413_v16, %v1325_v39  ;;  %v6209_v11 = vpop.eup %6208 }
 0x438   : > { %6210 = vtanh.f32 %v1414_v62  ;;  %v1328_v62 = vadd.f32 %v1327_v10, %v7377_v42  ;;  %v7535_v36 = vpop.permute.xlu1 %2436  ;;  %v11118_v10 = vld [vmem:[#allocation25_spill] sm:$0xff] }
 0x439   : > { %11116 = vst [vmem:[#allocation113_spill] sm:$0xff] %v7535_v36  ;;  %2115 = vperm.xlu0 %6027, %v11118_v10  }
 0x43a   : > { %1455 = vmatmul.bf16.gmra.mxu3 %v11115_v61  ;;  %v7539_v46 = vpop.permute.xlu2 %2473 }
 0x43b   : > { %11117 = vst [vmem:[#allocation114_spill] sm:$0xff] %v7539_v46 }
 0x43c   : > { %6029 = vset.pattern.permute.xlu2 %v6602_v1  ;;  %6028 = vset.pattern.permute.xlu1 %v6718_v34 }
 0x43d   : > { %v1416_v31 = vpop.f32.mrf.mxu3 }
 0x43e   : > { %v6211_v16 = vpop.eup %6210  ;;  %v1417_v61 = vadd.f32 %v1416_v31, %v1328_v62 }
 0x43f   : > { %v1499_v39 = vpack.c.bf16 %v6211_v16, %v6209_v11  ;;  %v1339_v16 = vpop.f32.mrf.mxu0 }
 0x440   : > { %6212 = vtanh.f32 %v1417_v61  ;;  %v7544_v11 = vpop.permute.xlu1 %2454 }
 0x441   : > { %5711 = vmatmul.msk.bf16.gmra.mxu1 %vm1128_vm2, %v1499_v39  ;;  %11119 = vst [vmem:[#allocation25_spill] sm:$0xff] %v7544_v11  ;;  %2600 = vperm.xlu0 %6027, %v7153_v22  }
 0x442   : > { %v7547_v36 = vpop.permute.xlu2 %2491 }
 0x443   : > { %11120 = vst [vmem:[#allocation115_spill] sm:$0xff] %v7547_v36  ;;  %v1335_v36 = vadd.f32 %v1334_v56, %v7377_v42 }
 0x444   : > { %2946 = vperm.xlu2 %6029, %v7531_v49   ;;  %2939 = vperm.xlu1 %6028, %v7403_v45  }
 0x445   : > { %v1418_v58 = vpop.f32.mrf.mxu3 }
 0x446   : > { %v1419_v28 = vadd.f32 %v1418_v58, %v1330_v12  ;;  %v6213_v39 = vpop.eup %6212 }
 0x447   : > { %v1342_v12 = vpop.f32.mrf.mxu0 }
 0x448   : > { %6214 = vtanh.f32 %v1419_v28  ;;  %v7552_v28 = vpop.permute.xlu1 %2467 }
 0x449   : > { %11121 = vst [vmem:[#allocation116_spill] sm:$0xff] %v7552_v28 }
 0x44a   : > { %v7556_v58 = vpop.permute.xlu2 %2503 }
 0x44b   : > { %11122 = vst [vmem:[#allocation117_spill] sm:$0xff] %v7556_v58  ;;  %v1340_v58 = vadd.f32 %v1339_v16, %v7377_v42 }
 0x44c   : > { %6031 = vset.pattern.permute.xlu2 %v6650_v14  ;;  %6030 = vset.pattern.permute.xlu1 %v6609_v3 }
 0x44d   : > { %v1421_v45 = vpop.f32.mrf.mxu3 }
 0x44e   : > { %v6215_v31 = vpop.eup %6214  ;;  %v1422_v61 = vadd.f32 %v1421_v45, %v1333_v18 }
 0x44f   : > { %v1500_v62 = vpack.c.bf16 %v6215_v31, %v6213_v39  ;;  %v7564_v39 = vperm.slane %v7207_v37, 5  ;;  %v1344_v56 = vpop.f32.mrf.mxu0 }
 0x450   : > { %6216 = vtanh.f32 %v1422_v61  ;;  %v7560_v0 = vpop.permute.xlu1 %2485 }
 0x451   : > { %5712 = vmatmul.msk.bf16.gmra.mxu1 %vm1128_vm2, %v1500_v62  ;;  %11123 = vst [vmem:[#allocation118_spill] sm:$0xff] %v7560_v0  ;;  %3085 = vperm.xlu0 %6027, %v7564_v39  }
 0x452   : > { %v7566_v31 = vpop.permute.xlu2 %2521 }
 0x453   : > { %11124 = vst [vmem:[#allocation119_spill] sm:$0xff] %v7566_v31 }
 0x454   : > { %2958 = vperm.xlu2 %6031, %v7531_v49   ;;  %2952 = vperm.xlu1 %6030, %v7531_v49  }
 0x455   : > { %v1423_v46 = vpop.f32.mrf.mxu3 }
 0x456   : > { %v1424_v11 = vadd.f32 %v1423_v46, %v1335_v36  ;;  %v6217_v45 = vpop.eup %6216  ;;  %v1338_v46 = vadd.f32 %v1337_v44, %v7377_v42 }
 0x458   : > { %6218 = vtanh.f32 %v1424_v11  ;;  %v7573_v61 = vpop.permute.xlu1 %2497 }
 0x459   : > { %11125 = vst [vmem:[#allocation120_spill] sm:$0xff] %v7573_v61  ;;  %6048 = vset.pattern.permute.xlu0 %v6708_v32 }
 0x45a   : > { %v7577_v37 = vpop.permute.xlu2 %2533 }
 0x45b   : > { %11126 = vst [vmem:[#allocation121_spill] sm:$0xff] %v7577_v37 }
 0x45c   : > { %6033 = vset.pattern.permute.xlu2 %v6622_v4  ;;  %6032 = vset.pattern.permute.xlu1 %v6647_v13 }
 0x45d   : > { %v1426_v18 = vpop.f32.mrf.mxu3 }
 0x45e   : > { %v6219_v62 = vpop.eup %6218  ;;  %v7570_v36 = vpop.f32.mrf.mxu1  ;;  %v1427_v31 = vadd.f32 %v1426_v18, %v1338_v46 }
 0x45f   : > { %v1501_v11 = vpack.c.bf16 %v6219_v62, %v6217_v45  ;;  %v1347_v45 = vpop.f32.mrf.mxu0 }
 0x460   : > { %6220 = vtanh.f32 %v1427_v31  ;;  %v7586_v62 = vpop.permute.xlu1 %2515  ;;  %v1343_v31 = vadd.f32 %v1342_v12, %v7377_v42 }
 0x461   : > { %5713 = vmatmul.msk.bf16.gmra.mxu1 %vm1128_vm2, %v1501_v11  ;;  %11127 = vst [vmem:[#allocation122_spill] sm:$0xff] %v7586_v62  ;;  %2145 = vperm.xlu0 %6048, %v11118_v10   ;;  %v1345_v62 = vadd.f32 %v1344_v56, %v7377_v42 }
 0x462   : > { %v7589_v11 = vpop.permute.xlu2 %2551 }
 0x463   : > { %11128 = vst [vmem:[#allocation123_spill] sm:$0xff] %v7589_v11 }
 0x464   : > { %2976 = vperm.xlu2 %6033, %v7531_v49   ;;  %2970 = vperm.xlu1 %6032, %v7531_v49  }
 0x465   : > { %v1428_v0 = vpop.f32.mrf.mxu3 }
 0x466   : > { %v1429_v28 = vadd.f32 %v1428_v0, %v1340_v58  ;;  %v7582_v59 = vpop.f32.mrf.mxu1  ;;  %v6221_v16 = vpop.eup %6220 }
 0x468   : > { %6222 = vtanh.f32 %v1429_v28  ;;  %v7596_v44 = vpop.permute.xlu1 %2527  ;;  %v1349_v28 = vpop.f32.mrf.mxu0 }
 0x469   : > { %11129 = vst [vmem:[#allocation124_spill] sm:$0xff] %v7596_v44  ;;  %2630 = vperm.xlu0 %6048, %v7153_v22  }
 0x46a   : > { %v7600_v11 = vpop.permute.xlu2 %2564 }
 0x46b   : > { %11130 = vst [vmem:[#allocation125_spill] sm:$0xff] %v7600_v11 }
 0x46c   : > { %6035 = vset.pattern.permute.xlu2 %v6683_v25  ;;  %6034 = vset.pattern.permute.xlu1 %v6665_v19 }
 0x46d   : > { %v1431_v58 = vpop.f32.mrf.mxu3 }
 0x46e   : > { %v6223_v0 = vpop.eup %6222  ;;  %v7593_v18 = vpop.f32.mrf.mxu1  ;;  %v1432_v37 = vadd.f32 %v1431_v58, %v1343_v31 }
 0x46f   : > { %v1502_v46 = vpack.c.bf16 %v6223_v0, %v6221_v16 }
 0x470   : > { %6224 = vtanh.f32 %v1432_v37  ;;  %v7609_v0 = vpop.permute.xlu1 %2545  ;;  %v1352_v31 = vpop.f32.mrf.mxu0  ;;  %v1348_v37 = vadd.f32 %v1347_v45, %v7377_v42 }
 0x471   : > { %5714 = vmatmul.msk.bf16.gmra.mxu1 %vm1128_vm2, %v1502_v46  ;;  %11131 = vst [vmem:[#allocation126_spill] sm:$0xff] %v7609_v0  ;;  %3115 = vperm.xlu0 %6048, %v7564_v39   ;;  %v1350_v0 = vadd.f32 %v1349_v28, %v7377_v42 }
 0x472   : > { %v7613_v58 = vpop.permute.xlu2 %2582 }
 0x473   : > { %11132 = vst [vmem:[#allocation127_spill] sm:$0xff] %v7613_v58 }
 0x474   : > { %2988 = vperm.xlu2 %6035, %v7531_v49   ;;  %2982 = vperm.xlu1 %6034, %v7531_v49  }
 0x475   : > { %v1433_v61 = vpop.f32.mrf.mxu3 }
 0x476   : > { %v1434_v20 = vadd.f32 %v1433_v61, %v1345_v62  ;;  %v7605_v12 = vpop.f32.mrf.mxu1  ;;  %v6225_v56 = vpop.eup %6224 }
 0x478   : > { %6226 = vtanh.f32 %v1434_v20  ;;  %v7619_v20 = vpop.permute.xlu1 %2558  ;;  %v1354_v51 = vpop.f32.mrf.mxu0 }
 0x479   : > { %11133 = vst [vmem:[#allocation128_spill] sm:$0xff] %v7619_v20  ;;  %6053 = vset.pattern.permute.xlu0 %v6609_v3  ;;  %v1355_v20 = vadd.f32 %v1354_v51, %v7377_v42  ;;  %v7667_v51 = vpop.xlane.xlu0 %1925 }
 0x47a   : > { %v7624_v58 = vpop.permute.xlu2 %2594  ;;  %11142 = vst [vmem:[#allocation135_spill] sm:$0xff] %v7667_v51 }
 0x47b   : > { %11134 = vst [vmem:[#allocation129_spill] sm:$0xff] %v7624_v58 }
 0x47c   : > { %6037 = vset.pattern.permute.xlu2 %v6696_v29  ;;  %6036 = vset.pattern.permute.xlu1 %v6699_v30 }
 0x47d   : > { %v1436_v61 = vpop.f32.mrf.mxu3 }
 0x47e   : > { %v6227_v62 = vpop.eup %6226  ;;  %v7616_v46 = vpop.f32.mrf.mxu1  ;;  %v1437_v11 = vadd.f32 %v1436_v61, %v1348_v37 }
 0x47f   : > { %v1503_v16 = vpack.c.bf16 %v6227_v62, %v6225_v56  ;;  %v11137_v62 = vld [vmem:[#allocation27_spill] sm:$0xff] }
 0x480   : > { %6228 = vtanh.f32 %v1437_v11  ;;  %v1353_v11 = vadd.f32 %v1352_v31, %v7377_v42  ;;  %v1357_v56 = vpop.f32.mrf.mxu0 }
 0x481   : > { %5715 = vmatmul.msk.bf16.gmra.mxu1 %vm1128_vm2, %v1503_v16  ;;  %v7632_v16 = vpop.permute.xlu1 %2576  ;;  %2176 = vperm.xlu0 %6053, %v11137_v62   ;;  %v7680_v51 = vpop.permute.xlu0 %2297 }
 0x482   : > { %11135 = vst [vmem:[#allocation130_spill] sm:$0xff] %v7632_v16  ;;  %v7636_v61 = vpop.permute.xlu2 %2612 }
 0x483   : > { %11136 = vst [vmem:[#allocation131_spill] sm:$0xff] %v7636_v61 }
 0x484   : > { %3006 = vperm.xlu2 %6037, %v7531_v49   ;;  %3000 = vperm.xlu1 %6036, %v7531_v49   ;;  %11145 = vst [vmem:[#allocation138_spill] sm:$0xff] %v7680_v51 }
 0x485   : > { %v1438_v44 = vpop.f32.mrf.mxu3 }
 0x486   : > { %v1439_v27 = vadd.f32 %v1438_v44, %v1350_v0  ;;  %v7628_v45 = vpop.f32.mrf.mxu1  ;;  %v6229_v28 = vpop.eup %6228 }
 0x488   : > { %6230 = vtanh.f32 %v1439_v27 }
 0x489   : > { %v7642_v27 = vpop.permute.xlu1 %2588  ;;  %2661 = vperm.xlu0 %6053, %v7210_v9  }
 0x48a   : > { %11138 = vst [vmem:[#allocation27_spill] sm:$0xff] %v7642_v27  ;;  %v7647_v61 = vpop.permute.xlu2 %2624 }
 0x48b   : > { %11139 = vst [vmem:[#allocation132_spill] sm:$0xff] %v7647_v61  ;;  %v7659_v61 = vld [vmem:[%s6619_s27] sm:$0xff] }
 0x48c   : > { %6039 = vset.pattern.permute.xlu2 %v6708_v32  ;;  %6038 = vset.pattern.permute.xlu1 %v6711_v33 }
 0x48d   : > { %v1441_v37 = vpop.f32.mrf.mxu3 }
 0x48e   : > { %v6231_v44 = vpop.eup %6230  ;;  %v7639_v0 = vpop.f32.mrf.mxu1  ;;  %v1442_v16 = vadd.f32 %v1441_v37, %v1353_v11  ;;  %v7662_v37 = vperm.slane %v7659_v61, 6 }
 0x48f   : > { %v1504_v58 = vpack.c.bf16 %v6231_v44, %v6229_v28  ;;  %v1358_v44 = vadd.f32 %v1357_v56, %v7377_v42 }
 0x490   : > { %6232 = vtanh.f32 %v1442_v16 }
 0x491   : > { %5716 = vmatmul.msk.bf16.gmra.mxu1 %vm1128_vm2, %v1504_v58  ;;  %v1359_v58 = vpop.f32.mrf.mxu0  ;;  %v7656_v27 = vpop.permute.xlu1 %2606  ;;  %3146 = vperm.xlu0 %6053, %v7662_v37  }
 0x492   : > { %11140 = vst [vmem:[#allocation133_spill] sm:$0xff] %v7656_v27  ;;  %v1360_v63 = vadd.f32 %v1359_v58, %v7377_v42 }
 0x494   : > { %3018 = vperm.xlu2 %6039, %v7531_v49   ;;  %3012 = vperm.xlu1 %6038, %v7531_v49  }
 0x495   : > { %v1443_v7 = vpop.f32.mrf.mxu3 }
 0x496   : > { %v1444_v31 = vadd.f32 %v1443_v7, %v1355_v20  ;;  %v7651_v28 = vpop.f32.mrf.mxu1  ;;  %v7665_v7 = vpop.permute.xlu2 %2642 }
 0x497   : > { %11141 = vst [vmem:[#allocation134_spill] sm:$0xff] %v7665_v7  ;;  %v6233_v20 = vpop.eup %6232 }
 0x498   : > { %6234 = vtanh.f32 %v1444_v31 }
 0x499   : > { %v7675_v5 = vpop.permute.xlu1 %2618  ;;  %v1362_v23 = vpop.f32.mrf.mxu0  ;;  %6058 = vset.pattern.permute.xlu0 %v6711_v33 }
 0x49a   : > { %11143 = vst [vmem:[#allocation136_spill] sm:$0xff] %v7675_v5 }
 0x49c   : > { %6041 = vset.pattern.permute.xlu2 %v6718_v34  ;;  %6040 = vset.pattern.permute.xlu1 %v6721_v35 }
 0x49d   : > { %v1446_v16 = vpop.f32.mrf.mxu3 }
 0x49e   : > { %v6235_v11 = vpop.eup %6234  ;;  %v7670_v31 = vpop.f32.mrf.mxu1  ;;  %v1447_v48 = vadd.f32 %v1446_v16, %v1358_v44 }
 0x49f   : > { %v1505_v27 = vpack.c.bf16 %v6235_v11, %v6233_v20  ;;  %v7678_v7 = vpop.permute.xlu2 %2655  ;;  %v7692_v44 = vpop.permute.xlu0 %2782 }
 0x4a0   : > { %11144 = vst [vmem:[#allocation137_spill] sm:$0xff] %v7678_v7  ;;  %6236 = vtanh.f32 %v1447_v48  ;;  %v1363_v48 = vadd.f32 %v1362_v23, %v7377_v42 }
 0x4a1   : > { %5717 = vmatmul.msk.bf16.gmra.mxu1 %vm1128_vm2, %v1505_v27  ;;  %v7687_v27 = vpop.permute.xlu1 %2636  ;;  %11148 = vst [vmem:[#allocation141_spill] sm:$0xff] %v7692_v44  ;;  %2236 = vperm.xlu0 %6058, %v11137_v62   ;;  %v1364_v58 = vpop.f32.mrf.mxu0 }
 0x4a2   : > { %11146 = vst [vmem:[#allocation139_spill] sm:$0xff] %v7687_v27  ;;  %v1365_v41 = vadd.f32 %v1364_v58, %v7377_v42 }
 0x4a4   : > { %3036 = vperm.xlu2 %6041, %v7531_v49   ;;  %3030 = vperm.xlu1 %6040, %v7531_v49  }
 0x4a5   : > { %v1448_v56 = vpop.f32.mrf.mxu3 }
 0x4a6   : > { %v1449_v20 = vadd.f32 %v1448_v56, %v1360_v63  ;;  %v7684_v11 = vpop.f32.mrf.mxu1  ;;  %v6237_v16 = vpop.eup %6236 }
 0x4a7   : > { %v7690_v7 = vpop.permute.xlu2 %2673 }
 0x4a8   : > { %6238 = vtanh.f32 %v1449_v20  ;;  %11147 = vst [vmem:[#allocation140_spill] sm:$0xff] %v7690_v7  ;;  %v7705_v7 = vpop.permute.xlu0 %2327 }
 0x4a9   : > { %v7700_v27 = vpop.permute.xlu1 %2648  ;;  %11151 = vst [vmem:[#allocation144_spill] sm:$0xff] %v7705_v7  ;;  %2721 = vperm.xlu0 %6058, %v7210_v9  }
 0x4aa   : > { %11149 = vst [vmem:[#allocation142_spill] sm:$0xff] %v7700_v27 }
 0x4ac   : > { %6043 = vset.pattern.permute.xlu2 %v6609_v3  ;;  %6042 = vset.pattern.permute.xlu1 %v6602_v1 }
 0x4ad   : > { %v1451_v51 = vpop.f32.mrf.mxu3 }
 0x4ae   : > { %v6239_v63 = vpop.eup %6238  ;;  %v7695_v56 = vpop.f32.mrf.mxu1  ;;  %v1452_v5 = vadd.f32 %v1451_v51, %v1363_v48 }
 0x4af   : > { %v1506_v20 = vpack.c.bf16 %v6239_v63, %v6237_v16  ;;  %v7703_v44 = vpop.permute.xlu2 %2685  ;;  %v1367_v63 = vpop.f32.mrf.mxu0 }
 0x4b0   : > { %11150 = vst [vmem:[#allocation143_spill] sm:$0xff] %v7703_v44  ;;  %6240 = vtanh.f32 %v1452_v5  ;;  %v7715_v7 = vpop.permute.xlu0 %2812 }
 0x4b1   : > { %5718 = vmatmul.msk.bf16.gmra.mxu1 %vm1128_vm2, %v1506_v20  ;;  %v7710_v20 = vpop.permute.xlu1 %2667  ;;  %11154 = vst [vmem:[#allocation147_spill] sm:$0xff] %v7715_v7  ;;  %3206 = vperm.xlu0 %6058, %v7662_v37  }
 0x4b2   : > { %11152 = vst [vmem:[#allocation145_spill] sm:$0xff] %v7710_v20 }
 0x4b4   : > { %3049 = vperm.xlu2 %6043, %v7564_v39   ;;  %3043 = vperm.xlu1 %6042, %v7564_v39  }
 0x4b5   : > { %v1453_v57 = vpop.f32.mrf.mxu3 }
 0x4b6   : > { %v1454_v23 = vadd.f32 %v1453_v57, %v1365_v41  ;;  %v1626_v16 = vpop.f32.mrf.mxu1  ;;  %v6241_v51 = vpop.eup %6240  ;;  %v1368_v41 = vadd.f32 %v1367_v63, %v7377_v42 }
 0x4b7   : > { %v7713_v44 = vpop.permute.xlu2 %2703 }
 0x4b8   : > { %6242 = vtanh.f32 %v1454_v23  ;;  %11153 = vst [vmem:[#allocation146_spill] sm:$0xff] %v7713_v44  ;;  %v1369_v23 = vpop.f32.mrf.mxu0  ;;  %v7726_v7 = vpop.permute.xlu0 %2357 }
 0x4b9   : > { %v7721_v20 = vpop.permute.xlu1 %2679  ;;  %11157 = vst [vmem:[#allocation150_spill] sm:$0xff] %v7726_v7  ;;  %6067 = vset.pattern.permute.xlu0 %v6602_v1  ;;  %v1370_v9 = vadd.f32 %v1369_v23, %v7377_v42 }
 0x4ba   : > { %11155 = vst [vmem:[#allocation148_spill] sm:$0xff] %v7721_v20 }
 0x4bc   : > { %6045 = vset.pattern.permute.xlu2 %v6647_v13  ;;  %6044 = vset.pattern.permute.xlu1 %v6606_v2 }
 0x4bd   : > { %v1456_v58 = vpop.f32.mrf.mxu3 }
 0x4be   : > { %v6243_v48 = vpop.eup %6242  ;;  %v1629_v57 = vpop.f32.mrf.mxu1  ;;  %v1457_v27 = vadd.f32 %v1456_v58, %v1368_v41  ;;  %v11161_v58 = vld [vmem:[#allocation16_spill] sm:$0xff] }
 0x4bf   : > { %v1507_v5 = vpack.c.bf16 %v6243_v48, %v6241_v51  ;;  %v7724_v44 = vpop.permute.xlu2 %2715 }
 0x4c0   : > { %11156 = vst [vmem:[#allocation149_spill] sm:$0xff] %v7724_v44  ;;  %6244 = vtanh.f32 %v1457_v27  ;;  %v7736_v44 = vpop.permute.xlu0 %2842 }
 0x4c1   : > { %5719 = vmatmul.msk.bf16.gmra.mxu1 %vm1128_vm2, %v1507_v5  ;;  %v7731_v5 = vpop.permute.xlu1 %2697  ;;  %11160 = vst [vmem:[#allocation153_spill] sm:$0xff] %v7736_v44  ;;  %1976 = vperm.xlu0 %6067, %v11161_v58  }
 0x4c2   : > { %11158 = vst [vmem:[#allocation151_spill] sm:$0xff] %v7731_v5 }
 0x4c4   : > { %3067 = vperm.xlu2 %6045, %v7564_v39   ;;  %3061 = vperm.xlu1 %6044, %v7564_v39  }
 0x4c5   : > { %v1458_v63 = vpop.f32.mrf.mxu3 }
 0x4c6   : > { %v1459_v51 = vadd.f32 %v1458_v63, %v1370_v9  ;;  %v1631_v48 = vpop.f32.mrf.mxu1  ;;  %v6245_v41 = vpop.eup %6244 }
 0x4c7   : > { %v7734_v20 = vpop.permute.xlu2 %2733 }
 0x4c8   : > { %6246 = vtanh.f32 %v1459_v51  ;;  %11159 = vst [vmem:[#allocation152_spill] sm:$0xff] %v7734_v20  ;;  %v7746_v63 = vpop.permute.xlu0 %2388  ;;  %v1685_v20 = vpack.c.bf16 %v1631_v48, %v1629_v57  ;;  %v11172_v48 = vpack.c.bf16 %v7651_v28, %v7639_v0 }
 0x4c9   : > { %v7741_v9 = vpop.permute.xlu1 %2709  ;;  %11164 = vst [vmem:[#allocation155_spill] sm:$0xff] %v7746_v63  ;;  %2267 = vperm.xlu0 %6067, %v11068_v21   ;;  %v1684_v21 = vpack.c.bf16 %v1626_v16, %v7695_v56 }
 0x4ca   : > { %11162 = vst [vmem:[#allocation16_spill] sm:$0xff] %v7741_v9 }
 0x4cc   : > { %6047 = vset.pattern.permute.xlu2 %v6665_v19  ;;  %6046 = vset.pattern.permute.xlu1 %v6622_v4 }
 0x4ce   : > { %v6247_v7 = vpop.eup %6246  ;;  %v1634_v42 = vpop.f32.mrf.mxu1 }
 0x4cf   : > { %v1508_v23 = vpack.c.bf16 %v6247_v7, %v6245_v41  ;;  %v7744_v27 = vpop.permute.xlu2 %2745 }
 0x4d0   : > { %11163 = vst [vmem:[#allocation154_spill] sm:$0xff] %v7744_v27 }
 0x4d1   : > { %5720 = vmatmul.msk.bf16.gmra.mxu1 %vm1128_vm2, %v1508_v23  ;;  %v7750_v7 = vpop.permute.xlu1 %2727  ;;  %v7755_v23 = vpop.permute.xlu0 %2873  ;;  %2752 = vperm.xlu0 %6067, %v7288_v40  }
 0x4d2   : > { %11165 = vst [vmem:[#allocation156_spill] sm:$0xff] %v7750_v7 }
 0x4d3   : > { %11167 = vst [vmem:[#allocation158_spill] sm:$0xff] %v7755_v23 }
 0x4d4   : > { %3079 = vperm.xlu2 %6047, %v7564_v39   ;;  %3073 = vperm.xlu1 %6046, %v7564_v39  }
 0x4d6   : > { %v1636_v51 = vpop.f32.mrf.mxu1 }
 0x4d7   : > { %v1686_v44 = vpack.c.bf16 %v1636_v51, %v1634_v42  ;;  %v7753_v41 = vpop.permute.xlu2 %2764  ;;  %v7765_v42 = vld [vmem:[%s6619_s27 + $0x8] sm:$0xff] }
 0x4d8   : > { %11166 = vst [vmem:[#allocation157_spill] sm:$0xff] %v7753_v41  ;;  %v7768_v51 = vperm.slane %v7765_v42, 6 }
 0x4d9   : > { %1696 = vmatpush.bf16.msra.mxu2 %v1686_v44  ;;  %v7762_v44 = vpop.permute.xlu1 %2739  ;;  %v7773_v40 = vpop.permute.xlu0 %2418 }
 0x4da   : > { %11168 = vst [vmem:[#allocation159_spill] sm:$0xff] %v7762_v44  ;;  %3237 = vperm.xlu0 %6067, %v7768_v51  }
 0x4db   : > { %11169 = vst [vmem:[#allocation160_spill] sm:$0xff] %v7768_v51 }
 0x4dc   : > { %6050 = vset.pattern.permute.xlu2 %v6699_v30  ;;  %6049 = vset.pattern.permute.xlu1 %v6680_v24  ;;  %11171 = vst [vmem:[#allocation162_spill] sm:$0xff] %v7773_v40  ;;  %v7789_v40 = vperm.slane %v7659_v61, 7  ;;  %v11177_v61 = vpack.c.bf16 %v7605_v12, %v7593_v18 }
 0x4dd   : > { %1697 = vmatpush.bf16.msra.mxu2 %v1685_v20  ;;  %v1683_v20 = vpack.c.bf16 %v7684_v11, %v7670_v31 }
 0x4de   : > { %v7758_v63 = vpop.f32.mrf.mxu1 }
 0x4df   : > { %v7771_v57 = vpop.permute.xlu2 %2776 }
 0x4e0   : > { %11170 = vst [vmem:[#allocation161_spill] sm:$0xff] %v7771_v57 }
 0x4e1   : > { %1698 = vmatpush.bf16.msra.mxu2 %v1684_v21  ;;  %v7786_v21 = vpop.permute.xlu1 %2758  ;;  %v7794_v11 = vpop.permute.xlu0 %2903 }
 0x4e2   : > { %11173 = vst [vmem:[#allocation163_spill] sm:$0xff] %v7786_v21  ;;  %3334 = vperm.xlu0 %6067, %v7789_v40  }
 0x4e3   : > { %11175 = vst [vmem:[#allocation165_spill] sm:$0xff] %v7794_v11 }
 0x4e4   : > { %3097 = vperm.xlu2 %6050, %v7564_v39   ;;  %3091 = vperm.xlu1 %6049, %v7564_v39  }
 0x4e5   : > { %1699 = vmatpush.bf16.msra.mxu2 %v1683_v20  ;;  %v11176_v20 = vpack.c.bf16 %v7628_v45, %v7616_v46  ;;  %v11181_v46 = vpack.c.bf16 %v7582_v59, %v7570_v36 }
 0x4e6   : > { %v7778_v56 = vpop.f32.mrf.mxu1 }
 0x4e7   : > { %v7792_v31 = vpop.permute.xlu2 %2794 }
 0x4e8   : > { %11174 = vst [vmem:[#allocation164_spill] sm:$0xff] %v7792_v31 }
 0x4e9   : > { %1700 = vmatpush.bf16.msra.mxu2 %v11172_v48  ;;  %v7806_v0 = vpop.permute.xlu1 %2770  ;;  %v7811_v48 = vpop.permute.xlu0 %2448 }
 0x4ea   : > { %11178 = vst [vmem:[#allocation166_spill] sm:$0xff] %v7806_v0  ;;  %6076 = vset.pattern.permute.xlu0 %v6606_v2 }
 0x4eb   : > { %11180 = vst [vmem:[#allocation168_spill] sm:$0xff] %v7811_v48 }
 0x4ec   : > { %6052 = vset.pattern.permute.xlu2 %v6711_v33  ;;  %6051 = vset.pattern.permute.xlu1 %v6696_v29 }
 0x4ed   : > { %1701 = vmatpush.bf16.msra.mxu2 %v11176_v20 }
 0x4ee   : > { %v7800_v16 = vpop.f32.mrf.mxu1 }
 0x4ef   : > { %v7809_v28 = vpop.permute.xlu2 %2806 }
 0x4f0   : > { %11179 = vst [vmem:[#allocation167_spill] sm:$0xff] %v7809_v28 }
 0x4f1   : > { %1702 = vmatpush.bf16.msra.mxu2 %v11177_v61  ;;  %v7823_v12 = vpop.permute.xlu1 %2788  ;;  %v7828_v61 = vpop.permute.xlu0 %2933 }
 0x4f2   : > { %11182 = vst [vmem:[#allocation169_spill] sm:$0xff] %v7823_v12  ;;  %2479 = vperm.xlu0 %6076, %v7080_v38  }
 0x4f3   : > { %11184 = vst [vmem:[#allocation171_spill] sm:$0xff] %v7828_v61 }
 0x4f4   : > { %3109 = vperm.xlu2 %6052, %v7564_v39   ;;  %3103 = vperm.xlu1 %6051, %v7564_v39  }
 0x4f5   : > { %1703 = vmatpush.bf16.msra.mxu2 %v11181_v46 }
 0x4f6   : > { %v7817_v45 = vpop.f32.mrf.mxu1 }
 0x4f7   : > { %v7826_v20 = vpop.permute.xlu2 %2824 }
 0x4f8   : > { %1704 = vmatmul.bf16.vlgmr.msra.gmra.mxu2 %v6792_v52  ;;  %11183 = vst [vmem:[#allocation170_spill] sm:$0xff] %v7826_v20 }
 0x4f9   : > { %v7834_v36 = vpop.permute.xlu1 %2800  ;;  %v7839_v46 = vpop.permute.xlu0 %2115 }
 0x4fa   : > { %11185 = vst [vmem:[#allocation172_spill] sm:$0xff] %v7834_v36  ;;  %2964 = vperm.xlu0 %6076, %v7531_v49  }
 0x4fb   : > { %11187 = vst [vmem:[#allocation174_spill] sm:$0xff] %v7839_v46 }
 0x4fc   : > { %6055 = vset.pattern.permute.xlu2 %v6721_v35  ;;  %6054 = vset.pattern.permute.xlu1 %v6766_v15 }
 0x4fe   : > { %v7831_v59 = vpop.f32.mrf.mxu1 }
 0x4ff   : > { %v7837_v52 = vpop.permute.xlu2 %2836 }
 0x500   : > { %11186 = vst [vmem:[#allocation173_spill] sm:$0xff] %v7837_v52 }
 0x501   : > { %v7848_v48 = vpop.permute.xlu1 %2818  ;;  %v7853_v23 = vpop.permute.xlu0 %2600 }
 0x502   : > { %11188 = vst [vmem:[#allocation175_spill] sm:$0xff] %v7848_v48  ;;  %3352 = vperm.xlu0 %6076, %v7789_v40  }
 0x503   : > { %11190 = vst [vmem:[#allocation177_spill] sm:$0xff] %v7853_v23 }
 0x504   : > { %3127 = vperm.xlu2 %6055, %v7564_v39   ;;  %3121 = vperm.xlu1 %6054, %v7564_v39  }
 0x506   : > { %v7842_v18 = vpop.f32.mrf.mxu1 }
 0x507   : > { %v7851_v11 = vpop.permute.xlu2 %2855 }
 0x508   : > { %1709 = vmatmul.bf16.gmra.mxu2 %v6806_v54  ;;  %11189 = vst [vmem:[#allocation176_spill] sm:$0xff] %v7851_v11 }
 0x509   : > { %v7859_v52 = vpop.permute.xlu1 %2830  ;;  %v7864_v61 = vpop.permute.xlu0 %3085 }
 0x50a   : > { %11191 = vst [vmem:[#allocation178_spill] sm:$0xff] %v7859_v52  ;;  %6079 = vset.pattern.permute.xlu0 %v6680_v24 }
 0x50b   : > { %11193 = vst [vmem:[#allocation180_spill] sm:$0xff] %v7864_v61 }
 0x50c   : > { %6057 = vset.pattern.permute.xlu2 %v6602_v1  ;;  %6056 = vset.pattern.permute.xlu1 %v6718_v34 }
 0x50e   : > { %v7856_v46 = vpop.f32.mrf.mxu1 }
 0x50f   : > { %v7862_v54 = vpop.permute.xlu2 %2867 }
 0x510   : > { %11192 = vst [vmem:[#allocation179_spill] sm:$0xff] %v7862_v54 }
 0x511   : > { %v7873_v11 = vpop.permute.xlu1 %2849  ;;  %v7878_v54 = vpop.permute.xlu0 %2145 }
 0x512   : > { %11194 = vst [vmem:[#allocation181_spill] sm:$0xff] %v7873_v11  ;;  %2509 = vperm.xlu0 %6079, %v7080_v38  }
 0x513   : > { %11196 = vst [vmem:[#allocation183_spill] sm:$0xff] %v7878_v54 }
 0x514   : > { %3140 = vperm.xlu2 %6057, %v7662_v37   ;;  %3133 = vperm.xlu1 %6056, %v7564_v39  }
 0x516   : > { %v7867_v1 = vpop.f32.mrf.mxu1 }
 0x517   : > { %v7876_v52 = vpop.permute.xlu2 %2885 }
 0x518   : > { %1714 = vmatmul.bf16.gmra.mxu2 %v6820_v60  ;;  %11195 = vst [vmem:[#allocation182_spill] sm:$0xff] %v7876_v52 }
 0x519   : > { %v7884_v48 = vpop.permute.xlu1 %2861  ;;  %v7889_v23 = vpop.permute.xlu0 %2630 }
 0x51a   : > { %11197 = vst [vmem:[#allocation184_spill] sm:$0xff] %v7884_v48  ;;  %2994 = vperm.xlu0 %6079, %v7531_v49  }
 0x51b   : > { %11199 = vst [vmem:[#allocation186_spill] sm:$0xff] %v7889_v23 }
 0x51c   : > { %6060 = vset.pattern.permute.xlu2 %v6606_v2  ;;  %6059 = vset.pattern.permute.xlu1 %v6650_v14 }
 0x51e   : > { %v7881_v61 = vpop.f32.mrf.mxu1 }
 0x51f   : > { %v7887_v60 = vpop.permute.xlu2 %2897 }
 0x520   : > { %11198 = vst [vmem:[#allocation185_spill] sm:$0xff] %v7887_v60 }
 0x521   : > { %v7896_v54 = vpop.permute.xlu1 %2879  ;;  %v7901_v48 = vpop.permute.xlu0 %3115 }
 0x522   : > { %11200 = vst [vmem:[#allocation187_spill] sm:$0xff] %v7896_v54  ;;  %3382 = vperm.xlu0 %6079, %v7789_v40  }
 0x523   : > { %11202 = vst [vmem:[#allocation189_spill] sm:$0xff] %v7901_v48 }
 0x524   : > { %3158 = vperm.xlu2 %6060, %v7662_v37   ;;  %3152 = vperm.xlu1 %6059, %v7662_v37  }
 0x526   : > { %v7892_v11 = vpop.f32.mrf.mxu1 }
 0x527   : > { %v7899_v52 = vpop.permute.xlu2 %2915 }
 0x528   : > { %1719 = vmatmul.bf16.gmra.mxu2 %v6834_v6  ;;  %11201 = vst [vmem:[#allocation188_spill] sm:$0xff] %v7899_v52 }
 0x529   : > { %v7905_v23 = vpop.permute.xlu1 %2891  ;;  %v7910_v20 = vpop.permute.xlu0 %2176 }
 0x52a   : > { %11203 = vst [vmem:[#allocation190_spill] sm:$0xff] %v7905_v23  ;;  %6084 = vset.pattern.permute.xlu0 %v6766_v15 }
 0x52b   : > { %11205 = vst [vmem:[#allocation192_spill] sm:$0xff] %v7910_v20 }
 0x52c   : > { %6062 = vset.pattern.permute.xlu2 %v6622_v4  ;;  %6061 = vset.pattern.permute.xlu1 %v6647_v13 }
 0x52e   : > { %v1664_v60 = vpop.f32.mrf.mxu1 }
 0x52f   : > { %v7908_v6 = vpop.permute.xlu2 %2927 }
 0x530   : > { %11204 = vst [vmem:[#allocation191_spill] sm:$0xff] %v7908_v6 }
 0x531   : > { %v7915_v48 = vpop.permute.xlu1 %2909  ;;  %v7920_v23 = vpop.permute.xlu0 %2661 }
 0x532   : > { %11206 = vst [vmem:[#allocation193_spill] sm:$0xff] %v7915_v48  ;;  %2054 = vperm.xlu0 %6084, %v11161_v58  }
 0x533   : > { %11208 = vst [vmem:[#allocation195_spill] sm:$0xff] %v7920_v23 }
 0x534   : > { %3170 = vperm.xlu2 %6062, %v7662_v37   ;;  %3164 = vperm.xlu1 %6061, %v7662_v37  }
 0x536   : > { %v1666_v54 = vpop.f32.mrf.mxu1 }
 0x537   : > { %v7918_v52 = vpop.permute.xlu2 %2946 }
 0x538   : > { %1724 = vmatmul.bf16.gmra.mxu2 %v6848_v17  ;;  %11207 = vst [vmem:[#allocation194_spill] sm:$0xff] %v7918_v52 }
 0x539   : > { %v7924_v20 = vpop.permute.xlu1 %2921  ;;  %v7929_v28 = vpop.permute.xlu0 %3146 }
 0x53a   : > { %11209 = vst [vmem:[#allocation196_spill] sm:$0xff] %v7924_v20  ;;  %2539 = vperm.xlu0 %6084, %v7080_v38  }
 0x53b   : > { %11211 = vst [vmem:[#allocation198_spill] sm:$0xff] %v7929_v28 }
 0x53c   : > { %6064 = vset.pattern.permute.xlu2 %v6680_v24  ;;  %6063 = vset.pattern.permute.xlu1 %v6683_v25 }
 0x53e   : > { %v1669_v6 = vpop.f32.mrf.mxu1 }
 0x53f   : > { %v7927_v17 = vpop.permute.xlu2 %2958 }
 0x540   : > { %11210 = vst [vmem:[#allocation197_spill] sm:$0xff] %v7927_v17 }
 0x541   : > { %v7934_v23 = vpop.permute.xlu1 %2939  ;;  %v7939_v52 = vpop.permute.xlu0 %2236 }
 0x542   : > { %11212 = vst [vmem:[#allocation199_spill] sm:$0xff] %v7934_v23  ;;  %3024 = vperm.xlu0 %6084, %v7531_v49  }
 0x543   : > { %11214 = vst [vmem:[#allocation201_spill] sm:$0xff] %v7939_v52 }
 0x544   : > { %3188 = vperm.xlu2 %6064, %v7662_v37   ;;  %3182 = vperm.xlu1 %6063, %v7662_v37  }
 0x546   : > { %v1671_v48 = vpop.f32.mrf.mxu1 }
 0x547   : > { %v7937_v58 = vpop.permute.xlu2 %2976 }
 0x548   : > { %1729 = vmatmul.bf16.gmra.mxu2 %v6862_v26  ;;  %11213 = vst [vmem:[#allocation200_spill] sm:$0xff] %v7937_v58 }
 0x549   : > { %v7943_v28 = vpop.permute.xlu1 %2952  ;;  %v7948_v38 = vpop.permute.xlu0 %2721 }
 0x54a   : > { %11215 = vst [vmem:[#allocation202_spill] sm:$0xff] %v7943_v28  ;;  %3412 = vperm.xlu0 %6084, %v7789_v40  }
 0x54b   : > { %11217 = vst [vmem:[#allocation204_spill] sm:$0xff] %v7948_v38  ;;  %v1692_v38 = vpack.c.bf16 %v1666_v54, %v1664_v60 }
 0x54c   : > { %6066 = vset.pattern.permute.xlu2 %v6696_v29  ;;  %6065 = vset.pattern.permute.xlu1 %v6699_v30 }
 0x54e   : > { %v1674_v17 = vpop.f32.mrf.mxu1 }
 0x54f   : > { %v7946_v26 = vpop.permute.xlu2 %2988 }
 0x550   : > { %11216 = vst [vmem:[#allocation203_spill] sm:$0xff] %v7946_v26  ;;  %v1693_v26 = vpack.c.bf16 %v1671_v48, %v1669_v6  ;;  %v11223_v48 = vpack.c.bf16 %v7867_v1, %v7856_v46  ;;  %v11228_v1 = vpack.c.bf16 %v7817_v45, %v7800_v16  ;;  %v8009_v45 = vperm.slane %v7765_v42, 7 }
 0x551   : > { %v7953_v49 = vpop.permute.xlu1 %2970  ;;  %v7958_v58 = vpop.permute.xlu0 %3206 }
 0x552   : > { %11218 = vst [vmem:[#allocation205_spill] sm:$0xff] %v7953_v49  ;;  %6089 = vset.pattern.permute.xlu0 %v6650_v14 }
 0x553   : > { %11220 = vst [vmem:[#allocation207_spill] sm:$0xff] %v7958_v58  ;;  %v11267_v58 = vld [vmem:[#allocation63_spill] sm:$0xff] }
 0x554   : > { %3200 = vperm.xlu2 %6066, %v7662_v37   ;;  %3194 = vperm.xlu1 %6065, %v7662_v37  }
 0x556   : > { %v1676_v23 = vpop.f32.mrf.mxu1 }
 0x557   : > { %v1694_v20 = vpack.c.bf16 %v1676_v23, %v1674_v17  ;;  %v7956_v52 = vpop.permute.xlu2 %3006  ;;  %v1691_v17 = vpack.c.bf16 %v7892_v11, %v7881_v61 }
 0x558   : > { %1734 = vmatmul.bf16.gmra.mxu2 %v6876_v43  ;;  %11219 = vst [vmem:[#allocation206_spill] sm:$0xff] %v7956_v52 }
 0x559   : > { %1785 = vmatpush.bf16.msra.mxu0 %v1694_v20  ;;  %v7962_v43 = vpop.permute.xlu1 %2982  ;;  %v7967_v20 = vpop.permute.xlu0 %1976 }
 0x55a   : > { %11221 = vst [vmem:[#allocation208_spill] sm:$0xff] %v7962_v43  ;;  %2085 = vperm.xlu0 %6089, %v11118_v10   ;;  %v11227_v10 = vpack.c.bf16 %v7842_v18, %v7831_v59  ;;  %v11335_v43 = vld [vmem:[#allocation96_spill] sm:$0xff] }
 0x55c   : > { %6069 = vset.pattern.permute.xlu2 %v6766_v15  ;;  %6068 = vset.pattern.permute.xlu1 %v6708_v32 }
 0x55d   : > { %1786 = vmatpush.bf16.msra.mxu0 %v1693_v26  ;;  %v11244_v26 = vld [vmem:[#allocation28_spill] sm:$0xff] }
 0x55f   : > { %v7965_v23 = vpop.permute.xlu2 %3018 }
 0x560   : > { %11222 = vst [vmem:[#allocation209_spill] sm:$0xff] %v7965_v23  ;;  %v3790_v23 = vsub.f32 1.0, %v11267_v58 }
 0x561   : > { %1787 = vmatpush.bf16.msra.mxu0 %v1692_v38  ;;  %v7977_v54 = vpop.permute.xlu1 %3000  ;;  %v7982_v6 = vpop.permute.xlu0 %2267 }
 0x562   : > { %11224 = vst [vmem:[#allocation210_spill] sm:$0xff] %v7977_v54  ;;  %2570 = vperm.xlu0 %6089, %v7153_v22   ;;  %v11232_v22 = vpack.c.bf16 %v7778_v56, %v7758_v63 }
 0x563   : > { %11226 = vst [vmem:[#allocation212_spill] sm:$0xff] %v7982_v6 }
 0x564   : > { %3218 = vperm.xlu2 %6069, %v7662_v37   ;;  %3212 = vperm.xlu1 %6068, %v7662_v37  }
 0x565   : > { %1788 = vmatpush.bf16.msra.mxu0 %v1691_v17  ;;  %v11246_v17 = vld [vmem:[#allocation38_spill] sm:$0xff] }
 0x567   : > { %v7980_v60 = vpop.permute.xlu2 %3036 }
 0x568   : > { %1739 = vmatmul.bf16.gmra.mxu2 %v6902_v55  ;;  %11225 = vst [vmem:[#allocation211_spill] sm:$0xff] %v7980_v60  ;;  %v11266_v60 = vld [vmem:[#allocation58_spill] sm:$0xff] }
 0x569   : > { %1789 = vmatpush.bf16.msra.mxu0 %v11223_v48  ;;  %v7992_v55 = vpop.permute.xlu1 %3012  ;;  %v7997_v61 = vpop.permute.xlu0 %2752 }
 0x56a   : > { %11229 = vst [vmem:[#allocation213_spill] sm:$0xff] %v7992_v55  ;;  %3055 = vperm.xlu0 %6089, %v7564_v39   ;;  %v11268_v55 = vld [vmem:[#allocation60_spill] sm:$0xff] }
 0x56b   : > { %11231 = vst [vmem:[#allocation215_spill] sm:$0xff] %v7997_v61  ;;  %v11264_v61 = vld [vmem:[#allocation56_spill] sm:$0xff]  ;;  %v3791_v52 = vsub.f32 1.0, %v11268_v55 }
 0x56c   : > { %6071 = vset.pattern.permute.xlu2 %v6718_v34  ;;  %6070 = vset.pattern.permute.xlu1 %v6721_v35 }
 0x56d   : > { %1790 = vmatpush.bf16.msra.mxu0 %v11227_v10 }
 0x56f   : > { %v7995_v11 = vpop.permute.xlu2 %3049 }
 0x570   : > { %11230 = vst [vmem:[#allocation214_spill] sm:$0xff] %v7995_v11  ;;  %v3787_v11 = vsub.f32 1.0, %v11264_v61 }
 0x571   : > { %1791 = vmatpush.bf16.msra.mxu0 %v11228_v1  ;;  %v8006_v16 = vpop.permute.xlu1 %3030  ;;  %v8014_v39 = vpop.permute.xlu0 %3237 }
 0x572   : > { %11233 = vst [vmem:[#allocation216_spill] sm:$0xff] %v8006_v16  ;;  %3443 = vperm.xlu0 %6089, %v8009_v45   ;;  %v3789_v16 = vsub.f32 1.0, %v11266_v60 }
 0x573   : > { %11235 = vst [vmem:[#allocation218_spill] sm:$0xff] %v8014_v39 }
 0x574   : > { %3230 = vperm.xlu2 %6071, %v7662_v37   ;;  %3224 = vperm.xlu1 %6070, %v7662_v37  }
 0x575   : > { %1792 = vmatpush.bf16.msra.mxu0 %v11232_v22 }
 0x577   : > { %v8012_v18 = vpop.permute.xlu2 %3067 }
 0x578   : > { %1793 = vmatmul.bf16.vlgmr.msra.gmra.mxu0 %v6778_v47  ;;  %1744 = vmatmul.bf16.gmra.mxu2 %v6922_v8  ;;  %11234 = vst [vmem:[#allocation217_spill] sm:$0xff] %v8012_v18  ;;  %v11263_v18 = vld [vmem:[#allocation30_spill] sm:$0xff] }
 0x579   : > { %v8019_v47 = vpop.permute.xlu1 %3043  ;;  %v8021_v8 = vpop.permute.xlu0 %3334 }
 0x57a   : > { %11236 = vst [vmem:[#allocation219_spill] sm:$0xff] %v8019_v47  ;;  %6094 = vset.pattern.permute.xlu0 %v6665_v19  ;;  %v11265_v47 = vld [vmem:[#allocation61_spill] sm:$0xff] }
 0x57b   : > { %v3788_v6 = vsub.f32 1.0, %v11265_v47  ;;  %v11273_v47 = vld [vmem:[#allocation62_spill] sm:$0xff] }
 0x57c   : > { %6073 = vset.pattern.permute.xlu2 %v6650_v14  ;;  %6072 = vset.pattern.permute.xlu1 %v6609_v3  ;;  %v3794_v60 = vsub.f32 1.0, %v11273_v47 }
 0x57f   : > { %v8024_v63 = vpop.permute.xlu2 %3079 }
 0x580   : > { %11237 = vst [vmem:[#allocation220_spill] sm:$0xff] %v8024_v63 }
 0x581   : > { %v8030_v42 = vpop.permute.xlu1 %3061  ;;  %v8033_v56 = vpop.permute.xlu0 %2479 }
 0x582   : > { %11238 = vst [vmem:[#allocation221_spill] sm:$0xff] %v8030_v42  ;;  %2206 = vperm.xlu0 %6094, %v11137_v62   ;;  %v11262_v42 = vld [vmem:[#allocation59_spill] sm:$0xff] }
 0x583   : > { %11239 = vst [vmem:[#allocation222_spill] sm:$0xff] %v8033_v56  ;;  %v11259_v56 = vld [vmem:[#allocation52_spill] sm:$0xff]  ;;  %v3786_v39 = vsub.f32 1.0, %v11262_v42 }
 0x584   : > { %3249 = vperm.xlu2 %6073, %v7768_v51   ;;  %3243 = vperm.xlu1 %6072, %v7768_v51  }
 0x587   : > { %v8035_v59 = vpop.permute.xlu2 %3097 }
 0x588   : > { %1798 = vmatmul.bf16.gmra.mxu0 %v6799_v53  ;;  %1749 = vmatmul.bf16.gmra.mxu2 %v6940_v50  ;;  %11240 = vst [vmem:[#allocation223_spill] sm:$0xff] %v8035_v59  ;;  %v11242_v53 = vld [vmem:[#allocation50_spill] sm:$0xff]  ;;  %v11260_v59 = vld [vmem:[#allocation57_spill] sm:$0xff] }
 0x589   : > { %v8039_v46 = vpop.permute.xlu1 %3073  ;;  %v8042_v50 = vpop.permute.xlu0 %2964 }
 0x58a   : > { %11241 = vst [vmem:[#allocation224_spill] sm:$0xff] %v8039_v46  ;;  %2691 = vperm.xlu0 %6094, %v11242_v53   ;;  %v11252_v53 = vld [vmem:[#allocation40_spill] sm:$0xff]  ;;  %v11261_v46 = vld [vmem:[#allocation54_spill] sm:$0xff] }
 0x58b   : > { %11243 = vst [vmem:[#allocation50_spill] sm:$0xff] %v8042_v50  ;;  %v11257_v50 = vld [vmem:[#allocation55_spill] sm:$0xff]  ;;  %v3785_v63 = vsub.f32 1.0, %v11261_v46 }
 0x58c   : > { %6075 = vset.pattern.permute.xlu2 %v6647_v13  ;;  %6074 = vset.pattern.permute.xlu1 %v6606_v2 }
 0x58d   : > { %v8112_v55 = vmul.f32 2.0, %v3785_v63  ;;  %v8130_v63 = vmul.f32 2.0, %v3794_v60  ;;  %v11296_v60 = vld [vmem:[#allocation77_spill] sm:$0xff] }
 0x58f   : > { %v8045_v38 = vpop.permute.xlu2 %3109  ;;  %11276 = vst [vmem:[#allocation231_spill] sm:$0xff] %v8112_v55 }
 0x590   : > { %11245 = vst [vmem:[#allocation28_spill] sm:$0xff] %v8045_v38  ;;  %v3781_v38 = vsub.f32 1.0, %v11257_v50 }
 0x591   : > { %v8051_v62 = vpop.permute.xlu0 %3352  ;;  %v8053_v48 = vpop.permute.xlu1 %3091  ;;  %11286 = vst [vmem:[#allocation239_spill] sm:$0xff] %v8130_v63  ;;  %v3808_v63 = vsub.f32 1.0, %v11296_v60 }
 0x592   : > { %3176 = vperm.xlu0 %6094, %v7662_v37   ;;  %11247 = vst [vmem:[#allocation38_spill] sm:$0xff] %v8053_v48  ;;  %v8104_v61 = vmul.f32 2.0, %v3781_v38  ;;  %v8122_v38 = vmul.f32 2.0, %v3790_v23  ;;  %v11291_v23 = vld [vmem:[#allocation73_spill] sm:$0xff] }
 0x594   : > { %3261 = vperm.xlu2 %6075, %v7768_v51   ;;  %3255 = vperm.xlu1 %6074, %v7768_v51   ;;  %11272 = vst [vmem:[#allocation228_spill] sm:$0xff] %v8104_v61  ;;  %v11402_v61 = vld [vmem:[#allocation124_spill] sm:$0xff] }
 0x595   : > { %11281 = vst [vmem:[#allocation236_spill] sm:$0xff] %v8122_v38  ;;  %v3803_v38 = vsub.f32 1.0, %v11291_v23 }
 0x597   : > { %v8057_v10 = vpop.permute.xlu2 %3127 }
 0x598   : > { %1803 = vmatmul.bf16.gmra.mxu0 %v11244_v26  ;;  %1754 = vmatmul.bf16.gmra.mxu2 %v11246_v17  ;;  %11248 = vst [vmem:[#allocation225_spill] sm:$0xff] %v8057_v10  ;;  %v11256_v10 = vld [vmem:[#allocation51_spill] sm:$0xff] }
 0x599   : > { %v8059_v1 = vpop.permute.xlu0 %2509  ;;  %v8062_v22 = vpop.permute.xlu1 %3103 }
 0x59a   : > { %11249 = vst [vmem:[#allocation226_spill] sm:$0xff] %v8059_v1  ;;  %3273 = vperm.xlu0 %6094, %v7768_v51  }
 0x59b   : > { %11250 = vst [vmem:[#allocation227_spill] sm:$0xff] %v8062_v22  ;;  %v3782_v22 = vsub.f32 1.0, %v11256_v10  ;;  %v11331_v10 = vld [vmem:[#allocation94_spill] sm:$0xff] }
 0x59c   : > { %6078 = vset.pattern.permute.xlu2 %v6650_v14  ;;  %6077 = vset.pattern.permute.xlu1 %v6609_v3  ;;  %v11251_v14 = vld [vmem:[#allocation29_spill] sm:$0xff] }
 0x59f   : > { %v8069_v37 = vpop.permute.xlu2 %3140 }
 0x5a1   : > { %v8071_v26 = vpop.permute.xlu0 %2994  ;;  %v8073_v17 = vpop.permute.xlu1 %3121 }
 0x5a2   : > { %6103 = vset.pattern.permute.xlu0 %v6680_v24  ;;  %11253 = vst [vmem:[#allocation29_spill] sm:$0xff] %v8071_v26  ;;  %v3783_v26 = vsub.f32 1.0, %v11259_v56  ;;  %v11269_v24 = vld [vmem:[#allocation65_spill] sm:$0xff]  ;;  %v11303_v56 = vld [vmem:[#allocation34_spill] sm:$0xff] }
 0x5a3   : > { %11254 = vst [vmem:[#allocation40_spill] sm:$0xff] %v8073_v17  ;;  %v3784_v17 = vsub.f32 1.0, %v11260_v59  ;;  %v11297_v59 = vld [vmem:[#allocation74_spill] sm:$0xff] }
 0x5a4   : > { %3346 = vperm.xlu2 %6078, %v7789_v40   ;;  %3340 = vperm.xlu1 %6077, %v7789_v40   ;;  %v8108_v58 = vmul.f32 2.0, %v3783_v26  ;;  %v11284_v26 = vld [vmem:[#allocation67_spill] sm:$0xff] }
 0x5a5   : > { %v8110_v46 = vmul.f32 2.0, %v3784_v17  ;;  %v11285_v17 = vld [vmem:[#allocation64_spill] sm:$0xff] }
 0x5a6   : > { %11274 = vst [vmem:[#allocation229_spill] sm:$0xff] %v8108_v58  ;;  %v11298_v58 = vld [vmem:[#allocation79_spill] sm:$0xff] }
 0x5a7   : > { %11275 = vst [vmem:[#allocation230_spill] sm:$0xff] %v8110_v46  ;;  %v3796_v46 = vsub.f32 1.0, %v11285_v17 }
 0x5a8   : > { %1808 = vmatmul.bf16.gmra.mxu0 %v11251_v14  ;;  %1759 = vmatmul.bf16.gmra.mxu2 %v11252_v53  ;;  %v8078_v14 = vpop.permute.xlu2 %3158  ;;  %v11255_v53 = vld [vmem:[#allocation53_spill] sm:$0xff] }
 0x5a9   : > { %v3780_v1 = vsub.f32 1.0, %v11255_v53  ;;  %v8083_v48 = vpop.permute.xlu0 %3382  ;;  %v8098_v54 = vpop.permute.xlu1 %3133  ;;  %v8150_v23 = vmul.f32 2.0, %v3796_v46  ;;  %v8165_v46 = vmul.f32 2.0, %v3803_v38  ;;  %v11317_v38 = vld [vmem:[#allocation82_spill] sm:$0xff] }
 0x5aa   : > { %3479 = vperm.xlu0 %6103, %v8009_v45   ;;  %11258 = vst [vmem:[#allocation53_spill] sm:$0xff] %v8083_v48  ;;  %v3793_v48 = vsub.f32 1.0, %v11269_v24  ;;  %v8114_v24 = vmul.f32 2.0, %v3786_v39  ;;  %v11287_v39 = vld [vmem:[#allocation69_spill] sm:$0xff] }
 0x5ab   : > { %11270 = vst [vmem:[#allocation55_spill] sm:$0xff] %v8098_v54  ;;  %v8100_v42 = vmul.f32 2.0, %v3780_v1  ;;  %v8118_v1 = vmul.f32 2.0, %v3788_v6  ;;  %v8124_v54 = vmul.f32 2.0, %v3791_v52  ;;  %v11289_v6 = vld [vmem:[#allocation71_spill] sm:$0xff]  ;;  %v11292_v52 = vld [vmem:[#allocation70_spill] sm:$0xff] }
 0x5ac   : > { %6081 = vset.pattern.permute.xlu2 %v6622_v4  ;;  %6080 = vset.pattern.permute.xlu1 %v6647_v13  ;;  %11277 = vst [vmem:[#allocation232_spill] sm:$0xff] %v8114_v24  ;;  %v8126_v47 = vmul.f32 2.0, %v3793_v48  ;;  %v3798_v24 = vsub.f32 1.0, %v11287_v39  ;;  %v11293_v48 = vld [vmem:[#allocation75_spill] sm:$0xff]  ;;  %v3809_v39 = vsub.f32 1.0, %v11297_v59  ;;  %v11330_v4 = vld [vmem:[#allocation89_spill] sm:$0xff] }
 0x5ad   : > { %11279 = vst [vmem:[#allocation234_spill] sm:$0xff] %v8118_v1  ;;  %v3800_v1 = vsub.f32 1.0, %v11289_v6 }
 0x5ae   : > { %11282 = vst [vmem:[#allocation237_spill] sm:$0xff] %v8124_v54  ;;  %v3804_v54 = vsub.f32 1.0, %v11292_v52  ;;  %v11302_v52 = vld [vmem:[#allocation76_spill] sm:$0xff] }
 0x5af   : > { %11283 = vst [vmem:[#allocation238_spill] sm:$0xff] %v8126_v47  ;;  %v3805_v47 = vsub.f32 1.0, %v11293_v48  ;;  %v3811_v48 = vsub.f32 1.0, %v11302_v52  ;;  %v8159_v59 = vmul.f32 2.0, %v3800_v1  ;;  %v8177_v1 = vmul.f32 2.0, %v3809_v39  ;;  %v11323_v39 = vld [vmem:[#allocation83_spill] sm:$0xff] }
 0x5b0   : > { %v8139_v55 = vpop.permute.xlu2 %3170  ;;  %11301 = vst [vmem:[#allocation243_spill] sm:$0xff] %v8150_v23  ;;  %v8167_v23 = vmul.f32 2.0, %v3804_v54  ;;  %v11318_v54 = vld [vmem:[#allocation80_spill] sm:$0xff] }
 0x5b1   : > { %11294 = vst [vmem:[#allocation240_spill] sm:$0xff] %v8139_v55  ;;  %v8146_v6 = vpop.permute.xlu0 %2054  ;;  %v3813_v55 = vsub.f32 1.0, %v11303_v56  ;;  %v11406_v56 = vld [vmem:[#allocation126_spill] sm:$0xff] }
 0x5b2   : > { %6108 = vset.pattern.permute.xlu0 %v6711_v33  ;;  %11299 = vst [vmem:[#allocation241_spill] sm:$0xff] %v8146_v6  ;;  %v8171_v6 = vpop.permute.xlu1 %3152 }
 0x5b3   : > { %11306 = vst [vmem:[#allocation245_spill] sm:$0xff] %v8159_v59 }
 0x5b4   : > { %3364 = vperm.xlu2 %6081, %v7789_v40   ;;  %3358 = vperm.xlu1 %6080, %v7789_v40   ;;  %11309 = vst [vmem:[#allocation247_spill] sm:$0xff] %v8165_v46  ;;  %v3815_v46 = vsub.f32 1.0, %v11317_v38  ;;  %v11328_v38 = vld [vmem:[#allocation87_spill] sm:$0xff] }
 0x5b5   : > { %11310 = vst [vmem:[#allocation248_spill] sm:$0xff] %v8167_v23  ;;  %v3816_v23 = vsub.f32 1.0, %v11318_v54  ;;  %v3826_v54 = vsub.f32 1.0, %v11328_v38  ;;  %v8211_v38 = vpop.f32.mrf.mxu2 }
 0x5b6   : > { %11314 = vst [vmem:[#allocation252_spill] sm:$0xff] %v8177_v1  ;;  %v3821_v1 = vsub.f32 1.0, %v11323_v39 }
 0x5b7   : > { %v8204_v39 = vmul.f32 2.0, %v3816_v23 }
 0x5b8   : > { %1813 = vmatmul.bf16.gmra.mxu0 %v11263_v18  ;;  %v8102_v18 = vmul.f32 2.0, %v3782_v22  ;;  %v8120_v22 = vmul.f32 2.0, %v3789_v16  ;;  %v11290_v16 = vld [vmem:[#allocation68_spill] sm:$0xff] }
 0x5b9   : > { %11333 = vst [vmem:[#allocation256_spill] sm:$0xff] %v8204_v39  ;;  %v8220_v23 = vpop.permute.xlu0 %2539 }
 0x5ba   : > { %11271 = vst [vmem:[#allocation30_spill] sm:$0xff] %v8102_v18  ;;  %3303 = vperm.xlu0 %6108, %v7768_v51  }
 0x5bb   : > { %11280 = vst [vmem:[#allocation235_spill] sm:$0xff] %v8120_v22  ;;  %v3801_v22 = vsub.f32 1.0, %v11290_v16 }
 0x5bc   : > { %6083 = vset.pattern.permute.xlu2 %v6683_v25  ;;  %6082 = vset.pattern.permute.xlu1 %v6665_v19  ;;  %v8116_v19 = vmul.f32 2.0, %v3787_v11  ;;  %v3795_v25 = vsub.f32 1.0, %v11284_v26  ;;  %v11288_v11 = vld [vmem:[#allocation66_spill] sm:$0xff]  ;;  %v11295_v26 = vld [vmem:[#allocation72_spill] sm:$0xff]  ;;  %11341 = vst [vmem:[#allocation261_spill] sm:$0xff] %v8220_v23 }
 0x5bd   : > { %v3806_v17 = vsub.f32 1.0, %v11295_v26  ;;  %v8155_v26 = vmul.f32 2.0, %v3798_v24 }
 0x5be   : > { %11278 = vst [vmem:[#allocation233_spill] sm:$0xff] %v8116_v19  ;;  %v3799_v19 = vsub.f32 1.0, %v11288_v11  ;;  %v3810_v11 = vsub.f32 1.0, %v11298_v58  ;;  %v8148_v16 = vmul.f32 2.0, %v3795_v25  ;;  %v11307_v58 = vld [vmem:[#allocation78_spill] sm:$0xff]  ;;  %v8163_v25 = vmul.f32 2.0, %v3801_v22 }
 0x5bf   : > { %11304 = vst [vmem:[#allocation76_spill] sm:$0xff] %v8155_v26  ;;  %v3814_v18 = vsub.f32 1.0, %v11307_v58  ;;  %v8173_v24 = vmul.f32 2.0, %v3806_v17  ;;  %v8183_v22 = vmul.f32 2.0, %v3813_v55  ;;  %v11321_v17 = vld [vmem:[#allocation81_spill] sm:$0xff]  ;;  %v11326_v55 = vld [vmem:[#allocation90_spill] sm:$0xff] }
 0x5c0   : > { %11300 = vst [vmem:[#allocation242_spill] sm:$0xff] %v8148_v16  ;;  %v8157_v60 = vmul.f32 2.0, %v3799_v19  ;;  %v8169_v16 = vmul.f32 2.0, %v3805_v47  ;;  %v8175_v19 = vmul.f32 2.0, %v3808_v63  ;;  %v8179_v59 = vmul.f32 2.0, %v3810_v11  ;;  %v11322_v63 = vld [vmem:[#allocation86_spill] sm:$0xff] }
 0x5c1   : > { %11308 = vst [vmem:[#allocation246_spill] sm:$0xff] %v8163_v25  ;;  %v8187_v47 = vmul.f32 2.0, %v3814_v18  ;;  %v11324_v11 = vld [vmem:[#allocation88_spill] sm:$0xff]  ;;  %v3825_v51 = vsub.f32 1.0, %v11326_v55  ;;  %v11327_v58 = vld [vmem:[#allocation31_spill] sm:$0xff]  ;;  %v3833_v55 = vsub.f32 1.0, %v11335_v43 }
 0x5c2   : > { %11305 = vst [vmem:[#allocation244_spill] sm:$0xff] %v8157_v60  ;;  %v8181_v60 = vmul.f32 2.0, %v3811_v48  ;;  %v11325_v48 = vld [vmem:[#allocation85_spill] sm:$0xff]  ;;  %v11329_v18 = vld [vmem:[#allocation92_spill] sm:$0xff]  ;;  %6113 = vset.pattern.permute.xlu0 %v6766_v15 }
 0x5c3   : > { %11311 = vst [vmem:[#allocation249_spill] sm:$0xff] %v8169_v16  ;;  %v11320_v16 = vld [vmem:[#allocation84_spill] sm:$0xff]  ;;  %v3824_v26 = vsub.f32 1.0, %v11325_v48  ;;  %v8241_v23 = vmul.f32 2.0, %v3833_v55 }
 0x5c4   : > { %3376 = vperm.xlu2 %6083, %v7789_v40   ;;  %3370 = vperm.xlu1 %6082, %v7789_v40   ;;  %11312 = vst [vmem:[#allocation250_spill] sm:$0xff] %v8173_v24  ;;  %v3818_v25 = vsub.f32 1.0, %v11320_v16  ;;  %v3819_v24 = vsub.f32 1.0, %v11321_v17  ;;  %v3829_v16 = vsub.f32 1.0, %v11330_v4  ;;  %v3830_v17 = vsub.f32 1.0, %v11331_v10  ;;  %v11361_v55 = vld [vmem:[#allocation100_spill] sm:$0xff] }
 0x5c5   : > { %11313 = vst [vmem:[#allocation251_spill] sm:$0xff] %v8175_v19  ;;  %v3820_v19 = vsub.f32 1.0, %v11322_v63  ;;  %v8202_v63 = vmul.f32 2.0, %v3815_v46  ;;  %v11340_v46 = vld [vmem:[#allocation93_spill] sm:$0xff] }
 0x5c6   : > { %11315 = vst [vmem:[#allocation253_spill] sm:$0xff] %v8179_v59  ;;  %v3823_v59 = vsub.f32 1.0, %v11324_v11  ;;  %v11334_v11 = vld [vmem:[#allocation91_spill] sm:$0xff]  ;;  %v8215_v4 = vmul.f32 2.0, %v3819_v24 }
 0x5c7   : > { %11316 = vst [vmem:[#allocation254_spill] sm:$0xff] %v8183_v22  ;;  %v3831_v48 = vsub.f32 1.0, %v11334_v11  ;;  %v8217_v10 = vmul.f32 2.0, %v3820_v19  ;;  %v8223_v11 = vmul.f32 2.0, %v3821_v1  ;;  %v8235_v19 = vmul.f32 2.0, %v3829_v16  ;;  %v11352_v1 = vld [vmem:[#allocation44_spill] sm:$0xff] }
 0x5c8   : > { %11319 = vst [vmem:[#allocation255_spill] sm:$0xff] %v8187_v47  ;;  %1818 = vmatmul.bf16.gmra.mxu0 %v11327_v58  ;;  %v3828_v47 = vsub.f32 1.0, %v11329_v18  ;;  %v8209_v58 = vpop.permute.xlu2 %3188  ;;  %v8213_v18 = vmul.f32 2.0, %v3818_v25  ;;  %v8225_v43 = vmul.f32 2.0, %v3823_v59  ;;  %v8231_v25 = vmul.f32 2.0, %v3826_v54  ;;  %v11353_v59 = vld [vmem:[#allocation95_spill] sm:$0xff] }
 0x5c9   : > { %11332 = vst [vmem:[#allocation31_spill] sm:$0xff] %v8202_v63  ;;  %v3835_v15 = vsub.f32 1.0, %v11352_v1  ;;  %v11356_v54 = vld [vmem:[#allocation99_spill] sm:$0xff]  ;;  %v11358_v16 = vld [vmem:[#allocation101_spill] sm:$0xff] }
 0x5ca   : > { %11336 = vst [vmem:[#allocation257_spill] sm:$0xff] %v8209_v58  ;;  %v8229_v58 = vmul.f32 2.0, %v3825_v51  ;;  %v8233_v24 = vmul.f32 2.0, %v3828_v47  ;;  %v11357_v47 = vld [vmem:[#allocation97_spill] sm:$0xff]  ;;  %v11370_v63 = vld [vmem:[#allocation111_spill] sm:$0xff]  ;;  %3509 = vperm.xlu0 %6113, %v8009_v45  }
 0x5cb   : > { %11337 = vst [vmem:[#allocation258_spill] sm:$0xff] %v8213_v18  ;;  %v11366_v18 = vld [vmem:[#allocation109_spill] sm:$0xff] }
 0x5cc   : > { %6086 = vset.pattern.permute.xlu2 %v6696_v29  ;;  %6085 = vset.pattern.permute.xlu1 %v6699_v30  ;;  %11338 = vst [vmem:[#allocation259_spill] sm:$0xff] %v8215_v4  ;;  %v3834_v29 = vsub.f32 1.0, %v11340_v46  ;;  %v8227_v30 = vmul.f32 2.0, %v3824_v26  ;;  %v8239_v46 = vmul.f32 2.0, %v3831_v48  ;;  %v8245_v26 = vpop.permute.xlu1 %3164  ;;  %v11360_v48 = vld [vmem:[#allocation103_spill] sm:$0xff] }
 0x5cd   : > { %11339 = vst [vmem:[#allocation260_spill] sm:$0xff] %v8217_v10  ;;  %v8237_v10 = vmul.f32 2.0, %v3830_v17  ;;  %v11359_v17 = vld [vmem:[#allocation98_spill] sm:$0xff] }
 0x5ce   : > { %11342 = vst [vmem:[#allocation262_spill] sm:$0xff] %v8223_v11  ;;  %v8247_v51 = vmul.f32 2.0, %v3834_v29  ;;  %v11364_v11 = vld [vmem:[#allocation107_spill] sm:$0xff]  ;;  %v11365_v29 = vld [vmem:[#allocation104_spill] sm:$0xff] }
 0x5cf   : > { %11343 = vst [vmem:[#allocation263_spill] sm:$0xff] %v8225_v43  ;;  %v3836_v43 = vsub.f32 1.0, %v11353_v59  ;;  %v3848_v4 = vsub.f32 1.0, %v11364_v11 }
 0x5d0   : > { %11344 = vst [vmem:[#allocation264_spill] sm:$0xff] %v8227_v30  ;;  %v11363_v30 = vld [vmem:[#allocation102_spill] sm:$0xff]  ;;  %v8287_v22 = vpop.permute.xlu2 %3200 }
 0x5d1   : > { %11345 = vst [vmem:[#allocation265_spill] sm:$0xff] %v8229_v58  ;;  %v11362_v58 = vld [vmem:[#allocation105_spill] sm:$0xff]  ;;  %v3846_v59 = vsub.f32 1.0, %v11363_v30  ;;  %v11371_v30 = vld [vmem:[#allocation42_spill] sm:$0xff] }
 0x5d2   : > { %11346 = vst [vmem:[#allocation266_spill] sm:$0xff] %v8231_v25  ;;  %v3838_v25 = vsub.f32 1.0, %v11356_v54  ;;  %v3845_v1 = vsub.f32 1.0, %v11362_v58  ;;  %v3850_v54 = vsub.f32 1.0, %v11366_v18  ;;  %v8268_v58 = vpop.f32.mrf.mxu2  ;;  %1764 = vmatmul.bf16.gmra.mxu2 %v11371_v30  ;;  %6118 = vset.pattern.permute.xlu0 %v6718_v34 }
 0x5d3   : > { %11347 = vst [vmem:[#allocation267_spill] sm:$0xff] %v8233_v24  ;;  %v3839_v24 = vsub.f32 1.0, %v11357_v47  ;;  %v8261_v47 = vmul.f32 2.0, %v3835_v15  ;;  %v11375_v15 = vld [vmem:[#allocation108_spill] sm:$0xff]  ;;  %v8289_v30 = vmul.f32 2.0, %v3846_v59  ;;  %v11390_v59 = vld [vmem:[#allocation25_spill] sm:$0xff] }
 0x5d4   : > { %11348 = vst [vmem:[#allocation268_spill] sm:$0xff] %v8235_v19  ;;  %v3840_v19 = vsub.f32 1.0, %v11358_v16  ;;  %3394 = vperm.xlu2 %6086, %v7789_v40   ;;  %v8263_v16 = vmul.f32 2.0, %v3836_v43  ;;  %3388 = vperm.xlu1 %6085, %v7789_v40   ;;  %v8271_v11 = vmul.f32 2.0, %v3838_v25  ;;  %v8291_v25 = vmul.f32 2.0, %v3848_v4  ;;  %v11391_v4 = vld [vmem:[#allocation112_spill] sm:$0xff] }
 0x5d5   : > { %11349 = vst [vmem:[#allocation269_spill] sm:$0xff] %v8237_v10  ;;  %v3841_v10 = vsub.f32 1.0, %v11359_v17  ;;  %v11369_v17 = vld [vmem:[#allocation106_spill] sm:$0xff] }
 0x5d6   : > { %11350 = vst [vmem:[#allocation270_spill] sm:$0xff] %v8239_v46  ;;  %v3843_v46 = vsub.f32 1.0, %v11360_v48  ;;  %v3851_v39 = vsub.f32 1.0, %v11369_v17  ;;  %v8275_v18 = vmul.f32 2.0, %v3840_v19  ;;  %v8285_v17 = vmul.f32 2.0, %v3845_v1  ;;  %v11388_v1 = vld [vmem:[#allocation110_spill] sm:$0xff] }
 0x5d7   : > { %11351 = vst [vmem:[#allocation271_spill] sm:$0xff] %v8241_v23  ;;  %v3844_v23 = vsub.f32 1.0, %v11361_v55  ;;  %v8279_v43 = vmul.f32 2.0, %v3841_v10  ;;  %v8295_v19 = vmul.f32 2.0, %v3850_v54  ;;  %v11393_v54 = vld [vmem:[#allocation114_spill] sm:$0xff] }
 0x5d8   : > { %11354 = vst [vmem:[#allocation272_spill] sm:$0xff] %v8245_v26  ;;  %v3853_v26 = vsub.f32 1.0, %v11370_v63  ;;  %v8299_v10 = vmul.f32 2.0, %v3851_v39  ;;  %v11395_v39 = vld [vmem:[#allocation115_spill] sm:$0xff] }
 0x5d9   : > { %11355 = vst [vmem:[#allocation273_spill] sm:$0xff] %v8247_v51  ;;  %v3849_v51 = vsub.f32 1.0, %v11365_v29  ;;  %v8273_v29 = vmul.f32 2.0, %v3839_v24  ;;  %v8283_v63 = vmul.f32 2.0, %v3844_v23  ;;  %v11387_v23 = vld [vmem:[#allocation113_spill] sm:$0xff] }
 0x5da   : > { %11367 = vst [vmem:[#allocation103_spill] sm:$0xff] %v8261_v47  ;;  %v3854_v47 = vsub.f32 1.0, %v11375_v15  ;;  %v3858_v15 = vsub.f32 1.0, %v11390_v59 }
 0x5db   : > { %11368 = vst [vmem:[#allocation100_spill] sm:$0xff] %v8263_v16  ;;  %v8281_v16 = vmul.f32 2.0, %v3843_v46  ;;  %v8293_v24 = vmul.f32 2.0, %v3849_v51  ;;  %v8301_v46 = vmul.f32 2.0, %v3853_v26  ;;  %v11392_v51 = vld [vmem:[#allocation116_spill] sm:$0xff] }
 0x5dc   : > { %11372 = vst [vmem:[#allocation42_spill] sm:$0xff] %v8271_v11  ;;  %v8305_v11 = vmul.f32 2.0, %v3854_v47  ;;  %v11396_v26 = vld [vmem:[#allocation120_spill] sm:$0xff]  ;;  %v11399_v47 = vld [vmem:[#allocation117_spill] sm:$0xff]  ;;  %6088 = vset.pattern.permute.xlu2 %v6708_v32  ;;  %6087 = vset.pattern.permute.xlu1 %v6711_v33  ;;  %v11435_v33 = vld [vmem:[#allocation139_spill] sm:$0xff] }
 0x5dd   : > { %11373 = vst [vmem:[#allocation274_spill] sm:$0xff] %v8273_v29  ;;  %v3856_v29 = vsub.f32 1.0, %v11388_v1  ;;  %v3866_v1 = vsub.f32 1.0, %v11399_v47  ;;  %v8331_v47 = vmul.f32 2.0, %v3858_v15 }
 0x5de   : > { %11374 = vst [vmem:[#allocation275_spill] sm:$0xff] %v8275_v18  ;;  %v8297_v18 = vpop.permute.xlu0 %3024 }
 0x5df   : > { %11376 = vst [vmem:[#allocation276_spill] sm:$0xff] %v8279_v43  ;;  %v3855_v43 = vsub.f32 1.0, %v11387_v23  ;;  %v8315_v23 = vpop.permute.xlu1 %3182 }
 0x5e0   : > { %11377 = vst [vmem:[#allocation277_spill] sm:$0xff] %v8281_v16 }
 0x5e1   : > { %11378 = vst [vmem:[#allocation278_spill] sm:$0xff] %v8285_v17  ;;  %v11401_v17 = vld [vmem:[#allocation119_spill] sm:$0xff] }
 0x5e2   : > { %11379 = vst [vmem:[#allocation279_spill] sm:$0xff] %v8287_v22  ;;  %v3859_v22 = vsub.f32 1.0, %v11391_v4  ;;  %v3869_v4 = vsub.f32 1.0, %v11401_v17 }
 0x5e3   : > { %11380 = vst [vmem:[#allocation280_spill] sm:$0xff] %v8289_v30  ;;  %v11397_v30 = vld [vmem:[#allocation32_spill] sm:$0xff] }
 0x5e4   : > { %11381 = vst [vmem:[#allocation281_spill] sm:$0xff] %v8291_v25  ;;  %v11394_v25 = vld [vmem:[#allocation118_spill] sm:$0xff]  ;;  %1823 = vmatmul.bf16.gmra.mxu0 %v11397_v30  ;;  %v3873_v30 = vsub.f32 1.0, %v11406_v56  ;;  %3406 = vperm.xlu2 %6088, %v7789_v40  }
 0x5e5   : > { %11382 = vst [vmem:[#allocation282_spill] sm:$0xff] %v8293_v24  ;;  %v3860_v24 = vsub.f32 1.0, %v11392_v51  ;;  %v3870_v51 = vsub.f32 1.0, %v11402_v61  ;;  %v11410_v61 = vld [vmem:[#allocation123_spill] sm:$0xff]  ;;  %3400 = vperm.xlu1 %6087, %v7789_v40  }
 0x5e6   : > { %11383 = vst [vmem:[#allocation283_spill] sm:$0xff] %v8295_v19  ;;  %v3861_v19 = vsub.f32 1.0, %v11393_v54  ;;  %v8322_v54 = vmul.f32 2.0, %v3855_v43  ;;  %v3874_v32 = vsub.f32 1.0, %v11410_v61  ;;  %v8357_v61 = vmul.f32 2.0, %v3873_v30  ;;  %v11430_v30 = vld [vmem:[#allocation133_spill] sm:$0xff] }
 0x5e7   : > { %11384 = vst [vmem:[#allocation284_spill] sm:$0xff] %v8297_v18  ;;  %v3863_v18 = vsub.f32 1.0, %v11394_v25  ;;  %v8324_v25 = vmul.f32 2.0, %v3856_v29  ;;  %v8335_v17 = vmul.f32 2.0, %v3860_v24  ;;  %v8353_v24 = vmul.f32 2.0, %v3870_v51  ;;  %v8368_v51 = vpop.permute.xlu0 %3412 }
 0x5e8   : > { %11385 = vst [vmem:[#allocation285_spill] sm:$0xff] %v8299_v10  ;;  %v3864_v10 = vsub.f32 1.0, %v11395_v39  ;;  %v11405_v39 = vld [vmem:[#allocation121_spill] sm:$0xff]  ;;  %v8339_v29 = vmul.f32 2.0, %v3861_v19  ;;  %v11421_v19 = vld [vmem:[#allocation128_spill] sm:$0xff] }
 0x5e9   : > { %11386 = vst [vmem:[#allocation286_spill] sm:$0xff] %v8301_v46  ;;  %v3865_v46 = vsub.f32 1.0, %v11396_v26  ;;  %v3871_v26 = vsub.f32 1.0, %v11405_v39  ;;  %v8341_v43 = vmul.f32 2.0, %v3863_v18  ;;  %v11422_v18 = vld [vmem:[#allocation125_spill] sm:$0xff] }
 0x5ea   : > { %11389 = vst [vmem:[#allocation287_spill] sm:$0xff] %v8305_v11  ;;  %v11400_v11 = vld [vmem:[#allocation122_spill] sm:$0xff]  ;;  %v8343_v39 = vmul.f32 2.0, %v3864_v10  ;;  %v8361_v10 = vpop.permute.xlu2 %3218 }
 0x5eb   : > { %11398 = vst [vmem:[#allocation32_spill] sm:$0xff] %v8315_v23  ;;  %v3868_v59 = vsub.f32 1.0, %v11400_v11  ;;  %v8329_v23 = vpop.f32.mrf.mxu2  ;;  %v8333_v11 = vmul.f32 2.0, %v3859_v22  ;;  %v8345_v56 = vmul.f32 2.0, %v3865_v46  ;;  %v8351_v22 = vmul.f32 2.0, %v3869_v4  ;;  %v11427_v4 = vld [vmem:[#allocation27_spill] sm:$0xff] }
 0x5ec   : > { %11403 = vst [vmem:[#allocation288_spill] sm:$0xff] %v8322_v54  ;;  %v8363_v46 = vmul.f32 2.0, %v3874_v32  ;;  %v11434_v32 = vld [vmem:[#allocation134_spill] sm:$0xff]  ;;  %6091 = vset.pattern.permute.xlu2 %v6718_v34  ;;  %v11625_v34 = vld [vmem:[#allocation232_spill] sm:$0xff] }
 0x5ed   : > { %11404 = vst [vmem:[#allocation289_spill] sm:$0xff] %v8324_v25  ;;  %v8347_v25 = vmul.f32 2.0, %v3866_v1  ;;  %v8349_v15 = vmul.f32 2.0, %v3868_v59  ;;  %v11425_v1 = vld [vmem:[#allocation130_spill] sm:$0xff]  ;;  %v11426_v59 = vld [vmem:[#allocation127_spill] sm:$0xff]  ;;  %6090 = vset.pattern.permute.xlu1 %v6721_v35 }
 0x5ee   : > { %11407 = vst [vmem:[#allocation290_spill] sm:$0xff] %v8331_v47  ;;  %v11433_v47 = vld [vmem:[#allocation132_spill] sm:$0xff] }
 0x5ef   : > { %11408 = vst [vmem:[#allocation291_spill] sm:$0xff] %v8333_v11  ;;  %v3886_v54 = vsub.f32 1.0, %v11433_v47 }
 0x5f0   : > { %11409 = vst [vmem:[#allocation292_spill] sm:$0xff] %v8335_v17  ;;  %v8355_v17 = vmul.f32 2.0, %v3871_v26  ;;  %v11429_v26 = vld [vmem:[#allocation129_spill] sm:$0xff] }
 0x5f1   : > { %11411 = vst [vmem:[#allocation293_spill] sm:$0xff] %v8339_v29  ;;  %v3875_v29 = vsub.f32 1.0, %v11421_v19  ;;  %v11440_v19 = vld [vmem:[#allocation145_spill] sm:$0xff] }
 0x5f2   : > { %11412 = vst [vmem:[#allocation294_spill] sm:$0xff] %v8341_v43  ;;  %v3876_v43 = vsub.f32 1.0, %v11422_v18 }
 0x5f3   : > { %11413 = vst [vmem:[#allocation295_spill] sm:$0xff] %v8343_v39  ;;  %v11432_v39 = vld [vmem:[#allocation136_spill] sm:$0xff]  ;;  %v8388_v47 = vpop.f32.mrf.mxu2 }
 0x5f4   : > { %11414 = vst [vmem:[#allocation296_spill] sm:$0xff] %v8345_v56  ;;  %v3885_v11 = vsub.f32 1.0, %v11432_v39  ;;  %v8386_v39 = vpop.permute.xlu1 %3194  ;;  %3424 = vperm.xlu2 %6091, %v7789_v40  }
 0x5f5   : > { %11415 = vst [vmem:[#allocation297_spill] sm:$0xff] %v8347_v25  ;;  %v3878_v25 = vsub.f32 1.0, %v11425_v1  ;;  %v3888_v1 = vsub.f32 1.0, %v11435_v33  ;;  %3418 = vperm.xlu1 %6090, %v7789_v40  }
 0x5f6   : > { %11416 = vst [vmem:[#allocation298_spill] sm:$0xff] %v8349_v15  ;;  %v3879_v15 = vsub.f32 1.0, %v11426_v59  ;;  %v8404_v18 = vmul.f32 2.0, %v3885_v11  ;;  %v11460_v11 = vld [vmem:[#allocation146_spill] sm:$0xff] }
 0x5f7   : > { %11417 = vst [vmem:[#allocation299_spill] sm:$0xff] %v8351_v22  ;;  %v3880_v22 = vsub.f32 1.0, %v11427_v4  ;;  %v8379_v4 = vmul.f32 2.0, %v3875_v29  ;;  %v8391_v33 = vmul.f32 2.0, %v3878_v25  ;;  %v8410_v25 = vmul.f32 2.0, %v3888_v1  ;;  %v11461_v1 = vld [vmem:[#allocation149_spill] sm:$0xff] }
 0x5f8   : > { %11418 = vst [vmem:[#allocation300_spill] sm:$0xff] %v8353_v24  ;;  %v11431_v24 = vld [vmem:[#allocation131_spill] sm:$0xff] }
 0x5f9   : > { %11419 = vst [vmem:[#allocation301_spill] sm:$0xff] %v8355_v17  ;;  %v3881_v17 = vsub.f32 1.0, %v11429_v26  ;;  %v3884_v56 = vsub.f32 1.0, %v11431_v24  ;;  %v11439_v26 = vld [vmem:[#allocation137_spill] sm:$0xff]  ;;  %v3893_v24 = vsub.f32 1.0, %v11440_v19  ;;  %v8395_v29 = vmul.f32 2.0, %v3880_v22 }
 0x5fa   : > { %11420 = vst [vmem:[#allocation302_spill] sm:$0xff] %v8357_v61  ;;  %v3883_v61 = vsub.f32 1.0, %v11430_v30  ;;  %v3891_v30 = vsub.f32 1.0, %v11439_v26 }
 0x5fb   : > { %11423 = vst [vmem:[#allocation303_spill] sm:$0xff] %v8361_v10  ;;  %v11436_v10 = vld [vmem:[#allocation142_spill] sm:$0xff]  ;;  %v8402_v19 = vmul.f32 2.0, %v3884_v56 }
 0x5fc   : > { %11424 = vst [vmem:[#allocation304_spill] sm:$0xff] %v8363_v46  ;;  %v3889_v46 = vsub.f32 1.0, %v11434_v32  ;;  %v3890_v59 = vsub.f32 1.0, %v11436_v10  ;;  %v11442_v32 = vld [vmem:[#allocation45_spill] sm:$0xff]  ;;  %v8393_v10 = vmul.f32 2.0, %v3879_v15  ;;  %v8400_v26 = vmul.f32 2.0, %v3883_v61  ;;  %6093 = vset.pattern.permute.xlu2 %v6609_v3 }
 0x5fd   : > { %11428 = vst [vmem:[#allocation305_spill] sm:$0xff] %v8368_v51  ;;  %v8381_v51 = vmul.f32 2.0, %v3876_v43  ;;  %1769 = vmatmul.bf16.gmra.mxu2 %v11442_v32  ;;  %v11446_v43 = vld [vmem:[#allocation140_spill] sm:$0xff]  ;;  %v8414_v22 = vmul.f32 2.0, %v3891_v30  ;;  %v8416_v32 = vmul.f32 2.0, %v3893_v24  ;;  %v3903_v30 = vsub.f32 1.0, %v7750_v7 }
 0x5fe   : > { %11437 = vst [vmem:[#allocation306_spill] sm:$0xff] %v8379_v4  ;;  %v3894_v4 = vsub.f32 1.0, %v11446_v43  ;;  %v8408_v16 = vmul.f32 2.0, %v3889_v46  ;;  %v8412_v15 = vmul.f32 2.0, %v3890_v59  ;;  %v11458_v61 = vld [vmem:[#allocation148_spill] sm:$0xff]  ;;  %v3900_v46 = vsub.f32 1.0, %v7741_v9 }
 0x5ff   : > { %11438 = vst [vmem:[#allocation307_spill] sm:$0xff] %v8381_v51  ;;  %v8398_v51 = vmul.f32 2.0, %v3881_v17  ;;  %v11457_v17 = vld [vmem:[#allocation143_spill] sm:$0xff]  ;;  %v11462_v59 = vld [vmem:[#allocation152_spill] sm:$0xff]  ;;  %v3905_v24 = vsub.f32 1.0, %v7762_v44  ;;  %v3910_v9 = vsub.f32 1.0, %v7806_v0 }
 0x600   : > { %11441 = vst [vmem:[#allocation308_spill] sm:$0xff] %v8386_v39  ;;  %v8406_v39 = vmul.f32 2.0, %v3886_v54  ;;  %v3896_v43 = vsub.f32 1.0, %v11457_v17  ;;  %v8420_v56 = vmul.f32 2.0, %v3894_v4  ;;  %v3898_v54 = vsub.f32 1.0, %v7731_v5  ;;  %v8430_v17 = vpop.permute.xlu2 %3230 }
 0x601   : > { %11443 = vst [vmem:[#allocation45_spill] sm:$0xff] %v8391_v33  ;;  %v3906_v4 = vsub.f32 1.0, %v7744_v27  ;;  %v3908_v5 = vsub.f32 1.0, %v7786_v21  ;;  %v3913_v44 = vsub.f32 1.0, %v7823_v12  ;;  %v8446_v27 = vpop.f32.mrf.mxu2  ;;  %v11521_v33 = vld [vmem:[#allocation188_spill] sm:$0xff] }
 0x602   : > { %11444 = vst [vmem:[#allocation309_spill] sm:$0xff] %v8393_v10 }
 0x603   : > { %11445 = vst [vmem:[#allocation310_spill] sm:$0xff] %v8395_v29  ;;  %v11490_v29 = vld [vmem:[#allocation184_spill] sm:$0xff] }
 0x604   : > { %11447 = vst [vmem:[#allocation311_spill] sm:$0xff] %v8398_v51  ;;  %3437 = vperm.xlu2 %6093, %v8009_v45  }
 0x605   : > { %11448 = vst [vmem:[#allocation312_spill] sm:$0xff] %v8400_v26  ;;  %v3895_v26 = vsub.f32 1.0, %v11458_v61  ;;  %v8450_v61 = vmul.f32 2.0, %v3898_v54  ;;  %v8469_v54 = vmul.f32 2.0, %v3908_v5  ;;  %v11481_v5 = vld [vmem:[#allocation170_spill] sm:$0xff] }
 0x606   : > { %11449 = vst [vmem:[#allocation313_spill] sm:$0xff] %v8402_v19  ;;  %v8465_v19 = vmul.f32 2.0, %v3906_v4 }
 0x607   : > { %11450 = vst [vmem:[#allocation314_spill] sm:$0xff] %v8404_v18  ;;  %v3899_v18 = vsub.f32 1.0, %v11460_v11  ;;  %v3909_v11 = vsub.f32 1.0, %v7753_v41  ;;  %v8441_v7 = vmul.f32 2.0, %v3895_v26 }
 0x608   : > { %11451 = vst [vmem:[#allocation315_spill] sm:$0xff] %v8406_v39  ;;  %v8463_v39 = vpop.permute.xlu1 %3212 }
 0x609   : > { %11452 = vst [vmem:[#allocation316_spill] sm:$0xff] %v8408_v16  ;;  %v3901_v16 = vsub.f32 1.0, %v11461_v1  ;;  %v8437_v1 = vpop.permute.xlu0 %2085  ;;  %v8523_v40 = vpop.f32.mrf.mxu2 }
 0x60a   : > { %11453 = vst [vmem:[#allocation317_spill] sm:$0xff] %v8410_v25  ;;  %v3914_v25 = vsub.f32 1.0, %v7792_v31 }
 0x60b   : > { %11454 = vst [vmem:[#allocation318_spill] sm:$0xff] %v8412_v15  ;;  %v3904_v15 = vsub.f32 1.0, %v11462_v59  ;;  %v8439_v59 = vmul.f32 2.0, %v3896_v43  ;;  %v8455_v43 = vmul.f32 2.0, %v3901_v16  ;;  %v8475_v16 = vmul.f32 2.0, %v3913_v44  ;;  %v11484_v44 = vld [vmem:[#allocation178_spill] sm:$0xff] }
 0x60c   : > { %11455 = vst [vmem:[#allocation319_spill] sm:$0xff] %v8414_v22  ;;  %v8452_v22 = vmul.f32 2.0, %v3900_v46  ;;  %v8471_v46 = vmul.f32 2.0, %v3910_v9  ;;  %v8483_v4 = vmul.f32 2.0, %v3914_v25  ;;  %v11482_v9 = vld [vmem:[#allocation175_spill] sm:$0xff]  ;;  %6096 = vset.pattern.permute.xlu2 %v6647_v13 }
 0x60d   : > { %11456 = vst [vmem:[#allocation320_spill] sm:$0xff] %v8416_v32  ;;  %v11463_v32 = vld [vmem:[#allocation33_spill] sm:$0xff]  ;;  %v8457_v26 = vmul.f32 2.0, %v3904_v15  ;;  %v3915_v15 = vsub.f32 1.0, %v7834_v36  ;;  %v11489_v25 = vld [vmem:[#allocation179_spill] sm:$0xff] }
 0x60e   : > { %11459 = vst [vmem:[#allocation321_spill] sm:$0xff] %v8420_v56  ;;  %1828 = vmatmul.bf16.gmra.mxu0 %v11463_v32  ;;  %v3911_v32 = vsub.f32 1.0, %v7771_v57  ;;  %v8448_v56 = vmul.f32 2.0, %v3899_v18  ;;  %v8467_v18 = vmul.f32 2.0, %v3909_v11  ;;  %v11480_v11 = vld [vmem:[#allocation167_spill] sm:$0xff]  ;;  %v11486_v36 = vld [vmem:[#allocation181_spill] sm:$0xff] }
 0x60f   : > { %11464 = vst [vmem:[#allocation33_spill] sm:$0xff] %v8439_v59  ;;  %v8459_v59 = vmul.f32 2.0, %v3903_v30  ;;  %v6319_v30 = vld [vmem:[%s10624_s4] sm:$0x7]  ;;  %v3923_v31 = vsub.f32 1.0, %v11486_v36  ;;  %v8499_v10 = vmul.f32 2.0, %v3915_v15  ;;  %v8504_v36 = vpop.permute.xlu2 %3249 }
 0x610   : > { %11465 = vst [vmem:[#allocation322_spill] sm:$0xff] %v8441_v7  ;;  %v8461_v7 = vmul.f32 2.0, %v3905_v24  ;;  %v8481_v24 = vperm.slane %v6319_v30, 2  ;;  %v11488_v30 = vld [vmem:[#allocation141_spill] sm:$0xff] }
 0x611   : > { %11466 = vst [vmem:[#allocation323_spill] sm:$0xff] %v8448_v56  ;;  %v11485_v56 = vld [vmem:[#allocation176_spill] sm:$0xff]  ;;  %v3912_v12 = vsub.f32 1.0, %v11488_v30  ;;  %v11497_v30 = vld [vmem:[#allocation187_spill] sm:$0xff] }
 0x612   : > { %11467 = vst [vmem:[#allocation324_spill] sm:$0xff] %v8450_v61  ;;  %v3924_v61 = vsub.f32 1.0, %v11485_v56  ;;  %v1706_v56 = vadd.f32 %v8211_v38, %v8481_v24  ;;  %v3928_v57 = vsub.f32 1.0, %v11497_v30  ;;  %v8521_v38 = vmul.f32 2.0, %v3923_v31 }
 0x613   : > { %11468 = vst [vmem:[#allocation325_spill] sm:$0xff] %v8452_v22  ;;  %v8473_v22 = vmul.f32 2.0, %v3911_v32  ;;  %v11483_v32 = vld [vmem:[#allocation173_spill] sm:$0xff] }
 0x614   : > { %11469 = vst [vmem:[#allocation326_spill] sm:$0xff] %v8455_v43  ;;  %v3920_v43 = vsub.f32 1.0, %v11484_v44  ;;  %3455 = vperm.xlu2 %6096, %v8009_v45  }
 0x615   : > { %11470 = vst [vmem:[#allocation327_spill] sm:$0xff] %v8457_v26  ;;  %v3918_v26 = vsub.f32 1.0, %v11482_v9 }
 0x616   : > { %11471 = vst [vmem:[#allocation328_spill] sm:$0xff] %v8459_v59  ;;  %v3921_v59 = vsub.f32 1.0, %v11483_v32  ;;  %v8517_v15 = vmul.f32 2.0, %v3920_v43 }
 0x617   : > { %11472 = vst [vmem:[#allocation329_spill] sm:$0xff] %v8461_v7  ;;  %v3919_v7 = vsub.f32 1.0, %v11481_v5  ;;  %v11491_v5 = vld [vmem:[#allocation144_spill] sm:$0xff] }
 0x618   : > { %11473 = vst [vmem:[#allocation330_spill] sm:$0xff] %v8465_v19  ;;  %v3916_v19 = vsub.f32 1.0, %v11480_v11  ;;  %v3925_v11 = vsub.f32 1.0, %v11490_v29  ;;  %v3837_v9 = vsub.f32 1.0, %v11491_v5  ;;  %v8510_v29 = vmul.f32 2.0, %v3918_v26  ;;  %v8513_v5 = vpop.permute.xlu0 %2570 }
 0x619   : > { %11474 = vst [vmem:[#allocation331_spill] sm:$0xff] %v8467_v18  ;;  %v8528_v26 = vmul.f32 2.0, %v3912_v12  ;;  %v8543_v12 = vmul.f32 2.0, %v3928_v57  ;;  %v11522_v57 = vld [vmem:[#allocation168_spill] sm:$0xff] }
 0x61a   : > { %11475 = vst [vmem:[#allocation332_spill] sm:$0xff] %v8469_v54  ;;  %v8506_v44 = vmul.f32 2.0, %v3916_v19  ;;  %v11502_v19 = vld [vmem:[#allocation47_spill] sm:$0xff]  ;;  %v8532_v30 = vmul.f32 2.0, %v3925_v11 }
 0x61b   : > { %11476 = vst [vmem:[#allocation333_spill] sm:$0xff] %v8471_v46  ;;  %1774 = vmatmul.bf16.gmra.mxu2 %v11502_v19  ;;  %v11514_v11 = vld [vmem:[#allocation155_spill] sm:$0xff]  ;;  %v11520_v46 = vld [vmem:[#allocation165_spill] sm:$0xff] }
 0x61c   : > { %11477 = vst [vmem:[#allocation334_spill] sm:$0xff] %v8473_v22  ;;  %v11492_v22 = vld [vmem:[#allocation147_spill] sm:$0xff] }
 0x61d   : > { %11478 = vst [vmem:[#allocation335_spill] sm:$0xff] %v8475_v16  ;;  %v11487_v16 = vld [vmem:[#allocation138_spill] sm:$0xff]  ;;  %v3917_v32 = vsub.f32 1.0, %v11492_v22  ;;  %v8515_v22 = vmul.f32 2.0, %v3921_v59  ;;  %v1794_v59 = vpop.f32.mrf.mxu0 }
 0x61e   : > { %11479 = vst [vmem:[#allocation336_spill] sm:$0xff] %v8483_v4  ;;  %v3832_v51 = vsub.f32 1.0, %v11487_v16  ;;  %v3926_v4 = vsub.f32 1.0, %v11489_v25  ;;  %v8508_v25 = vmul.f32 2.0, %v3919_v7 }
 0x61f   : > { %11493 = vst [vmem:[#allocation337_spill] sm:$0xff] %v8499_v10  ;;  %v8519_v10 = vmul.f32 2.0, %v3924_v61  ;;  %v8536_v43 = vmul.f32 2.0, %v3917_v32  ;;  %v11509_v61 = vld [vmem:[#allocation182_spill] sm:$0xff] }
 0x620   : > { %11494 = vst [vmem:[#allocation338_spill] sm:$0xff] %v8506_v44  ;;  %v8526_v7 = vmul.f32 2.0, %v3832_v51  ;;  %v3929_v31 = vsub.f32 1.0, %v11509_v61  ;;  %v11511_v51 = vld [vmem:[#allocation153_spill] sm:$0xff]  ;;  %v11515_v44 = vld [vmem:[#allocation158_spill] sm:$0xff]  ;;  %v11518_v61 = vld [vmem:[#allocation35_spill] sm:$0xff] }
 0x621   : > { %11495 = vst [vmem:[#allocation339_spill] sm:$0xff] %v8508_v25  ;;  %v8530_v25 = vmul.f32 2.0, %v3926_v4  ;;  %v11513_v4 = vld [vmem:[#allocation190_spill] sm:$0xff]  ;;  %1833 = vmatmul.bf16.gmra.mxu0 %v11518_v61 }
 0x622   : > { %11496 = vst [vmem:[#allocation340_spill] sm:$0xff] %v8510_v29  ;;  %v3922_v29 = vsub.f32 1.0, %v11511_v51  ;;  %v3934_v51 = vsub.f32 1.0, %v11521_v33 }
 0x623   : > { %11498 = vst [vmem:[#allocation341_spill] sm:$0xff] %v8515_v22  ;;  %v8534_v22 = vmul.f32 2.0, %v3837_v9  ;;  %v3927_v9 = vsub.f32 1.0, %v11515_v44  ;;  %v11524_v44 = vld [vmem:[#allocation191_spill] sm:$0xff] }
 0x624   : > { %11499 = vst [vmem:[#allocation342_spill] sm:$0xff] %v8517_v15  ;;  %v11510_v15 = vld [vmem:[#allocation150_spill] sm:$0xff]  ;;  %v3936_v0 = vsub.f32 1.0, %v11524_v44  ;;  %v8563_v41 = vmul.f32 2.0, %v3922_v29  ;;  %v1708_v44 = vadd.f32 %v8268_v58, %v8481_v24 }
 0x625   : > { %11500 = vst [vmem:[#allocation343_spill] sm:$0xff] %v8519_v10  ;;  %v1795_v10 = vadd.f32 %v1794_v59, %v1706_v56  ;;  %v3842_v19 = vsub.f32 1.0, %v11510_v15  ;;  %v11519_v56 = vld [vmem:[#allocation162_spill] sm:$0xff]  ;;  %v3932_v15 = vsub.f32 1.0, %v11520_v46  ;;  %v11529_v46 = vld [vmem:[#allocation171_spill] sm:$0xff]  ;;  %v8570_v3 = vmul.f32 2.0, %v3927_v9  ;;  %v8588_v9 = vpop.permute.xlu0 %3055 }
 0x626   : > { %11501 = vst [vmem:[#allocation344_spill] sm:$0xff] %v8521_v38  ;;  %v8539_v38 = vpop.permute.xlu1 %3224  ;;  %v3852_v59 = vsub.f32 1.0, %v11519_v56  ;;  %v3937_v54 = vsub.f32 1.0, %v11529_v46  ;;  %v8584_v46 = vmul.f32 2.0, %v3934_v51  ;;  %v11543_v51 = vld [vmem:[#allocation199_spill] sm:$0xff] }
 0x627   : > { %11503 = vst [vmem:[#allocation47_spill] sm:$0xff] %v8526_v7  ;;  %6248 = vtanh.f32 %v1795_v10  ;;  %v8561_v61 = vmul.f32 2.0, %v3842_v19  ;;  %v8582_v29 = vmul.f32 2.0, %v3932_v15  ;;  %v11542_v15 = vld [vmem:[#allocation194_spill] sm:$0xff] }
 0x628   : > { %11504 = vst [vmem:[#allocation345_spill] sm:$0xff] %v8528_v26  ;;  %v11516_v26 = vld [vmem:[#allocation185_spill] sm:$0xff]  ;;  %v8580_v19 = vmul.f32 2.0, %v3852_v59  ;;  %v8598_v59 = vmul.f32 2.0, %v3937_v54 }
 0x629   : > { %11505 = vst [vmem:[#allocation346_spill] sm:$0xff] %v8530_v25  ;;  %v3930_v25 = vsub.f32 1.0, %v11513_v4  ;;  %v3931_v32 = vsub.f32 1.0, %v11516_v26  ;;  %v8556_v4 = vmul.f32 2.0, %v3929_v31  ;;  %v11525_v26 = vld [vmem:[#allocation196_spill] sm:$0xff] }
 0x62a   : > { %11506 = vst [vmem:[#allocation347_spill] sm:$0xff] %v8532_v30  ;;  %v3847_v30 = vsub.f32 1.0, %v11514_v11  ;;  %v3935_v18 = vsub.f32 1.0, %v11525_v26  ;;  %v8576_v26 = vpop.permute.xlu2 %3261 }
 0x62b   : > { %11507 = vst [vmem:[#allocation348_spill] sm:$0xff] %v8534_v22  ;;  %v8566_v33 = vmul.f32 2.0, %v3930_v25  ;;  %v8572_v31 = vmul.f32 2.0, %v3931_v32 }
 0x62c   : > { %11508 = vst [vmem:[#allocation349_spill] sm:$0xff] %v8536_v43  ;;  %v11517_v43 = vld [vmem:[#allocation193_spill] sm:$0xff]  ;;  %v8568_v10 = vmul.f32 2.0, %v3847_v30  ;;  %v1796_v30 = vpop.f32.mrf.mxu0  ;;  %v8594_v58 = vmul.f32 2.0, %v3935_v18 }
 0x62d   : > { %11512 = vst [vmem:[#allocation350_spill] sm:$0xff] %v8543_v12  ;;  %v3933_v22 = vsub.f32 1.0, %v11517_v43  ;;  %v3857_v12 = vsub.f32 1.0, %v11522_v57  ;;  %v11526_v43 = vld [vmem:[#allocation14_spill] sm:$0xff] }
 0x62e   : > { %11523 = vst [vmem:[#allocation155_spill] sm:$0xff] %v8556_v4  ;;  %6092 = vset.pattern.permute.xlu1 %v11526_v43  ;;  %v8578_v43 = vpop.f32.mrf.mxu2  ;;  %v8596_v4 = vpop.eup %6248 }
 0x62f   : > { %11527 = vst [vmem:[#allocation35_spill] sm:$0xff] %v8561_v61  ;;  %v8586_v25 = vmul.f32 2.0, %v3933_v22  ;;  %v8590_v32 = vmul.f32 2.0, %v3857_v12  ;;  %v3779_v22 = vsub.f32 1.0, %v7967_v20  ;;  %v8606_v18 = vpop.permute.xlu1 %3243  ;;  %v3940_v61 = vsub.f32 1.0, %v7943_v28 }
 0x630   : > { %11528 = vst [vmem:[#allocation162_spill] sm:$0xff] %v8563_v41  ;;  %v11545_v41 = vld [vmem:[#allocation177_spill] sm:$0xff]  ;;  %v3523_v28 = vmul.f32 %v8596_v4, %v7967_v20 }
 0x631   : > { %11530 = vst [vmem:[#allocation168_spill] sm:$0xff] %v8566_v33  ;;  %v1797_v33 = vadd.f32 %v1796_v30, %v1708_v44  ;;  %v3882_v12 = vsub.f32 1.0, %v11545_v41  ;;  %v11546_v44 = vld [vmem:[#allocation180_spill] sm:$0xff]  ;;  %v1711_v41 = vadd.f32 %v8329_v23, %v8481_v24  ;;  %v4035_v7 = vmul.f32 2.0, %v3779_v22  ;;  %v11555_v23 = vld [vmem:[#allocation49_spill] sm:$0xff] }
 0x632   : > { %11531 = vst [vmem:[#allocation14_spill] sm:$0xff] %v8570_v3  ;;  %v3962_v30 = vsub.f32 1.0, %v11546_v44 }
 0x633   : > { %11532 = vst [vmem:[#allocation351_spill] sm:$0xff] %v8572_v31  ;;  %v8592_v31 = vmul.f32 2.0, %v3936_v0  ;;  %v3971_v0 = vsub.f32 1.0, %v8069_v37  ;;  %6250 = vtanh.f32 %v1797_v33  ;;  %v3715_v33 = vmul.f32 %v8596_v4, %v8069_v37 }
 0x634   : > { %11533 = vst [vmem:[#allocation352_spill] sm:$0xff] %v8576_v26  ;;  %v3555_v37 = vmul.f32 %v8596_v4, %v11302_v52  ;;  %v1799_v20 = vpop.f32.mrf.mxu0 }
 0x635   : > { %11534 = vst [vmem:[#allocation353_spill] sm:$0xff] %v8582_v29  ;;  %v3939_v29 = vsub.f32 1.0, %v11542_v15 }
 0x636   : > { %11535 = vst [vmem:[#allocation354_spill] sm:$0xff] %v8584_v46  ;;  %v3938_v46 = vsub.f32 1.0, %v11543_v51  ;;  %v11549_v51 = vld [vmem:[#allocation183_spill] sm:$0xff]  ;;  %3431 = vperm.xlu1 %6092, %v8009_v45   ;;  %v8630_v26 = vpop.f32.mrf.mxu2  ;;  %1779 = vmatmul.bf16.gmra.mxu2 %v11555_v23  ;;  %v8645_v23 = vpop.permute.xlu0 %3443 }
 0x637   : > { %11536 = vst [vmem:[#allocation355_spill] sm:$0xff] %v8586_v25  ;;  %v11544_v25 = vld [vmem:[#allocation174_spill] sm:$0xff]  ;;  %v3807_v21 = vsub.f32 1.0, %v11549_v51  ;;  %v8620_v44 = vmul.f32 2.0, %v3939_v29  ;;  %v8628_v51 = vmul.f32 2.0, %v3882_v12  ;;  %v8635_v29 = vmul.f32 2.0, %v3962_v30 }
 0x638   : > { %11537 = vst [vmem:[#allocation356_spill] sm:$0xff] %v8588_v9  ;;  %v3802_v3 = vsub.f32 1.0, %v11544_v25  ;;  %v11550_v25 = vld [vmem:[#allocation192_spill] sm:$0xff]  ;;  %v4227_v9 = vmul.f32 2.0, %v3971_v0 }
 0x639   : > { %11538 = vst [vmem:[#allocation357_spill] sm:$0xff] %v8592_v31  ;;  %v11547_v31 = vld [vmem:[#allocation197_spill] sm:$0xff]  ;;  %v3812_v15 = vsub.f32 1.0, %v11550_v25  ;;  %v8643_v12 = vmul.f32 2.0, %v3807_v21  ;;  %v11561_v21 = vld [vmem:[#allocation36_spill] sm:$0xff] }
 0x63a   : > { %11539 = vst [vmem:[#allocation358_spill] sm:$0xff] %v8594_v58  ;;  %v3941_v54 = vsub.f32 1.0, %v11547_v31  ;;  %v8622_v31 = vmul.f32 2.0, %v3938_v46  ;;  %v8626_v16 = vmul.f32 2.0, %v3802_v3  ;;  %v8641_v3 = vpop.eup %6250  ;;  %1838 = vmatmul.bf16.gmra.mxu0 %v11561_v21 }
 0x63b   : > { %11540 = vst [vmem:[#allocation359_spill] sm:$0xff] %v8596_v4  ;;  %v4068_v0 = vmul.f32 2.0, %v3812_v15  ;;  %v11562_v15 = vld [vmem:[#allocation200_spill] sm:$0xff]  ;;  %v3588_v13 = vmul.f32 %v8641_v3, %v11361_v55  ;;  %v3587_v55 = vmul.f32 %v8596_v4, %v11360_v48 }
 0x63c   : > { %11541 = vst [vmem:[#allocation360_spill] sm:$0xff] %v8598_v59  ;;  %v11548_v59 = vld [vmem:[#allocation198_spill] sm:$0xff]  ;;  %v8637_v46 = vmul.f32 2.0, %v3941_v54  ;;  %v3943_v54 = vsub.f32 1.0, %v7953_v49  ;;  %v1801_v21 = vpop.f32.mrf.mxu0 }
 0x63d   : > { %v3972_v58 = vsub.f32 1.0, %v11548_v59  ;;  %11551 = vst [vmem:[#allocation198_spill] sm:$0xff] %v8620_v44  ;;  %v4483_v44 = vsub.f32 %v3715_v33, %v4227_v9  ;;  %v3716_v52 = vmul.f32 %v8641_v3, %v11548_v59  ;;  %v4323_v9 = vsub.f32 %v3555_v37, %v8181_v60 }
 0x63e   : > { %11552 = vst [vmem:[#allocation192_spill] sm:$0xff] %v8622_v31  ;;  %v8639_v31 = vmul.f32 2.0, %v3940_v61  ;;  %v3524_v61 = vmul.f32 %v8641_v3, %v11255_v53  ;;  %v3944_v33 = vsub.f32 1.0, %v11562_v15  ;;  %v1713_v53 = vadd.f32 %v8388_v47, %v8481_v24  ;;  %6095 = vset.pattern.permute.xlu1 %v6606_v2 }
 0x63f   : > { %11553 = vst [vmem:[#allocation361_spill] sm:$0xff] %v8626_v16  ;;  %v4228_v22 = vmul.f32 2.0, %v3972_v58  ;;  %v3347_v16 = vpop.permute.xlu2 %3346  ;;  %v4291_v58 = vsub.f32 %v3523_v28, %v4035_v7  ;;  %v3973_v28 = vsub.f32 1.0, %v8171_v6  ;;  %v8665_v7 = vpop.permute.xlu1 %3255  ;;  %v8676_v2 = vsel %vm1128_vm2, %v4323_v9, -inf }
 0x640   : > { %11554 = vst [vmem:[#allocation362_spill] sm:$0xff] %v8628_v51  ;;  %v1800_v51 = vadd.f32 %v1799_v20, %v1711_v41  ;;  %v3556_v41 = vmul.f32 %v8641_v3, %v11550_v25  ;;  %v4005_v59 = vsub.f32 1.0, %v3347_v16  ;;  %v4292_v30 = vsub.f32 %v3524_v61, %v8100_v42 }
 0x641   : > { %11556 = vst [vmem:[#allocation49_spill] sm:$0xff] %v8635_v29  ;;  %v4484_v20 = vsub.f32 %v3716_v52, %v4228_v22  ;;  %v4961_v25 = vsel %vm1128_vm2, %v4483_v44, -inf  ;;  %v4547_v37 = vsel %vm1128_vm2, %v4291_v58, -inf  ;;  %v8673_v22 = vpop.f32.mrf.mxu2  ;;  %v4003_v44 = vsub.f32 1.0, %v8021_v8  ;;  %v11571_v29 = vld [vmem:[#allocation189_spill] sm:$0xff] }
 0x642   : > { %11557 = vst [vmem:[#allocation363_spill] sm:$0xff] %v8637_v46  ;;  %6252 = vtanh.f32 %v1800_v51  ;;  %v4324_v60 = vsub.f32 %v3556_v41, %v4068_v0  ;;  %v4548_v42 = vsel %vm1128_vm2, %v4292_v30, -inf  ;;  %v8682_v0 = vmul.f32 2.0, %v4005_v59  ;;  %v11564_v41 = vld [vmem:[#allocation186_spill] sm:$0xff] }
 0x643   : > { %11558 = vst [vmem:[#allocation364_spill] sm:$0xff] %v8639_v31  ;;  %v4962_v51 = vsel %vm1128_vm2, %v4484_v20, -inf  ;;  %v4549_v47 = vmax.f32 %v4547_v37, %v4548_v42  ;;  %v3887_v20 = vsub.f32 1.0, %v11564_v41  ;;  %v8691_v9 = vmul.f32 2.0, %v3943_v54  ;;  %v11589_v31 = vld [vmem:[#allocation52_spill] sm:$0xff] }
 0x644   : > { %11559 = vst [vmem:[#allocation365_spill] sm:$0xff] %v8641_v3  ;;  %v4963_v52 = vmax.f32 %v4961_v25, %v4962_v51  ;;  %v8679_v61 = vsel %vm1128_vm2, %v4324_v60, -inf  ;;  %v4229_v25 = vmul.f32 2.0, %v3973_v28  ;;  %v1802_v60 = vadd.f32 %v1801_v21, %v1713_v53  ;;  %v8708_v53 = vpop.permute.xlu0 %2206  ;;  %v11567_v21 = vld [vmem:[#allocation277_spill] sm:$0xff] }
 0x645   : > { %11560 = vst [vmem:[#allocation366_spill] sm:$0xff] %v8643_v12  ;;  %v4356_v37 = vsub.f32 %v3588_v13, %v8283_v63  ;;  %v8701_v42 = vmul.f32 2.0, %v3944_v33  ;;  %v4006_v30 = vsub.f32 1.0, %v8051_v62  ;;  %v3974_v54 = vsub.f32 1.0, %v8078_v14  ;;  %v11568_v13 = vld [vmem:[#allocation34_spill] sm:$0xff] }
 0x646   : > { %11563 = vst [vmem:[#allocation36_spill] sm:$0xff] %v8665_v7  ;;  %6254 = vtanh.f32 %v1802_v60  ;;  %v4259_v28 = vmul.f32 2.0, %v4003_v44  ;;  %v1716_v63 = vadd.f32 %v8446_v27, %v8481_v24  ;;  %3449 = vperm.xlu1 %6095, %v8009_v45   ;;  %v3747_v33 = vmul.f32 %v8596_v4, %v8021_v8  ;;  %v11569_v60 = vld [vmem:[#allocation228_spill] sm:$0xff] }
 0x647   : > { %11565 = vst [vmem:[#allocation367_spill] sm:$0xff] %v8691_v9  ;;  %v3967_v41 = vsub.f32 1.0, %v11571_v29  ;;  %v4262_v27 = vmul.f32 2.0, %v4006_v30  ;;  %v11573_v29 = vld [vmem:[#allocation254_spill] sm:$0xff]  ;;  %v11585_v9 = vld [vmem:[#allocation240_spill] sm:$0xff] }
 0x648   : > { %v8688_v58 = vpop.eup %6252  ;;  %11566 = vst [vmem:[#allocation368_spill] sm:$0xff] %v8701_v42  ;;  %v4515_v30 = vsub.f32 %v3747_v33, %v4259_v28 }
 0x649   : > { %v8694_v51 = vmul.f32 %v8688_v58, %v3347_v16  ;;  %v3717_v59 = vmul.f32 %v8688_v58, %v8171_v6  ;;  %v3525_v48 = vmul.f32 %v8688_v58, %v11257_v50  ;;  %v4355_v50 = vsub.f32 %v3587_v55, %v11567_v21  ;;  %v3341_v21 = vpop.permute.xlu1 %3340  ;;  %v8728_v8 = vpop.f32.mrf.mxu2 }
 0x64a   : > { %v3557_v44 = vmul.f32 %v8688_v58, %v11568_v13  ;;  %v8724_v55 = vsel %vm1128_vm2, %v4356_v37, -inf }
 0x64b   : > { %v4517_v16 = vsub.f32 %v8694_v51, %v8682_v0  ;;  %v4485_v6 = vsub.f32 %v3717_v59, %v4229_v25  ;;  %v4293_v0 = vsub.f32 %v3525_v48, %v11569_v60  ;;  %v8719_v51 = vmul.f32 2.0, %v3887_v20  ;;  %v1804_v60 = vpop.f32.mrf.mxu0 }
 0x64c   : > { %v4230_v59 = vmul.f32 2.0, %v3974_v54  ;;  %v3748_v48 = vmul.f32 %v8641_v3, %v3341_v21  ;;  %v4004_v20 = vsub.f32 1.0, %v3341_v21  ;;  %v8737_v37 = vpop.eup %6254  ;;  %v1805_v54 = vadd.f32 %v1804_v60, %v1716_v63  ;;  %v11576_v63 = vld [vmem:[#allocation37_spill] sm:$0xff] }
 0x64d   : > { %11570 = vst [vmem:[#allocation277_spill] sm:$0xff] %v8719_v51  ;;  %v4964_v25 = vsel %vm1128_vm2, %v4485_v6, -inf  ;;  %v4550_v13 = vsel %vm1128_vm2, %v4293_v0, -inf  ;;  %v8735_v6 = vsel %vm1128_vm2, %v4355_v50, -inf  ;;  %v3750_v0 = vmul.f32 %v8737_v37, %v8051_v62  ;;  %1843 = vmatmul.bf16.gmra.mxu0 %v11576_v63  ;;  %v11579_v62 = vld [vmem:[#allocation15_spill] sm:$0xff] }
 0x64e   : > { %v8726_v42 = vmax.f32 %v4963_v52, %v4964_v25  ;;  %v8732_v51 = vmax.f32 %v4549_v47, %v4550_v13  ;;  %11572 = vst [vmem:[#allocation34_spill] sm:$0xff] %v8737_v37  ;;  %v4325_v52 = vsub.f32 %v3557_v44, %v11573_v29  ;;  %v4260_v12 = vmul.f32 2.0, %v4004_v20  ;;  %v11575_v13 = vld [vmem:[#allocation208_spill] sm:$0xff]  ;;  %v11577_v29 = vld [vmem:[#allocation51_spill] sm:$0xff]  ;;  %6098 = vset.pattern.permute.xlu2 %v11579_v62 }
 0x64f   : > { %v3718_v47 = vmul.f32 %v8737_v37, %v8078_v14  ;;  %v8748_v21 = vmul.f32 2.0, %v3967_v41  ;;  %v3945_v28 = vsub.f32 1.0, %v11575_v13  ;;  %6256 = vtanh.f32 %v1805_v54  ;;  %v11578_v44 = vld [vmem:[#allocation272_spill] sm:$0xff]  ;;  %v11580_v14 = vld [vmem:[#allocation105_spill] sm:$0xff]  ;;  %v11581_v50 = vld [vmem:[#allocation203_spill] sm:$0xff]  ;;  %6097 = vset.pattern.permute.xlu1 %v11579_v62 }
 0x650   : > { %v3526_v33 = vmul.f32 %v8737_v37, %v11577_v29  ;;  %v3975_v20 = vsub.f32 1.0, %v11578_v44  ;;  %v4516_v60 = vsub.f32 %v3748_v48, %v4260_v12  ;;  %v3589_v15 = vmul.f32 %v8688_v58, %v11580_v14  ;;  %v11582_v54 = vld [vmem:[#allocation78_spill] sm:$0xff]  ;;  %v8765_v48 = vpop.permute.xlu0 %2691 }
 0x651   : > { %11574 = vst [vmem:[#allocation228_spill] sm:$0xff] %v8748_v21  ;;  %v4486_v25 = vsub.f32 %v3718_v47, %v4230_v59  ;;  %v3946_v41 = vsub.f32 1.0, %v11581_v50  ;;  %v4518_v21 = vsub.f32 %v3750_v0, %v4262_v27  ;;  %v3558_v63 = vmul.f32 %v8737_v37, %v11582_v54  ;;  %v11584_v47 = vld [vmem:[#allocation30_spill] sm:$0xff]  ;;  %v8773_v62 = vpop.f32.mrf.mxu2 }
 0x652   : > { %v4619_v13 = vsel %vm1128_vm2, %v4325_v52, -inf  ;;  %v5030_v29 = vsel %vm1128_vm2, %v4515_v30, -inf  ;;  %v5031_v12 = vsel %vm1128_vm2, %v4516_v60, -inf  ;;  %11583 = vst [vmem:[#allocation254_spill] sm:$0xff] %v8765_v48  ;;  %v4294_v14 = vsub.f32 %v3526_v33, %v11584_v47  ;;  %v11586_v54 = vld [vmem:[#allocation278_spill] sm:$0xff] }
 0x653   : > { %v4966_v59 = vsel %vm1128_vm2, %v4486_v25, -inf  ;;  %v3976_v50 = vsub.f32 1.0, %v11585_v9  ;;  %v5032_v49 = vmax.f32 %v5030_v29, %v5031_v12  ;;  %v1718_v27 = vadd.f32 %v8523_v40, %v8481_v24  ;;  %v1806_v60 = vpop.f32.mrf.mxu0 }
 0x654   : > { %v4967_v0 = vmax.f32 %v8726_v42, %v4966_v59  ;;  %v4231_v52 = vmul.f32 2.0, %v3975_v20  ;;  %v5033_v30 = vsel %vm1128_vm2, %v4517_v16, -inf  ;;  %v4357_v46 = vsub.f32 %v3589_v15, %v11586_v54  ;;  %v3365_v42 = vpop.permute.xlu2 %3364  ;;  %v11588_v59 = vld [vmem:[#allocation255_spill] sm:$0xff]  ;;  %v11590_v54 = vld [vmem:[#allocation82_spill] sm:$0xff] }
 0x655   : > { %v11587_v25 = vmax.f32 %v8676_v2, %v8679_v61  ;;  %v8780_v47 = vpop.eup %6256  ;;  %v8782_v29 = vmax.f32 %v5032_v49, %v5033_v30  ;;  %v1807_v12 = vadd.f32 %v1806_v60, %v1718_v27  ;;  %v8785_v40 = vsel %vm1128_vm2, %v4518_v21, -inf  ;;  %v11593_v27 = vld [vmem:[#allocation229_spill] sm:$0xff] }
 0x656   : > { %v4326_v20 = vsub.f32 %v3558_v63, %v11588_v59  ;;  %v3719_v16 = vmul.f32 %v8780_v47, %v11578_v44  ;;  %v3527_v15 = vmul.f32 %v8780_v47, %v11589_v31  ;;  %v3559_v2 = vmul.f32 %v8780_v47, %v11590_v54  ;;  %3461 = vperm.xlu2 %6098, %v8009_v45   ;;  %v11594_v31 = vld [vmem:[#allocation31_spill] sm:$0xff] }
 0x657   : > { %v4620_v33 = vmax.f32 %v11587_v25, %v4619_v13  ;;  %v4552_v61 = vsel %vm1128_vm2, %v4294_v14, -inf  ;;  %v8795_v49 = vmul.f32 2.0, %v3946_v41  ;;  %v8797_v13 = vmul.f32 2.0, %v3945_v28  ;;  %v11595_v25 = vld [vmem:[#allocation195_spill] sm:$0xff]  ;;  %v11596_v14 = vld [vmem:[#allocation160_spill] sm:$0xff] }
 0x658   : > { %6258 = vtanh.f32 %v1807_v12  ;;  %v5036_v21 = vmax.f32 %v8782_v29, %v8785_v40  ;;  %v4008_v63 = vsub.f32 1.0, %v3365_v42  ;;  %v4487_v44 = vsub.f32 %v3719_v16, %v4231_v52  ;;  %3267 = vperm.xlu1 %6097, %v11596_v14  }
 0x659   : > { %11591 = vst [vmem:[#allocation37_spill] sm:$0xff] %v8795_v49  ;;  %v4295_v30 = vsub.f32 %v3527_v15, %v11593_v27  ;;  %v4327_v60 = vsub.f32 %v3559_v2, %v11594_v31  ;;  %v3892_v59 = vsub.f32 1.0, %v11595_v25  ;;  %v1721_v41 = vadd.f32 %v8578_v43, %v8481_v24  ;;  %v3359_v15 = vpop.permute.xlu1 %3358  ;;  %v8815_v2 = vpop.f32.mrf.mxu2  ;;  %v11603_v25 = vld [vmem:[#allocation102_spill] sm:$0xff] }
 0x65a   : > { %11592 = vst [vmem:[#allocation51_spill] sm:$0xff] %v8797_v13  ;;  %v4553_v28 = vmax.f32 %v8732_v51, %v4552_v61  ;;  %v4688_v12 = vsel %vm1128_vm2, %v4357_v46, -inf  ;;  %v4232_v29 = vmul.f32 2.0, %v3976_v50  ;;  %v4968_v40 = vsel %vm1128_vm2, %v4487_v44, -inf  ;;  %v3177_v44 = vpop.permute.xlu0 %3176 }
 0x65b   : > { %v4554_v52 = vsel %vm1128_vm2, %v4295_v30, -inf  ;;  %v4621_v16 = vsel %vm1128_vm2, %v4326_v20, -inf  ;;  %v8813_v54 = vmax.f32 %v4967_v0, %v4968_v40  ;;  %v4623_v31 = vsel %vm1128_vm2, %v4327_v60, -inf  ;;  %v1809_v61 = vpop.f32.mrf.mxu0 }
 0x65c   : > { %v8817_v27 = vmax.f32 %v4553_v28, %v4554_v52  ;;  %v4622_v43 = vmax.f32 %v4620_v33, %v4621_v16  ;;  %v3751_v51 = vmul.f32 %v8780_v47, %v3359_v15  ;;  %v4007_v46 = vsub.f32 1.0, %v3359_v15  ;;  %v11598_v52 = vld [vmem:[#allocation125_spill] sm:$0xff] }
 0x65d   : > { %v4264_v50 = vmul.f32 2.0, %v4008_v63  ;;  %v11597_v30 = vmax.f32 %v8735_v6, %v8724_v55  ;;  %v3817_v40 = vsub.f32 1.0, %v8708_v53  ;;  %v1810_v28 = vadd.f32 %v1809_v61, %v1721_v41  ;;  %v11599_v6 = vld [vmem:[#allocation39_spill] sm:$0xff]  ;;  %v11601_v61 = vld [vmem:[#allocation80_spill] sm:$0xff]  ;;  %v11605_v55 = vld [vmem:[#allocation17_spill] sm:$0xff] }
 0x65e   : > { %v8826_v0 = vpop.eup %6258  ;;  %v3620_v33 = vmul.f32 %v8641_v3, %v11598_v52  ;;  %v8831_v60 = vmax.f32 %v4622_v43, %v4623_v31  ;;  %v4263_v16 = vmul.f32 2.0, %v4007_v46  ;;  %1848 = vmatmul.bf16.gmra.mxu0 %v11599_v6  ;;  %v11602_v52 = vld [vmem:[#allocation19_spill] sm:$0xff]  ;;  %v8846_v49 = vmul.f32 2.0, %v3892_v59  ;;  %v11630_v3 = vld [vmem:[#allocation281_spill] sm:$0xff] }
 0x65f   : > { %v8824_v20 = vmax.f32 %v11597_v30, %v4688_v12  ;;  %v3752_v63 = vmul.f32 %v8826_v0, %v3365_v42  ;;  %v3720_v15 = vmul.f32 %v8826_v0, %v11585_v9  ;;  %6260 = vtanh.f32 %v1810_v28  ;;  %v11600_v30 = vld [vmem:[#allocation57_spill] sm:$0xff]  ;;  %6100 = vset.pattern.permute.xlu2 %v11602_v52 }
 0x660   : > { %v3977_v12 = vsub.f32 1.0, %v3177_v44  ;;  %v3528_v41 = vmul.f32 %v8826_v0, %v11600_v30  ;;  %v3560_v43 = vmul.f32 %v8826_v0, %v11601_v61  ;;  %v4519_v31 = vsub.f32 %v3751_v51, %v4263_v16  ;;  %11604 = vst [vmem:[#allocation272_spill] sm:$0xff] %v8846_v49  ;;  %6099 = vset.pattern.permute.xlu1 %v11605_v55  ;;  %v11606_v30 = vld [vmem:[#allocation230_spill] sm:$0xff] }
 0x661   : > { %v4520_v46 = vsub.f32 %v3752_v63, %v4264_v50  ;;  %v4488_v42 = vsub.f32 %v3720_v15, %v4232_v29  ;;  %v3590_v9 = vmul.f32 %v8737_v37, %v11603_v25  ;;  %v4073_v28 = vmul.f32 2.0, %v3817_v40  ;;  %v11607_v50 = vld [vmem:[#allocation256_spill] sm:$0xff]  ;;  %v8863_v63 = vpop.f32.mrf.mxu2  ;;  %v11653_v37 = vld [vmem:[#allocation283_spill] sm:$0xff] }
 0x662   : > { %v3591_v6 = vmul.f32 %v8780_v47, %v11514_v11  ;;  %v4296_v13 = vsub.f32 %v3528_v41, %v11606_v30  ;;  %v5037_v61 = vsel %vm1128_vm2, %v4519_v31, -inf  ;;  %v4328_v16 = vsub.f32 %v3560_v43, %v11607_v50  ;;  %v11608_v11 = vld [vmem:[#allocation128_spill] sm:$0xff]  ;;  %v3377_v31 = vpop.permute.xlu2 %3376  ;;  %v11611_v50 = vld [vmem:[#allocation54_spill] sm:$0xff] }
 0x663   : > { %v8854_v51 = vsel %vm1128_vm2, %v4520_v46, -inf  ;;  %v4970_v29 = vsel %vm1128_vm2, %v4488_v42, -inf  ;;  %v8858_v25 = vmax.f32 %v5036_v21, %v5037_v61  ;;  %v1723_v59 = vadd.f32 %v8630_v26, %v8481_v24  ;;  %v1811_v41 = vpop.f32.mrf.mxu0  ;;  %v11609_v46 = vld [vmem:[#allocation280_spill] sm:$0xff]  ;;  %v11610_v42 = vld [vmem:[#allocation307_spill] sm:$0xff]  ;;  %v11613_v26 = vld [vmem:[#allocation306_spill] sm:$0xff] }
 0x664   : > { %v4971_v40 = vmax.f32 %v8813_v54, %v4970_v29  ;;  %v3619_v15 = vmul.f32 %v8596_v4, %v11608_v11  ;;  %v4233_v55 = vmul.f32 2.0, %v3977_v12  ;;  %v4358_v30 = vsub.f32 %v3590_v9, %v11609_v46  ;;  %v11612_v9 = vld [vmem:[#allocation210_spill] sm:$0xff] }
 0x665   : > { %v4388_v49 = vsub.f32 %v3620_v33, %v11610_v42  ;;  %v4556_v21 = vsel %vm1128_vm2, %v4296_v13, -inf  ;;  %v8870_v43 = vpop.eup %6260  ;;  %v1812_v54 = vadd.f32 %v1811_v41, %v1723_v59  ;;  %v4359_v61 = vsub.f32 %v3591_v6, %v8568_v10  ;;  %v11614_v10 = vld [vmem:[#allocation231_spill] sm:$0xff] }
 0x666   : > { %v4557_v29 = vmax.f32 %v8817_v27, %v4556_v21  ;;  %v3721_v12 = vmul.f32 %v8870_v43, %v3177_v44  ;;  %v3529_v11 = vmul.f32 %v8870_v43, %v11611_v50  ;;  %v3561_v33 = vmul.f32 %v8870_v43, %v8708_v53  ;;  %v11615_v21 = vld [vmem:[#allocation32_spill] sm:$0xff] }
 0x667   : > { %v4625_v13 = vsel %vm1128_vm2, %v4328_v16, -inf  ;;  %v3948_v46 = vsub.f32 1.0, %v11612_v9  ;;  %6262 = vtanh.f32 %v1812_v54  ;;  %v4010_v42 = vsub.f32 1.0, %v3377_v31  ;;  %3279 = vperm.xlu2 %6100, %v11596_v14   ;;  %v11622_v9 = vld [vmem:[#allocation206_spill] sm:$0xff] }
 0x668   : > { %v4387_v59 = vsub.f32 %v3619_v15, %v11613_v26  ;;  %v4489_v41 = vsub.f32 %v3721_v12, %v4233_v55  ;;  %v4297_v27 = vsub.f32 %v3529_v11, %v11614_v10  ;;  %v4329_v44 = vsub.f32 %v3561_v33, %v4073_v28  ;;  %3467 = vperm.xlu1 %6099, %v8009_v45   ;;  %v3371_v12 = vpop.permute.xlu1 %3370 }
 0x669   : > { %v4690_v6 = vsel %vm1128_vm2, %v4358_v30, -inf  ;;  %v3978_v50 = vsub.f32 1.0, %v11615_v21  ;;  %v1726_v53 = vadd.f32 %v8673_v22, %v8481_v24  ;;  %v4626_v16 = vmax.f32 %v8831_v60, %v4625_v13  ;;  %v8907_v10 = vpop.f32.mrf.mxu2 }
 0x66a   : > { %v8893_v54 = vsel %vm1128_vm2, %v4388_v49, -inf  ;;  %v4972_v15 = vsel %vm1128_vm2, %v4489_v41, -inf  ;;  %v4558_v55 = vsel %vm1128_vm2, %v4297_v27, -inf  ;;  %v4627_v28 = vsel %vm1128_vm2, %v4329_v44, -inf }
 0x66b   : > { %v4692_v30 = vsel %vm1128_vm2, %v4359_v61, -inf  ;;  %v8899_v26 = vmax.f32 %v4971_v40, %v4972_v15  ;;  %v8901_v11 = vmax.f32 %v4557_v29, %v4558_v55  ;;  %v8903_v22 = vmax.f32 %v4626_v16, %v4627_v28  ;;  %v1814_v41 = vpop.f32.mrf.mxu0  ;;  %v11617_v28 = vld [vmem:[#allocation257_spill] sm:$0xff]  ;;  %v11621_v16 = vld [vmem:[#allocation84_spill] sm:$0xff] }
 0x66c   : > { %v4691_v60 = vmax.f32 %v8824_v20, %v4690_v6  ;;  %v3753_v49 = vmul.f32 %v8870_v43, %v3371_v12  ;;  %v4009_v33 = vsub.f32 1.0, %v3371_v12  ;;  %v4266_v13 = vmul.f32 2.0, %v4010_v42 }
 0x66d   : > { %v8910_v27 = vsel %vm1128_vm2, %v4387_v59, -inf  ;;  %v8912_v61 = vpop.eup %6262  ;;  %v4234_v40 = vmul.f32 2.0, %v3978_v50  ;;  %v1815_v44 = vadd.f32 %v1814_v41, %v1726_v53  ;;  %v11616_v59 = vld [vmem:[#allocation53_spill] sm:$0xff]  ;;  %v3979_v12 = vsub.f32 1.0, %v11617_v28  ;;  %v11619_v53 = vld [vmem:[#allocation59_spill] sm:$0xff]  ;;  %v11620_v41 = vld [vmem:[#allocation18_spill] sm:$0xff] }
 0x66e   : > { %v8914_v29 = vmax.f32 %v4691_v60, %v4692_v30  ;;  %v4265_v20 = vmul.f32 2.0, %v4009_v33  ;;  %v3754_v6 = vmul.f32 %v8912_v61, %v3377_v31  ;;  %v3722_v15 = vmul.f32 %v8912_v61, %v11615_v21  ;;  %v11618_v50 = vld [vmem:[#allocation41_spill] sm:$0xff] }
 0x66f   : > { %v4011_v55 = vsub.f32 1.0, %v11616_v59  ;;  %6264 = vtanh.f32 %v1815_v44  ;;  %1853 = vmatmul.bf16.gmra.mxu0 %v11618_v50  ;;  %v3530_v30 = vmul.f32 %v8912_v61, %v11619_v53  ;;  %6102 = vset.pattern.permute.xlu2 %v11620_v41  ;;  %v3562_v42 = vmul.f32 %v8912_v61, %v11621_v16  ;;  %v11624_v44 = vld [vmem:[#allocation107_spill] sm:$0xff]  ;;  %v11626_v53 = vld [vmem:[#allocation201_spill] sm:$0xff] }
 0x670   : > { %v4521_v60 = vsub.f32 %v3753_v49, %v4265_v20  ;;  %v4522_v33 = vsub.f32 %v3754_v6, %v4266_v13  ;;  %v4490_v31 = vsub.f32 %v3722_v15, %v4234_v40  ;;  %v3949_v21 = vsub.f32 1.0, %v11622_v9  ;;  %6101 = vset.pattern.permute.xlu1 %v11602_v52  ;;  %v11627_v16 = vld [vmem:[#allocation213_spill] sm:$0xff] }
 0x671   : > { %v8932_v48 = vmul.f32 2.0, %v3948_v46  ;;  %v3592_v50 = vmul.f32 %v8826_v0, %v11624_v44  ;;  %v4298_v4 = vsub.f32 %v3530_v30, %v11625_v34  ;;  %v3822_v49 = vsub.f32 1.0, %v11626_v53 }
 0x672   : > { %v5041_v13 = vsel %vm1128_vm2, %v4521_v60, -inf  ;;  %v5043_v40 = vsel %vm1128_vm2, %v4522_v33, -inf  ;;  %v4974_v20 = vsel %vm1128_vm2, %v4490_v31, -inf  ;;  %v3950_v6 = vsub.f32 1.0, %v11627_v16 }
 0x673   : > { %11623 = vst [vmem:[#allocation15_spill] sm:$0xff] %v8932_v48  ;;  %v11628_v46 = vmax.f32 %v8858_v25, %v8854_v51  ;;  %v1728_v52 = vadd.f32 %v8728_v8, %v8481_v24  ;;  %v4975_v41 = vmax.f32 %v8899_v26, %v4974_v20  ;;  %v4267_v34 = vmul.f32 2.0, %v4011_v55  ;;  %v1816_v44 = vpop.f32.mrf.mxu0  ;;  %v11629_v48 = vld [vmem:[#allocation258_spill] sm:$0xff]  ;;  %v8957_v25 = vpop.f32.mrf.mxu2  ;;  %v11631_v55 = vld [vmem:[#allocation56_spill] sm:$0xff] }
 0x674   : > { %v4235_v30 = vmul.f32 2.0, %v3979_v12  ;;  %v4330_v60 = vsub.f32 %v3562_v42, %v11629_v48  ;;  %v4560_v33 = vsel %vm1128_vm2, %v4298_v4, -inf  ;;  %v4360_v7 = vsub.f32 %v3592_v50, %v11630_v3  ;;  %v11632_v4 = vld [vmem:[#allocation81_spill] sm:$0xff] }
 0x675   : > { %v5042_v15 = vmax.f32 %v11628_v46, %v5041_v13  ;;  %v8951_v9 = vpop.eup %6264  ;;  %v1817_v16 = vadd.f32 %v1816_v44, %v1728_v52  ;;  %v4561_v51 = vmax.f32 %v8901_v11, %v4560_v33  ;;  %v8965_v12 = vmul.f32 2.0, %v3822_v49  ;;  %v11634_v3 = vld [vmem:[#allocation209_spill] sm:$0xff]  ;;  %v11636_v49 = vld [vmem:[#allocation104_spill] sm:$0xff]  ;;  %v11638_v52 = vld [vmem:[#allocation259_spill] sm:$0xff] }
 0x676   : > { %v3755_v8 = vmul.f32 %v8951_v9, %v11616_v59  ;;  %v3723_v26 = vmul.f32 %v8951_v9, %v11617_v28  ;;  %v3531_v48 = vmul.f32 %v8951_v9, %v11631_v55  ;;  %v3563_v42 = vmul.f32 %v8951_v9, %v11632_v4  ;;  %v11637_v46 = vld [vmem:[#allocation233_spill] sm:$0xff] }
 0x677   : > { %v5044_v31 = vmax.f32 %v5042_v15, %v5043_v40  ;;  %v8967_v13 = vmul.f32 2.0, %v3949_v21  ;;  %v3951_v11 = vsub.f32 1.0, %v11634_v3  ;;  %6266 = vtanh.f32 %v1817_v16  ;;  %3285 = vperm.xlu2 %6102, %v11596_v14  }
 0x678   : > { %v8970_v50 = vmul.f32 2.0, %v3950_v6  ;;  %v4523_v59 = vsub.f32 %v3755_v8, %v4267_v34  ;;  %v4491_v40 = vsub.f32 %v3723_v26, %v4235_v30  ;;  %v4629_v28 = vsel %vm1128_vm2, %v4330_v60, -inf  ;;  %3473 = vperm.xlu1 %6101, %v8009_v45   ;;  %v11639_v6 = vld [vmem:[#allocation308_spill] sm:$0xff]  ;;  %v3389_v60 = vpop.permute.xlu1 %3388 }
 0x679   : > { %11633 = vst [vmem:[#allocation105_spill] sm:$0xff] %v8967_v13  ;;  %v1731_v20 = vadd.f32 %v8773_v62, %v8481_v24  ;;  %v3593_v21 = vmul.f32 %v8870_v43, %v11636_v49  ;;  %v4299_v15 = vsub.f32 %v3531_v48, %v11637_v46  ;;  %v4331_v16 = vsub.f32 %v3563_v42, %v11638_v52  ;;  %v11640_v48 = vld [vmem:[#allocation204_spill] sm:$0xff]  ;;  %v3395_v52 = vpop.permute.xlu2 %3394 }
 0x67a   : > { %11635 = vst [vmem:[#allocation78_spill] sm:$0xff] %v8970_v50  ;;  %v3980_v44 = vsub.f32 1.0, %v11639_v6  ;;  %v5045_v33 = vsel %vm1128_vm2, %v4523_v59, -inf  ;;  %v4976_v34 = vsel %vm1128_vm2, %v4491_v40, -inf  ;;  %v4694_v30 = vsel %vm1128_vm2, %v4360_v7, -inf  ;;  %v11651_v50 = vld [vmem:[#allocation207_spill] sm:$0xff] }
 0x67b   : > { %v8985_v8 = vmax.f32 %v5044_v31, %v5045_v33  ;;  %v8987_v62 = vmax.f32 %v4975_v41, %v4976_v34  ;;  %v4562_v26 = vsel %vm1128_vm2, %v4299_v15, -inf  ;;  %v4630_v55 = vmax.f32 %v8903_v22, %v4629_v28  ;;  %v1819_v49 = vpop.f32.mrf.mxu0  ;;  %v11641_v31 = vld [vmem:[#allocation282_spill] sm:$0xff] }
 0x67c   : > { %v3902_v4 = vsub.f32 1.0, %v11640_v48  ;;  %v4012_v42 = vsub.f32 1.0, %v3389_v60  ;;  %v8992_v46 = vmax.f32 %v4561_v51, %v4562_v26  ;;  %v4631_v59 = vsel %vm1128_vm2, %v4331_v16, -inf  ;;  %v11643_v16 = vld [vmem:[#allocation43_spill] sm:$0xff] }
 0x67d   : > { %v8995_v40 = vpop.eup %6266  ;;  %v1820_v7 = vadd.f32 %v1819_v49, %v1731_v20  ;;  %v4361_v33 = vsub.f32 %v3593_v21, %v11641_v31  ;;  %v8998_v41 = vmax.f32 %v4630_v55, %v4631_v59  ;;  %v4695_v15 = vmax.f32 %v8914_v29, %v4694_v30  ;;  %v11644_v20 = vld [vmem:[#allocation61_spill] sm:$0xff]  ;;  %v11645_v21 = vld [vmem:[#allocation86_spill] sm:$0xff]  ;;  %v11646_v59 = vld [vmem:[#allocation279_spill] sm:$0xff] }
 0x67e   : > { %v4236_v34 = vmul.f32 2.0, %v3980_v44  ;;  %v3756_v22 = vmul.f32 %v8995_v40, %v3389_v60  ;;  %v4268_v28 = vmul.f32 2.0, %v4012_v42  ;;  %v3724_v51 = vmul.f32 %v8995_v40, %v11639_v6  ;;  %v11647_v30 = vld [vmem:[#allocation21_spill] sm:$0xff]  ;;  %v9013_v42 = vpop.f32.mrf.mxu2  ;;  %v11649_v31 = vld [vmem:[#allocation234_spill] sm:$0xff] }
 0x67f   : > { %v9004_v26 = vmul.f32 2.0, %v3951_v11  ;;  %6268 = vtanh.f32 %v1820_v7  ;;  %1858 = vmatmul.bf16.gmra.mxu0 %v11643_v16  ;;  %v3532_v49 = vmul.f32 %v8995_v40, %v11644_v20  ;;  %v3564_v55 = vmul.f32 %v8995_v40, %v11645_v21  ;;  %6105 = vset.pattern.permute.xlu2 %v11647_v30  ;;  %v11648_v11 = vld [vmem:[#allocation109_spill] sm:$0xff]  ;;  %v11650_v20 = vld [vmem:[#allocation260_spill] sm:$0xff] }
 0x680   : > { %v3981_v29 = vsub.f32 1.0, %v11646_v59  ;;  %v4524_v44 = vsub.f32 %v3756_v22, %v4268_v28  ;;  %v4013_v60 = vsub.f32 1.0, %v3395_v52  ;;  %v4492_v6 = vsub.f32 %v3724_v51, %v4236_v34  ;;  %6104 = vset.pattern.permute.xlu1 %v11647_v30  ;;  %v11652_v22 = vld [vmem:[#allocation216_spill] sm:$0xff] }
 0x681   : > { %11642 = vst [vmem:[#allocation30_spill] sm:$0xff] %v9004_v26  ;;  %v3594_v7 = vmul.f32 %v8912_v61, %v11648_v11  ;;  %v4300_v16 = vsub.f32 %v3532_v49, %v11649_v31  ;;  %v4332_v26 = vsub.f32 %v3564_v55, %v11650_v20  ;;  %v4696_v21 = vsel %vm1128_vm2, %v4361_v33, -inf }
 0x682   : > { %v3982_v48 = vsub.f32 1.0, %v11651_v50  ;;  %v3953_v28 = vsub.f32 1.0, %v11652_v22  ;;  %v5047_v3 = vsel %vm1128_vm2, %v4524_v44, -inf  ;;  %v4978_v13 = vsel %vm1128_vm2, %v4492_v6, -inf }
 0x683   : > { %v1733_v34 = vadd.f32 %v8815_v2, %v8481_v24  ;;  %v5048_v51 = vmax.f32 %v8985_v8, %v5047_v3  ;;  %v4979_v30 = vmax.f32 %v8987_v62, %v4978_v13  ;;  %v4564_v49 = vsel %vm1128_vm2, %v4300_v16, -inf  ;;  %v1821_v11 = vpop.f32.mrf.mxu0  ;;  %v11654_v62 = vld [vmem:[#allocation58_spill] sm:$0xff] }
 0x684   : > { %v4269_v55 = vmul.f32 2.0, %v4013_v60  ;;  %v4565_v33 = vmax.f32 %v8992_v46, %v4564_v49  ;;  %v4633_v31 = vsel %vm1128_vm2, %v4332_v26, -inf  ;;  %v9032_v20 = vmax.f32 %v4695_v15, %v4696_v21  ;;  %v11655_v60 = vld [vmem:[#allocation83_spill] sm:$0xff]  ;;  %v11660_v49 = vld [vmem:[#allocation106_spill] sm:$0xff] }
 0x685   : > { %v9034_v44 = vpop.eup %6268  ;;  %v4237_v6 = vmul.f32 2.0, %v3981_v29  ;;  %v1822_v22 = vadd.f32 %v1821_v11, %v1733_v34  ;;  %v4362_v2 = vsub.f32 %v3594_v7, %v11653_v37  ;;  %v4634_v3 = vmax.f32 %v8998_v41, %v4633_v31  ;;  %v11657_v29 = vld [vmem:[#allocation211_spill] sm:$0xff] }
 0x686   : > { %v3757_v13 = vmul.f32 %v9034_v44, %v3395_v52  ;;  %v3725_v8 = vmul.f32 %v9034_v44, %v11646_v59  ;;  %v3533_v46 = vmul.f32 %v9034_v44, %v11654_v62  ;;  %v3565_v15 = vmul.f32 %v9034_v44, %v11655_v60  ;;  %v11659_v7 = vld [vmem:[#allocation235_spill] sm:$0xff]  ;;  %v9061_v31 = vpop.f32.mrf.mxu2 }
 0x687   : > { %v9045_v26 = vmul.f32 2.0, %v3902_v4  ;;  %v4238_v16 = vmul.f32 2.0, %v3982_v48  ;;  %v3954_v21 = vsub.f32 1.0, %v11657_v29  ;;  %6270 = vtanh.f32 %v1822_v22  ;;  %3485 = vperm.xlu2 %6105, %v8009_v45   ;;  %v11661_v48 = vld [vmem:[#allocation262_spill] sm:$0xff] }
 0x688   : > { %v9048_v37 = vmul.f32 2.0, %v3953_v28  ;;  %v4525_v41 = vsub.f32 %v3757_v13, %v4269_v55  ;;  %v4493_v52 = vsub.f32 %v3725_v8, %v4237_v6  ;;  %v4301_v59 = vsub.f32 %v3533_v46, %v11659_v7  ;;  %3291 = vperm.xlu1 %6104, %v11596_v14   ;;  %v3401_v8 = vpop.permute.xlu1 %3400 }
 0x689   : > { %11656 = vst [vmem:[#allocation240_spill] sm:$0xff] %v9045_v26  ;;  %v1736_v34 = vadd.f32 %v8863_v63, %v8481_v24  ;;  %v3595_v4 = vmul.f32 %v8951_v9, %v11660_v49  ;;  %v4333_v11 = vsub.f32 %v3565_v15, %v11661_v48  ;;  %v4698_v22 = vsel %vm1128_vm2, %v4362_v2, -inf  ;;  %v11662_v2 = vld [vmem:[#allocation212_spill] sm:$0xff] }
 0x68a   : > { %11658 = vst [vmem:[#allocation278_spill] sm:$0xff] %v9048_v37  ;;  %v3877_v28 = vsub.f32 1.0, %v8513_v5  ;;  %v5049_v55 = vsel %vm1128_vm2, %v4525_v41, -inf  ;;  %v4980_v6 = vsel %vm1128_vm2, %v4493_v52, -inf  ;;  %v4566_v13 = vsel %vm1128_vm2, %v4301_v59, -inf }
 0x68b   : > { %v9065_v63 = vmax.f32 %v5048_v51, %v5049_v55  ;;  %v9067_v62 = vmax.f32 %v4979_v30, %v4980_v6  ;;  %v9069_v46 = vmax.f32 %v4565_v33, %v4566_v13  ;;  %v4635_v60 = vsel %vm1128_vm2, %v4333_v11, -inf  ;;  %v1824_v49 = vpop.f32.mrf.mxu0  ;;  %v3407_v55 = vpop.permute.xlu2 %3406  ;;  %v11665_v33 = vld [vmem:[#allocation285_spill] sm:$0xff] }
 0x68c   : > { %v3827_v15 = vsub.f32 1.0, %v11662_v2  ;;  %v4014_v7 = vsub.f32 1.0, %v3401_v8  ;;  %v9073_v41 = vmax.f32 %v4634_v3, %v4635_v60  ;;  %v4699_v48 = vmax.f32 %v9032_v20, %v4698_v22  ;;  %v11666_v60 = vld [vmem:[#allocation46_spill] sm:$0xff]  ;;  %v11667_v20 = vld [vmem:[#allocation63_spill] sm:$0xff] }
 0x68d   : > { %v9076_v52 = vpop.eup %6270  ;;  %v9078_v59 = vmul.f32 2.0, %v3954_v21  ;;  %v3983_v51 = vsub.f32 1.0, %v8463_v39  ;;  %v1825_v30 = vadd.f32 %v1824_v49, %v1736_v34  ;;  %v4363_v6 = vsub.f32 %v3595_v4, %v11665_v33 }
 0x68e   : > { %11663 = vst [vmem:[#allocation255_spill] sm:$0xff] %v9076_v52  ;;  %v4133_v13 = vmul.f32 2.0, %v3877_v28  ;;  %v3758_v11 = vmul.f32 %v9076_v52, %v3401_v8  ;;  %v4270_v37 = vmul.f32 2.0, %v4014_v7  ;;  %v3726_v3 = vmul.f32 %v9076_v52, %v11651_v50  ;;  %v11668_v8 = vld [vmem:[#allocation20_spill] sm:$0xff] }
 0x68f   : > { %11664 = vst [vmem:[#allocation52_spill] sm:$0xff] %v9078_v59  ;;  %6272 = vtanh.f32 %v1825_v30  ;;  %1863 = vmatmul.bf16.gmra.mxu0 %v11666_v60  ;;  %v3534_v21 = vmul.f32 %v9076_v52, %v11667_v20  ;;  %v3566_v22 = vmul.f32 %v9076_v52, %v11626_v53  ;;  %v3621_v34 = vmul.f32 %v8688_v58, %v8513_v5  ;;  %v11669_v30 = vld [vmem:[#allocation236_spill] sm:$0xff]  ;;  %v11670_v20 = vld [vmem:[#allocation219_spill] sm:$0xff] }
 0x690   : > { %v9092_v4 = vmul.f32 2.0, %v3827_v15  ;;  %v4526_v28 = vsub.f32 %v3758_v11, %v4270_v37  ;;  %6107 = vset.pattern.permute.xlu2 %v11668_v8  ;;  %v4015_v7 = vsub.f32 1.0, %v3407_v55  ;;  %v4494_v49 = vsub.f32 %v3726_v3, %v4238_v16  ;;  %6106 = vset.pattern.permute.xlu1 %v11668_v8  ;;  %v11680_v59 = vld [vmem:[#allocation263_spill] sm:$0xff] }
 0x691   : > { %v3596_v50 = vmul.f32 %v8995_v40, %v11519_v56  ;;  %v4302_v33 = vsub.f32 %v3534_v21, %v11669_v30  ;;  %v4334_v60 = vsub.f32 %v3566_v22, %v8965_v12  ;;  %v4700_v53 = vsel %vm1128_vm2, %v4363_v6, -inf  ;;  %v9108_v12 = vpop.f32.mrf.mxu2 }
 0x692   : > { %v3955_v5 = vsub.f32 1.0, %v11670_v20  ;;  %v4239_v15 = vmul.f32 2.0, %v3983_v51  ;;  %v5051_v37 = vsel %vm1128_vm2, %v4526_v28, -inf  ;;  %v4982_v11 = vsel %vm1128_vm2, %v4494_v49, -inf }
 0x693   : > { %v1738_v16 = vadd.f32 %v8907_v10, %v8481_v24  ;;  %v5052_v3 = vmax.f32 %v9065_v63, %v5051_v37  ;;  %v4983_v56 = vmax.f32 %v9067_v62, %v4982_v11  ;;  %v4389_v8 = vsub.f32 %v3621_v34, %v4133_v13  ;;  %v1826_v30 = vpop.f32.mrf.mxu0  ;;  %v11675_v11 = vld [vmem:[#allocation241_spill] sm:$0xff] }
 0x694   : > { %v4271_v21 = vmul.f32 2.0, %v4015_v7  ;;  %v4568_v6 = vsel %vm1128_vm2, %v4302_v33, -inf  ;;  %v4637_v51 = vsel %vm1128_vm2, %v4334_v60, -inf  ;;  %v9112_v22 = vmax.f32 %v4699_v48, %v4700_v53  ;;  %v11672_v7 = vld [vmem:[#allocation60_spill] sm:$0xff]  ;;  %v11674_v53 = vld [vmem:[#allocation214_spill] sm:$0xff] }
 0x695   : > { %v9114_v28 = vpop.eup %6272  ;;  %v1827_v49 = vadd.f32 %v1826_v30, %v1738_v16  ;;  %v4364_v10 = vsub.f32 %v3596_v50, %v8580_v19  ;;  %v4569_v63 = vmax.f32 %v9069_v46, %v4568_v6  ;;  %v4638_v62 = vmax.f32 %v9073_v41, %v4637_v51  ;;  %v11673_v60 = vld [vmem:[#allocation88_spill] sm:$0xff]  ;;  %v11676_v19 = vld [vmem:[#allocation303_spill] sm:$0xff]  ;;  %v11677_v46 = vld [vmem:[#allocation305_spill] sm:$0xff] }
 0x696   : > { %11671 = vst [vmem:[#allocation82_spill] sm:$0xff] %v9114_v28  ;;  %v3759_v13 = vmul.f32 %v9114_v28, %v3407_v55  ;;  %v3727_v34 = vmul.f32 %v9114_v28, %v8463_v39  ;;  %v3535_v33 = vmul.f32 %v9114_v28, %v11672_v7  ;;  %v3567_v48 = vmul.f32 %v9114_v28, %v11673_v60  ;;  %v11678_v39 = vld [vmem:[#allocation237_spill] sm:$0xff]  ;;  %v11679_v7 = vld [vmem:[#allocation111_spill] sm:$0xff] }
 0x697   : > { %v3956_v37 = vsub.f32 1.0, %v11674_v53  ;;  %v3792_v16 = vsub.f32 1.0, %v11675_v11  ;;  %v3984_v50 = vsub.f32 1.0, %v11676_v19  ;;  %6274 = vtanh.f32 %v1827_v49 }
 0x698   : > { %v4016_v41 = vsub.f32 1.0, %v11677_v46  ;;  %v4527_v30 = vsub.f32 %v3759_v13, %v4271_v21  ;;  %3491 = vperm.xlu2 %6107, %v8009_v45   ;;  %v4495_v55 = vsub.f32 %v3727_v34, %v4239_v15  ;;  %v4303_v6 = vsub.f32 %v3535_v33, %v11678_v39  ;;  %3297 = vperm.xlu1 %6106, %v11596_v14  }
 0x699   : > { %v1741_v51 = vadd.f32 %v8957_v25, %v8481_v24  ;;  %v3597_v60 = vmul.f32 %v9034_v44, %v11679_v7  ;;  %v4335_v53 = vsub.f32 %v3567_v48, %v11680_v59  ;;  %v4702_v49 = vsel %vm1128_vm2, %v4364_v10, -inf }
 0x69a   : > { %v5053_v20 = vsel %vm1128_vm2, %v4527_v30, -inf  ;;  %v4984_v21 = vsel %vm1128_vm2, %v4495_v55, -inf  ;;  %v4570_v15 = vsel %vm1128_vm2, %v4303_v6, -inf  ;;  %v4757_v13 = vsel %vm1128_vm2, %v4389_v8, -inf }
 0x69b   : > { %v9143_v34 = vmax.f32 %v5052_v3, %v5053_v20  ;;  %v9145_v25 = vmax.f32 %v4983_v56, %v4984_v21  ;;  %v9147_v33 = vmax.f32 %v4569_v63, %v4570_v15  ;;  %v4639_v39 = vsel %vm1128_vm2, %v4335_v53, -inf  ;;  %v1829_v10 = vpop.f32.mrf.mxu0  ;;  %v3419_v20 = vpop.permute.xlu1 %3418  ;;  %v11683_v3 = vld [vmem:[#allocation286_spill] sm:$0xff] }
 0x69c   : > { %v9150_v7 = vmul.f32 2.0, %v3955_v5  ;;  %v4272_v59 = vmul.f32 2.0, %v4016_v41  ;;  %v9152_v48 = vmax.f32 %v4638_v62, %v4639_v39  ;;  %v4703_v30 = vmax.f32 %v9112_v22, %v4702_v49  ;;  %v11685_v5 = vld [vmem:[#allocation215_spill] sm:$0xff]  ;;  %v9166_v15 = vpop.f32.mrf.mxu2  ;;  %v11689_v49 = vld [vmem:[#allocation22_spill] sm:$0xff] }
 0x69d   : > { %v9155_v55 = vpop.eup %6274  ;;  %v4048_v6 = vmul.f32 2.0, %v3792_v16  ;;  %v1830_v8 = vadd.f32 %v1829_v10, %v1741_v51  ;;  %v4365_v56 = vsub.f32 %v3597_v60, %v11683_v3  ;;  %v11684_v63 = vmax.f32 %v8910_v27, %v8893_v54  ;;  %v11686_v51 = vld [vmem:[#allocation48_spill] sm:$0xff]  ;;  %v11687_v27 = vld [vmem:[#allocation85_spill] sm:$0xff]  ;;  %v11690_v10 = vld [vmem:[#allocation23_spill] sm:$0xff] }
 0x69e   : > { %11681 = vst [vmem:[#allocation229_spill] sm:$0xff] %v9150_v7  ;;  %v3907_v53 = vsub.f32 1.0, %v11685_v5  ;;  %v4240_v41 = vmul.f32 2.0, %v3984_v50  ;;  %v3760_v62 = vmul.f32 %v9155_v55, %v11677_v46  ;;  %v3728_v22 = vmul.f32 %v9155_v55, %v11676_v19  ;;  %v11691_v19 = vld [vmem:[#allocation108_spill] sm:$0xff] }
 0x69f   : > { %11682 = vst [vmem:[#allocation31_spill] sm:$0xff] %v9155_v55  ;;  %v9161_v21 = vmax.f32 %v11684_v63, %v4757_v13  ;;  %v3985_v16 = vsub.f32 1.0, %v8539_v38  ;;  %6276 = vtanh.f32 %v1830_v8  ;;  %1868 = vmatmul.bf16.gmra.mxu0 %v11686_v51  ;;  %v3536_v54 = vmul.f32 %v9155_v55, %v11675_v11  ;;  %v11692_v63 = vld [vmem:[#allocation264_spill] sm:$0xff] }
 0x6a0   : > { %v3568_v60 = vmul.f32 %v9155_v55, %v11687_v27  ;;  %v9176_v50 = vmul.f32 2.0, %v3956_v37  ;;  %6110 = vset.pattern.permute.xlu2 %v11689_v49  ;;  %v4017_v46 = vsub.f32 1.0, %v3419_v20  ;;  %v4528_v13 = vsub.f32 %v3760_v62, %v4272_v59  ;;  %6109 = vset.pattern.permute.xlu1 %v11690_v10  ;;  %v11694_v27 = vld [vmem:[#allocation217_spill] sm:$0xff] }
 0x6a1   : > { %v4496_v39 = vsub.f32 %v3728_v22, %v4240_v41  ;;  %v3598_v8 = vmul.f32 %v9076_v52, %v11691_v19  ;;  %v4304_v3 = vsub.f32 %v3536_v54, %v4048_v6  ;;  %v4704_v11 = vsel %vm1128_vm2, %v4365_v56, -inf }
 0x6a2   : > { %11688 = vst [vmem:[#allocation160_spill] sm:$0xff] %v9176_v50  ;;  %v4336_v51 = vsub.f32 %v3568_v60, %v11692_v63  ;;  %v9184_v7 = vmul.f32 2.0, %v3907_v53  ;;  %v3959_v37 = vsub.f32 1.0, %v11694_v27  ;;  %v5055_v50 = vsel %vm1128_vm2, %v4528_v13, -inf  ;;  %v11699_v63 = vld [vmem:[#allocation218_spill] sm:$0xff]  ;;  %v11704_v27 = vld [vmem:[#allocation265_spill] sm:$0xff] }
 0x6a3   : > { %v4986_v29 = vsel %vm1128_vm2, %v4496_v39, -inf  ;;  %v4241_v59 = vmul.f32 2.0, %v3985_v16  ;;  %v1743_v41 = vadd.f32 %v9013_v42, %v8481_v24  ;;  %v5056_v62 = vmax.f32 %v9143_v34, %v5055_v50  ;;  %v1831_v54 = vpop.f32.mrf.mxu0  ;;  %v3425_v39 = vpop.permute.xlu2 %3424  ;;  %v11696_v16 = vld [vmem:[#allocation287_spill] sm:$0xff]  ;;  %v11697_v50 = vld [vmem:[#allocation65_spill] sm:$0xff] }
 0x6a4   : > { %11693 = vst [vmem:[#allocation125_spill] sm:$0xff] %v9184_v7  ;;  %v4987_v6 = vmax.f32 %v9145_v25, %v4986_v29  ;;  %v4273_v22 = vmul.f32 2.0, %v4017_v46  ;;  %v4572_v56 = vsel %vm1128_vm2, %v4304_v3, -inf  ;;  %v4641_v53 = vsel %vm1128_vm2, %v4336_v51, -inf }
 0x6a5   : > { %v9195_v60 = vmax.f32 %v4703_v30, %v4704_v11  ;;  %v9197_v10 = vpop.eup %6276  ;;  %v1832_v13 = vadd.f32 %v1831_v54, %v1743_v41  ;;  %v4366_v19 = vsub.f32 %v3598_v8, %v11696_v16  ;;  %v4573_v42 = vmax.f32 %v9147_v33, %v4572_v56  ;;  %v11698_v30 = vld [vmem:[#allocation90_spill] sm:$0xff]  ;;  %v11700_v11 = vld [vmem:[#allocation221_spill] sm:$0xff]  ;;  %v11701_v8 = vld [vmem:[#allocation220_spill] sm:$0xff] }
 0x6a6   : > { %11695 = vst [vmem:[#allocation39_spill] sm:$0xff] %v9197_v10  ;;  %v4642_v34 = vmax.f32 %v9152_v48, %v4641_v53  ;;  %v3761_v29 = vmul.f32 %v9197_v10, %v3419_v20  ;;  %v3729_v25 = vmul.f32 %v9197_v10, %v8539_v38  ;;  %v3537_v46 = vmul.f32 %v9197_v10, %v11697_v50  ;;  %v9213_v20 = vpop.f32.mrf.mxu2  ;;  %v11702_v56 = vld [vmem:[#allocation238_spill] sm:$0xff]  ;;  %v11703_v50 = vld [vmem:[#allocation113_spill] sm:$0xff] }
 0x6a7   : > { %v3569_v3 = vmul.f32 %v9197_v10, %v11698_v30  ;;  %v3987_v51 = vsub.f32 1.0, %v11699_v63  ;;  %v3958_v41 = vsub.f32 1.0, %v11700_v11  ;;  %v3961_v54 = vsub.f32 1.0, %v11701_v8 }
 0x6a8   : > { %6278 = vtanh.f32 %v1832_v13  ;;  %v4529_v33 = vsub.f32 %v3761_v29, %v4273_v22  ;;  %3309 = vperm.xlu2 %6110, %v11596_v14   ;;  %v4018_v48 = vsub.f32 1.0, %v3425_v39  ;;  %v4497_v38 = vsub.f32 %v3729_v25, %v4241_v59  ;;  %3497 = vperm.xlu1 %6109, %v8009_v45  }
 0x6a9   : > { %v4305_v53 = vsub.f32 %v3537_v46, %v11702_v56  ;;  %v1746_v16 = vadd.f32 %v9061_v31, %v8481_v24  ;;  %v3599_v30 = vmul.f32 %v9114_v28, %v11703_v50  ;;  %v4337_v8 = vsub.f32 %v3569_v3, %v11704_v27 }
 0x6aa   : > { %v4706_v22 = vsel %vm1128_vm2, %v4366_v19, -inf  ;;  %v3986_v13 = vsub.f32 1.0, %v8430_v17  ;;  %v5057_v29 = vsel %vm1128_vm2, %v4529_v33, -inf  ;;  %v4988_v59 = vsel %vm1128_vm2, %v4497_v38, -inf }
 0x6ab   : > { %v4574_v25 = vsel %vm1128_vm2, %v4305_v53, -inf  ;;  %v9227_v46 = vmax.f32 %v5056_v62, %v5057_v29  ;;  %v9229_v31 = vmax.f32 %v4987_v6, %v4988_v59  ;;  %v4643_v50 = vsel %vm1128_vm2, %v4337_v8, -inf  ;;  %v1834_v19 = vpop.f32.mrf.mxu0  ;;  %v3432_v53 = vpop.permute.xlu1 %3431 }
 0x6ac   : > { %v9231_v56 = vmax.f32 %v4573_v42, %v4574_v25  ;;  %v9234_v11 = vmul.f32 2.0, %v3959_v37  ;;  %v4274_v27 = vmul.f32 2.0, %v4018_v48  ;;  %v9236_v3 = vmax.f32 %v4642_v34, %v4643_v50  ;;  %v11708_v42 = vld [vmem:[#allocation288_spill] sm:$0xff]  ;;  %v11711_v48 = vld [vmem:[#allocation87_spill] sm:$0xff]  ;;  %v11713_v25 = vld [vmem:[#allocation26_spill] sm:$0xff] }
 0x6ad   : > { %v4707_v33 = vmax.f32 %v9195_v60, %v4706_v22  ;;  %v9241_v38 = vmul.f32 2.0, %v3987_v51  ;;  %v9243_v62 = vmul.f32 2.0, %v3958_v41  ;;  %v1835_v6 = vadd.f32 %v1834_v19, %v1746_v16  ;;  %v11710_v51 = vld [vmem:[#allocation62_spill] sm:$0xff]  ;;  %v11712_v22 = vld [vmem:[#allocation224_spill] sm:$0xff]  ;;  %v11715_v19 = vld [vmem:[#allocation239_spill] sm:$0xff] }
 0x6ae   : > { %11705 = vst [vmem:[#allocation57_spill] sm:$0xff] %v9234_v11  ;;  %v9239_v26 = vpop.eup %6278  ;;  %v4367_v29 = vsub.f32 %v3599_v30, %v11708_v42  ;;  %v4242_v59 = vmul.f32 2.0, %v3986_v13  ;;  %v9251_v60 = vmul.f32 2.0, %v3961_v54  ;;  %v3960_v30 = vsub.f32 1.0, %v11712_v22  ;;  %v11716_v42 = vld [vmem:[#allocation266_spill] sm:$0xff] }
 0x6af   : > { %11706 = vst [vmem:[#allocation80_spill] sm:$0xff] %v9239_v26  ;;  %v3762_v37 = vmul.f32 %v9239_v26, %v3425_v39  ;;  %v1913_v8 = vpack.c.bf16 %v9239_v26, %v9197_v10  ;;  %v3730_v34 = vmul.f32 %v9239_v26, %v8430_v17  ;;  %6280 = vtanh.f32 %v1835_v6  ;;  %v11714_v17 = vld [vmem:[#allocation110_spill] sm:$0xff] }
 0x6b0   : > { %11707 = vst [vmem:[#allocation19_spill] sm:$0xff] %v9243_v62  ;;  %v3538_v41 = vmul.f32 %v9239_v26, %v11710_v51  ;;  %v3570_v16 = vmul.f32 %v9239_v26, %v11711_v48  ;;  %6112 = vset.pattern.permute.xlu2 %v11713_v25  ;;  %v4019_v39 = vsub.f32 1.0, %v3432_v53  ;;  %6111 = vset.pattern.permute.xlu1 %v11689_v49  ;;  %v11717_v48 = vld [vmem:[#allocation223_spill] sm:$0xff] }
 0x6b1   : > { %11709 = vst [vmem:[#allocation102_spill] sm:$0xff] %v9251_v60  ;;  %v4530_v13 = vsub.f32 %v3762_v37, %v4274_v27  ;;  %1930 = vmatpush.bf16.msrb.mxu3 %v1913_v8  ;;  %v4498_v50 = vsub.f32 %v3730_v34, %v4242_v59  ;;  %v3600_v54 = vmul.f32 %v9155_v55, %v11714_v17  ;;  %v4708_v60 = vsel %vm1128_vm2, %v4367_v29, -inf  ;;  %v9269_v8 = vpop.f32.mrf.mxu2 }
 0x6b2   : > { %v4306_v6 = vsub.f32 %v3538_v41, %v11715_v19  ;;  %v4338_v51 = vsub.f32 %v3570_v16, %v11716_v42  ;;  %v3964_v11 = vsub.f32 1.0, %v11717_v48  ;;  %v1912_v37 = vpack.c.bf16 %v9155_v55, %v9114_v28  ;;  %v11719_v48 = vld [vmem:[#allocation289_spill] sm:$0xff] }
 0x6b3   : > { %v5059_v27 = vsel %vm1128_vm2, %v4530_v13, -inf  ;;  %v4990_v49 = vsel %vm1128_vm2, %v4498_v50, -inf  ;;  %v1748_v59 = vadd.f32 %v9108_v12, %v8481_v24  ;;  %v1911_v41 = vpack.c.bf16 %v9076_v52, %v9034_v44  ;;  %v1836_v25 = vpop.f32.mrf.mxu0  ;;  %v3438_v12 = vpop.permute.xlu2 %3437 }
 0x6b4   : > { %v5060_v34 = vmax.f32 %v9227_v46, %v5059_v27  ;;  %v4991_v29 = vmax.f32 %v9229_v31, %v4990_v49  ;;  %v4275_v16 = vmul.f32 2.0, %v4019_v39  ;;  %v4576_v13 = vsel %vm1128_vm2, %v4306_v6, -inf  ;;  %v11720_v6 = vld [vmem:[#allocation67_spill] sm:$0xff] }
 0x6b5   : > { %1931 = vmatpush.bf16.msrb.mxu3 %v1912_v37  ;;  %v4645_v17 = vsel %vm1128_vm2, %v4338_v51, -inf  ;;  %v9280_v19 = vmax.f32 %v4707_v33, %v4708_v60  ;;  %v9282_v50 = vpop.eup %6280  ;;  %v1837_v42 = vadd.f32 %v1836_v25, %v1748_v59  ;;  %v4368_v46 = vsub.f32 %v3600_v54, %v11719_v48  ;;  %v11723_v54 = vld [vmem:[#allocation222_spill] sm:$0xff] }
 0x6b6   : > { %11718 = vst [vmem:[#allocation17_spill] sm:$0xff] %v9282_v50  ;;  %v4577_v27 = vmax.f32 %v9231_v56, %v4576_v13  ;;  %v4646_v62 = vmax.f32 %v9236_v3, %v4645_v17  ;;  %v3763_v31 = vmul.f32 %v9282_v50, %v3432_v53  ;;  %v3731_v39 = vmul.f32 %v9282_v50, %v11699_v63 }
 0x6b7   : > { %v3539_v51 = vmul.f32 %v9282_v50, %v11720_v6  ;;  %v3571_v33 = vmul.f32 %v9282_v50, %v11662_v2  ;;  %v9294_v60 = vmul.f32 2.0, %v3960_v30  ;;  %v9296_v37 = vmul.f32 2.0, %v3964_v11  ;;  %v11724_v11 = vld [vmem:[#allocation242_spill] sm:$0xff] }
 0x6b8   : > { %v3862_v48 = vsub.f32 1.0, %v11723_v54  ;;  %6282 = vtanh.f32 %v1837_v42  ;;  %v3988_v56 = vsub.f32 1.0, %v8606_v18  ;;  %v4531_v3 = vsub.f32 %v3763_v31, %v4275_v16  ;;  %3315 = vperm.xlu2 %6112, %v11596_v14   ;;  %3503 = vperm.xlu1 %6111, %v8009_v45  }
 0x6b9   : > { %11721 = vst [vmem:[#allocation230_spill] sm:$0xff] %v9294_v60  ;;  %1932 = vmatpush.bf16.msrb.mxu3 %v1911_v41  ;;  %v4020_v63 = vsub.f32 1.0, %v3438_v12  ;;  %v4499_v53 = vsub.f32 %v3731_v39, %v9241_v38  ;;  %v1751_v49 = vadd.f32 %v9166_v15, %v8481_v24  ;;  %v3601_v2 = vmul.f32 %v9197_v10, %v11522_v57  ;;  %v9322_v39 = vpop.f32.mrf.mxu2 }
 0x6ba   : > { %11722 = vst [vmem:[#allocation256_spill] sm:$0xff] %v9296_v37  ;;  %v4307_v30 = vsub.f32 %v3539_v51, %v11724_v11  ;;  %v4339_v59 = vsub.f32 %v3571_v33, %v9092_v4  ;;  %v5061_v16 = vsel %vm1128_vm2, %v4531_v3, -inf  ;;  %v1910_v41 = vpack.c.bf16 %v8995_v40, %v8951_v9  ;;  %v11726_v11 = vld [vmem:[#allocation64_spill] sm:$0xff] }
 0x6bb   : > { %v4992_v25 = vsel %vm1128_vm2, %v4499_v53, -inf  ;;  %v4710_v38 = vsel %vm1128_vm2, %v4368_v46, -inf  ;;  %v9314_v13 = vmul.f32 2.0, %v3862_v48  ;;  %v9316_v15 = vmax.f32 %v5060_v34, %v5061_v16  ;;  %v1839_v31 = vpop.f32.mrf.mxu0 }
 0x6bc   : > { %v9318_v17 = vmax.f32 %v4991_v29, %v4992_v25  ;;  %v4578_v57 = vsel %vm1128_vm2, %v4307_v30, -inf  ;;  %v3989_v42 = vsub.f32 1.0, %v8504_v36  ;;  %v4276_v4 = vmul.f32 2.0, %v4020_v63  ;;  %v11727_v30 = vld [vmem:[#allocation38_spill] sm:$0xff] }
 0x6bd   : > { %1933 = vmatpush.bf16.msrb.mxu3 %v1910_v41  ;;  %v9324_v6 = vmax.f32 %v4577_v27, %v4578_v57  ;;  %v4647_v51 = vsel %vm1128_vm2, %v4339_v59, -inf  ;;  %v1840_v33 = vadd.f32 %v1839_v31, %v1751_v49  ;;  %v4369_v34 = vsub.f32 %v3601_v2, %v8590_v32  ;;  %v11728_v49 = vld [vmem:[#allocation92_spill] sm:$0xff]  ;;  %v11731_v41 = vld [vmem:[#allocation25_spill] sm:$0xff]  ;;  %v11733_v31 = vld [vmem:[#allocation267_spill] sm:$0xff] }
 0x6be   : > { %v9327_v46 = vpop.eup %6282  ;;  %v9330_v29 = vmax.f32 %v4646_v62, %v4647_v51  ;;  %v4711_v48 = vmax.f32 %v9280_v19, %v4710_v38  ;;  %v4244_v3 = vmul.f32 2.0, %v3988_v56  ;;  %v3963_v59 = vsub.f32 1.0, %v11727_v30  ;;  %v11729_v62 = vld [vmem:[#allocation28_spill] sm:$0xff]  ;;  %v11732_v38 = vld [vmem:[#allocation243_spill] sm:$0xff] }
 0x6bf   : > { %11725 = vst [vmem:[#allocation128_spill] sm:$0xff] %v9327_v46  ;;  %v3764_v63 = vmul.f32 %v9327_v46, %v3438_v12  ;;  %v3732_v53 = vmul.f32 %v9327_v46, %v8606_v18  ;;  %v3540_v27 = vmul.f32 %v9327_v46, %v11726_v11  ;;  %v3797_v16 = vsub.f32 1.0, %v8437_v1  ;;  %v11734_v11 = vld [vmem:[#allocation50_spill] sm:$0xff] }
 0x6c0   : > { %6284 = vtanh.f32 %v1840_v33  ;;  %v3572_v32 = vmul.f32 %v9327_v46, %v11728_v49  ;;  %v3966_v2 = vsub.f32 1.0, %v11729_v62  ;;  %v4021_v19 = vsub.f32 1.0, %v8645_v23  ;;  %6115 = vset.pattern.permute.xlu2 %v6721_v35  ;;  %6114 = vset.pattern.permute.xlu1 %v6721_v35 }
 0x6c1   : > { %v4532_v56 = vsub.f32 %v3764_v63, %v4276_v4  ;;  %v11730_v18 = vpack.c.bf16 %v8912_v61, %v8870_v43  ;;  %v4500_v12 = vsub.f32 %v3732_v53, %v4244_v3  ;;  %v3602_v25 = vmul.f32 %v9239_v26, %v11731_v41 }
 0x6c2   : > { %v4308_v57 = vsub.f32 %v3540_v27, %v11732_v38  ;;  %v4340_v51 = vsub.f32 %v3572_v32, %v11733_v31  ;;  %v4712_v33 = vsel %vm1128_vm2, %v4369_v34, -inf  ;;  %v3942_v4 = vsub.f32 1.0, %v11734_v11  ;;  %v11736_v38 = vld [vmem:[#allocation290_spill] sm:$0xff]  ;;  %v9375_v31 = vpop.f32.mrf.mxu2 }
 0x6c3   : > { %1934 = vmatpush.bf16.msrb.mxu3 %v11730_v18  ;;  %v4245_v63 = vmul.f32 2.0, %v3989_v42  ;;  %v5063_v49 = vsel %vm1128_vm2, %v4532_v56, -inf  ;;  %v4994_v62 = vsel %vm1128_vm2, %v4500_v12, -inf  ;;  %v4053_v18 = vmul.f32 2.0, %v3797_v16  ;;  %v1841_v41 = vpop.f32.mrf.mxu0 }
 0x6c4   : > { %v1753_v35 = vadd.f32 %v9213_v20, %v8481_v24  ;;  %v5064_v3 = vmax.f32 %v9316_v15, %v5063_v49  ;;  %v4995_v53 = vmax.f32 %v9318_v17, %v4994_v62  ;;  %v4277_v27 = vmul.f32 2.0, %v4021_v19  ;;  %v3450_v20 = vpop.permute.xlu1 %3449 }
 0x6c5   : > { %v11735_v34 = vpack.c.bf16 %v8826_v0, %v8780_v47  ;;  %v4580_v42 = vsel %vm1128_vm2, %v4308_v57, -inf  ;;  %v4649_v32 = vsel %vm1128_vm2, %v4340_v51, -inf  ;;  %v9366_v56 = vmax.f32 %v4711_v48, %v4712_v33  ;;  %v11737_v51 = vld [vmem:[#allocation89_spill] sm:$0xff] }
 0x6c6   : > { %v9368_v16 = vpop.eup %6284  ;;  %v1842_v12 = vadd.f32 %v1841_v41, %v1753_v35  ;;  %v4370_v15 = vsub.f32 %v3602_v25, %v11736_v38  ;;  %v4581_v17 = vmax.f32 %v9324_v6, %v4580_v42  ;;  %v4650_v62 = vmax.f32 %v9330_v29, %v4649_v32  ;;  %v11741_v29 = vld [vmem:[#allocation227_spill] sm:$0xff]  ;;  %v11742_v35 = vld [vmem:[#allocation34_spill] sm:$0xff]  ;;  %v11745_v32 = vld [vmem:[#allocation268_spill] sm:$0xff] }
 0x6c7   : > { %1935 = vmatpush.bf16.msrb.mxu3 %v11735_v34  ;;  %v3765_v19 = vmul.f32 %v9368_v16, %v8645_v23  ;;  %v3733_v57 = vmul.f32 %v9368_v16, %v8504_v36  ;;  %v3541_v48 = vmul.f32 %v9368_v16, %v8437_v1  ;;  %v3573_v33 = vmul.f32 %v9368_v16, %v11737_v51  ;;  %v11746_v38 = vld [vmem:[#allocation36_spill] sm:$0xff] }
 0x6c8   : > { %v9383_v49 = vmul.f32 2.0, %v3963_v59  ;;  %v9385_v25 = vmul.f32 2.0, %v3966_v2  ;;  %v9387_v6 = vmul.f32 2.0, %v3942_v4  ;;  %6286 = vtanh.f32 %v1842_v12  ;;  %3515 = vperm.xlu2 %6115, %v8009_v45   ;;  %3321 = vperm.xlu1 %6114, %v11596_v14   ;;  %v11744_v2 = vld [vmem:[#allocation112_spill] sm:$0xff] }
 0x6c9   : > { %v3965_v23 = vsub.f32 1.0, %v11741_v29  ;;  %v11743_v36 = vpack.c.bf16 %v11742_v35, %v8688_v58  ;;  %v4022_v41 = vsub.f32 1.0, %v3450_v20  ;;  %v4533_v1 = vsub.f32 %v3765_v19, %v4277_v27 }
 0x6ca   : > { %11738 = vst [vmem:[#allocation280_spill] sm:$0xff] %v9383_v49  ;;  %v4501_v34 = vsub.f32 %v3733_v57, %v4245_v63  ;;  %v1756_v59 = vadd.f32 %v9269_v8, %v8481_v24  ;;  %v3603_v4 = vmul.f32 %v9282_v50, %v11744_v2  ;;  %v4309_v42 = vsub.f32 %v3541_v48, %v4053_v18  ;;  %v11747_v63 = vld [vmem:[#allocation225_spill] sm:$0xff]  ;;  %v3456_v8 = vpop.permute.xlu2 %3455  ;;  %v11750_v49 = vld [vmem:[#allocation359_spill] sm:$0xff] }
 0x6cb   : > { %11739 = vst [vmem:[#allocation307_spill] sm:$0xff] %v9385_v25  ;;  %1936 = vmatpush.bf16.msrb.mxu3 %v11743_v36  ;;  %v4341_v12 = vsub.f32 %v3573_v33, %v11745_v32  ;;  %v3990_v51 = vsub.f32 1.0, %v11746_v38  ;;  %v5065_v25 = vsel %vm1128_vm2, %v4533_v1, -inf  ;;  %v4714_v27 = vsel %vm1128_vm2, %v4370_v15, -inf  ;;  %v1844_v33 = vpop.f32.mrf.mxu0  ;;  %v11749_v32 = vld [vmem:[#allocation365_spill] sm:$0xff] }
 0x6cc   : > { %11740 = vst [vmem:[#allocation54_spill] sm:$0xff] %v9387_v6  ;;  %v4996_v36 = vsel %vm1128_vm2, %v4501_v34, -inf  ;;  %v3969_v19 = vsub.f32 1.0, %v11747_v63  ;;  %v9405_v57 = vmax.f32 %v5064_v3, %v5065_v25  ;;  %v4582_v2 = vsel %vm1128_vm2, %v4309_v42, -inf  ;;  %v11752_v25 = vld [vmem:[#allocation291_spill] sm:$0xff] }
 0x6cd   : > { %v9407_v37 = vmax.f32 %v4995_v53, %v4996_v36  ;;  %v9410_v18 = vmul.f32 2.0, %v3965_v23  ;;  %v4278_v48 = vmul.f32 2.0, %v4022_v41  ;;  %v11751_v1 = vpack.c.bf16 %v11749_v32, %v11750_v49 }
 0x6ce   : > { %v9415_v34 = vmax.f32 %v4581_v17, %v4582_v2  ;;  %v4651_v15 = vsel %vm1128_vm2, %v4341_v12, -inf  ;;  %v9418_v63 = vpop.eup %6286  ;;  %v1845_v3 = vadd.f32 %v1844_v33, %v1756_v59  ;;  %v4371_v53 = vsub.f32 %v3603_v4, %v11752_v25  ;;  %v11754_v12 = vld [vmem:[#allocation69_spill] sm:$0xff]  ;;  %v11755_v4 = vld [vmem:[#allocation94_spill] sm:$0xff]  ;;  %v11756_v33 = vld [vmem:[#allocation40_spill] sm:$0xff] }
 0x6cf   : > { %11748 = vst [vmem:[#allocation306_spill] sm:$0xff] %v9410_v18  ;;  %1937 = vmatpush.bf16.msrb.mxu3 %v11751_v1  ;;  %v9421_v36 = vmax.f32 %v4650_v62, %v4651_v15  ;;  %v4715_v23 = vmax.f32 %v9366_v56, %v4714_v27  ;;  %v4246_v42 = vmul.f32 2.0, %v3990_v51  ;;  %v3766_v41 = vmul.f32 %v9418_v63, %v3450_v20  ;;  %v11757_v27 = vld [vmem:[#allocation24_spill] sm:$0xff]  ;;  %v9437_v1 = vpop.f32.mrf.mxu2  ;;  %v11760_v17 = vld [vmem:[#allocation269_spill] sm:$0xff] }
 0x6d0   : > { %v3734_v18 = vmul.f32 %v9418_v63, %v11746_v38  ;;  %v9429_v2 = vmul.f32 2.0, %v3969_v19  ;;  %6288 = vtanh.f32 %v1845_v3  ;;  %v3542_v59 = vmul.f32 %v9418_v63, %v11754_v12  ;;  %6117 = vset.pattern.permute.xlu2 %v11757_v27  ;;  %v11758_v15 = vld [vmem:[#allocation352_spill] sm:$0xff]  ;;  %6116 = vset.pattern.permute.xlu1 %v11757_v27 }
 0x6d1   : > { %v3574_v62 = vmul.f32 %v9418_v63, %v11755_v4  ;;  %v3968_v56 = vsub.f32 1.0, %v11756_v33  ;;  %v4534_v51 = vsub.f32 %v3766_v41, %v4278_v48  ;;  %v4023_v20 = vsub.f32 1.0, %v3456_v8  ;;  %v11759_v19 = vld [vmem:[#allocation76_spill] sm:$0xff]  ;;  %v11761_v4 = vld [vmem:[#allocation226_spill] sm:$0xff] }
 0x6d2   : > { %11753 = vst [vmem:[#allocation231_spill] sm:$0xff] %v9429_v2  ;;  %v4502_v38 = vsub.f32 %v3734_v18, %v4246_v42  ;;  %v3991_v25 = vsub.f32 1.0, %v11758_v15  ;;  %v4310_v3 = vsub.f32 %v3542_v59, %v11759_v19  ;;  %v4716_v2 = vsel %vm1128_vm2, %v4371_v53, -inf  ;;  %v11762_v33 = vld [vmem:[#allocation116_spill] sm:$0xff]  ;;  %v11763_v18 = vld [vmem:[#allocation29_spill] sm:$0xff]  ;;  %v3268_v19 = vpop.permute.xlu1 %3267  ;;  %v3462_v50 = vpop.permute.xlu2 %3461 }
 0x6d3   : > { %v4342_v12 = vsub.f32 %v3574_v62, %v11760_v17  ;;  %v3867_v29 = vsub.f32 1.0, %v11761_v4  ;;  %v5067_v48 = vsel %vm1128_vm2, %v4534_v51, -inf  ;;  %v3604_v30 = vmul.f32 %v9327_v46, %v11762_v33  ;;  %v1846_v62 = vpop.f32.mrf.mxu0 }
 0x6d4   : > { %v4998_v41 = vsel %vm1128_vm2, %v4502_v38, -inf  ;;  %v3947_v42 = vsub.f32 1.0, %v11763_v18  ;;  %v1758_v27 = vadd.f32 %v9322_v39, %v8481_v24  ;;  %v5068_v59 = vmax.f32 %v9405_v57, %v5067_v48 }
 0x6d5   : > { %v4999_v17 = vmax.f32 %v9407_v37, %v4998_v41  ;;  %v4279_v53 = vmul.f32 2.0, %v4023_v20  ;;  %v4584_v60 = vsel %vm1128_vm2, %v4310_v3, -inf  ;;  %v4653_v51 = vsel %vm1128_vm2, %v4342_v12, -inf  ;;  %v11765_v20 = vld [vmem:[#allocation66_spill] sm:$0xff]  ;;  %v11766_v12 = vld [vmem:[#allocation292_spill] sm:$0xff] }
 0x6d6   : > { %v9456_v38 = vmax.f32 %v4715_v23, %v4716_v2  ;;  %v9458_v22 = vpop.eup %6288  ;;  %v4247_v33 = vmul.f32 2.0, %v3991_v25  ;;  %v1847_v46 = vadd.f32 %v1846_v62, %v1758_v27  ;;  %v4585_v39 = vmax.f32 %v9415_v34, %v4584_v60  ;;  %v11768_v25 = vld [vmem:[#allocation91_spill] sm:$0xff] }
 0x6d7   : > { %11764 = vst [vmem:[#allocation32_spill] sm:$0xff] %v9458_v22  ;;  %v4654_v57 = vmax.f32 %v9421_v36, %v4653_v51  ;;  %v3767_v48 = vmul.f32 %v9458_v22, %v3456_v8  ;;  %v3735_v37 = vmul.f32 %v9458_v22, %v11758_v15  ;;  %v3543_v3 = vmul.f32 %v9458_v22, %v11765_v20  ;;  %v3274_v15 = vpop.permute.xlu0 %3273 }
 0x6d8   : > { %v4372_v23 = vsub.f32 %v3604_v30, %v11766_v12  ;;  %v9468_v2 = vmul.f32 2.0, %v3968_v56  ;;  %v9470_v41 = vmul.f32 2.0, %v3867_v29  ;;  %6290 = vtanh.f32 %v1847_v46  ;;  %3521 = vperm.xlu2 %6117, %v8009_v45   ;;  %3327 = vperm.xlu1 %6116, %v11596_v14   ;;  %v11770_v30 = vld [vmem:[#allocation244_spill] sm:$0xff]  ;;  %v11771_v56 = vld [vmem:[#allocation270_spill] sm:$0xff] }
 0x6d9   : > { %v3575_v60 = vmul.f32 %v9458_v22, %v11768_v25  ;;  %v4535_v34 = vsub.f32 %v3767_v48, %v4279_v53  ;;  %v4024_v8 = vsub.f32 1.0, %v3462_v50  ;;  %v3992_v36 = vsub.f32 1.0, %v3268_v19  ;;  %v9485_v48 = vpop.f32.mrf.mxu2 }
 0x6da   : > { %11767 = vst [vmem:[#allocation53_spill] sm:$0xff] %v9468_v2  ;;  %v4503_v27 = vsub.f32 %v3735_v37, %v4247_v33  ;;  %v1761_v51 = vadd.f32 %v9375_v31, %v8481_v24  ;;  %v4311_v29 = vsub.f32 %v3543_v3, %v11770_v30  ;;  %v9481_v20 = vmul.f32 2.0, %v3947_v42  ;;  %v11773_v37 = vld [vmem:[#allocation261_spill] sm:$0xff]  ;;  %v11774_v31 = vld [vmem:[#allocation284_spill] sm:$0xff] }
 0x6db   : > { %v4343_v46 = vsub.f32 %v3575_v60, %v11771_v56  ;;  %v5069_v53 = vsel %vm1128_vm2, %v4535_v34, -inf  ;;  %v9488_v33 = vsel %vm1128_vm2, %v4372_v23, -inf  ;;  %v3872_v12 = vsub.f32 1.0, %v11773_v37  ;;  %v1849_v30 = vpop.f32.mrf.mxu0  ;;  %v3468_v23 = vpop.permute.xlu1 %3467 }
 0x6dc   : > { %11772 = vst [vmem:[#allocation257_spill] sm:$0xff] %v9481_v20  ;;  %v5000_v45 = vsel %vm1128_vm2, %v4503_v27, -inf  ;;  %v3952_v25 = vsub.f32 1.0, %v11774_v31  ;;  %v9492_v14 = vmax.f32 %v5068_v59, %v5069_v53  ;;  %v4280_v60 = vmul.f32 2.0, %v4024_v8 }
 0x6dd   : > { %v9494_v3 = vmax.f32 %v4999_v17, %v5000_v45  ;;  %v4248_v42 = vmul.f32 2.0, %v3992_v36  ;;  %v4586_v34 = vsel %vm1128_vm2, %v4311_v29, -inf  ;;  %v4655_v27 = vsel %vm1128_vm2, %v4343_v46, -inf  ;;  %v11776_v17 = vld [vmem:[#allocation356_spill] sm:$0xff]  ;;  %v11778_v45 = vld [vmem:[#allocation138_spill] sm:$0xff] }
 0x6de   : > { %v9498_v56 = vpop.eup %6290  ;;  %v1850_v62 = vadd.f32 %v1849_v30, %v1761_v51  ;;  %v9500_v2 = vmax.f32 %v4585_v39, %v4586_v34  ;;  %v9502_v20 = vmax.f32 %v4654_v57, %v4655_v27  ;;  %v3957_v8 = vsub.f32 1.0, %v11776_v17  ;;  %v9513_v51 = vpop.permute.xlu2 %3279  ;;  %v11777_v39 = vld [vmem:[#allocation71_spill] sm:$0xff] }
 0x6df   : > { %11775 = vst [vmem:[#allocation41_spill] sm:$0xff] %v9498_v56  ;;  %v3768_v36 = vmul.f32 %v9498_v56, %v3462_v50  ;;  %v3736_v29 = vmul.f32 %v9498_v56, %v3268_v19  ;;  %v9511_v53 = vmul.f32 2.0, %v3872_v12  ;;  %v3544_v57 = vmul.f32 %v9498_v56, %v11777_v39  ;;  %v11780_v19 = vld [vmem:[#allocation114_spill] sm:$0xff]  ;;  %v11781_v12 = vld [vmem:[#allocation245_spill] sm:$0xff] }
 0x6e0   : > { %6292 = vtanh.f32 %v1850_v62  ;;  %v3576_v30 = vmul.f32 %v9498_v56, %v11778_v45  ;;  %v4025_v59 = vsub.f32 1.0, %v3468_v23  ;;  %v3993_v50 = vsub.f32 1.0, %v3274_v15  ;;  %v11782_v62 = vld [vmem:[#allocation47_spill] sm:$0xff] }
 0x6e1   : > { %v4536_v34 = vsub.f32 %v3768_v36, %v4280_v60  ;;  %v4504_v27 = vsub.f32 %v3736_v29, %v4248_v42  ;;  %v9519_v17 = vmul.f32 2.0, %v3952_v25  ;;  %v3605_v46 = vmul.f32 %v9368_v16, %v11780_v19  ;;  %v11785_v29 = vld [vmem:[#allocation194_spill] sm:$0xff] }
 0x6e2   : > { %v4312_v31 = vsub.f32 %v3544_v57, %v11781_v12  ;;  %v4344_v18 = vsub.f32 %v3576_v30, %v11782_v62  ;;  %v9525_v26 = vmul.f32 2.0, %v3957_v8  ;;  %v9531_v60 = vmul.f32 %v11750_v49, %v11685_v5  ;;  %v11787_v12 = vld [vmem:[#allocation293_spill] sm:$0xff] }
 0x6e3   : > { %11779 = vst [vmem:[#allocation59_spill] sm:$0xff] %v9519_v17  ;;  %v5071_v39 = vsel %vm1128_vm2, %v4536_v34, -inf  ;;  %v5002_v10 = vsel %vm1128_vm2, %v4504_v27, -inf  ;;  %v1763_v25 = vadd.f32 %v9437_v1, %v8481_v24  ;;  %v9539_v57 = vmul.f32 %v11750_v49, %v11785_v29  ;;  %v1851_v30 = vpop.f32.mrf.mxu0  ;;  %v9541_v34 = vpop.f32.mrf.mxu2  ;;  %v11804_v17 = vld [vmem:[#allocation157_spill] sm:$0xff] }
 0x6e4   : > { %11783 = vst [vmem:[#allocation18_spill] sm:$0xff] %v9525_v26  ;;  %v5072_v42 = vmax.f32 %v9492_v14, %v5071_v39  ;;  %v5003_v36 = vmax.f32 %v9494_v3, %v5002_v10  ;;  %v4281_v8 = vmul.f32 2.0, %v4025_v59  ;;  %v4249_v45 = vmul.f32 2.0, %v3993_v50  ;;  %v11788_v50 = vld [vmem:[#allocation68_spill] sm:$0xff]  ;;  %v11802_v26 = vld [vmem:[#allocation93_spill] sm:$0xff] }
 0x6e5   : > { %11784 = vst [vmem:[#allocation84_spill] sm:$0xff] %v9531_v60  ;;  %v4588_v27 = vsel %vm1128_vm2, %v4312_v31, -inf  ;;  %v4657_v5 = vsel %vm1128_vm2, %v4344_v18, -inf  ;;  %v1852_v1 = vadd.f32 %v1851_v30, %v1763_v25  ;;  %v4373_v14 = vsub.f32 %v3605_v46, %v11787_v12  ;;  %v11789_v39 = vld [vmem:[#allocation96_spill] sm:$0xff]  ;;  %v11790_v18 = vld [vmem:[#allocation163_spill] sm:$0xff]  ;;  %v11793_v30 = vld [vmem:[#allocation246_spill] sm:$0xff] }
 0x6e6   : > { %11786 = vst [vmem:[#allocation107_spill] sm:$0xff] %v9539_v57  ;;  %v9545_v19 = vpop.eup %6292  ;;  %v4589_v10 = vmax.f32 %v9500_v2, %v4588_v27  ;;  %v4658_v3 = vmax.f32 %v9502_v20, %v4657_v5  ;;  %v9558_v25 = vmul.f32 %v11749_v32, %v11790_v18  ;;  %v1766_v5 = vadd.f32 %v9485_v48, %v8481_v24 }
 0x6e7   : > { %v3769_v49 = vmul.f32 %v9545_v19, %v3468_v23  ;;  %v3737_v59 = vmul.f32 %v9545_v19, %v3274_v15  ;;  %v3545_v62 = vmul.f32 %v9545_v19, %v11788_v50  ;;  %v3577_v31 = vmul.f32 %v9545_v19, %v11789_v39  ;;  %v11794_v50 = vld [vmem:[#allocation271_spill] sm:$0xff] }
 0x6e8   : > { %6294 = vtanh.f32 %v1852_v1  ;;  %11791 = vst [vmem:[#allocation232_spill] sm:$0xff] %v9558_v25  ;;  %v3994_v15 = vsub.f32 1.0, %v9513_v51  ;;  %v3286_v1 = vpop.permute.xlu2 %3285  ;;  %v3606_v12 = vmul.f32 %v9418_v63, %v11723_v54  ;;  %v4720_v18 = vsel %vm1128_vm2, %v4373_v14, -inf }
 0x6e9   : > { %v4537_v23 = vsub.f32 %v3769_v49, %v4281_v8  ;;  %v4505_v29 = vsub.f32 %v3737_v59, %v4249_v45  ;;  %v4313_v27 = vsub.f32 %v3545_v62, %v11793_v30  ;;  %v4345_v39 = vsub.f32 %v3577_v31, %v11794_v50  ;;  %v11795_v45 = vld [vmem:[#allocation202_spill] sm:$0xff] }
 0x6ea   : > { %v9576_v49 = vmul.f32 %v11749_v32, %v11795_v45  ;;  %v3474_v30 = vpop.permute.xlu1 %3473  ;;  %v4250_v14 = vmul.f32 2.0, %v3994_v15  ;;  %v11797_v32 = vmax.f32 %v9456_v38, %v9488_v33  ;;  %v9614_v33 = vmul.f32 %v8688_v58, %v11804_v17 }
 0x6eb   : > { %v5073_v2 = vsel %vm1128_vm2, %v4537_v23, -inf  ;;  %v5004_v8 = vsel %vm1128_vm2, %v4505_v29, -inf  ;;  %v4590_v59 = vsel %vm1128_vm2, %v4313_v27, -inf  ;;  %v4659_v31 = vsel %vm1128_vm2, %v4345_v39, -inf  ;;  %v1770_v38 = vpop.f32.mrf.mxu2 }
 0x6ec   : > { %11796 = vst [vmem:[#allocation201_spill] sm:$0xff] %v9576_v49  ;;  %v9579_v62 = vmax.f32 %v5072_v42, %v5073_v2  ;;  %v9581_v48 = vmax.f32 %v5003_v36, %v5004_v8  ;;  %v9583_v54 = vmax.f32 %v4589_v10, %v4590_v59  ;;  %v4026_v50 = vsub.f32 1.0, %v3474_v30  ;;  %v1854_v23 = vpop.f32.mrf.mxu0  ;;  %v11798_v42 = vld [vmem:[#allocation254_spill] sm:$0xff]  ;;  %v3480_v8 = vpop.permute.xlu0 %3479 }
 0x6ed   : > { %v9586_v20 = vmax.f32 %v4658_v3, %v4659_v31  ;;  %v9591_v29 = vmax.f32 %v11797_v32, %v4720_v18  ;;  %v3897_v36 = vsub.f32 1.0, %v11798_v42  ;;  %v1855_v2 = vadd.f32 %v1854_v23, %v1766_v5  ;;  %v11800_v31 = vld [vmem:[#allocation174_spill] sm:$0xff]  ;;  %11805 = vst [vmem:[#allocation258_spill] sm:$0xff] %v9614_v33 }
 0x6ee   : > { %v9593_v27 = vpop.eup %6294  ;;  %v4374_v10 = vsub.f32 %v3606_v12, %v9314_v13  ;;  %v4282_v59 = vmul.f32 2.0, %v4026_v50  ;;  %v3995_v18 = vsub.f32 1.0, %v3286_v1  ;;  %v4027_v15 = vsub.f32 1.0, %v3480_v8  ;;  %v11810_v13 = vld [vmem:[#allocation273_spill] sm:$0xff]  ;;  %v11891_v42 = vld [vmem:[#allocation74_spill] sm:$0xff] }
 0x6ef   : > { %v3738_v3 = vmul.f32 %v9593_v27, %v9513_v51  ;;  %v3770_v39 = vmul.f32 %v9593_v27, %v3474_v30  ;;  %6296 = vtanh.f32 %v1855_v2  ;;  %v3546_v5 = vmul.f32 %v9593_v27, %v11800_v31  ;;  %v11803_v30 = vld [vmem:[#allocation118_spill] sm:$0xff]  ;;  %v11806_v2 = vld [vmem:[#allocation361_spill] sm:$0xff] }
 0x6f0   : > { %v3578_v51 = vmul.f32 %v9593_v27, %v11802_v26  ;;  %v3607_v50 = vmul.f32 %v9458_v22, %v11803_v30  ;;  %v4722_v31 = vsel %vm1128_vm2, %v4374_v10, -inf  ;;  %v9618_v57 = vmul.f32 2.0, %v3897_v36 }
 0x6f1   : > { %v4506_v12 = vsub.f32 %v3738_v3, %v4250_v14  ;;  %v4538_v32 = vsub.f32 %v3770_v39, %v4282_v59  ;;  %v4314_v46 = vsub.f32 %v3546_v5, %v11806_v2  ;;  %v11808_v39 = vld [vmem:[#allocation197_spill] sm:$0xff]  ;;  %v1768_v59 = vadd.f32 %v9541_v34, %v8481_v24  ;;  %v3486_v2 = vpop.permute.xlu2 %3485 }
 0x6f2   : > { %11807 = vst [vmem:[#allocation281_spill] sm:$0xff] %v9618_v57  ;;  %v9624_v26 = vmul.f32 %v8688_v58, %v11808_v39  ;;  %v4251_v5 = vmul.f32 2.0, %v3995_v18  ;;  %v4283_v10 = vmul.f32 2.0, %v4027_v15  ;;  %v4346_v57 = vsub.f32 %v3578_v51, %v11810_v13  ;;  %v11811_v39 = vld [vmem:[#allocation294_spill] sm:$0xff] }
 0x6f3   : > { %v5006_v14 = vsel %vm1128_vm2, %v4506_v12, -inf  ;;  %v5075_v3 = vsel %vm1128_vm2, %v4538_v32, -inf  ;;  %v4592_v12 = vsel %vm1128_vm2, %v4314_v46, -inf  ;;  %v4723_v32 = vmax.f32 %v9591_v29, %v4722_v31  ;;  %v11814_v46 = vld [vmem:[#allocation44_spill] sm:$0xff]  ;;  %v11815_v31 = vld [vmem:[#allocation130_spill] sm:$0xff] }
 0x6f4   : > { %11809 = vst [vmem:[#allocation56_spill] sm:$0xff] %v9624_v26  ;;  %v5007_v17 = vmax.f32 %v9581_v48, %v5006_v14  ;;  %v5076_v30 = vmax.f32 %v9579_v62, %v5075_v3  ;;  %v1856_v36 = vpop.f32.mrf.mxu0  ;;  %v4375_v49 = vsub.f32 %v3607_v50, %v11811_v39  ;;  %v4593_v62 = vmax.f32 %v9583_v54, %v4592_v12  ;;  %v11813_v14 = vld [vmem:[#allocation73_spill] sm:$0xff]  ;;  %v11816_v3 = vld [vmem:[#allocation166_spill] sm:$0xff]  ;;  %v11820_v48 = vld [vmem:[#allocation103_spill] sm:$0xff] }
 0x6f5   : > { %v9633_v23 = vpop.eup %6296  ;;  %v1857_v58 = vadd.f32 %v1856_v36, %v1768_v59  ;;  %v4028_v51 = vsub.f32 1.0, %v3486_v2  ;;  %v9647_v50 = vmul.f32 %v11742_v35, %v11815_v31  ;;  %v9651_v59 = vmul.f32 %v11742_v35, %v11816_v3  ;;  %v1772_v36 = vpop.f32.mrf.mxu2  ;;  %v11837_v26 = vld [vmem:[#allocation144_spill] sm:$0xff] }
 0x6f6   : > { %v3739_v18 = vmul.f32 %v9633_v23, %v3286_v1  ;;  %v3771_v15 = vmul.f32 %v9633_v23, %v3480_v8  ;;  %v3547_v13 = vmul.f32 %v9633_v23, %v11813_v14  ;;  %v3579_v29 = vmul.f32 %v9633_v23, %v11814_v46  ;;  %v11818_v8 = vld [vmem:[#allocation247_spill] sm:$0xff] }
 0x6f7   : > { %6298 = vtanh.f32 %v1857_v58  ;;  %11817 = vst [vmem:[#allocation81_spill] sm:$0xff] %v9651_v59  ;;  %v4661_v39 = vsel %vm1128_vm2, %v4346_v57, -inf  ;;  %v1771_v14 = vadd.f32 %v1770_v38, %v8481_v24  ;;  %v11819_v46 = vld [vmem:[#allocation115_spill] sm:$0xff]  ;;  %v4724_v31 = vsel %vm1128_vm2, %v4375_v49, -inf }
 0x6f8   : > { %v4507_v54 = vsub.f32 %v3739_v18, %v4251_v5  ;;  %v4539_v1 = vsub.f32 %v3771_v15, %v4283_v10  ;;  %v4315_v12 = vsub.f32 %v3547_v13, %v11818_v8  ;;  %v3608_v58 = vmul.f32 %v9498_v56, %v11819_v46 }
 0x6f9   : > { %v4347_v34 = vsub.f32 %v3579_v29, %v11820_v48  ;;  %v9664_v5 = vmul.f32 %v11742_v35, %v11734_v11  ;;  %v4662_v48 = vmax.f32 %v9586_v20, %v4661_v39  ;;  %v4284_v49 = vmul.f32 2.0, %v4028_v51  ;;  %v3492_v8 = vpop.permute.xlu2 %3491  ;;  %v11824_v39 = vld [vmem:[#allocation45_spill] sm:$0xff] }
 0x6fa   : > { %v5008_v33 = vsel %vm1128_vm2, %v4507_v54, -inf  ;;  %v5077_v3 = vsel %vm1128_vm2, %v4539_v1, -inf  ;;  %v4594_v10 = vsel %vm1128_vm2, %v4315_v12, -inf  ;;  %v3292_v18 = vpop.permute.xlu1 %3291  ;;  %v9675_v1 = vmax.f32 %v4723_v32, %v4724_v31  ;;  %v11825_v32 = vld [vmem:[#allocation70_spill] sm:$0xff] }
 0x6fb   : > { %11821 = vst [vmem:[#allocation104_spill] sm:$0xff] %v9664_v5  ;;  %v9667_v57 = vmax.f32 %v5007_v17, %v5008_v33  ;;  %v9669_v38 = vmax.f32 %v5076_v30, %v5077_v3  ;;  %v9671_v15 = vmax.f32 %v4593_v62, %v4594_v10  ;;  %v3996_v13 = vsub.f32 1.0, %v3292_v18  ;;  %v11822_v33 = vld [vmem:[#allocation295_spill] sm:$0xff]  ;;  %v11835_v5 = vld [vmem:[#allocation296_spill] sm:$0xff] }
 0x6fc   : > { %v1859_v29 = vpop.f32.mrf.mxu0  ;;  %v4663_v54 = vsel %vm1128_vm2, %v4347_v34, -inf  ;;  %v4376_v17 = vsub.f32 %v3608_v58, %v11822_v33  ;;  %v4390_v34 = vsub.f32 %v9647_v50, %v11824_v39  ;;  %v11829_v50 = vld [vmem:[#allocation248_spill] sm:$0xff] }
 0x6fd   : > { %v9677_v11 = vpop.eup %6298  ;;  %v1860_v35 = vadd.f32 %v1859_v29, %v1771_v14  ;;  %v4664_v62 = vmax.f32 %v4662_v48, %v4663_v54  ;;  %v4252_v51 = vmul.f32 2.0, %v3996_v13  ;;  %v11826_v14 = vld [vmem:[#allocation95_spill] sm:$0xff]  ;;  %v4029_v54 = vsub.f32 1.0, %v3492_v8  ;;  %v11830_v33 = vld [vmem:[#allocation100_spill] sm:$0xff] }
 0x6fe   : > { %v3772_v46 = vmul.f32 %v9677_v11, %v3486_v2  ;;  %v3740_v20 = vmul.f32 %v9677_v11, %v3292_v18  ;;  %v3548_v31 = vmul.f32 %v9677_v11, %v11825_v32  ;;  %v3580_v3 = vmul.f32 %v9677_v11, %v11826_v14  ;;  %v11828_v18 = vld [vmem:[#allocation120_spill] sm:$0xff] }
 0x6ff   : > { %6300 = vtanh.f32 %v1860_v35  ;;  %v3609_v13 = vmul.f32 %v9545_v19, %v11828_v18  ;;  %v4726_v32 = vsel %vm1128_vm2, %v4376_v17, -inf  ;;  %v4285_v18 = vmul.f32 2.0, %v4029_v54 }
 0x700   : > { %v4540_v29 = vsub.f32 %v3772_v46, %v4284_v49  ;;  %v4508_v48 = vsub.f32 %v3740_v20, %v4252_v51  ;;  %v4316_v35 = vsub.f32 %v3548_v31, %v11829_v50  ;;  %v4348_v39 = vsub.f32 %v3580_v3, %v11830_v33  ;;  %v1775_v49 = vpop.f32.mrf.mxu2  ;;  %v11831_v46 = vld [vmem:[#allocation127_spill] sm:$0xff]  ;;  %v11832_v51 = vld [vmem:[#allocation161_spill] sm:$0xff] }
 0x701   : > { %v9705_v20 = vmul.f32 %v8780_v47, %v11831_v46  ;;  %v9709_v2 = vmul.f32 %v8780_v47, %v11832_v51  ;;  %v1773_v31 = vadd.f32 %v1772_v36, %v8481_v24  ;;  %v4727_v10 = vmax.f32 %v9675_v1, %v4726_v32  ;;  %v3304_v36 = vpop.permute.xlu0 %3303  ;;  %v11840_v32 = vld [vmem:[#allocation297_spill] sm:$0xff] }
 0x702   : > { %v5079_v14 = vsel %vm1128_vm2, %v4540_v29, -inf  ;;  %v9701_v12 = vsel %vm1128_vm2, %v4508_v48, -inf  ;;  %v11834_v29 = vld [vmem:[#allocation117_spill] sm:$0xff]  ;;  %v4596_v33 = vsel %vm1128_vm2, %v4316_v35, -inf  ;;  %v4665_v46 = vsel %vm1128_vm2, %v4348_v39, -inf }
 0x703   : > { %11833 = vst [vmem:[#allocation233_spill] sm:$0xff] %v9709_v2  ;;  %v5080_v3 = vmax.f32 %v9669_v38, %v5079_v14  ;;  %v3610_v48 = vmul.f32 %v9593_v27, %v11834_v29  ;;  %v4377_v38 = vsub.f32 %v3609_v13, %v11835_v5  ;;  %v4597_v14 = vmax.f32 %v9671_v15, %v4596_v33  ;;  %v11836_v29 = vld [vmem:[#allocation75_spill] sm:$0xff]  ;;  %v11838_v39 = vld [vmem:[#allocation205_spill] sm:$0xff] }
 0x704   : > { %v1861_v50 = vpop.f32.mrf.mxu0  ;;  %v4666_v17 = vmax.f32 %v4664_v62, %v4665_v46  ;;  %v9731_v1 = vmul.f32 %v8780_v47, %v11838_v39  ;;  %v3998_v13 = vsub.f32 1.0, %v3304_v36  ;;  %v11843_v33 = vld [vmem:[#allocation249_spill] sm:$0xff]  ;;  %v3611_v47 = vmul.f32 %v9633_v23, %v11761_v4  ;;  %v11858_v2 = vld [vmem:[#allocation299_spill] sm:$0xff] }
 0x705   : > { %v9720_v51 = vpop.eup %6300  ;;  %v1862_v6 = vadd.f32 %v1861_v50, %v1773_v31  ;;  %v4378_v31 = vsub.f32 %v3610_v48, %v11840_v32  ;;  %v11841_v50 = vld [vmem:[#allocation309_spill] sm:$0xff]  ;;  %v9745_v48 = vsel %vm1128_vm2, %v4390_v34, -inf }
 0x706   : > { %v3773_v30 = vmul.f32 %v9720_v51, %v3492_v8  ;;  %v3549_v54 = vmul.f32 %v9720_v51, %v11836_v29  ;;  %v3581_v35 = vmul.f32 %v9720_v51, %v11837_v26  ;;  %11839 = vst [vmem:[#allocation259_spill] sm:$0xff] %v9731_v1  ;;  %v11844_v29 = vld [vmem:[#allocation348_spill] sm:$0xff]  ;;  %v1776_v26 = vadd.f32 %v1775_v49, %v8481_v24 }
 0x707   : > { %6302 = vtanh.f32 %v1862_v6  ;;  %v4728_v6 = vsel %vm1128_vm2, %v4377_v38, -inf  ;;  %v4730_v4 = vsel %vm1128_vm2, %v4378_v31, -inf  ;;  %v4254_v62 = vmul.f32 2.0, %v3998_v13 }
 0x708   : > { %v4541_v8 = vsub.f32 %v3773_v30, %v4285_v18  ;;  %v4317_v46 = vsub.f32 %v3549_v54, %v11843_v33  ;;  %v4349_v58 = vsub.f32 %v3581_v35, %v11844_v29  ;;  %v4729_v18 = vmax.f32 %v4727_v10, %v4728_v6  ;;  %v3310_v33 = vpop.permute.xlu2 %3309  ;;  %v1777_v34 = vpop.f32.mrf.mxu2 }
 0x70a   : > { %v5081_v39 = vsel %vm1128_vm2, %v4541_v8, -inf  ;;  %v4598_v32 = vsel %vm1128_vm2, %v4317_v46, -inf  ;;  %v4667_v30 = vsel %vm1128_vm2, %v4349_v58, -inf  ;;  %v3298_v35 = vpop.permute.xlu1 %3297  ;;  %v4731_v15 = vmax.f32 %v4729_v18, %v4730_v4  ;;  %v11848_v18 = vld [vmem:[#allocation99_spill] sm:$0xff]  ;;  %v11855_v8 = vld [vmem:[#allocation42_spill] sm:$0xff] }
 0x70b   : > { %v9750_v54 = vmax.f32 %v5080_v3, %v5081_v39  ;;  %v9752_v49 = vmax.f32 %v4597_v14, %v4598_v32  ;;  %v9754_v29 = vmax.f32 %v4666_v17, %v4667_v30  ;;  %v3997_v38 = vsub.f32 1.0, %v3298_v35  ;;  %v11846_v3 = vld [vmem:[#allocation122_spill] sm:$0xff]  ;;  %v11847_v32 = vld [vmem:[#allocation72_spill] sm:$0xff] }
 0x70c   : > { %v1864_v5 = vpop.f32.mrf.mxu0  ;;  %v3612_v6 = vmul.f32 %v9677_v11, %v11846_v3  ;;  %v4379_v14 = vsub.f32 %v3611_v47, %v9470_v41  ;;  %v4760_v17 = vmax.f32 %v9161_v21, %v9745_v48  ;;  %v3741_v31 = vmul.f32 %v9720_v51, %v3298_v35  ;;  %v11850_v3 = vld [vmem:[#allocation27_spill] sm:$0xff]  ;;  %v11851_v35 = vld [vmem:[#allocation141_spill] sm:$0xff] }
 0x70d   : > { %v9759_v58 = vpop.eup %6302  ;;  %v1865_v10 = vadd.f32 %v1864_v5, %v1776_v26  ;;  %v4253_v39 = vmul.f32 2.0, %v3997_v38  ;;  %v11849_v26 = vld [vmem:[#allocation119_spill] sm:$0xff]  ;;  %v3624_v41 = vmul.f32 %v8826_v0, %v11850_v3  ;;  %v3999_v48 = vsub.f32 1.0, %v3310_v33 }
 0x70e   : > { %v3742_v13 = vmul.f32 %v9759_v58, %v3304_v36  ;;  %v3550_v30 = vmul.f32 %v9759_v58, %v11847_v32  ;;  %v3582_v5 = vmul.f32 %v9759_v58, %v11848_v18  ;;  %v3613_v4 = vmul.f32 %v9720_v51, %v11849_v26  ;;  %v11853_v36 = vld [vmem:[#allocation124_spill] sm:$0xff] }
 0x70f   : > { %6304 = vtanh.f32 %v1865_v10  ;;  %v4509_v47 = vsub.f32 %v3741_v31, %v4253_v39  ;;  %v9778_v38 = vmul.f32 %v8826_v0, %v11851_v35  ;;  %v3614_v32 = vmul.f32 %v9759_v58, %v11853_v36  ;;  %v11854_v10 = vld [vmem:[#allocation250_spill] sm:$0xff] }
 0x710   : > { %v4510_v21 = vsub.f32 %v3742_v13, %v4254_v62  ;;  %v4318_v46 = vsub.f32 %v3550_v30, %v11854_v10  ;;  %v4350_v18 = vsub.f32 %v3582_v5, %v11855_v8  ;;  %v4732_v1 = vsel %vm1128_vm2, %v4379_v14, -inf  ;;  %v11856_v31 = vld [vmem:[#allocation298_spill] sm:$0xff] }
 0x711   : > { %11852 = vst [vmem:[#allocation308_spill] sm:$0xff] %v9778_v38  ;;  %v5012_v26 = vsel %vm1128_vm2, %v4509_v47, -inf  ;;  %v1778_v3 = vadd.f32 %v1777_v34, %v8481_v24  ;;  %v4380_v39 = vsub.f32 %v3612_v6, %v11856_v31  ;;  %v11857_v13 = vmax.f32 %v9667_v57, %v9701_v12  ;;  %v11859_v57 = vld [vmem:[#allocation200_spill] sm:$0xff] }
 0x712   : > { %v5014_v62 = vsel %vm1128_vm2, %v4510_v21, -inf  ;;  %v4381_v36 = vsub.f32 %v3613_v4, %v11858_v2  ;;  %v4600_v30 = vsel %vm1128_vm2, %v4318_v46, -inf  ;;  %v4669_v8 = vsel %vm1128_vm2, %v4350_v18, -inf  ;;  %v3316_v59 = vpop.permute.xlu2 %3315  ;;  %v11861_v2 = vld [vmem:[#allocation300_spill] sm:$0xff]  ;;  %v1780_v4 = vpop.f32.mrf.mxu2  ;;  %v11862_v18 = vld [vmem:[#allocation183_spill] sm:$0xff] }
 0x713   : > { %v5013_v35 = vmax.f32 %v11857_v13, %v5012_v26  ;;  %v4255_v5 = vmul.f32 2.0, %v3999_v48  ;;  %v4601_v47 = vmax.f32 %v9752_v49, %v4600_v30  ;;  %v4670_v34 = vmax.f32 %v9754_v29, %v4669_v8  ;;  %v11863_v26 = vld [vmem:[#allocation97_spill] sm:$0xff]  ;;  %v11864_v29 = vld [vmem:[#allocation310_spill] sm:$0xff] }
 0x714   : > { %v1866_v14 = vpop.f32.mrf.mxu0  ;;  %v4733_v10 = vmax.f32 %v4731_v15, %v4732_v1  ;;  %v9801_v12 = vmul.f32 %v8826_v0, %v11859_v57  ;;  %v4382_v46 = vsub.f32 %v3614_v32, %v11861_v2  ;;  %v4734_v15 = vsel %vm1128_vm2, %v4380_v39, -inf  ;;  %v11867_v8 = vld [vmem:[#allocation274_spill] sm:$0xff]  ;;  %v11880_v39 = vld [vmem:[#allocation311_spill] sm:$0xff]  ;;  %v11890_v2 = vld [vmem:[#allocation301_spill] sm:$0xff] }
 0x715   : > { %v9797_v21 = vpop.eup %6304  ;;  %v5015_v6 = vmax.f32 %v5013_v35, %v5014_v62  ;;  %v1867_v31 = vadd.f32 %v1866_v14, %v1778_v3  ;;  %v4392_v3 = vsub.f32 %v3624_v41, %v11864_v29  ;;  %v4736_v62 = vsel %vm1128_vm2, %v4381_v36, -inf  ;;  %v11866_v35 = vld [vmem:[#allocation366_spill] sm:$0xff] }
 0x716   : > { %11860 = vst [vmem:[#allocation282_spill] sm:$0xff] %v9801_v12  ;;  %v3743_v48 = vmul.f32 %v9797_v21, %v3310_v33  ;;  %v3551_v49 = vmul.f32 %v9797_v21, %v11862_v18  ;;  %v3583_v1 = vmul.f32 %v9797_v21, %v11863_v26  ;;  %v11865_v0 = vsub.f32 %v9705_v20, %v11841_v50  ;;  %v11888_v12 = vld [vmem:[#allocation312_spill] sm:$0xff] }
 0x717   : > { %6306 = vtanh.f32 %v1867_v31  ;;  %v4000_v33 = vsub.f32 1.0, %v3316_v59  ;;  %v1781_v57 = vadd.f32 %v1780_v4, %v8481_v24  ;;  %v4735_v31 = vmax.f32 %v4733_v10, %v4734_v15  ;;  %v11870_v15 = vld [vmem:[#allocation129_spill] sm:$0xff] }
 0x718   : > { %v4761_v32 = vsel %vm1128_vm2, %v11865_v0, -inf  ;;  %v4511_v13 = vsub.f32 %v3743_v48, %v4255_v5  ;;  %v4319_v30 = vsub.f32 %v3551_v49, %v11866_v35  ;;  %v4351_v14 = vsub.f32 %v3583_v1, %v11867_v8  ;;  %v11874_v8 = vld [vmem:[#allocation177_spill] sm:$0xff]  ;;  %v11887_v35 = vld [vmem:[#allocation362_spill] sm:$0xff] }
 0x719   : > { %v9822_v41 = vsel %vm1128_vm2, %v4382_v46, -inf  ;;  %v9827_v5 = vmax.f32 %v4760_v17, %v4761_v32  ;;  %v9835_v26 = vmax.f32 %v4735_v31, %v4736_v62  ;;  %v4256_v46 = vmul.f32 2.0, %v4000_v33  ;;  %v11871_v32 = vld [vmem:[#allocation169_spill] sm:$0xff] }
 0x71a   : > { %v5016_v36 = vsel %vm1128_vm2, %v4511_v13, -inf  ;;  %v4602_v20 = vsel %vm1128_vm2, %v4319_v30, -inf  ;;  %v4671_v50 = vsel %vm1128_vm2, %v4351_v14, -inf  ;;  %v3498_v18 = vpop.permute.xlu1 %3497  ;;  %v3625_v29 = vmul.f32 %v8870_v43, %v11870_v15  ;;  %v11877_v15 = vld [vmem:[#allocation131_spill] sm:$0xff]  ;;  %v11879_v30 = vld [vmem:[#allocation136_spill] sm:$0xff] }
 0x71b   : > { %v9829_v48 = vmax.f32 %v5015_v6, %v5016_v36  ;;  %v9831_v49 = vmax.f32 %v4601_v47, %v4602_v20  ;;  %v9833_v4 = vmax.f32 %v4670_v34, %v4671_v50  ;;  %v4030_v10 = vsub.f32 1.0, %v3498_v18  ;;  %v11876_v36 = vld [vmem:[#allocation208_spill] sm:$0xff] }
 0x71c   : > { %v1869_v1 = vpop.f32.mrf.mxu0  ;;  %v9840_v0 = vsel %vm1128_vm2, %v4392_v3, -inf  ;;  %v9846_v47 = vmul.f32 %v8870_v43, %v11871_v32  ;;  %v3774_v13 = vmul.f32 %v9759_v58, %v3498_v18  ;;  %v9858_v14 = vmul.f32 %v8912_v61, %v11874_v8  ;;  %v1782_v18 = vpop.f32.mrf.mxu2  ;;  %v11878_v32 = vld [vmem:[#allocation121_spill] sm:$0xff]  ;;  %v11886_v34 = vld [vmem:[#allocation164_spill] sm:$0xff] }
 0x71d   : > { %11869 = vst [vmem:[#allocation43_spill] sm:$0xff] %v9829_v48  ;;  %v9842_v17 = vpop.eup %6306  ;;  %v1870_v6 = vadd.f32 %v1869_v1, %v1781_v57  ;;  %v4286_v33 = vmul.f32 2.0, %v4030_v10  ;;  %v11875_v57 = vld [vmem:[#allocation133_spill] sm:$0xff]  ;;  %v9866_v20 = vmul.f32 %v8870_v43, %v11876_v36  ;;  %v3615_v8 = vmul.f32 %v9797_v21, %v11878_v32  ;;  %v11899_v48 = vld [vmem:[#allocation139_spill] sm:$0xff] }
 0x71e   : > { %11872 = vst [vmem:[#allocation61_spill] sm:$0xff] %v9846_v47  ;;  %v3744_v3 = vmul.f32 %v9842_v17, %v3316_v59  ;;  %v9862_v31 = vmul.f32 %v8951_v9, %v11875_v57  ;;  %v6320_v59 = vld [vmem:[%s6619_s27] sm:$0xff]  ;;  %v9877_v57 = vmul.f32 %v9034_v44, %v11879_v30  ;;  %v4393_v62 = vsub.f32 %v3625_v29, %v11880_v39  ;;  %v11883_v36 = vld [vmem:[#allocation77_spill] sm:$0xff]  ;;  %v11893_v39 = vld [vmem:[#allocation251_spill] sm:$0xff] }
 0x71f   : > { %6308 = vtanh.f32 %v1870_v6  ;;  %v4542_v50 = vsub.f32 %v3774_v13, %v4286_v33  ;;  %v1928_v1 = vpack.c.bf16 %v6320_v59, %v6320_v59  ;;  %v9871_v6 = vmul.f32 %v8995_v40, %v11877_v15  ;;  %v11884_v15 = vld [vmem:[#allocation132_spill] sm:$0xff]  ;;  %v11889_v43 = vld [vmem:[#allocation313_spill] sm:$0xff] }
 0x720   : > { %v4512_v10 = vsub.f32 %v3744_v3, %v4256_v46  ;;  %v3510_v3 = vpop.permute.xlu0 %3509  ;;  %v3552_v59 = vmul.f32 %v9842_v17, %v11883_v36  ;;  %v9892_v30 = vmul.f32 %v9076_v52, %v11884_v15  ;;  %v1783_v29 = vadd.f32 %v1782_v18, %v8481_v24  ;;  %v11892_v15 = vld [vmem:[#allocation98_spill] sm:$0xff]  ;;  %v11894_v24 = vld [vmem:[#allocation275_spill] sm:$0xff] }
 0x721   : > { %v9883_v46 = vsel %vm1128_vm2, %v4542_v50, -inf  ;;  %1938 = vmatmul.bf16.vlgmr.msrb.gmra.mxu3 %v1928_v1  ;;  %v9903_v36 = vmul.f32 %v8912_v61, %v11886_v34  ;;  %v4032_v50 = vsub.f32 1.0, %v3510_v3  ;;  %v4383_v38 = vsub.f32 %v3615_v8, %v11890_v2  ;;  %v11895_v52 = vld [vmem:[#allocation314_spill] sm:$0xff] }
 0x722   : > { %v9886_v33 = vsel %vm1128_vm2, %v4512_v10, -inf  ;;  %v3516_v32 = vpop.permute.xlu2 %3515  ;;  %v11885_v10 = vld [vmem:[#allocation101_spill] sm:$0xff]  ;;  %v4320_v7 = vsub.f32 %v3552_v59, %v11893_v39  ;;  %v11898_v8 = vld [vmem:[#allocation186_spill] sm:$0xff]  ;;  %v11901_v39 = vld [vmem:[#allocation276_spill] sm:$0xff]  ;;  %v3776_v56 = vmul.f32 %v9842_v17, %v3510_v3  ;;  %v11903_v3 = vmax.f32 %v9835_v26, %v9822_v41 }
 0x723   : > { %11882 = vst [vmem:[#allocation86_spill] sm:$0xff] %v9886_v33  ;;  %v3584_v13 = vmul.f32 %v9842_v17, %v11885_v10  ;;  %v3616_v10 = vmul.f32 %v9842_v17, %v11773_v37  ;;  %v4033_v34 = vsub.f32 1.0, %v3516_v32  ;;  %v11897_v33 = vld [vmem:[#allocation126_spill] sm:$0xff]  ;;  %v4765_v37 = vsel %vm1128_vm2, %v4393_v62, -inf }
 0x724   : > { %v1871_v1 = vpop.f32.mrf.mxu0  ;;  %v11906_v41 = vld [vmem:[#allocation150_spill] sm:$0xff] }
 0x725   : > { %v9911_v18 = vpop.eup %6308  ;;  %v1872_v47 = vadd.f32 %v1871_v1, %v1783_v29  ;;  %v4352_v60 = vsub.f32 %v3584_v13, %v11894_v24  ;;  %v11896_v1 = vld [vmem:[#allocation315_spill] sm:$0xff]  ;;  %v4288_v13 = vmul.f32 2.0, %v4032_v50  ;;  %v4740_v29 = vsel %vm1128_vm2, %v4383_v38, -inf  ;;  %v11902_v38 = vld [vmem:[#allocation302_spill] sm:$0xff] }
 0x726   : > { %v3553_v45 = vmul.f32 %v9911_v18, %v11891_v42  ;;  %v3585_v25 = vmul.f32 %v9911_v18, %v11892_v15  ;;  %v3617_v2 = vmul.f32 %v9911_v18, %v11897_v33  ;;  %v9930_v42 = vmul.f32 %v9114_v28, %v11898_v8 }
 0x727   : > { %6310 = vtanh.f32 %v1872_v47  ;;  %v9934_v15 = vmul.f32 %v9155_v55, %v11899_v48  ;;  %v11900_v47 = vld [vmem:[#allocation252_spill] sm:$0xff]  ;;  %v4289_v33 = vmul.f32 2.0, %v4033_v34  ;;  %v4384_v22 = vsub.f32 %v3616_v10, %v9511_v53 }
 0x728   : > { %v4321_v59 = vsub.f32 %v3553_v45, %v11900_v47  ;;  %v4353_v24 = vsub.f32 %v3585_v25, %v11901_v39  ;;  %v4604_v8 = vsel %vm1128_vm2, %v4320_v7, -inf  ;;  %v3777_v28 = vmul.f32 %v9911_v18, %v3516_v32 }
 0x729   : > { %v4605_v55 = vmax.f32 %v9831_v49, %v4604_v8  ;;  %v4673_v25 = vsel %vm1128_vm2, %v4352_v60, -inf  ;;  %v4385_v47 = vsub.f32 %v3617_v2, %v11902_v38  ;;  %v4741_v53 = vmax.f32 %v11903_v3, %v4740_v29  ;;  %v11907_v8 = vld [vmem:[#allocation123_spill] sm:$0xff] }
 0x72a   : > { %v3504_v48 = vpop.permute.xlu1 %3503  ;;  %v4606_v45 = vsel %vm1128_vm2, %v4321_v59, -inf  ;;  %v4674_v62 = vmax.f32 %v9833_v4, %v4673_v25  ;;  %v4675_v49 = vsel %vm1128_vm2, %v4353_v24, -inf  ;;  %v11904_v34 = vmax.f32 %v9827_v5, %v9840_v0  ;;  %v11905_v4 = vld [vmem:[#allocation79_spill] sm:$0xff] }
 0x72b   : > { %v4031_v50 = vsub.f32 1.0, %v3504_v48  ;;  %v3775_v7 = vmul.f32 %v9797_v21, %v3504_v48  ;;  %v4607_v32 = vmax.f32 %v4605_v55, %v4606_v45  ;;  %v4544_v29 = vsub.f32 %v3776_v56, %v4288_v13  ;;  %v11909_v45 = vld [vmem:[#allocation35_spill] sm:$0xff]  ;;  %v11910_v56 = vld [vmem:[#allocation304_spill] sm:$0xff] }
 0x72c   : > { %v4766_v60 = vmax.f32 %v11904_v34, %v4765_v37  ;;  %v1919_v55 = vpack.c.bf16 %v9759_v58, %v9720_v51  ;;  %v4742_v5 = vsel %vm1128_vm2, %v4384_v22, -inf  ;;  %v11908_v37 = vld [vmem:[#allocation253_spill] sm:$0xff]  ;;  %v4545_v38 = vsub.f32 %v3777_v28, %v4289_v33 }
 0x72d   : > { %v9952_v10 = vpop.eup %6310  ;;  %v4287_v59 = vmul.f32 2.0, %v4031_v50  ;;  %v4676_v50 = vmax.f32 %v4674_v62, %v4675_v49  ;;  %v1920_v3 = vpack.c.bf16 %v9842_v17, %v9797_v21  ;;  %v4744_v34 = vsel %vm1128_vm2, %v4385_v47, -inf }
 0x72e   : > { %v1921_v2 = vpack.c.bf16 %v9952_v10, %v9911_v18  ;;  %v3554_v39 = vmul.f32 %v9952_v10, %v11905_v4  ;;  %v3586_v26 = vmul.f32 %v9952_v10, %v11906_v41  ;;  %v3618_v24 = vmul.f32 %v9952_v10, %v11907_v8 }
 0x72f   : > { %v4543_v0 = vsub.f32 %v3775_v7, %v4287_v59  ;;  %v4743_v59 = vmax.f32 %v4741_v53, %v4742_v5  ;;  %v11911_v28 = vmax.f32 %v9750_v54, %v9883_v46  ;;  %v11914_v8 = vsub.f32 %v9858_v14, %v11887_v35 }
 0x730   : > { %1943 = vmatpush.bf16.msrb.mxu1 %v1921_v2  ;;  %v4322_v48 = vsub.f32 %v3554_v39, %v11908_v37  ;;  %v4354_v25 = vsub.f32 %v3586_v26, %v11909_v45  ;;  %v4386_v13 = vsub.f32 %v3618_v24, %v11910_v56  ;;  %v5087_v2 = vsel %vm1128_vm2, %v4544_v29, -inf }
 0x731   : > { %v5085_v4 = vsel %vm1128_vm2, %v4543_v0, -inf  ;;  %v4745_v47 = vmax.f32 %v4743_v59, %v4744_v34  ;;  %v4767_v53 = vsel %vm1128_vm2, %v11914_v8, -inf  ;;  %v5089_v46 = vsel %vm1128_vm2, %v4545_v38, -inf  ;;  %v11919_v38 = vld [vmem:[#allocation134_spill] sm:$0xff]  ;;  %v11931_v8 = vld [vmem:[#allocation336_spill] sm:$0xff] }
 0x732   : > { %v3522_v41 = vpop.permute.xlu2 %3521  ;;  %v4608_v22 = vsel %vm1128_vm2, %v4322_v48, -inf  ;;  %v4677_v7 = vsel %vm1128_vm2, %v4354_v25, -inf  ;;  %v5086_v33 = vmax.f32 %v11911_v28, %v5085_v4  ;;  %v4746_v26 = vsel %vm1128_vm2, %v4386_v13, -inf  ;;  %v11918_v25 = vld [vmem:[#allocation203_spill] sm:$0xff]  ;;  %v11921_v13 = vld [vmem:[#allocation277_spill] sm:$0xff] }
 0x733   : > { %v4034_v62 = vsub.f32 1.0, %v3522_v41  ;;  %v9983_v49 = vmax.f32 %v4607_v32, %v4608_v22  ;;  %v9985_v39 = vmax.f32 %v4676_v50, %v4677_v7  ;;  %v3778_v29 = vmul.f32 %v9952_v10, %v3522_v41  ;;  %v11925_v41 = vld [vmem:[#allocation80_spill] sm:$0xff]  ;;  %v11928_v28 = vld [vmem:[#allocation317_spill] sm:$0xff] }
 0x734   : > { %1944 = vmatpush.bf16.msrb.mxu1 %v1920_v3  ;;  %v5088_v24 = vmax.f32 %v5086_v33, %v5087_v2  ;;  %v4768_v54 = vmax.f32 %v4766_v60, %v4767_v53  ;;  %v9994_v32 = vmax.f32 %v4745_v47, %v4746_v26  ;;  %v11916_v0 = vsub.f32 %v9862_v31, %v11888_v12  ;;  %v11920_v3 = vld [vmem:[#allocation39_spill] sm:$0xff]  ;;  %v11930_v47 = vld [vmem:[#allocation29_spill] sm:$0xff] }
 0x735   : > { %11912 = vst [vmem:[#allocation279_spill] sm:$0xff] %v9983_v49  ;;  %v4290_v5 = vmul.f32 2.0, %v4034_v62  ;;  %v11917_v48 = vsub.f32 %v9871_v6, %v11889_v43  ;;  %v10006_v50 = vmul.f32 %v8912_v61, %v11918_v25  ;;  %v3633_v56 = vmul.f32 %v11920_v3, %v11919_v38  ;;  %v11922_v31 = vld [vmem:[#allocation51_spill] sm:$0xff]  ;;  %v11924_v61 = vld [vmem:[#allocation142_spill] sm:$0xff] }
 0x736   : > { %11913 = vst [vmem:[#allocation21_spill] sm:$0xff] %v9985_v39  ;;  %v4769_v37 = vsel %vm1128_vm2, %v11916_v0, -inf  ;;  %v5090_v45 = vmax.f32 %v5088_v24, %v5089_v46  ;;  %v4399_v12 = vsub.f32 %v9930_v42, %v11921_v13  ;;  %v11923_v6 = vsub.f32 %v9877_v57, %v11895_v52  ;;  %v11932_v24 = vld [vmem:[#allocation37_spill] sm:$0xff] }
 0x737   : > { %11915 = vst [vmem:[#allocation109_spill] sm:$0xff] %v9994_v32  ;;  %v4771_v35 = vsel %vm1128_vm2, %v11917_v48, -inf  ;;  %v4546_v14 = vsub.f32 %v3778_v29, %v4290_v5  ;;  %v4770_v60 = vmax.f32 %v4768_v54, %v4769_v37  ;;  %v3634_v22 = vmul.f32 %v11925_v41, %v11924_v61  ;;  %v11934_v46 = vld [vmem:[#allocation17_spill] sm:$0xff]  ;;  %v11936_v48 = vld [vmem:[#allocation167_spill] sm:$0xff] }
 0x738   : > { %1945 = vmatpush.bf16.msrb.mxu1 %v1919_v55  ;;  %v4773_v43 = vsel %vm1128_vm2, %v11923_v6, -inf  ;;  %v11926_v55 = vld [vmem:[#allocation172_spill] sm:$0xff]  ;;  %v1918_v42 = vpack.c.bf16 %v9677_v11, %v9633_v23  ;;  %v4400_v52 = vsub.f32 %v9934_v15, %v11928_v28  ;;  %v11929_v57 = vsub.f32 %v9892_v30, %v11896_v1  ;;  %v11933_v15 = vld [vmem:[#allocation137_spill] sm:$0xff]  ;;  %v11939_v6 = vld [vmem:[#allocation195_spill] sm:$0xff] }
 0x739   : > { %v5091_v4 = vsel %vm1128_vm2, %v4546_v14, -inf  ;;  %v10023_v7 = vmul.f32 %v8951_v9, %v11926_v55  ;;  %v4772_v59 = vmax.f32 %v4770_v60, %v4771_v35  ;;  %v10037_v26 = vmul.f32 %v8951_v9, %v11930_v47  ;;  %v11935_v30 = vld [vmem:[#allocation316_spill] sm:$0xff]  ;;  %v11937_v35 = vld [vmem:[#allocation318_spill] sm:$0xff]  ;;  %v11941_v61 = vld [vmem:[#allocation147_spill] sm:$0xff] }
 0x73a   : > { %v10025_v2 = vmax.f32 %v5090_v45, %v5091_v4  ;;  %v4775_v33 = vsel %vm1128_vm2, %v11929_v57, -inf  ;;  %v3322_v62 = vpop.permute.xlu1 %3321  ;;  %v3635_v0 = vmul.f32 %v11934_v46, %v11933_v15  ;;  %v4401_v1 = vsub.f32 %v3633_v56, %v11935_v30  ;;  %v11938_v45 = vld [vmem:[#allocation337_spill] sm:$0xff]  ;;  %v11942_v55 = vld [vmem:[#allocation210_spill] sm:$0xff]  ;;  %v11948_v47 = vld [vmem:[#allocation319_spill] sm:$0xff] }
 0x73b   : > { %v4774_v5 = vmax.f32 %v4772_v59, %v4773_v43  ;;  %v4001_v54 = vsub.f32 1.0, %v3322_v62  ;;  %v4777_v37 = vsel %vm1128_vm2, %v4399_v12, -inf  ;;  %v10049_v9 = vmul.f32 %v8995_v40, %v11936_v48  ;;  %v11940_v43 = vld [vmem:[#allocation128_spill] sm:$0xff] }
 0x73c   : > { %11927 = vst [vmem:[#allocation234_spill] sm:$0xff] %v10025_v2  ;;  %1946 = vmatpush.bf16.msrb.mxu1 %v1918_v42  ;;  %v4402_v14 = vsub.f32 %v3634_v22, %v11937_v35  ;;  %v3745_v38 = vmul.f32 %v9911_v18, %v3322_v62  ;;  %v3636_v4 = vmul.f32 %v11940_v43, %v11939_v6  ;;  %v4779_v56 = vsel %vm1128_vm2, %v4400_v52, -inf  ;;  %v11944_v22 = vld [vmem:[#allocation206_spill] sm:$0xff]  ;;  %v11947_v62 = vld [vmem:[#allocation145_spill] sm:$0xff]  ;;  %v11949_v15 = vld [vmem:[#allocation140_spill] sm:$0xff] }
 0x73d   : > { %v4776_v60 = vmax.f32 %v4774_v5, %v4775_v33  ;;  %v4257_v13 = vmul.f32 2.0, %v4001_v54  ;;  %v10060_v12 = vmul.f32 %v9034_v44, %v11941_v61  ;;  %v10064_v59 = vmul.f32 %v8995_v40, %v11942_v55  ;;  %v11950_v30 = vld [vmem:[#allocation148_spill] sm:$0xff]  ;;  %v11952_v35 = vld [vmem:[#allocation257_spill] sm:$0xff] }
 0x73e   : > { %v10068_v42 = vmul.f32 %v9034_v44, %v11944_v22  ;;  %v11946_v33 = vpack.c.bf16 %v9593_v27, %v9545_v19  ;;  %v3637_v52 = vmul.f32 %v9368_v16, %v11947_v62  ;;  %v4403_v5 = vsub.f32 %v3635_v0, %v11948_v47  ;;  %v11951_v48 = vld [vmem:[#allocation32_spill] sm:$0xff]  ;;  %v11954_v6 = vld [vmem:[#allocation41_spill] sm:$0xff] }
 0x73f   : > { %11943 = vst [vmem:[#allocation260_spill] sm:$0xff] %v10064_v59  ;;  %v4778_v28 = vmax.f32 %v4776_v60, %v4777_v37  ;;  %v4513_v57 = vsub.f32 %v3745_v38, %v4257_v13  ;;  %v4781_v54 = vsel %vm1128_vm2, %v4401_v1, -inf  ;;  %v3638_v40 = vmul.f32 %v9418_v63, %v11949_v15  ;;  %v11953_v13 = vld [vmem:[#allocation143_spill] sm:$0xff]  ;;  %v11955_v55 = vld [vmem:[#allocation272_spill] sm:$0xff]  ;;  %v11960_v15 = vld [vmem:[#allocation338_spill] sm:$0xff] }
 0x740   : > { %11945 = vst [vmem:[#allocation207_spill] sm:$0xff] %v10068_v42  ;;  %1947 = vmatpush.bf16.msrb.mxu1 %v11946_v33  ;;  %v3639_v44 = vmul.f32 %v11951_v48, %v11950_v30  ;;  %v3640_v61 = vmul.f32 %v11954_v6, %v11953_v13  ;;  %v4404_v22 = vsub.f32 %v3636_v4, %v11955_v55  ;;  %v4783_v0 = vsel %vm1128_vm2, %v4402_v14, -inf  ;;  %v11956_v1 = vld [vmem:[#allocation43_spill] sm:$0xff]  ;;  %v11957_v33 = vld [vmem:[#allocation86_spill] sm:$0xff]  ;;  %v11963_v13 = vld [vmem:[#allocation320_spill] sm:$0xff] }
 0x741   : > { %v4780_v60 = vmax.f32 %v4778_v28, %v4779_v56  ;;  %v5020_v38 = vsel %vm1128_vm2, %v4513_v57, -inf  ;;  %v11958_v62 = vmax.f32 %v11956_v1, %v11957_v33  ;;  %v11962_v57 = vpack.c.bf16 %v11954_v6, %v11951_v48  ;;  %v11964_v55 = vld [vmem:[#allocation349_spill] sm:$0xff]  ;;  %v11966_v33 = vld [vmem:[#allocation175_spill] sm:$0xff]  ;;  %v11977_v37 = vld [vmem:[#allocation254_spill] sm:$0xff] }
 0x742   : > { %v4405_v4 = vsub.f32 %v3637_v52, %v11963_v13  ;;  %v4785_v1 = vsel %vm1128_vm2, %v4403_v5, -inf  ;;  %v11968_v56 = vld [vmem:[#allocation321_spill] sm:$0xff]  ;;  %v4787_v52 = vsel %vm1128_vm2, %v4404_v22, -inf  ;;  %v11971_v13 = vld [vmem:[#allocation84_spill] sm:$0xff] }
 0x743   : > { %v10091_v47 = vmax.f32 %v11958_v62, %v5020_v38  ;;  %v4782_v28 = vmax.f32 %v4780_v60, %v4781_v54  ;;  %v11967_v62 = vld [vmem:[#allocation255_spill] sm:$0xff]  ;;  %v4406_v54 = vsub.f32 %v3638_v40, %v11968_v56  ;;  %v11969_v60 = vld [vmem:[#allocation322_spill] sm:$0xff]  ;;  %v11972_v14 = vld [vmem:[#allocation125_spill] sm:$0xff]  ;;  %v3641_v40 = vmul.f32 %v9545_v19, %v11977_v37 }
 0x744   : > { %1948 = vmatpush.bf16.msrb.mxu1 %v11962_v57  ;;  %v10108_v34 = vmul.f32 %v11967_v62, %v11966_v33  ;;  %v4407_v30 = vsub.f32 %v3639_v44, %v11969_v60  ;;  %v11970_v57 = vld [vmem:[#allocation33_spill] sm:$0xff]  ;;  %v11973_v2 = vsub.f32 %v11971_v13, %v11972_v14  ;;  %v11975_v5 = vld [vmem:[#allocation332_spill] sm:$0xff]  ;;  %v11981_v14 = vpack.c.bf16 %v9418_v63, %v9368_v16  ;;  %v11985_v13 = vld [vmem:[#allocation107_spill] sm:$0xff] }
 0x745   : > { %11959 = vst [vmem:[#allocation283_spill] sm:$0xff] %v10091_v47  ;;  %v4784_v25 = vmax.f32 %v4782_v28, %v4783_v0  ;;  %v4408_v53 = vsub.f32 %v3640_v61, %v11970_v57  ;;  %v11974_v47 = vld [vmem:[#allocation232_spill] sm:$0xff]  ;;  %v11978_v0 = vld [vmem:[#allocation258_spill] sm:$0xff]  ;;  %v11979_v28 = vld [vmem:[#allocation331_spill] sm:$0xff] }
 0x746   : > { %v4823_v38 = vsel %vm1128_vm2, %v11973_v2, -inf  ;;  %v11976_v32 = vsub.f32 %v11974_v47, %v11975_v5  ;;  %v11980_v61 = vsub.f32 %v11978_v0, %v11979_v28  ;;  %v4789_v2 = vsel %vm1128_vm2, %v4405_v4, -inf  ;;  %v11982_v60 = vld [vmem:[#allocation81_spill] sm:$0xff]  ;;  %v11986_v37 = vld [vmem:[#allocation198_spill] sm:$0xff]  ;;  %v11989_v5 = vld [vmem:[#allocation364_spill] sm:$0xff] }
 0x747   : > { %v4786_v56 = vmax.f32 %v4784_v25, %v4785_v1  ;;  %v11983_v47 = vld [vmem:[#allocation333_spill] sm:$0xff]  ;;  %v11987_v25 = vsub.f32 %v11985_v13, %v11986_v37  ;;  %v11991_v42 = vld [vmem:[#allocation56_spill] sm:$0xff]  ;;  %v11992_v4 = vld [vmem:[#allocation363_spill] sm:$0xff]  ;;  %v4791_v13 = vsel %vm1128_vm2, %v4406_v54, -inf }
 0x748   : > { %v4824_v33 = vsel %vm1128_vm2, %v11976_v32, -inf  ;;  %v4826_v22 = vsel %vm1128_vm2, %v11980_v61, -inf  ;;  %1949 = vmatpush.bf16.msrb.mxu1 %v11981_v14  ;;  %v11984_v57 = vsub.f32 %v11982_v60, %v11983_v47  ;;  %v11988_v1 = vld [vmem:[#allocation201_spill] sm:$0xff]  ;;  %v11993_v29 = vsub.f32 %v11991_v42, %v11992_v4  ;;  %v11994_v47 = vld [vmem:[#allocation151_spill] sm:$0xff] }
 0x749   : > { %v4825_v44 = vmax.f32 %v4823_v38, %v4824_v33  ;;  %v4892_v38 = vsel %vm1128_vm2, %v11987_v25, -inf  ;;  %v11990_v33 = vsub.f32 %v11988_v1, %v11989_v5  ;;  %v4788_v28 = vmax.f32 %v4786_v56, %v4787_v52  ;;  %v11995_v37 = vld [vmem:[#allocation233_spill] sm:$0xff]  ;;  %v11996_v25 = vld [vmem:[#allocation334_spill] sm:$0xff]  ;;  %v11998_v5 = vld [vmem:[#allocation104_spill] sm:$0xff] }
 0x74a   : > { %v4828_v32 = vsel %vm1128_vm2, %v11984_v57, -inf  ;;  %v4895_v60 = vsel %vm1128_vm2, %v11993_v29, -inf  ;;  %v3642_v57 = vmul.f32 %v9593_v27, %v11994_v47  ;;  %v11997_v59 = vsub.f32 %v11995_v37, %v11996_v25  ;;  %v12003_v4 = vld [vmem:[#allocation281_spill] sm:$0xff]  ;;  %v12005_v25 = vld [vmem:[#allocation367_spill] sm:$0xff] }
 0x74b   : > { %v4893_v0 = vsel %vm1128_vm2, %v11990_v33, -inf  ;;  %v4827_v61 = vmax.f32 %v4825_v44, %v4826_v22  ;;  %v11999_v33 = vld [vmem:[#allocation54_spill] sm:$0xff]  ;;  %v12001_v44 = vld [vmem:[#allocation213_spill] sm:$0xff]  ;;  %v4790_v29 = vmax.f32 %v4788_v28, %v4789_v2  ;;  %v4409_v47 = vsub.f32 %v3641_v40, %v12003_v4 }
 0x74c   : > { %v4894_v14 = vmax.f32 %v4892_v38, %v4893_v0  ;;  %v4830_v1 = vsel %vm1128_vm2, %v11997_v59, -inf  ;;  %v12000_v52 = vsub.f32 %v11998_v5, %v11999_v33  ;;  %v10161_v42 = vmul.f32 %v11967_v62, %v12001_v44  ;;  %v12002_v0 = vld [vmem:[#allocation146_spill] sm:$0xff]  ;;  %v12004_v59 = vld [vmem:[#allocation259_spill] sm:$0xff]  ;;  %v12007_v33 = vld [vmem:[#allocation340_spill] sm:$0xff] }
 0x74d   : > { %v4829_v22 = vmax.f32 %v4827_v61, %v4828_v32  ;;  %v3643_v54 = vmul.f32 %v9633_v23, %v12002_v0  ;;  %v4793_v37 = vsel %vm1128_vm2, %v4407_v30, -inf  ;;  %v12006_v39 = vsub.f32 %v12004_v59, %v12005_v25  ;;  %v12008_v32 = vld [vmem:[#allocation16_spill] sm:$0xff]  ;;  %v12011_v30 = vld [vmem:[#allocation345_spill] sm:$0xff]  ;;  %v12013_v59 = vld [vmem:[#allocation170_spill] sm:$0xff] }
 0x74e   : > { %v4897_v56 = vsel %vm1128_vm2, %v12000_v52, -inf  ;;  %v4896_v38 = vmax.f32 %v4894_v14, %v4895_v60  ;;  %v4430_v52 = vsub.f32 %v10108_v34, %v12007_v33  ;;  %v4792_v62 = vmax.f32 %v4790_v29, %v4791_v13  ;;  %v12009_v61 = vld [vmem:[#allocation324_spill] sm:$0xff]  ;;  %v12016_v29 = vld [vmem:[#allocation209_spill] sm:$0xff]  ;;  %v12018_v33 = vld [vmem:[#allocation178_spill] sm:$0xff] }
 0x74f   : > { %v4899_v5 = vsel %vm1128_vm2, %v12006_v39, -inf  ;;  %v4831_v44 = vmax.f32 %v4829_v22, %v4830_v1  ;;  %v3644_v28 = vmul.f32 %v9677_v11, %v12008_v32  ;;  %v4410_v14 = vsub.f32 %v3642_v57, %v12009_v61  ;;  %v12010_v60 = vld [vmem:[#allocation308_spill] sm:$0xff]  ;;  %v12014_v39 = vld [vmem:[#allocation82_spill] sm:$0xff]  ;;  %v12015_v1 = vld [vmem:[#allocation149_spill] sm:$0xff] }
 0x750   : > { %v4898_v2 = vmax.f32 %v4896_v38, %v4897_v56  ;;  %v4795_v40 = vsel %vm1128_vm2, %v4408_v53, -inf  ;;  %v12012_v0 = vsub.f32 %v12010_v60, %v12011_v30  ;;  %v3663_v25 = vmul.f32 %v12014_v39, %v12013_v59  ;;  %v12017_v57 = vld [vmem:[#allocation323_spill] sm:$0xff]  ;;  %v12020_v30 = vld [vmem:[#allocation61_spill] sm:$0xff] }
 0x751   : > { %v4794_v49 = vmax.f32 %v4792_v62, %v4793_v37  ;;  %v3645_v56 = vmul.f32 %v9720_v51, %v12015_v1  ;;  %v10187_v22 = vmul.f32 %v12014_v39, %v12016_v29  ;;  %v4411_v53 = vsub.f32 %v3643_v54, %v12017_v57  ;;  %v12019_v32 = vld [vmem:[#allocation31_spill] sm:$0xff]  ;;  %v12025_v54 = vld [vmem:[#allocation325_spill] sm:$0xff]  ;;  %v12026_v1 = vld [vmem:[#allocation156_spill] sm:$0xff] }
 0x752   : > { %v4832_v4 = vsel %vm1128_vm2, %v12012_v0, -inf  ;;  %v4900_v13 = vmax.f32 %v4898_v2, %v4899_v5  ;;  %v4797_v38 = vsel %vm1128_vm2, %v4409_v47, -inf  ;;  %v3664_v61 = vmul.f32 %v12019_v32, %v12018_v33  ;;  %v12021_v0 = vld [vmem:[#allocation335_spill] sm:$0xff]  ;;  %v12024_v2 = vld [vmem:[#allocation204_spill] sm:$0xff] }
 0x753   : > { %v4833_v34 = vmax.f32 %v4831_v44, %v4832_v4  ;;  %v4796_v60 = vmax.f32 %v4794_v49, %v4795_v40  ;;  %v12022_v37 = vsub.f32 %v12020_v30, %v12021_v0  ;;  %v12023_v62 = vsub.f32 %v9903_v36, %v11931_v8  ;;  %v12027_v40 = vld [vmem:[#allocation339_spill] sm:$0xff]  ;;  %v12029_v8 = vld [vmem:[#allocation326_spill] sm:$0xff] }
 0x754   : > { %v3646_v4 = vmul.f32 %v9759_v58, %v12024_v2  ;;  %v4412_v59 = vsub.f32 %v3644_v28, %v12025_v54  ;;  %v4799_v47 = vsel %vm1128_vm2, %v4410_v14, -inf  ;;  %v3647_v49 = vmul.f32 %v9797_v21, %v12026_v1  ;;  %v12030_v28 = vld [vmem:[#allocation282_spill] sm:$0xff] }
 0x755   : > { %v4834_v5 = vsel %vm1128_vm2, %v12022_v37, -inf  ;;  %v4836_v44 = vsel %vm1128_vm2, %v12023_v62, -inf  ;;  %v4431_v29 = vsub.f32 %v3663_v25, %v12027_v40  ;;  %v4798_v57 = vmax.f32 %v4796_v60, %v4797_v38  ;;  %v12031_v62 = vld [vmem:[#allocation368_spill] sm:$0xff]  ;;  %v12034_v25 = vld [vmem:[#allocation342_spill] sm:$0xff] }
 0x756   : > { %v4835_v39 = vmax.f32 %v4833_v34, %v4834_v5  ;;  %v12028_v33 = vsub.f32 %v10023_v7, %v11938_v45  ;;  %v4413_v30 = vsub.f32 %v3645_v56, %v12029_v8  ;;  %v4801_v0 = vsel %vm1128_vm2, %v4411_v53, -inf  ;;  %v12033_v5 = vld [vmem:[#allocation173_spill] sm:$0xff]  ;;  %v12036_v56 = vld [vmem:[#allocation152_spill] sm:$0xff] }
 0x757   : > { %v12032_v14 = vsub.f32 %v12030_v28, %v12031_v62  ;;  %v3665_v2 = vmul.f32 %v11920_v3, %v12033_v5  ;;  %v4432_v38 = vsub.f32 %v3664_v61, %v12034_v25  ;;  %v4800_v60 = vmax.f32 %v4798_v57, %v4799_v47  ;;  %v12038_v40 = vld [vmem:[#allocation328_spill] sm:$0xff]  ;;  %v12045_v25 = vld [vmem:[#allocation181_spill] sm:$0xff] }
 0x758   : > { %v4838_v36 = vsel %vm1128_vm2, %v12028_v33, -inf  ;;  %v4837_v37 = vmax.f32 %v4835_v39, %v4836_v44  ;;  %v12035_v7 = vsub.f32 %v10049_v9, %v11960_v15  ;;  %v3648_v53 = vmul.f32 %v9842_v17, %v12036_v56  ;;  %v12037_v44 = vld [vmem:[#allocation240_spill] sm:$0xff]  ;;  %v12040_v9 = vld [vmem:[#allocation159_spill] sm:$0xff] }
 0x759   : > { %v4901_v34 = vsel %vm1128_vm2, %v12032_v14, -inf  ;;  %v4414_v54 = vsub.f32 %v3646_v4, %v12037_v44  ;;  %v4803_v39 = vsel %vm1128_vm2, %v4412_v59, -inf  ;;  %v4415_v33 = vsub.f32 %v3647_v49, %v12038_v40  ;;  %v12044_v14 = vld [vmem:[#allocation327_spill] sm:$0xff]  ;;  %v12047_v56 = vld [vmem:[#allocation176_spill] sm:$0xff]  ;;  %v12048_v44 = vld [vmem:[#allocation329_spill] sm:$0xff] }
 0x75a   : > { %v4840_v45 = vsel %vm1128_vm2, %v12035_v7, -inf  ;;  %v4839_v1 = vmax.f32 %v4837_v37, %v4838_v36  ;;  %v4802_v8 = vmax.f32 %v4800_v60, %v4801_v0  ;;  %v12039_v61 = vsub.f32 %v10060_v12, %v11964_v55  ;;  %v12042_v36 = vld [vmem:[#allocation153_spill] sm:$0xff] }
 0x75b   : > { %v4902_v57 = vmax.f32 %v4900_v13, %v4901_v34  ;;  %v3649_v15 = vmul.f32 %v9911_v18, %v12040_v9  ;;  %v4805_v28 = vsel %vm1128_vm2, %v4413_v30, -inf  ;;  %v12041_v4 = vsub.f32 %v9866_v20, %v11922_v31  ;;  %v12043_v13 = vld [vmem:[#allocation154_spill] sm:$0xff]  ;;  %v12046_v31 = vld [vmem:[#allocation341_spill] sm:$0xff] }
 0x75c   : > { %v4842_v47 = vsel %vm1128_vm2, %v12039_v61, -inf  ;;  %v4841_v62 = vmax.f32 %v4839_v1, %v4840_v45  ;;  %v3666_v49 = vmul.f32 %v11925_v41, %v12042_v36  ;;  %v4804_v0 = vmax.f32 %v4802_v8, %v4803_v39  ;;  %v12050_v8 = vld [vmem:[#allocation162_spill] sm:$0xff] }
 0x75d   : > { %v4903_v59 = vsel %vm1128_vm2, %v12041_v4, -inf  ;;  %v4844_v12 = vsel %vm1128_vm2, %v4430_v52, -inf  ;;  %v3650_v37 = vmul.f32 %v9952_v10, %v12043_v13  ;;  %v4416_v34 = vsub.f32 %v3648_v53, %v12044_v14  ;;  %v12049_v53 = vld [vmem:[#allocation284_spill] sm:$0xff]  ;;  %v12052_v9 = vld [vmem:[#allocation330_spill] sm:$0xff]  ;;  %v12057_v14 = vld [vmem:[#allocation179_spill] sm:$0xff] }
 0x75e   : > { %v10244_v55 = vmax.f32 %v4902_v57, %v4903_v59  ;;  %v4807_v30 = vsel %vm1128_vm2, %v4414_v54, -inf  ;;  %v4843_v5 = vmax.f32 %v4841_v62, %v4842_v47  ;;  %v3667_v20 = vmul.f32 %v11934_v46, %v12045_v25  ;;  %v12051_v57 = vld [vmem:[#allocation216_spill] sm:$0xff] }
 0x75f   : > { %v4433_v60 = vsub.f32 %v3665_v2, %v12046_v31  ;;  %v4806_v7 = vmax.f32 %v4804_v0, %v4805_v28  ;;  %v4846_v45 = vsel %vm1128_vm2, %v4431_v29, -inf  ;;  %v3668_v52 = vmul.f32 %v11940_v43, %v12047_v56  ;;  %v12054_v59 = vld [vmem:[#allocation344_spill] sm:$0xff]  ;;  %v12055_v0 = vld [vmem:[#allocation343_spill] sm:$0xff] }
 0x760   : > { %v4417_v39 = vsub.f32 %v3649_v15, %v12048_v44  ;;  %v4809_v1 = vsel %vm1128_vm2, %v4415_v33, -inf  ;;  %v4845_v40 = vmax.f32 %v4843_v5, %v4844_v12  ;;  %v10260_v54 = vmul.f32 %v12019_v32, %v12049_v53  ;;  %v12053_v33 = vld [vmem:[#allocation184_spill] sm:$0xff]  ;;  %v12063_v53 = vld [vmem:[#allocation59_spill] sm:$0xff] }
 0x761   : > { %v4434_v61 = vsub.f32 %v3666_v49, %v12050_v8  ;;  %v4808_v47 = vmax.f32 %v4806_v7, %v4807_v30  ;;  %v4848_v2 = vsel %vm1128_vm2, %v4432_v38, -inf  ;;  %v10266_v29 = vmul.f32 %v11920_v3, %v12051_v57  ;;  %v12064_v8 = vld [vmem:[#allocation278_spill] sm:$0xff] }
 0x762   : > { %v4418_v28 = vsub.f32 %v3650_v37, %v12052_v9  ;;  %v4811_v15 = vsel %vm1128_vm2, %v4416_v34, -inf  ;;  %v4847_v62 = vmax.f32 %v4845_v40, %v4846_v45  ;;  %v3669_v4 = vmul.f32 %v9368_v16, %v12053_v33  ;;  %v12062_v40 = vld [vmem:[#allocation30_spill] sm:$0xff]  ;;  %v12067_v33 = vld [vmem:[#allocation219_spill] sm:$0xff] }
 0x763   : > { %v4435_v32 = vsub.f32 %v3667_v20, %v12054_v59  ;;  %v4810_v36 = vmax.f32 %v4808_v47, %v4809_v1  ;;  %v4850_v49 = vsel %vm1128_vm2, %v4433_v60, -inf  ;;  %v4436_v12 = vsub.f32 %v3668_v52, %v12055_v0  ;;  %v12058_v20 = vld [vmem:[#allocation211_spill] sm:$0xff]  ;;  %v12059_v60 = vld [vmem:[#allocation78_spill] sm:$0xff] }
 0x764   : > { %v4813_v38 = vsel %vm1128_vm2, %v4417_v39, -inf  ;;  %v4849_v13 = vmax.f32 %v4847_v62, %v4848_v2  ;;  %v12056_v3 = vsub.f32 %v10006_v50, %v11932_v24  ;;  %v3670_v34 = vmul.f32 %v9418_v63, %v12057_v14  ;;  %v12060_v24 = vld [vmem:[#allocation158_spill] sm:$0xff]  ;;  %v12061_v52 = vld [vmem:[#allocation347_spill] sm:$0xff] }
 0x765   : > { %v4812_v30 = vmax.f32 %v4810_v36, %v4811_v15  ;;  %v4852_v5 = vsel %vm1128_vm2, %v4434_v61, -inf  ;;  %v10286_v31 = vmul.f32 %v11925_v41, %v12058_v20  ;;  %v4815_v45 = vsel %vm1128_vm2, %v4418_v28, -inf  ;;  %v12065_v2 = vld [vmem:[#allocation187_spill] sm:$0xff]  ;;  %v12066_v9 = vld [vmem:[#allocation346_spill] sm:$0xff]  ;;  %v12069_v36 = vld [vmem:[#allocation52_spill] sm:$0xff] }
 0x766   : > { %v4905_v37 = vsel %vm1128_vm2, %v12056_v3, -inf  ;;  %v4851_v50 = vmax.f32 %v4849_v13, %v4850_v49  ;;  %v3671_v56 = vmul.f32 %v11951_v48, %v12060_v24  ;;  %v4437_v44 = vsub.f32 %v3669_v4, %v12061_v52  ;;  %v12068_v59 = vld [vmem:[#allocation214_spill] sm:$0xff]  ;;  %v12071_v3 = vld [vmem:[#allocation356_spill] sm:$0xff]  ;;  %v12074_v20 = vld [vmem:[#allocation217_spill] sm:$0xff] }
 0x767   : > { %v4906_v25 = vmax.f32 %v10244_v55, %v4905_v37  ;;  %v4814_v39 = vmax.f32 %v4812_v30, %v4813_v38  ;;  %v4854_v1 = vsel %vm1128_vm2, %v4435_v32, -inf  ;;  %v3672_v57 = vmul.f32 %v11954_v6, %v12065_v2  ;;  %v12070_v38 = vld [vmem:[#allocation182_spill] sm:$0xff]  ;;  %v12073_v30 = vld [vmem:[#allocation221_spill] sm:$0xff] }
 0x768   : > { %v4853_v47 = vmax.f32 %v4851_v50, %v4852_v5  ;;  %v4438_v28 = vsub.f32 %v3670_v34, %v12066_v9  ;;  %v4856_v62 = vsel %vm1128_vm2, %v4436_v12, -inf  ;;  %v10309_v4 = vmul.f32 %v11934_v46, %v12067_v33  ;;  %v12072_v12 = vld [vmem:[#allocation14_spill] sm:$0xff]  ;;  %v12079_v9 = vld [vmem:[#allocation224_spill] sm:$0xff]  ;;  %v12081_v33 = vld [vmem:[#allocation155_spill] sm:$0xff] }
 0x769   : > { %v10304_v15 = vmax.f32 %v4814_v39, %v4815_v45  ;;  %v10313_v32 = vmul.f32 %v11940_v43, %v12068_v59  ;;  %v3673_v13 = vmul.f32 %v9545_v19, %v12070_v38  ;;  %v10321_v37 = vmul.f32 %v9368_v16, %v12071_v3  ;;  %v12076_v16 = vld [vmem:[#allocation190_spill] sm:$0xff]  ;;  %v12083_v38 = vld [vmem:[#allocation160_spill] sm:$0xff]  ;;  %v12103_v61 = vld [vmem:[#allocation353_spill] sm:$0xff] }
 0x76a   : > { %v4855_v0 = vmax.f32 %v4853_v47, %v4854_v1  ;;  %v4439_v14 = vsub.f32 %v3671_v56, %v12072_v12  ;;  %v4858_v34 = vsel %vm1128_vm2, %v4437_v44, -inf  ;;  %v10327_v5 = vmul.f32 %v9418_v63, %v12073_v30  ;;  %v12077_v56 = vld [vmem:[#allocation350_spill] sm:$0xff]  ;;  %v12078_v63 = vld [vmem:[#allocation185_spill] sm:$0xff]  ;;  %v12094_v12 = vld [vmem:[#allocation188_spill] sm:$0xff] }
 0x76b   : > { %v10331_v45 = vmul.f32 %v11951_v48, %v12074_v20  ;;  %v12075_v24 = vsub.f32 %v10037_v26, %v11952_v35  ;;  %v3674_v39 = vmul.f32 %v9593_v27, %v12076_v16  ;;  %v4440_v1 = vsub.f32 %v3672_v57, %v12077_v56  ;;  %v12084_v3 = vld [vmem:[#allocation18_spill] sm:$0xff]  ;;  %v12086_v20 = vld [vmem:[#allocation57_spill] sm:$0xff]  ;;  %v12089_v16 = vld [vmem:[#allocation168_spill] sm:$0xff] }
 0x76c   : > { %v4857_v50 = vmax.f32 %v4855_v0, %v4856_v62  ;;  %v4860_v44 = vsel %vm1128_vm2, %v4438_v28, -inf  ;;  %v3675_v2 = vmul.f32 %v9633_v23, %v12078_v63  ;;  %v10345_v48 = vmul.f32 %v11954_v6, %v12079_v9  ;;  %v12080_v62 = vld [vmem:[#allocation220_spill] sm:$0xff]  ;;  %v12082_v0 = vld [vmem:[#allocation229_spill] sm:$0xff]  ;;  %v12085_v6 = vld [vmem:[#allocation19_spill] sm:$0xff] }
 0x76d   : > { %v4907_v52 = vsel %vm1128_vm2, %v12075_v24, -inf  ;;  %v10349_v26 = vmul.f32 %v9545_v19, %v12080_v62  ;;  %v4441_v59 = vsub.f32 %v3673_v13, %v12081_v33  ;;  %v4862_v28 = vsel %vm1128_vm2, %v4439_v14, -inf  ;;  %v12088_v24 = vld [vmem:[#allocation180_spill] sm:$0xff]  ;;  %v12090_v63 = vld [vmem:[#allocation351_spill] sm:$0xff]  ;;  %v12091_v62 = vld [vmem:[#allocation230_spill] sm:$0xff] }
 0x76e   : > { %v4908_v47 = vmax.f32 %v4906_v25, %v4907_v52  ;;  %v4859_v35 = vmax.f32 %v4857_v50, %v4858_v34  ;;  %v12087_v50 = vld [vmem:[#allocation165_spill] sm:$0xff]  ;;  %v10367_v52 = vmul.f32 %v9593_v27, %v12088_v24  ;;  %v4442_v56 = vsub.f32 %v3674_v39, %v12089_v16  ;;  %v12092_v30 = vld [vmem:[#allocation102_spill] sm:$0xff]  ;;  %v12095_v24 = vld [vmem:[#allocation279_spill] sm:$0xff] }
 0x76f   : > { %v3676_v13 = vmul.f32 %v9677_v11, %v12087_v50  ;;  %v4864_v14 = vsel %vm1128_vm2, %v4440_v1, -inf  ;;  %v4443_v9 = vsub.f32 %v3675_v2, %v12090_v63  ;;  %v3678_v27 = vmul.f32 %v9759_v58, %v12094_v12  ;;  %v12096_v1 = vld [vmem:[#allocation21_spill] sm:$0xff]  ;;  %v12097_v63 = vld [vmem:[#allocation260_spill] sm:$0xff]  ;;  %v12098_v57 = vld [vmem:[#allocation15_spill] sm:$0xff] }
 0x770   : > { %v4861_v34 = vmax.f32 %v4859_v35, %v4860_v44  ;;  %v12093_v35 = vld [vmem:[#allocation193_spill] sm:$0xff]  ;;  %v4610_v25 = vrot.slane %v12095_v24, 4  ;;  %v4866_v39 = vsel %vm1128_vm2, %v4441_v59, -inf  ;;  %v4679_v16 = vrot.slane %v12096_v1, 4  ;;  %v12100_v19 = vld [vmem:[#allocation207_spill] sm:$0xff]  ;;  %v12105_v43 = vld [vmem:[#allocation196_spill] sm:$0xff] }
 0x771   : > { %v3677_v50 = vmul.f32 %v9720_v51, %v12093_v35  ;;  %v12099_v33 = vsub.f32 %v12097_v63, %v12098_v57  ;;  %v4444_v41 = vsub.f32 %v3676_v13, %v12103_v61  ;;  %v12104_v12 = vld [vmem:[#allocation49_spill] sm:$0xff]  ;;  %v4868_v59 = vsel %vm1128_vm2, %v4442_v56, -inf  ;;  %v12109_v61 = vld [vmem:[#allocation354_spill] sm:$0xff] }
 0x772   : > { %v4863_v44 = vmax.f32 %v4861_v34, %v4862_v28  ;;  %v12101_v28 = vld [vmem:[#allocation105_spill] sm:$0xff]  ;;  %v4446_v13 = vsub.f32 %v3678_v27, %v12109_v61  ;;  %v4870_v55 = vsel %vm1128_vm2, %v4443_v9, -inf  ;;  %v12110_v56 = vsub.f32 %v10187_v22, %v12062_v40  ;;  %v12112_v9 = vld [vmem:[#allocation358_spill] sm:$0xff]  ;;  %v12114_v40 = vld [vmem:[#allocation171_spill] sm:$0xff]  ;;  %v3328_v61 = vpop.permute.xlu1 %3327 }
 0x773   : > { %v4909_v49 = vsel %vm1128_vm2, %v12099_v33, -inf  ;;  %v12102_v34 = vsub.f32 %v12100_v19, %v12101_v28  ;;  %v12107_v33 = vsub.f32 %v10161_v42, %v12059_v60  ;;  %v12108_v28 = vld [vmem:[#allocation355_spill] sm:$0xff]  ;;  %v4872_v27 = vsel %vm1128_vm2, %v4444_v41, -inf }
 0x774   : > { %v4865_v2 = vmax.f32 %v4863_v44, %v4864_v14  ;;  %v4910_v7 = vmax.f32 %v4908_v47, %v4909_v49  ;;  %v3679_v14 = vmul.f32 %v9797_v21, %v12105_v43  ;;  %v12106_v44 = vld [vmem:[#allocation109_spill] sm:$0xff]  ;;  %v4611_v49 = vmax.f32 %v12095_v24, %v4610_v25  ;;  %v12111_v42 = vld [vmem:[#allocation191_spill] sm:$0xff] }
 0x775   : > { %v4911_v35 = vsel %vm1128_vm2, %v12102_v34, -inf  ;;  %v4748_v57 = vrot.slane %v12106_v44, 4  ;;  %v4913_v19 = vsel %vm1128_vm2, %v12107_v33, -inf  ;;  %v4445_v34 = vsub.f32 %v3677_v50, %v12108_v28 }
 0x776   : > { %v4867_v63 = vmax.f32 %v4865_v2, %v4866_v39  ;;  %v4912_v46 = vmax.f32 %v4910_v7, %v4911_v35  ;;  %v4680_v47 = vmax.f32 %v12096_v1, %v4679_v16  ;;  %v4915_v39 = vsel %vm1128_vm2, %v12110_v56, -inf  ;;  %v12115_v35 = vld [vmem:[#allocation199_spill] sm:$0xff] }
 0x777   : > { %v3680_v60 = vmul.f32 %v9842_v17, %v12111_v42  ;;  %v4817_v50 = vrot.slane %v10304_v15, 4  ;;  %v4447_v7 = vsub.f32 %v3679_v14, %v12112_v9  ;;  %v4749_v25 = vmax.f32 %v12106_v44, %v4748_v57 }
 0x778   : > { %v4869_v43 = vmax.f32 %v4867_v63, %v4868_v59  ;;  %v4914_v2 = vmax.f32 %v4912_v46, %v4913_v19  ;;  %v12113_v1 = vsub.f32 %v10260_v54, %v12063_v53  ;;  %v3681_v16 = vmul.f32 %v9911_v18, %v12114_v40  ;;  %v12117_v54 = vld [vmem:[#allocation357_spill] sm:$0xff] }
 0x779   : > { %v3682_v59 = vmul.f32 %v9952_v10, %v12115_v35  ;;  %v4874_v63 = vsel %vm1128_vm2, %v4445_v34, -inf  ;;  %v4612_v46 = vrot.slane %v4611_v49, 2  ;;  %v4681_v33 = vrot.slane %v4680_v47, 2  ;;  %v12123_v35 = vld [vmem:[#allocation223_spill] sm:$0xff] }
 0x77a   : > { %v4871_v24 = vmax.f32 %v4869_v43, %v4870_v55  ;;  %v4917_v22 = vsel %vm1128_vm2, %v12113_v1, -inf  ;;  %v4916_v41 = vmax.f32 %v4914_v2, %v4915_v39  ;;  %v12116_v55 = vsub.f32 %v10266_v29, %v12064_v8  ;;  %v12118_v43 = vld [vmem:[#allocation38_spill] sm:$0xff]  ;;  %v12120_v8 = vld [vmem:[#allocation360_spill] sm:$0xff] }
 0x77b   : > { %v4448_v53 = vsub.f32 %v3680_v60, %v12117_v54  ;;  %v4818_v57 = vmax.f32 %v10304_v15, %v4817_v50  ;;  %v4876_v19 = vsel %vm1128_vm2, %v4446_v13, -inf  ;;  %v10435_v34 = vmul.f32 %v9633_v23, %v12118_v43  ;;  %v12121_v60 = vld [vmem:[#allocation192_spill] sm:$0xff] }
 0x77c   : > { %v4873_v14 = vmax.f32 %v4871_v24, %v4872_v27  ;;  %v4919_v44 = vsel %vm1128_vm2, %v12116_v55, -inf  ;;  %v4918_v28 = vmax.f32 %v4916_v41, %v4917_v22  ;;  %v4750_v56 = vrot.slane %v4749_v25, 2 }
 0x77d   : > { %v12119_v42 = vsub.f32 %v10286_v31, %v12069_v36  ;;  %v4449_v27 = vsub.f32 %v3681_v16, %v12120_v8  ;;  %v4450_v2 = vsub.f32 %v3682_v59, %v12121_v60  ;;  %v4878_v15 = vsel %vm1128_vm2, %v4447_v7, -inf  ;;  %v12132_v8 = vld [vmem:[#allocation306_spill] sm:$0xff] }
 0x77e   : > { %v4875_v39 = vmax.f32 %v4873_v14, %v4874_v63  ;;  %v4920_v13 = vmax.f32 %v4918_v28, %v4919_v44  ;;  %v4613_v50 = vmax.f32 %v4611_v49, %v4612_v46  ;;  %v4682_v9 = vmax.f32 %v4680_v47, %v4681_v33  ;;  %v12125_v63 = vld [vmem:[#allocation227_spill] sm:$0xff] }
 0x77f   : > { %v4921_v29 = vsel %vm1128_vm2, %v12119_v42, -inf  ;;  %v12122_v23 = vsub.f32 %v10309_v4, %v12082_v0  ;;  %v4002_v22 = vsub.f32 1.0, %v3328_v61  ;;  %v4819_v40 = vrot.slane %v4818_v57, 2  ;;  %v12126_v0 = vld [vmem:[#allocation280_spill] sm:$0xff] }
 0x780   : > { %v4877_v24 = vmax.f32 %v4875_v39, %v4876_v19  ;;  %v4880_v31 = vsel %vm1128_vm2, %v4448_v53, -inf  ;;  %v4922_v36 = vmax.f32 %v4920_v13, %v4921_v29  ;;  %v10451_v16 = vmul.f32 %v9677_v11, %v12123_v35  ;;  %v12128_v53 = vld [vmem:[#allocation256_spill] sm:$0xff] }
 0x781   : > { %v4923_v1 = vsel %vm1128_vm2, %v12122_v23, -inf  ;;  %v4751_v59 = vmax.f32 %v4749_v25, %v4750_v56  ;;  %v12124_v49 = vsub.f32 %v10313_v32, %v12083_v38  ;;  %v10459_v4 = vmul.f32 %v9720_v51, %v12125_v63  ;;  %v12130_v39 = vld [vmem:[#allocation28_spill] sm:$0xff] }
 0x782   : > { %v4879_v7 = vmax.f32 %v4877_v24, %v4878_v15  ;;  %v4475_v41 = vsub.f32 %v10435_v34, %v12126_v0  ;;  %v4882_v46 = vsel %vm1128_vm2, %v4449_v27, -inf  ;;  %v4924_v33 = vmax.f32 %v4922_v36, %v4923_v1 }
 0x783   : > { %v4925_v47 = vsel %vm1128_vm2, %v12124_v49, -inf  ;;  %v4614_v14 = vrot.slane %v4613_v50, 1  ;;  %v4683_v11 = vrot.slane %v4682_v9, 1  ;;  %v12127_v25 = vsub.f32 %v10321_v37, %v12084_v3  ;;  %v12131_v3 = vld [vmem:[#allocation189_spill] sm:$0xff] }
 0x784   : > { %v4881_v55 = vmax.f32 %v4879_v7, %v4880_v31  ;;  %v4258_v38 = vmul.f32 2.0, %v4002_v22  ;;  %v4820_v44 = vmax.f32 %v4818_v57, %v4819_v40  ;;  %v4884_v54 = vsel %vm1128_vm2, %v4450_v2, -inf  ;;  %v12136_v40 = vld [vmem:[#allocation228_spill] sm:$0xff] }
 0x785   : > { %v4927_v32 = vsel %vm1128_vm2, %v12127_v25, -inf  ;;  %v4926_v51 = vmax.f32 %v4924_v33, %v4925_v47  ;;  %v4476_v19 = vsub.f32 %v10451_v16, %v12128_v53  ;;  %v4752_v28 = vrot.slane %v4751_v59, 1 }
 0x786   : > { %v4883_v43 = vmax.f32 %v4881_v55, %v4882_v46  ;;  %v12129_v34 = vsub.f32 %v10327_v5, %v12085_v6  ;;  %v10477_v37 = vmul.f32 %v9759_v58, %v12130_v39  ;;  %v10481_v57 = vmul.f32 %v9797_v21, %v12131_v3  ;;  %v12143_v3 = vld [vmem:[#allocation17_spill] sm:$0xff] }
 0x787   : > { %v3746_v42 = vmul.f32 %v9952_v10, %v3328_v61  ;;  %v4928_v29 = vmax.f32 %v4926_v51, %v4927_v32  ;;  %v4477_v27 = vsub.f32 %v10459_v4, %v12132_v8  ;;  %v4615_v60 = vmax.f32 %v4613_v50, %v4614_v14  ;;  %v12135_v50 = vld [vmem:[#allocation307_spill] sm:$0xff]  ;;  %v12142_v32 = vld [vmem:[#allocation53_spill] sm:$0xff] }
 0x788   : > { %v4929_v56 = vsel %vm1128_vm2, %v12129_v34, -inf  ;;  %v4885_v2 = vmax.f32 %v4883_v43, %v4884_v54  ;;  %v12133_v5 = vsub.f32 %v10331_v45, %v12086_v20  ;;  %v4684_v58 = vmax.f32 %v4682_v9, %v4683_v11  ;;  %v12137_v9 = vld [vmem:[#allocation40_spill] sm:$0xff]  ;;  %v12140_v4 = vld [vmem:[#allocation283_spill] sm:$0xff] }
 0x789   : > { %v4514_v15 = vsub.f32 %v3746_v42, %v4258_v38  ;;  %v4821_v13 = vrot.slane %v4820_v44, 1  ;;  %v4930_v24 = vmax.f32 %v4928_v29, %v4929_v56  ;;  %v4753_v21 = vmax.f32 %v4751_v59, %v4752_v28  ;;  %v5831_v29 = vld [vmem:[%s10626_s6 + $0x18] sm:$0xff]  ;;  %v12145_v8 = vld [vmem:[#allocation55_spill] sm:$0xff] }
 0x78a   : > { %v4931_v6 = vsel %vm1128_vm2, %v12133_v5, -inf  ;;  %v4886_v23 = vrot.slane %v4885_v2, 4  ;;  %v12134_v61 = vsub.f32 %v10345_v48, %v12091_v62  ;;  %v4478_v22 = vsub.f32 %v10477_v37, %v12135_v50  ;;  %5250 = vmatpush.bf16.msra.mxu3 %v5831_v29  ;;  %v12148_v50 = vld [vmem:[#allocation231_spill] sm:$0xff] }
 0x78b   : > { %v4479_v45 = vsub.f32 %v10481_v57, %v12136_v40  ;;  %v4932_v20 = vmax.f32 %v4930_v24, %v4931_v6  ;;  %v3712_v31 = vmul.f32 %v9842_v17, %v12137_v9  ;;  %v12138_v35 = vsub.f32 %v10349_v26, %v12092_v30  ;;  %v12141_v26 = vld [vmem:[#allocation225_spill] sm:$0xff]  ;;  %v12144_v57 = vld [vmem:[#allocation128_spill] sm:$0xff] }
 0x78c   : > { %v4933_v1 = vsel %vm1128_vm2, %v12134_v61, -inf  ;;  %v4887_v36 = vmax.f32 %v4885_v2, %v4886_v23  ;;  %v4822_v62 = vmax.f32 %v4820_v44, %v4821_v13  ;;  %v5022_v59 = vsel %vm1128_vm2, %v4514_v15, -inf  ;;  %v12147_v23 = vld [vmem:[#allocation234_spill] sm:$0xff] }
 0x78d   : > { %v4935_v48 = vsel %vm1128_vm2, %v12138_v35, -inf  ;;  %v4934_v16 = vmax.f32 %v4932_v20, %v4933_v1  ;;  %v5108_v7 = vsel %vm5107_vm3, %v4684_v58, %v4615_v60  ;;  %v12139_v47 = vsub.f32 %v10367_v52, %v12104_v12 }
 0x78e   : > { %v4888_v49 = vrot.slane %v4887_v36, 2  ;;  %v5023_v17 = vmax.f32 %v12140_v4, %v5022_v59  ;;  %v5110_v0 = vsel %vm5109_vm4, %v4753_v21, %v5108_v7  ;;  %v3713_v30 = vmul.f32 %v9911_v18, %v12141_v26  ;;  %v5829_v7 = vld [vmem:[%s10626_s6 + $0x8] sm:$0xff]  ;;  %v5828_v26 = vld [vmem:[%s10626_s6] sm:$0xff] }
 0x78f   : > { %v4937_v63 = vsel %vm1128_vm2, %v12139_v47, -inf  ;;  %v4936_v46 = vmax.f32 %v4934_v16, %v4935_v48  ;;  %v5112_v33 = vsel %vm5111_vm5, %v4822_v62, %v5110_v0  ;;  %v4939_v11 = vsel %vm1128_vm2, %v4475_v41, -inf  ;;  %v5834_v16 = vld [vmem:[%s10626_s6 + $0x30] sm:$0xff] }
 0x790   : > { %v4889_v14 = vmax.f32 %v4887_v36, %v4888_v49  ;;  %v5129_v55 = vpack.c.bf16 %v4615_v60, %v4615_v60  ;;  %v5130_v25 = vpack.c.bf16 %v4684_v58, %v4684_v58  ;;  %v4480_v52 = vsub.f32 %v3712_v31, %v12142_v32  ;;  %v5835_v31 = vld [vmem:[%s10626_s6 + $0x38] sm:$0xff] }
 0x791   : > { %v4938_v12 = vmax.f32 %v4936_v46, %v4937_v63  ;;  %v5131_v38 = vpack.c.bf16 %v4753_v21, %v4753_v21  ;;  %v5132_v44 = vpack.c.bf16 %v4822_v62, %v4822_v62  ;;  %v4941_v51 = vsel %vm1128_vm2, %v4476_v19, -inf  ;;  %5186 = vmatpush.bf16.msrb.mxu2 %v5835_v31 }
 0x792   : > { %v4890_v54 = vrot.slane %v4889_v14, 1  ;;  %v5203_v53 = vunpack.c.l.b16 %v5129_v55  ;;  %v5204_v28 = vunpack.c.l.b16 %v5130_v25  ;;  %v4943_v43 = vsel %vm1128_vm2, %v4477_v27, -inf  ;;  %v6321_v27 = vld [vmem:[%s6619_s27 + $0x8] sm:$0xff]  ;;  %s5765_s27 = sshll.u32 %s6526_s13, 3 }
 0x793   : > { %v4940_v18 = vmax.f32 %v4938_v12, %v4939_v11  ;;  %v5024_v34 = vrot.slane %v5023_v17, 4  ;;  %v5205_v56 = vunpack.c.l.b16 %v5131_v38  ;;  %v5206_v41 = vunpack.c.l.b16 %v5132_v44  ;;  %s5295_s18 = scalar_lea.hbm %s10629_s9, %s5765_s27 }
 0x794   : > { %v4891_v39 = vmax.f32 %v4889_v14, %v4890_v54  ;;  %v5211_v37 = vsel %vm5107_vm3, %v5204_v28, %v5203_v53  ;;  %v1914_v42 = vpack.c.bf16 %v12144_v57, %v12143_v3  ;;  %v3714_v19 = vmul.f32 %v9952_v10, %v12145_v8  ;;  %v5830_v10 = vld [vmem:[%s10626_s6 + $0x10] sm:$0xff]  ;;  %s5299_s17 = sshll.u32 %s5295_s18, 4  ;;  %s5300_s17 = int_to_ptr.hbm [resolvable:$true] %s5299_s17 }
 0x795   : > { %v4942_v60 = vmax.f32 %v4940_v18, %v4941_v51  ;;  %v5212_v2 = vsel %vm5109_vm4, %v5205_v56, %v5211_v37  ;;  %v1929_v5 = vpack.c.bf16 %v6321_v27, %v6321_v27  ;;  %v4945_v6 = vsel %vm1128_vm2, %v4478_v22, -inf  ;;  %5251 = vmatpush.bf16.msra.mxu3 %v5830_v10  ;;  %5187 = vmatpush.bf16.msrb.mxu2 %v5834_v16  ;;  %s6366_s20 = sshra.s32 %s5300_s17, 4  ;;  %s6367_s20 = int_to_ptr.hbm [resolvable:$true] %s6366_s20 }
 0x796   : > { %v5114_v15 = vsel %vm5113_vm6, %v4891_v39, %v5112_v33  ;;  %v5133_v58 = vpack.c.bf16 %v4891_v39, %v4891_v39  ;;  %v5213_v13 = vsel %vm5111_vm5, %v5206_v41, %v5212_v2  ;;  %1950 = vmatpush.bf16.msrb.mxu1 %v1914_v42  ;;  %v12146_v24 = vsub.f32 1.0, %v12145_v8  ;;  %v12149_v8 = vld [vmem:[#allocation135_spill] sm:$0xff]  ;;  %v5832_v2 = vld [vmem:[%s10626_s6 + $0x20] sm:$0xff]  ;;  %s6368_s13 = scalar_lea.hbm %s6367_s20, 8  ;;  %p6373_p1 = scmp.lt.s32.totalorder %s6367_s20, %s10629_s9 }
 0x797   : > { %v5093_v61 = vrot.slane %v12147_v23, 4  ;;  %v4944_v1 = vmax.f32 %v4942_v60, %v4943_v43  ;;  %v4481_v40 = vsub.f32 %v3713_v30, %v12148_v50  ;;  %v4947_v22 = vsel %vm1128_vm2, %v4479_v45, -inf  ;;  %v5833_v60 = vld [vmem:[%s10626_s6 + $0x28] sm:$0xff]  ;;  %p6369_p6 = scmp.ne.s32.totalorder %s6367_s20, %s6368_s13  ;;  %p6374_p3 = scmp.lt.s32.totalorder %s6372_s24, %s6368_s13 }
 0x798   : > { %v4226_v21 = vmul.f32 2.0, %v12146_v24  ;;  %v5025_v20 = vmax.f32 %v5023_v17, %v5024_v34  ;;  %v5207_v9 = vunpack.c.l.b16 %v5133_v58  ;;  %v4949_v48 = vsel %vm1128_vm2, %v4480_v52, -inf }
 0x799   : > { %v4946_v36 = vmax.f32 %v4944_v1, %v4945_v6  ;;  %1951 = vmatmul.bf16.vlgmr.msrb.gmra.mxu1 %v1929_v5  ;;  %v5094_v45 = vmax.f32 %v12147_v23, %v5093_v61  ;;  %v4951_v49 = vsel %vm1128_vm2, %v4481_v40, -inf  ;;  %5252 = vmatpush.bf16.msra.mxu3 %v5829_v7  ;;  %p6370_p13 = pnand %p6369_p6, %p6555_p11  ;;  %p6375_p4 = por %p6374_p3, %p6373_p1 }
 0x79a   : > { %v4482_v35 = vsub.f32 %v3714_v19, %v4226_v21  ;;  %v5214_v62 = vsel %vm5113_vm6, %v5207_v9, %v5213_v13  ;;  %v5026_v47 = vrot.slane %v5025_v20, 2  ;;  %v1927_v19 = vmax.f32 %v12149_v8, 1.0  ;;  %5188 = vmatpush.bf16.msrb.mxu2 %v5833_v60 }
 0x79b   : > { %v4948_v59 = vmax.f32 %v4946_v36, %v4947_v22  ;;  %v5095_v17 = vrot.slane %v5094_v45, 2  ;;  %p6371_p0 = pneg %p6370_p13 }
 0x79c   : > { %v4953_v4 = vsel %vm1128_vm2, %v4482_v35, -inf  ;;  %v5027_v30 = vmax.f32 %v5025_v20, %v5026_v47  ;;  %6312 = vrcp.f32 %v1927_v19  ;;  %vm1961_vm10 = vweird.f32 %v1927_v19 }
 0x79d   : > { %v4950_v63 = vmax.f32 %v4948_v59, %v4949_v48  ;;  %v5096_v33 = vmax.f32 %v5094_v45, %v5095_v17  ;;  %5253 = vmatpush.bf16.msra.mxu3 %v5828_v26  ;;  %v1967_v58 = vand.u32 2147483648, %v1927_v19  ;;  %v1965_v24 = vand.u32 2147483647, %v1927_v19  ;;  %p6376_p7 = pnand %p6375_p4, %p6371_p0 }
 0x79e   : > { %v5028_v11 = vrot.slane %v5027_v30, 1  ;;  %5189 = vmatpush.bf16.msrb.mxu2 %v5832_v2 }
 0x79f   : > { %v4952_v0 = vmax.f32 %v4950_v63, %v4951_v49  ;;  %v5097_v25 = vrot.slane %v5096_v33, 1  ;;  %v1968_v21 = vor.u32 1.1754944e-38, %v1967_v58  ;;  %vm1966_vm13 = vcmp.eq.f32.partialorder %v1965_v24, 8.507059e+37 }
 0x7a0   : > { %v5029_v52 = vmax.f32 %v5027_v30, %v5028_v11 }
 0x7a1   : > { %v4954_v46 = vmax.f32 %v4952_v0, %v4953_v4  ;;  %v5098_v44 = vmax.f32 %v5096_v33, %v5097_v25 }
 0x7a2   : > { %v5135_v51 = vpack.c.bf16 %v5029_v52, %v5029_v52  ;;  %v6313_v27 = vpop.eup %6312 }
 0x7a3   : > { %v4955_v14 = vrot.slane %v4954_v46, 4  ;;  %v5136_v28 = vpack.c.bf16 %v5098_v44, %v5098_v44  ;;  %v1957_v5 = vmul.f32 %v6313_v27, %v1927_v19  ;;  %vm1962_vm11 = vweird.f32 %v6313_v27 }
 0x7a4   : > { %v1939_v38 = vpop.f32.mrf.mxu3  ;;  %v5209_v56 = vunpack.c.l.b16 %v5135_v51  ;;  %vm1963_vm12 = vmor %vm1961_vm10, %vm1962_vm11 }
 0x7a5   : > { %v4956_v55 = vmax.f32 %v4954_v46, %v4955_v14  ;;  %v5210_v37 = vunpack.c.l.b16 %v5136_v28  ;;  %v1958_v6 = vsub.f32 1.0, %v1957_v5 }
 0x7a7   : > { %v4957_v32 = vrot.slane %v4956_v55, 2 }
 0x7a9   : > { %v4958_v12 = vmax.f32 %v4956_v55, %v4957_v32 }
 0x7ab   : > { %v4959_v54 = vrot.slane %v4958_v12, 1 }
 0x7ac   : > { %v1941_v41 = vpop.f32.mrf.mxu3 }
 0x7ad   : > { %v4960_v53 = vmax.f32 %v4958_v12, %v4959_v54 }
 0x7af   : > { %v5116_v18 = vsel %vm5115_vm7, %v4960_v53, %v5114_v15  ;;  %v5134_v43 = vpack.c.bf16 %v4960_v53, %v4960_v53  ;;  %v1959_v15 = vmul.f32 %v6313_v27, %v1958_v6 }
 0x7b0   : > { %v5118_v34 = vsel %vm5117_vm8, %v5029_v52, %v5116_v18 }
 0x7b1   : > { %v5208_v39 = vunpack.c.l.b16 %v5134_v43  ;;  %v1960_v13 = vadd.f32 %v6313_v27, %v1959_v15  ;;  %v5120_v31 = vsel %vm5119_vm9, %v5098_v44, %v5118_v34 }
 0x7b2   : > { %5122 = vst.msk [vmem:[%s393_s29] sm:$0xff] %vm1128_vm2, %v5120_v31 }
 0x7b3   : > { %v5215_v3 = vsel %vm5115_vm7, %v5208_v39, %v5214_v62  ;;  %v1964_v23 = vsel %vm1963_vm12, %v6313_v27, %v1960_v13 }
 0x7b4   : > { %v5216_v57 = vsel %vm5117_vm8, %v5209_v56, %v5215_v3  ;;  %v1969_v10 = vsel %vm1966_vm13, %v1968_v21, %v1964_v23 }
 0x7b5   : > { %v5217_v42 = vsel %vm5119_vm9, %v5210_v37, %v5216_v57 }
 0x7b6   : > { %v5218_v29 = vpack.c.b16 %v5217_v42, %v5217_v42 }
 0x7b8   : > { %5762 = vmatmul.msk.bf16.vlgmr.msra.gmra.mxu3 %vm1128_vm2, %v5218_v29 }
 0x816   : > { %v1952_v61 = vpop.f32.mrf.mxu1 }
 0x817   : > { %v1953_v1 = vadd.f32 %v1952_v61, %v1939_v38 }
 0x819   : > { %v1970_v50 = vmul.f32 %v1969_v10, %v1953_v1 }
 0x81b   : > { %v5145_v40 = vpack.c.bf16 %v1970_v50, %v1970_v50  ;;  %5124 = vrot.lane.b32.xlu0 %v1970_v50, %s6454_s23 }
 0x81d   : > { %5745 = vmatmul.msk.bf16.vlgmr.msrb.gmra.mxu2 %vm1128_vm2, %v5145_v40 }
 0x81e   : > { %v1954_v22 = vpop.f32.mrf.mxu1 }
 0x83b   : > { %v5255_v20 = vpop.f32.mrf.mxu3 }
 0x843   : > { %v5257_v9 = vpop.f32.mrf.mxu3 }
 0x88d   : > { %v5125_v36 = vpop.permute.xlu0 %5124 }
 0x88e   : > { %5128 = vst.msk [vmem:[%s393_s29] sm:$0xff] %vm5127_vm14, %v5125_v36 }
 0x88f   : > { %6379 = shalt.err (!%p6376_p7)
}
 0x890   : > { %5842 = dma.vmem_to_hbm [thread:$0]  (%p6555_p11), %s5298_s16, 128, %s5300_s17, %s5271_s25   ;;  %v6119_v35 = vld [vmem:[%s10627_s7] ss:$0 sm:$0xff] }
 0x891   : > { %s5281_s29 = scalar_lea.hbm %s10628_s8, %s5765_s27  ;;  %s386_s19 = scalar_lea.vmem [#allocation5], %s5435_s28 }
 0x892   : > { %s5283_s20 = sshll.u32 %s386_s19, 4  ;;  %s5285_s13 = sshll.u32 %s5281_s29, 4  ;;  %s5284_s20 = int_to_ptr.vmem [resolvable:$true] %s5283_s20  ;;  %s5286_s13 = int_to_ptr.hbm [resolvable:$true] %s5285_s13 }
 0x893   : > { %s5266_s26 = scalar_lea.sflag [#allocation4], %s6591_s14  ;;  %s6394_s16 = sshra.s32 %s5286_s13, 4  ;;  %s6395_s16 = int_to_ptr.hbm [resolvable:$true] %s6394_s16 }
 0x894   : > { %s6396_s17 = scalar_lea.hbm %s6395_s16, 8  ;;  %s6400_s27 = scalar_lea.hbm %s10628_s8, 16 }
 0x895   : > { %p6397_p5 = scmp.ne.s32.totalorder %s6395_s16, %s6396_s17  ;;  %p6401_p2 = scmp.lt.s32.totalorder %s6395_s16, %s10628_s8 }
 0x896   : > { %p6402_p9 = scmp.lt.s32.totalorder %s6400_s27, %s6396_s17 }
 0x897   : > { %p6398_p8 = pnand %p6397_p5, %p6555_p11 }
 0x898   : > { %p6403_p6 = por %p6402_p9, %p6401_p2 }
 0x899   : > { %p6399_p10 = pneg %p6398_p8 }
 0x89b   : > { %p6404_p13 = pnand %p6403_p6, %p6399_p10 }
 0x8a0   : > { %v5191_v48 = vpop.f32.mrf.mxu2 }
 0x8a1   : > { %v5256_v62 = vadd.f32 %v5255_v20, %v5191_v48 }
 0x8a3   : > { %v5263_v16 = vadd.f32 %v6119_v35, %v5256_v62 }
 0x8a5   : > { %5264 = vst [vmem:[%s386_s19] sm:$0xff] %v5263_v16 }
 0x8a6   : > { %6407 = shalt.err (!%p6404_p13)
}
 0x8a7   : > { %5841 = dma.vmem_to_hbm [thread:$0]  (%p6555_p11), %s5284_s20, 128, %s5286_s13, %s5266_s26  }
 0x8a8   : > { %v5193_v45 = vpop.f32.mrf.mxu2 }
 0x8a9 PF: > { %s5311_s14 = sand.u32 1, %s6438_s30   ;;  %p12150_p0 = scmp.ge.s32.totalorder %s6450_s12, 2 }
 0x8aa   : > { %s5312_s24 = scalar_lea.sflag [#allocation4], %s5311_s14 }
 0x8ab   : > { %p5850_p1 = pnand %p12150_p0, %p6559_p12 }
 0x8ad   : > { %p5851_p3 = pneg %p5850_p1 }
 0x8af   : > { %6429 = dma.done.wait (%p5851_p3), %s5312_s24, 128  }
 0x8b0   : > { %6431 = vsyncadd (%p5851_p3), %s5312_s24, 4294967168  ;;  %s5322_s23 = scalar_lea.sflag [#allocation7], %s5311_s14 }
 0x8b1   : > { %6433 = dma.done.wait (%p5851_p3), %s5322_s23, 128  }
 0x8b2   : > { %6435 = vsyncadd (%p5851_p3), %s5322_s23, 4294967168  ;;  %s12151_s12 = sld [smem:[#allocation12_spill]]  ;;  %s12154_s30 = smov %s6442_s10 }
 0x8b3   : > { %s12152_s21 = sld [smem:[#allocation11_spill]] }
 0x8b4   : > { %s12153_s11 = sld [smem:[#allocation13_spill]] }
 0x8b8   : > { %p26_p11 = scmp.ge.s32.totalorder %s12151_s12, 4  }
 0x8b9   : > { %s12155_s10 = smov %s12152_s21 }
 0x8ba   :  { %28 = sbr.rel (!%p26_p11) target bundleno = 10 (0xa), region = 122 }
 0x8bf   :  { %5328 = vsyncpa [#allocation3], 1 }
 0x8c0   :  { %5330 = vsyncpa [#allocation3 + $0x1], 1 }
 0x8c1   :  { %5331 = vsyncpa [#allocation4], 1 }
 0x8c2   :  { %5333 = vsyncpa [#allocation4 + $0x1], 1 }
 0x8c3   :  { %5334 = vsyncpa [#allocation7], 1 }
 0x8c4   :  { %5336 = vsyncpa [#allocation7 + $0x1], 1 }

</bundles_post_ra>
